<compile_context>
chip_gen: v5e
topology: v5e:2x2
jax: 0.10.0
libtpu: 0.0.40
codegen_flags: <defaults>
</compile_context>

<pallas_src>
import jax
import jax.numpy as jnp
from jax.experimental import pallas as pl
from jax.experimental.pallas import tpu as pltpu

N_BATCH = 8            # N*10*6*6 must be divisible by 320 (the .view(-1, 320))
H_IN = W_IN = 28       # 28 -> conv(k=5) 24 -> pool 12 -> pool 6
K = 5
C1 = 10                # conv1 output channels
HO = H_IN - K + 1      # 24
H1 = HO // 2           # 12
H2 = HO // 4           # 6
F_IN = 320             # fc1 input width (PyTorch view(-1, 320))
F_HID = 50
F_OUT = 10
F_OUT_PAD = 128        # lane-dense fc2 / log_softmax slab width


def conv_pool_kernel(p_ref, w_ref, b_ref, o_ref):
    """conv1 (one MXU matmul) -> +bias -> maxpool2 -> relu -> maxpool2 -> relu.

    p_ref: (HO*HO*N, 25)   im2col patches, rows ordered (i, j, n)
    w_ref: (25, 10)        [kh*5+kw, Cout]
    b_ref: (1, 10)
    o_ref: (6, 6, N, 10)   [h, w, n, c]
    """
    n = o_ref.shape[2]
    conv = jnp.dot(p_ref[...], w_ref[...], preferred_element_type=jnp.float32)
    conv = conv + b_ref[...]                               # (HO*HO*N, 10)
    # Un-flatten rows (i, j, n).  n is a multiple of 8, so each (8, 10) minor
    # tile of the matmul result maps 1:1 to one (i, j) position: this reshape
    # (and the pooling reshapes below, which only split leading dims) is
    # layout-preserving.
    conv = conv.reshape(HO, HO, n, C1)                     # (24, 24, N, 10)

    # max_pool2d(2) then relu
    p1 = conv.reshape(H1, 2, H1, 2, n, C1).max(axis=3).max(axis=1)
    p1 = jnp.maximum(p1, 0.0)                              # (12, 12, N, 10)

    # Dropout2d: identity (eval / inference semantics)
    p2 = p1.reshape(H2, 2, H2, 2, n, C1).max(axis=3).max(axis=1)
    o_ref[...] = jnp.maximum(p2, 0.0)                      # (6, 6, N, 10)


def mlp_kernel(h_ref, w1_ref, b1_ref, w2_ref, b2_ref, o_ref):
    """fc1 -> relu -> [dropout=id] -> fc2 -> log_softmax(dim=1), padded rows/lanes."""
    h = h_ref[...]                                                      # (Rp, 320)
    a1 = jnp.dot(h, w1_ref[...], preferred_element_type=jnp.float32) + b1_ref[...]
    a1 = jnp.maximum(a1, 0.0)
    # TODO(synk): training-mode dropout would need pltpu.prng_*; eval mode = identity.
    a2 = jnp.dot(a1, w2_ref[...], preferred_element_type=jnp.float32) + b2_ref[...]
    # Padded output lanes carry bias -1e30, so they contribute exp(..) == 0 here.
    m = jnp.max(a2, axis=-1, keepdims=True)
    s = a2 - m
    lse = jnp.log(jnp.sum(jnp.exp(s), axis=-1, keepdims=True))
    o_ref[...] = s - lse


def net_forward(x_nchw, conv1_w, conv1_b, fc1_w, fc1_b, fc2_w, fc2_b):
    n = x_nchw.shape[0]
    assert (n * C1 * H2 * H2) % F_IN == 0, "view(-1, 320) needs N*360 % 320 == 0"

    cparams = pltpu.CompilerParams(vmem_limit_bytes=16 * 1024 * 1024)

    # ---- im2col in the wrapper (XLA): rows ordered (i, j, n), 25 taps on lanes.
    x_hwn = jnp.transpose(x_nchw[:, 0].astype(jnp.float32), (1, 2, 0))      # (28, 28, N)
    cols = [x_hwn[kh:kh + HO, kw:kw + HO, :] for kh in range(K) for kw in range(K)]
    patches = jnp.stack(cols, axis=-1).reshape(HO * HO * n, K * K)          # (4608, 25)
    w_taps = conv1_w.reshape(C1, K * K).T.astype(jnp.float32)               # (25, 10)

    feat = pl.pallas_call(
        conv_pool_kernel,
        out_shape=jax.ShapeDtypeStruct((H2, H2, n, C1), jnp.float32),
        in_specs=[
            pl.BlockSpec((HO * HO * n, K * K), lambda: (0, 0)),
            pl.BlockSpec((K * K, C1), lambda: (0, 0)),
            pl.BlockSpec((1, C1), lambda: (0, 0)),
        ],
        out_specs=pl.BlockSpec((H2, H2, n, C1), lambda: (0, 0, 0, 0)),
        cost_estimate=pl.CostEstimate(
            flops=2 * HO * HO * n * K * K * C1,
            transcendentals=0,
            bytes_accessed=4 * (HO * HO * n * K * K + K * K * C1 + C1
                                + H2 * H2 * n * C1)),
        compiler_params=cparams,
    )(patches, w_taps, conv1_b.reshape(1, C1).astype(jnp.float32))

    # x.view(-1, 320): PyTorch flattens in (N, C, H, W) order.  The 11.5 KB
    # reorder stays in XLA (see TODO at top).
    flat = jnp.transpose(feat, (2, 3, 0, 1)).reshape(-1)                    # (N*360,)
    r = flat.shape[0] // F_IN
    r_pad = ((r + 7) // 8) * 8
    h = jnp.pad(flat, (0, r_pad * F_IN - flat.shape[0])).reshape(r_pad, F_IN)

    # fc weights: fc2 padded to a lane-dense 128-wide slab; padded columns get
    # zero weights and bias -1e30 so log_softmax ignores them exactly.
    w1 = fc1_w.T.astype(jnp.float32)                                        # (320, 50)
    b1 = fc1_b.reshape(1, F_HID).astype(jnp.float32)
    w2 = jnp.pad(fc2_w.T.astype(jnp.float32), ((0, 0), (0, F_OUT_PAD - F_OUT)))
    b2 = jnp.concatenate(
        [fc2_b.astype(jnp.float32),
         jnp.full((F_OUT_PAD - F_OUT,), -1e30, jnp.float32)]).reshape(1, F_OUT_PAD)

    out = pl.pallas_call(
        mlp_kernel,
        out_shape=jax.ShapeDtypeStruct((r_pad, F_OUT_PAD), jnp.float32),
        in_specs=[
            pl.BlockSpec((r_pad, F_IN), lambda: (0, 0)),
            pl.BlockSpec((F_IN, F_HID), lambda: (0, 0)),
            pl.BlockSpec((1, F_HID), lambda: (0, 0)),
            pl.BlockSpec((F_HID, F_OUT_PAD), lambda: (0, 0)),
            pl.BlockSpec((1, F_OUT_PAD), lambda: (0, 0)),
        ],
        out_specs=pl.BlockSpec((r_pad, F_OUT_PAD), lambda: (0, 0)),
        cost_estimate=pl.CostEstimate(
            flops=2 * r_pad * (F_IN * F_HID + F_HID * F_OUT_PAD),
            transcendentals=r_pad * (F_OUT_PAD + 1),
            bytes_accessed=4 * (r_pad * F_IN + F_IN * F_HID + F_HID
                                + F_HID * F_OUT_PAD + F_OUT_PAD
                                + r_pad * F_OUT_PAD)),
        compiler_params=cparams,
    )(h, w1, b1, w2, b2)

    return out[:r, :F_OUT]


def ref_forward(x, conv1_w, conv1_b, fc1_w, fc1_b, fc2_w, fc2_b):
    """Pure-JAX (XLA) reference of the exact PyTorch forward, eval mode."""
    y = jax.lax.conv_general_dilated(
        x, conv1_w, window_strides=(1, 1), padding="VALID",
        dimension_numbers=("NCHW", "OIHW", "NCHW"))
    y = y + conv1_b.reshape(1, -1, 1, 1)
    y = jax.lax.reduce_window(y, -jnp.inf, jax.lax.max, (1, 1, 2, 2), (1, 1, 2, 2), "VALID")
    y = jnp.maximum(y, 0.0)
    # Dropout2d: identity
    y = jax.lax.reduce_window(y, -jnp.inf, jax.lax.max, (1, 1, 2, 2), (1, 1, 2, 2), "VALID")
    y = jnp.maximum(y, 0.0)
    h = y.reshape(-1, 320)
    h = jnp.maximum(h @ fc1_w.T + fc1_b, 0.0)
    o = h @ fc2_w.T + fc2_b
    return jax.nn.log_softmax(o, axis=1)


if __name__ == "__main__":
    key = jax.random.PRNGKey(0)
    ks = jax.random.split(key, 8)
    x = jax.random.normal(ks[0], (N_BATCH, 1, H_IN, W_IN), jnp.float32)

    # Deterministic synthetic parameters (shapes from Net.__init__).
    conv1_w = jax.random.normal(ks[1], (10, 1, 5, 5), jnp.float32) * 0.1
    conv1_b = jax.random.normal(ks[2], (10,), jnp.float32) * 0.1
    # conv2 params exist in the module but are never used in forward() as written.
    conv2_w = jax.random.normal(ks[3], (20, 10, 5, 5), jnp.float32) * 0.05  # unused
    conv2_b = jnp.zeros((20,), jnp.float32)                                  # unused
    fc1_w = jax.random.normal(ks[4], (50, 320), jnp.float32) * 0.05
    fc1_b = jax.random.normal(ks[5], (50,), jnp.float32) * 0.05
    fc2_w = jax.random.normal(ks[6], (10, 50), jnp.float32) * 0.1
    fc2_b = jax.random.normal(ks[7], (10,), jnp.float32) * 0.1

    fwd = jax.jit(net_forward)
    out = fwd(x, conv1_w, conv1_b, fc1_w, fc1_b, fc2_w, fc2_b)
    out = jax.block_until_ready(out)

    ref = ref_forward(x, conv1_w, conv1_b, fc1_w, fc1_b, fc2_w, fc2_b)
    assert out.shape == (N_BATCH * 10 * 6 * 6 // 320, 10), out.shape
    max_err = float(jnp.max(jnp.abs(out - ref)))
    assert jnp.allclose(out, ref, atol=1e-4, rtol=1e-4), f"max abs err = {max_err}"

    print("KERNEL_OK")
</pallas_src>

<mosaic_0001>
module attributes {stable_mosaic.version = 11 : i64} {
  func.func @conv_pool_kernel(%arg0: memref<4608x25xf32, #tpu.memory_space<vmem>>, %arg1: memref<25x10xf32, #tpu.memory_space<vmem>>, %arg2: memref<1x10xf32, #tpu.memory_space<vmem>>, %arg3: memref<6x6x8x10xf32, #tpu.memory_space<vmem>>) attributes {dimension_semantics = [], scalar_prefetch = 0 : i64, scratch_operands = 0 : i64, tpu.core_type = #tpu.core_type<tc>} {
    %c0 = arith.constant 0 : index
    %c0_0 = arith.constant 0 : index
    %0 = vector.load %arg0[%c0, %c0_0] : memref<4608x25xf32, #tpu.memory_space<vmem>>, vector<4608x25xf32>
    %c0_1 = arith.constant 0 : index
    %c0_2 = arith.constant 0 : index
    %1 = vector.load %arg1[%c0_1, %c0_2] : memref<25x10xf32, #tpu.memory_space<vmem>>, vector<25x10xf32>
    %cst = arith.constant dense<0.000000e+00> : vector<4608x10xf32>
    %2 = tpu.matmul %0, %1, %cst {dimension_numbers = #tpu.dot_dimension_numbers<[1], [0], [0], [1], [0, 0, 1, 1], [], []>} : vector<4608x25xf32>, vector<25x10xf32>, vector<4608x10xf32> -> vector<4608x10xf32>
    %c0_3 = arith.constant 0 : index
    %c0_4 = arith.constant 0 : index
    %3 = vector.load %arg2[%c0_3, %c0_4] : memref<1x10xf32, #tpu.memory_space<vmem>>, vector<1x10xf32>
    %4 = vector.broadcast %3 : vector<1x10xf32> to vector<4608x10xf32>
    %5 = arith.addf %2, %4 : vector<4608x10xf32>
    %6 = vector.shape_cast %5 : vector<4608x10xf32> to vector<24x24x8x10xf32>
    %7 = vector.shape_cast %6 : vector<24x24x8x10xf32> to vector<12x2x12x2x8x10xf32>
    %cst_5 = arith.constant dense<0xFF800000> : vector<12x2x12x8x10xf32>
    %8 = vector.multi_reduction <maximumf>, %7, %cst_5 [3] : vector<12x2x12x2x8x10xf32> to vector<12x2x12x8x10xf32>
    %cst_6 = arith.constant dense<0xFF800000> : vector<12x12x8x10xf32>
    %9 = vector.multi_reduction <maximumf>, %8, %cst_6 [1] : vector<12x2x12x8x10xf32> to vector<12x12x8x10xf32>
    %cst_7 = arith.constant 0.000000e+00 : f32
    %10 = vector.broadcast %cst_7 : f32 to vector<12x12x8x10xf32>
    %11 = arith.maximumf %9, %10 : vector<12x12x8x10xf32>
    %12 = vector.shape_cast %11 : vector<12x12x8x10xf32> to vector<6x2x6x2x8x10xf32>
    %cst_8 = arith.constant dense<0xFF800000> : vector<6x2x6x8x10xf32>
    %13 = vector.multi_reduction <maximumf>, %12, %cst_8 [3] : vector<6x2x6x2x8x10xf32> to vector<6x2x6x8x10xf32>
    %cst_9 = arith.constant dense<0xFF800000> : vector<6x6x8x10xf32>
    %14 = vector.multi_reduction <maximumf>, %13, %cst_9 [1] : vector<6x2x6x8x10xf32> to vector<6x6x8x10xf32>
    %cst_10 = arith.constant 0.000000e+00 : f32
    %15 = vector.broadcast %cst_10 : f32 to vector<6x6x8x10xf32>
    %16 = arith.maximumf %14, %15 : vector<6x6x8x10xf32>
    %c0_11 = arith.constant 0 : index
    %c0_12 = arith.constant 0 : index
    %c0_13 = arith.constant 0 : index
    %c0_14 = arith.constant 0 : index
    %17 = vector.load %arg3[%c0_11, %c0_12, %c0_13, %c0_14] : memref<6x6x8x10xf32, #tpu.memory_space<vmem>>, vector<6x6x8x10xf32>
    tpu.vector_store %arg3[%c0_11, %c0_12, %c0_13, %c0_14], %16 {strides = array<i32>} : memref<6x6x8x10xf32, #tpu.memory_space<vmem>>, vector<6x6x8x10xf32>,
    return
  }
}

module attributes {stable_mosaic.version = 11 : i64} {
  func.func @mlp_kernel(%arg0: memref<16x320xf32, #tpu.memory_space<vmem>>, %arg1: memref<320x50xf32, #tpu.memory_space<vmem>>, %arg2: memref<1x50xf32, #tpu.memory_space<vmem>>, %arg3: memref<50x128xf32, #tpu.memory_space<vmem>>, %arg4: memref<1x128xf32, #tpu.memory_space<vmem>>, %arg5: memref<16x128xf32, #tpu.memory_space<vmem>>) attributes {dimension_semantics = [], scalar_prefetch = 0 : i64, scratch_operands = 0 : i64, tpu.core_type = #tpu.core_type<tc>} {
    %c0 = arith.constant 0 : index
    %c0_0 = arith.constant 0 : index
    %0 = vector.load %arg0[%c0, %c0_0] : memref<16x320xf32, #tpu.memory_space<vmem>>, vector<16x320xf32>
    %c0_1 = arith.constant 0 : index
    %c0_2 = arith.constant 0 : index
    %1 = vector.load %arg1[%c0_1, %c0_2] : memref<320x50xf32, #tpu.memory_space<vmem>>, vector<320x50xf32>
    %cst = arith.constant dense<0.000000e+00> : vector<16x50xf32>
    %2 = tpu.matmul %0, %1, %cst {dimension_numbers = #tpu.dot_dimension_numbers<[1], [0], [0], [1], [0, 0, 1, 1], [], []>} : vector<16x320xf32>, vector<320x50xf32>, vector<16x50xf32> -> vector<16x50xf32>
    %c0_3 = arith.constant 0 : index
    %c0_4 = arith.constant 0 : index
    %3 = vector.load %arg2[%c0_3, %c0_4] : memref<1x50xf32, #tpu.memory_space<vmem>>, vector<1x50xf32>
    %4 = vector.broadcast %3 : vector<1x50xf32> to vector<16x50xf32>
    %5 = arith.addf %2, %4 : vector<16x50xf32>
    %cst_5 = arith.constant 0.000000e+00 : f32
    %6 = vector.broadcast %cst_5 : f32 to vector<16x50xf32>
    %7 = arith.maximumf %5, %6 : vector<16x50xf32>
    %c0_6 = arith.constant 0 : index
    %c0_7 = arith.constant 0 : index
    %8 = vector.load %arg3[%c0_6, %c0_7] : memref<50x128xf32, #tpu.memory_space<vmem>>, vector<50x128xf32>
    %cst_8 = arith.constant dense<0.000000e+00> : vector<16x128xf32>
    %9 = tpu.matmul %7, %8, %cst_8 {dimension_numbers = #tpu.dot_dimension_numbers<[1], [0], [0], [1], [0, 0, 1, 1], [], []>} : vector<16x50xf32>, vector<50x128xf32>, vector<16x128xf32> -> vector<16x128xf32>
    %c0_9 = arith.constant 0 : index
    %c0_10 = arith.constant 0 : index
    %10 = vector.load %arg4[%c0_9, %c0_10] : memref<1x128xf32, #tpu.memory_space<vmem>>, vector<1x128xf32>
    %11 = vector.broadcast %10 : vector<1x128xf32> to vector<16x128xf32>
    %12 = arith.addf %9, %11 : vector<16x128xf32>
    %cst_11 = arith.constant dense<0xFF800000> : vector<16xf32>
    %13 = vector.multi_reduction <maximumf>, %12, %cst_11 [1] : vector<16x128xf32> to vector<16xf32>
    %14 = vector.shape_cast %13 : vector<16xf32> to vector<16x1xf32>
    %15 = vector.broadcast %14 : vector<16x1xf32> to vector<16x128xf32>
    %16 = arith.subf %12, %15 : vector<16x128xf32>
    %17 = math.exp %16 : vector<16x128xf32>
    %cst_12 = arith.constant dense<0.000000e+00> : vector<16xf32>
    %18 = vector.multi_reduction <add>, %17, %cst_12 [1] : vector<16x128xf32> to vector<16xf32>
    %19 = vector.shape_cast %18 : vector<16xf32> to vector<16x1xf32>
    %20 = math.log %19 : vector<16x1xf32>
    %21 = vector.broadcast %20 : vector<16x1xf32> to vector<16x128xf32>
    %22 = arith.subf %16, %21 : vector<16x128xf32>
    %c0_13 = arith.constant 0 : index
    %c0_14 = arith.constant 0 : index
    %23 = vector.load %arg5[%c0_13, %c0_14] : memref<16x128xf32, #tpu.memory_space<vmem>>, vector<16x128xf32>
    tpu.vector_store %arg5[%c0_13, %c0_14], %22 {strides = array<i32>} : memref<16x128xf32, #tpu.memory_space<vmem>>, vector<16x128xf32>,
    return
  }
}

</mosaic_0001>

<bundles_post_ra>
// kernel: net_forward.3
= control target key start
LH: loop header
LB: loop body
LE: loop exit
PB: predicated region body
PF: predicated region fallthrough
CT: control target
= control target key end

     0   :  { %vm167_vm0 = vcmask 1041408   ;;  %s481_s0 = inlined_call_operand.vmem [shape: f32[16,320], index: 0, kind: input, shape index: {}]   ;;  %s482_s1 = inlined_call_operand.vmem [shape: f32[320,50], index: 1, kind: input, shape index: {}]   ;;  %s483_s2 = inlined_call_operand.vmem [shape: f32[1,50], index: 2, kind: input, shape index: {}]   ;;  %s484_s3 = inlined_call_operand.vmem [shape: f32[50,128], index: 3, kind: input, shape index: {}]   ;;  %s485_s4 = inlined_call_operand.vmem [shape: f32[1,128], index: 4, kind: input, shape index: {}]   ;;  %s486_s5 = inlined_call_operand.hbm [shape: f32[16,128], index: 5, kind: output, shape index: {}]  }
   0x1   :  { %v42_v0 = vld [vmem:[%s482_s1 + $0x78] sm:$0xff]  ;;  %v41_v1 = vld [vmem:[%s482_s1 + $0x70] sm:$0xff]  ;;  %v40_v4 = vld [vmem:[%s482_s1 + $0x68] sm:$0xff] }
   0x2   :  { %v58_v2 = vld [vmem:[%s482_s1 + $0xf8] sm:$0xff]  ;;  %78 = vmatpush.msra.mxu0 %v42_v0  ;;  %v57_v3 = vld [vmem:[%s482_s1 + $0xf0] sm:$0xff]  ;;  %v56_v5 = vld [vmem:[%s482_s1 + $0xe8] sm:$0xff] }
   0x3   :  { %101 = vmatpush.msra.mxu1 %v58_v2  ;;  %v39_v6 = vld [vmem:[%s482_s1 + $0x60] sm:$0xff]  ;;  %v66_v8 = vld [vmem:[%s482_s1 + $0x138] sm:$0xff]  ;;  %v65_v11 = vld [vmem:[%s482_s1 + $0x130] sm:$0xff] }
   0x4   :  { %79 = vmatpush.msra.mxu0 %v41_v1  ;;  %v55_v7 = vld [vmem:[%s482_s1 + $0xe0] sm:$0xff]  ;;  %v38_v9 = vld [vmem:[%s482_s1 + $0x58] sm:$0xff]  ;;  %132 = vmatpush.msra.mxu2 %v66_v8  ;;  %v64_v12 = vld [vmem:[%s482_s1 + $0x128] sm:$0xff] }
   0x5   :  { %102 = vmatpush.msra.mxu1 %v57_v3  ;;  %v54_v10 = vld [vmem:[%s482_s1 + $0xd8] sm:$0xff]  ;;  %v37_v13 = vld [vmem:[%s482_s1 + $0x50] sm:$0xff]  ;;  %v63_v15 = vld [vmem:[%s482_s1 + $0x120] sm:$0xff] }
   0x6   :  { %80 = vmatpush.msra.mxu0 %v40_v4  ;;  %v53_v14 = vld [vmem:[%s482_s1 + $0xd0] sm:$0xff]  ;;  %133 = vmatpush.msra.mxu2 %v65_v11  ;;  %v36_v16 = vld [vmem:[%s482_s1 + $0x48] sm:$0xff]  ;;  %v62_v18 = vld [vmem:[%s482_s1 + $0x118] sm:$0xff] }
   0x7   :  { %103 = vmatpush.msra.mxu1 %v56_v5  ;;  %v52_v17 = vld [vmem:[%s482_s1 + $0xc8] sm:$0xff]  ;;  %v35_v19 = vld [vmem:[%s482_s1 + $0x40] sm:$0xff]  ;;  %v61_v21 = vld [vmem:[%s482_s1 + $0x110] sm:$0xff] }
   0x8   :  { %81 = vmatpush.msra.mxu0 %v39_v6  ;;  %134 = vmatpush.msra.mxu2 %v64_v12  ;;  %v51_v20 = vld [vmem:[%s482_s1 + $0xc0] sm:$0xff]  ;;  %v34_v22 = vld [vmem:[%s482_s1 + $0x38] sm:$0xff]  ;;  %v33_v23 = vld [vmem:[%s482_s1 + $0x30] sm:$0xff] }
   0x9   :  { %104 = vmatpush.msra.mxu1 %v55_v7  ;;  %v50_v24 = vld [vmem:[%s482_s1 + $0xb8] sm:$0xff]  ;;  %v60_v25 = vld [vmem:[%s482_s1 + $0x108] sm:$0xff]  ;;  %v155_v26 = vld [vmem:[%s484_s3 + $0x30] sm:$0x3] }
   0xa   :  { %82 = vmatpush.msra.mxu0 %v38_v9  ;;  %135 = vmatpush.msra.mxu2 %v63_v15  ;;  %v154_v27 = vld [vmem:[%s484_s3 + $0x28] sm:$0xff]  ;;  %v49_v28 = vld [vmem:[%s482_s1 + $0xb0] sm:$0xff]  ;;  %v59_v29 = vld [vmem:[%s482_s1 + $0x100] sm:$0xff] }
   0xb   :  { %105 = vmatpush.msra.mxu1 %v54_v10  ;;  %236 = vmatpush.msk.msra.mxu3 %vm167_vm0, %v155_v26 }
   0xc   :  { %83 = vmatpush.msra.mxu0 %v37_v13  ;;  %136 = vmatpush.msra.mxu2 %v62_v18 }
   0xd   :  { %106 = vmatpush.msra.mxu1 %v53_v14 }
   0xe   :  { %84 = vmatpush.msra.mxu0 %v36_v16  ;;  %137 = vmatpush.msra.mxu2 %v61_v21 }
   0xf   :  { %107 = vmatpush.msra.mxu1 %v52_v17 }
  0x10   :  { %85 = vmatpush.msra.mxu0 %v35_v19 }
  0x11   :  { %108 = vmatpush.msra.mxu1 %v51_v20 }
  0x12   :  { %86 = vmatpush.msra.mxu0 %v34_v22 }
  0x13   :  { %109 = vmatpush.msra.mxu1 %v50_v24 }
  0x14   :  { %10 = vsyncpa [#allocation3], 0  ;;  %v32_v30 = vld [vmem:[%s482_s1 + $0x28] sm:$0xff]  ;;  %138 = vmatpush.msra.mxu2 %v60_v25  ;;  %181 = vmatpush.msra.mxu3 %v154_v27  ;;  %v23_v32 = vld [vmem:[%s481_s0 + $0x10] sm:$0xff]  ;;  %vm71_vm1 = vcmask 523264   ;;  %vm160_vm2 = vcmask 408576  }
  0x15   :  { %v48_v31 = vld [vmem:[%s482_s1 + $0xa8] sm:$0xff]  ;;  %87 = vmatpush.msra.mxu0 %v33_v23  ;;  %110 = vmatpush.msra.mxu1 %v49_v28  ;;  %v31_v33 = vld [vmem:[%s482_s1 + $0x20] sm:$0xff]  ;;  %v30_v35 = vld [vmem:[%s482_s1 + $0x18] sm:$0xff]  ;;  %s222_s27 = sshll.u32 %s486_s5, 4  ;;  %s279_s28 = smov 128   ;;  %s223_s27 = int_to_ptr.hbm [resolvable:$true] %s222_s27 }
  0x16   :  { %v47_v34 = vld [vmem:[%s482_s1 + $0xa0] sm:$0xff]  ;;  %139 = vmatpush.msra.mxu2 %v59_v29  ;;  %v46_v36 = vld [vmem:[%s482_s1 + $0x98] sm:$0xff]  ;;  %v29_v37 = vld [vmem:[%s482_s1 + $0x10] sm:$0xff]  ;;  %s280_s29 = smov 8  }
  0x17   :  { %88 = vmatpush.msra.mxu0 %v32_v30  ;;  %111 = vmatpush.msra.mxu1 %v48_v31  ;;  %v45_v38 = vld [vmem:[%s482_s1 + $0x90] sm:$0xff]  ;;  %v28_v39 = vld [vmem:[%s482_s1 + $0x8] sm:$0xff]  ;;  %v27_v42 = vld [vmem:[%s482_s1] sm:$0xff] }
  0x18   :  { %234 = vmatmul.msk.f32.vlgmr.msra.gmra.mxu2 %vm71_vm1, %v23_v32  ;;  %v44_v40 = vld [vmem:[%s482_s1 + $0x88] sm:$0xff]  ;;  %v43_v43 = vld [vmem:[%s482_s1 + $0x80] sm:$0xff]  ;;  %v24_v46 = vld [vmem:[%s481_s0 + $0x18] sm:$0xff] }
  0x19   :  { %89 = vmatpush.msra.mxu0 %v31_v33  ;;  %112 = vmatpush.msra.mxu1 %v47_v34  ;;  %v26_v41 = vld [vmem:[%s481_s0 + $0x28] sm:$0xff]  ;;  %v21_v44 = vld [vmem:[%s481_s0] sm:$0xff]  ;;  %v152_v49 = vld [vmem:[%s484_s3 + $0x18] sm:$0xff] }
  0x1a   :  { %v22_v45 = vld [vmem:[%s481_s0 + $0x8] sm:$0xff]  ;;  %v25_v47 = vld [vmem:[%s481_s0 + $0x20] sm:$0xff]  ;;  %v151_v50 = vld [vmem:[%s484_s3 + $0x10] sm:$0xff] }
  0x1b   :  { %90 = vmatpush.msra.mxu0 %v30_v35  ;;  %113 = vmatpush.msra.mxu1 %v46_v36  ;;  %v153_v48 = vld [vmem:[%s484_s3 + $0x20] sm:$0xff]  ;;  %v150_v51 = vld [vmem:[%s484_s3 + $0x8] sm:$0xff] }
  0x1c   :  { %182 = vmatpush.msra.mxu3 %v153_v48  ;;  %v149_v52 = vld [vmem:[%s484_s3] sm:$0xff] }
  0x1d   :  { %91 = vmatpush.msra.mxu0 %v29_v37  ;;  %114 = vmatpush.msra.mxu1 %v45_v38  ;;  %v242_v53 = vld [vmem:[%s483_s2] ss:$0 sm:$0xff]  ;;  %s278_s2 = smov [#allocation2]  }
  0x1e   :  { %183 = vmatpush.msra.mxu3 %v152_v49  ;;  %v243_v4 = vld [vmem:[%s485_s4] ss:$0 sm:$0xff]  ;;  %s220_s4 = sshll.u32 %s278_s2, 4  ;;  %s221_s4 = int_to_ptr.vmem [resolvable:$true] %s220_s4 }
  0x1f   :  { %92 = vmatpush.msra.mxu0 %v28_v39  ;;  %115 = vmatpush.msra.mxu1 %v44_v40 }
  0x20   :  { %235 = vmatmul.msk.f32.gmra.mxu2 %vm71_vm1, %v26_v41  ;;  %184 = vmatpush.msra.mxu3 %v151_v50 }
  0x21   :  { %93 = vmatpush.msra.mxu0 %v27_v42  ;;  %116 = vmatpush.msra.mxu1 %v43_v43 }
  0x22   :  { %94 = vmatmul.f32.vlgmr.msra.gmra.mxu0 %v21_v44  ;;  %117 = vmatmul.f32.vlgmr.msra.gmra.mxu1 %v22_v45 }
  0x23   :  { %185 = vmatpush.msra.mxu3 %v150_v51 }
  0x25   :  { %186 = vmatpush.msra.mxu3 %v149_v52 }
  0x2a   :  { %97 = vmatmul.f32.gmra.mxu0 %v24_v46  ;;  %120 = vmatmul.f32.gmra.mxu1 %v25_v47 }
  0x9b   :  { %v141_v54 = vpop.f32.mrf.mxu2 }
  0x9f   :  { %v95_v55 = vpop.f32.mrf.mxu0  ;;  %v118_v56 = vpop.f32.mrf.mxu1 }
  0xa0   :  { %v96_v57 = vadd.f32 %v242_v53, %v95_v55 }
  0xa2   :  { %v119_v58 = vadd.f32 %v118_v56, %v96_v57 }
  0xa3   :  { %v144_v0 = vpop.f32.mrf.mxu2 }
  0xa4   :  { %v142_v59 = vadd.f32 %v141_v54, %v119_v58 }
  0xa6   :  { %v147_v60 = vmax.f32 %v142_v59, 0.0 }
  0xa7   :  { %v98_v61 = vpop.f32.mrf.mxu0  ;;  %v121_v62 = vpop.f32.mrf.mxu1 }
  0xa8   :  { %v99_v63 = vadd.f32 %v242_v53, %v98_v61  ;;  %237 = vmatmul.msk.f32.vlgmr.msra.gmra.mxu3 %vm160_vm2, %v147_v60 }
  0xaa   :  { %v122_v1 = vadd.f32 %v121_v62, %v99_v63 }
  0xac   :  { %v145_v2 = vadd.f32 %v144_v0, %v122_v1 }
  0xae   :  { %v148_v3 = vmax.f32 %v145_v2, 0.0 }
  0xb0   :  { %238 = vmatmul.msk.f32.gmra.mxu3 %vm160_vm2, %v148_v3 }
 0x12b   :  { %v188_v5 = vpop.f32.mrf.mxu3 }
 0x12c   :  { %v189_v6 = vadd.f32 %v243_v4, %v188_v5 }
 0x12e   :  { %194 = vmax.xlane.f32.xlu0 %v189_v6 }
 0x133   :  { %v191_v7 = vpop.f32.mrf.mxu3 }
 0x134   :  { %v192_v8 = vadd.f32 %v243_v4, %v191_v7 }
 0x136   :  { %196 = vmax.xlane.f32.xlu0 %v192_v8 }
 0x1a1   :  { %v195_v9 = vpop.xlane.xlu0 %194 }
 0x1a2   :  { %v198_v10 = vsub.f32 %v189_v6, %v195_v9 }
 0x1a4   :  { %v200_v11 = vmul.f32 1.442695, %v198_v10 }
 0x1a6   :  { %244 = vpow2.f32 %v200_v11 }
 0x1a9   :  { %v197_v12 = vpop.xlane.xlu0 %196 }
 0x1aa   :  { %v199_v13 = vsub.f32 %v192_v8, %v197_v12 }
 0x1ac   :  { %v245_v14 = vpop.eup %244  ;;  %v202_v15 = vmul.f32 1.442695, %v199_v13 }
 0x1ad   :  { %204 = vadd.xlane.f32.xlu1 %v245_v14 }
 0x1ae   :  { %246 = vpow2.f32 %v202_v15 }
 0x1b4   :  { %v247_v16 = vpop.eup %246 }
 0x1b5   :  { %206 = vadd.xlane.f32.xlu1 %v247_v16 }
 0x220   :  { %v205_v17 = vpop.xlane.xlu1 %204 }
 0x221   :  { %248 = vlog2.f32 %v205_v17 }
 0x227   :  { %v249_v18 = vpop.eup %248 }
 0x228   :  { %v209_v19 = vmul.f32 0.6931472, %v249_v18  ;;  %v207_v20 = vpop.xlane.xlu1 %206 }
 0x229   :  { %250 = vlog2.f32 %v207_v20 }
 0x22a   :  { %v212_v21 = vsub.f32 %v198_v10, %v209_v19 }
 0x22c   :  { %214 = vst [vmem:[#allocation2] sm:$0xff] %v212_v21 }
 0x22f   :  { %v251_v22 = vpop.eup %250 }
 0x230   :  { %v211_v23 = vmul.f32 0.6931472, %v251_v22 }
 0x232   :  { %v213_v24 = vsub.f32 %v199_v13, %v211_v23 }
 0x234   :  { %215 = vst [vmem:[#allocation2 + $0x8] sm:$0xff] %v213_v24 }
 0x235   :  { %228 = dma.vmem_to_hbm [thread:$0]  %s221_s4, 256, %s223_s27, [#allocation3], %s279_s28, %s279_s28, %s280_s29  }
 0x236   :  { %276 = dma.done.wait [#allocation3], 256  }
 0x237   :  { %277 = vsyncadd [#allocation3], 4294967040 }
 0x238   :  { %233 = vsyncpa [#allocation3], 1 }

// kernel: net_forward.2
= control target key start
LH: loop header
LB: loop body
LE: loop exit
PB: predicated region body
PF: predicated region fallthrough
CT: control target
= control target key end

     0   :  { %vm2327_vm0 = vcmask 1040384   ;;  %vm598_vm1 = vcmask 203776   ;;  %vm4076_vm2 = vcmask 80896   ;;  %s12559_s1 = inlined_call_operand.vmem [shape: f32[25,10], index: 1, kind: input, shape index: {}]   ;;  %s12560_s0 = inlined_call_operand.vmem [shape: f32[4608,25], index: 0, kind: input, shape index: {}]   ;;  %s12561_s2 = inlined_call_operand.vmem [shape: f32[1,10], index: 2, kind: input, shape index: {}]   ;;  %s12562_s3 = inlined_call_operand.vmem [shape: f32[6,6,8,10], index: 3, kind: output, shape index: {}]  }
   0x1   :  { %v593_v0 = vld [vmem:[%s12559_s1 + $0x18] sm:$0x1]  ;;  %v592_v1 = vld [vmem:[%s12559_s1 + $0x10] sm:$0xff]  ;;  %v591_v2 = vld [vmem:[%s12559_s1 + $0x8] sm:$0xff] }
   0x2   :  { %5917 = vmatpush.msk.msra.mxu0 %vm2327_vm0, %v593_v0  ;;  %6494 = vmatpush.msk.msra.mxu1 %vm2327_vm0, %v593_v0  ;;  %v590_v3 = vld [vmem:[%s12559_s1] sm:$0xff]  ;;  %v15_v8 = vld [vmem:[%s12560_s0 + $0x8] sm:$0xff]  ;;  %v16_v12 = vld [vmem:[%s12560_s0 + $0x10] sm:$0xff] }
   0x3   :  { %6495 = vmatpush.msk.msra.mxu2 %vm2327_vm0, %v593_v0  ;;  %6496 = vmatpush.msk.msra.mxu3 %vm2327_vm0, %v593_v0  ;;  %v14_v4 = vld [vmem:[%s12560_s0] sm:$0xff]  ;;  %v159_v9 = vld [vmem:[%s12560_s0 + $0x488] sm:$0xff]  ;;  %v160_v13 = vld [vmem:[%s12560_s0 + $0x490] sm:$0xff] }
   0x4   :  { %2344 = vmatpush.msra.mxu0 %v592_v1  ;;  %6497 = vmatpush.msra.mxu1 %v592_v1  ;;  %v158_v5 = vld [vmem:[%s12560_s0 + $0x480] sm:$0xff]  ;;  %v303_v10 = vld [vmem:[%s12560_s0 + $0x908] sm:$0xff]  ;;  %v304_v14 = vld [vmem:[%s12560_s0 + $0x910] sm:$0xff] }
   0x5   :  { %6498 = vmatpush.msra.mxu2 %v592_v1  ;;  %6499 = vmatpush.msra.mxu3 %v592_v1  ;;  %v302_v6 = vld [vmem:[%s12560_s0 + $0x900] sm:$0xff]  ;;  %v447_v11 = vld [vmem:[%s12560_s0 + $0xd88] sm:$0xff]  ;;  %v448_v15 = vld [vmem:[%s12560_s0 + $0xd90] sm:$0xff] }
   0x6   :  { %2345 = vmatpush.msra.mxu0 %v591_v2  ;;  %6500 = vmatpush.msra.mxu1 %v591_v2  ;;  %v446_v7 = vld [vmem:[%s12560_s0 + $0xd80] sm:$0xff]  ;;  %v17_v16 = vld [vmem:[%s12560_s0 + $0x18] sm:$0xff]  ;;  %v19_v24 = vld [vmem:[%s12560_s0 + $0x28] sm:$0xff] }
   0x7   :  { %6501 = vmatpush.msra.mxu2 %v591_v2  ;;  %6502 = vmatpush.msra.mxu3 %v591_v2  ;;  %v161_v17 = vld [vmem:[%s12560_s0 + $0x498] sm:$0xff]  ;;  %v18_v20 = vld [vmem:[%s12560_s0 + $0x20] sm:$0xff]  ;;  %v163_v25 = vld [vmem:[%s12560_s0 + $0x4a8] sm:$0xff] }
   0x8   :  { %2346 = vmatpush.msra.mxu0 %v590_v3  ;;  %6503 = vmatpush.msra.mxu1 %v590_v3  ;;  %v305_v18 = vld [vmem:[%s12560_s0 + $0x918] sm:$0xff]  ;;  %v162_v21 = vld [vmem:[%s12560_s0 + $0x4a0] sm:$0xff]  ;;  %v307_v26 = vld [vmem:[%s12560_s0 + $0x928] sm:$0xff] }
   0x9   :  { %6504 = vmatpush.msra.mxu2 %v590_v3  ;;  %6505 = vmatpush.msra.mxu3 %v590_v3  ;;  %v449_v19 = vld [vmem:[%s12560_s0 + $0xd98] sm:$0xff]  ;;  %v306_v22 = vld [vmem:[%s12560_s0 + $0x920] sm:$0xff]  ;;  %v451_v27 = vld [vmem:[%s12560_s0 + $0xda8] sm:$0xff] }
   0xa   :  { %5918 = vmatmul.msk.f32.vlgmr.msra.gmra.mxu0 %vm598_vm1, %v14_v4  ;;  %6062 = vmatmul.msk.f32.vlgmr.msra.gmra.mxu1 %vm598_vm1, %v158_v5  ;;  %v450_v23 = vld [vmem:[%s12560_s0 + $0xda0] sm:$0xff]  ;;  %v20_v28 = vld [vmem:[%s12560_s0 + $0x30] sm:$0xff]  ;;  %v21_v32 = vld [vmem:[%s12560_s0 + $0x38] sm:$0xff] }
   0xb   :  { %6206 = vmatmul.msk.f32.vlgmr.msra.gmra.mxu2 %vm598_vm1, %v302_v6  ;;  %6350 = vmatmul.msk.f32.vlgmr.msra.gmra.mxu3 %vm598_vm1, %v446_v7  ;;  %v164_v29 = vld [vmem:[%s12560_s0 + $0x4b0] sm:$0xff]  ;;  %v165_v33 = vld [vmem:[%s12560_s0 + $0x4b8] sm:$0xff]  ;;  %v22_v36 = vld [vmem:[%s12560_s0 + $0x40] sm:$0xff] }
   0xc   :  { %v308_v30 = vld [vmem:[%s12560_s0 + $0x930] sm:$0xff]  ;;  %v309_v34 = vld [vmem:[%s12560_s0 + $0x938] sm:$0xff]  ;;  %v166_v37 = vld [vmem:[%s12560_s0 + $0x4c0] sm:$0xff] }
   0xd   :  { %v452_v31 = vld [vmem:[%s12560_s0 + $0xdb0] sm:$0xff]  ;;  %v453_v35 = vld [vmem:[%s12560_s0 + $0xdb8] sm:$0xff]  ;;  %v310_v38 = vld [vmem:[%s12560_s0 + $0x940] sm:$0xff] }
   0xe   :  { %v454_v39 = vld [vmem:[%s12560_s0 + $0xdc0] sm:$0xff]  ;;  %v23_v40 = vld [vmem:[%s12560_s0 + $0x48] sm:$0xff]  ;;  %v24_v44 = vld [vmem:[%s12560_s0 + $0x50] sm:$0xff] }
   0xf   :  { %v167_v41 = vld [vmem:[%s12560_s0 + $0x4c8] sm:$0xff]  ;;  %v168_v45 = vld [vmem:[%s12560_s0 + $0x4d0] sm:$0xff]  ;;  %v25_v48 = vld [vmem:[%s12560_s0 + $0x58] sm:$0xff] }
  0x10   :  { %v311_v42 = vld [vmem:[%s12560_s0 + $0x948] sm:$0xff]  ;;  %v312_v46 = vld [vmem:[%s12560_s0 + $0x950] sm:$0xff]  ;;  %v169_v49 = vld [vmem:[%s12560_s0 + $0x4d8] sm:$0xff] }
  0x11   :  { %v455_v43 = vld [vmem:[%s12560_s0 + $0xdc8] sm:$0xff]  ;;  %v456_v47 = vld [vmem:[%s12560_s0 + $0xdd0] sm:$0xff]  ;;  %v313_v50 = vld [vmem:[%s12560_s0 + $0x958] sm:$0xff] }
  0x12   :  { %5919 = vmatmul.msk.f32.gmra.mxu0 %vm598_vm1, %v15_v8  ;;  %6063 = vmatmul.msk.f32.gmra.mxu1 %vm598_vm1, %v159_v9  ;;  %v457_v51 = vld [vmem:[%s12560_s0 + $0xdd8] sm:$0xff]  ;;  %v26_v52 = vld [vmem:[%s12560_s0 + $0x60] sm:$0xff]  ;;  %v27_v56 = vld [vmem:[%s12560_s0 + $0x68] sm:$0xff] }
  0x13   :  { %6207 = vmatmul.msk.f32.gmra.mxu2 %vm598_vm1, %v303_v10  ;;  %6351 = vmatmul.msk.f32.gmra.mxu3 %vm598_vm1, %v447_v11  ;;  %v170_v53 = vld [vmem:[%s12560_s0 + $0x4e0] sm:$0xff]  ;;  %v171_v57 = vld [vmem:[%s12560_s0 + $0x4e8] sm:$0xff]  ;;  %v28_v60 = vld [vmem:[%s12560_s0 + $0x70] sm:$0xff] }
  0x14   :  { %v314_v54 = vld [vmem:[%s12560_s0 + $0x960] sm:$0xff]  ;;  %v315_v58 = vld [vmem:[%s12560_s0 + $0x968] sm:$0xff]  ;;  %v172_v61 = vld [vmem:[%s12560_s0 + $0x4f0] sm:$0xff] }
  0x15   :  { %v458_v55 = vld [vmem:[%s12560_s0 + $0xde0] sm:$0xff]  ;;  %v459_v59 = vld [vmem:[%s12560_s0 + $0xde8] sm:$0xff]  ;;  %v316_v62 = vld [vmem:[%s12560_s0 + $0x970] sm:$0xff] }
  0x16   :  { %v460_v63 = vld [vmem:[%s12560_s0 + $0xdf0] sm:$0xff]  ;;  %v29_v0 = vld [vmem:[%s12560_s0 + $0x78] sm:$0xff]  ;;  %v30_v6 = vld [vmem:[%s12560_s0 + $0x80] sm:$0xff] }
  0x17   :  { %v173_v1 = vld [vmem:[%s12560_s0 + $0x4f8] sm:$0xff]  ;;  %v174_v7 = vld [vmem:[%s12560_s0 + $0x500] sm:$0xff] }
  0x18   :  { %v317_v2 = vld [vmem:[%s12560_s0 + $0x978] sm:$0xff]  ;;  %v318_v8 = vld [vmem:[%s12560_s0 + $0x980] sm:$0xff] }
  0x19   :  { %v461_v3 = vld [vmem:[%s12560_s0 + $0xdf8] sm:$0xff]  ;;  %v462_v9 = vld [vmem:[%s12560_s0 + $0xe00] sm:$0xff] }
  0x1a   :  { %5920 = vmatmul.msk.f32.gmra.mxu0 %vm598_vm1, %v16_v12  ;;  %6064 = vmatmul.msk.f32.gmra.mxu1 %vm598_vm1, %v160_v13 }
  0x1b   :  { %6208 = vmatmul.msk.f32.gmra.mxu2 %vm598_vm1, %v304_v14  ;;  %6352 = vmatmul.msk.f32.gmra.mxu3 %vm598_vm1, %v448_v15  ;;  %v31_v14 = vld [vmem:[%s12560_s0 + $0x88] sm:$0xff] }
  0x1c   :  { %v175_v15 = vld [vmem:[%s12560_s0 + $0x508] sm:$0xff] }
  0x22   :  { %5921 = vmatmul.msk.f32.gmra.mxu0 %vm598_vm1, %v17_v16  ;;  %6065 = vmatmul.msk.f32.gmra.mxu1 %vm598_vm1, %v161_v17  ;;  %v319_v16 = vld [vmem:[%s12560_s0 + $0x988] sm:$0xff] }
  0x23   :  { %6209 = vmatmul.msk.f32.gmra.mxu2 %vm598_vm1, %v305_v18  ;;  %6353 = vmatmul.msk.f32.gmra.mxu3 %vm598_vm1, %v449_v19  ;;  %v463_v17 = vld [vmem:[%s12560_s0 + $0xe08] sm:$0xff]  ;;  %v6841_v18 = vld [vmem:[%s12561_s2] ss:$0 sm:$0xff] }
  0x2a   :  { %5922 = vmatmul.msk.f32.gmra.mxu0 %vm598_vm1, %v18_v20  ;;  %6066 = vmatmul.msk.f32.gmra.mxu1 %vm598_vm1, %v162_v21 }
  0x2b   :  { %6210 = vmatmul.msk.f32.gmra.mxu2 %vm598_vm1, %v306_v22  ;;  %6354 = vmatmul.msk.f32.gmra.mxu3 %vm598_vm1, %v450_v23 }
  0x32   :  { %5923 = vmatmul.msk.f32.gmra.mxu0 %vm598_vm1, %v19_v24  ;;  %6067 = vmatmul.msk.f32.gmra.mxu1 %vm598_vm1, %v163_v25 }
  0x33   :  { %6211 = vmatmul.msk.f32.gmra.mxu2 %vm598_vm1, %v307_v26  ;;  %6355 = vmatmul.msk.f32.gmra.mxu3 %vm598_vm1, %v451_v27  ;;  %v32_v27 = vld [vmem:[%s12560_s0 + $0x90] sm:$0xff] }
  0x3a   :  { %5924 = vmatmul.msk.f32.gmra.mxu0 %vm598_vm1, %v20_v28  ;;  %6068 = vmatmul.msk.f32.gmra.mxu1 %vm598_vm1, %v164_v29  ;;  %v176_v28 = vld [vmem:[%s12560_s0 + $0x510] sm:$0xff] }
  0x3b   :  { %6212 = vmatmul.msk.f32.gmra.mxu2 %vm598_vm1, %v308_v30  ;;  %6356 = vmatmul.msk.f32.gmra.mxu3 %vm598_vm1, %v452_v31  ;;  %v320_v29 = vld [vmem:[%s12560_s0 + $0x990] sm:$0xff] }
  0x3c   :  { %v464_v30 = vld [vmem:[%s12560_s0 + $0xe10] sm:$0xff] }
  0x42   :  { %5925 = vmatmul.msk.f32.gmra.mxu0 %vm598_vm1, %v21_v32  ;;  %6069 = vmatmul.msk.f32.gmra.mxu1 %vm598_vm1, %v165_v33 }
  0x43   :  { %6213 = vmatmul.msk.f32.gmra.mxu2 %vm598_vm1, %v309_v34  ;;  %6357 = vmatmul.msk.f32.gmra.mxu3 %vm598_vm1, %v453_v35 }
  0x4a   :  { %5926 = vmatmul.msk.f32.gmra.mxu0 %vm598_vm1, %v22_v36  ;;  %6070 = vmatmul.msk.f32.gmra.mxu1 %vm598_vm1, %v166_v37 }
  0x4b   :  { %6214 = vmatmul.msk.f32.gmra.mxu2 %vm598_vm1, %v310_v38  ;;  %6358 = vmatmul.msk.f32.gmra.mxu3 %vm598_vm1, %v454_v39 }
  0x52   :  { %5927 = vmatmul.msk.f32.gmra.mxu0 %vm598_vm1, %v23_v40  ;;  %6071 = vmatmul.msk.f32.gmra.mxu1 %vm598_vm1, %v167_v41  ;;  %v33_v41 = vld [vmem:[%s12560_s0 + $0x98] sm:$0xff] }
  0x53   :  { %6215 = vmatmul.msk.f32.gmra.mxu2 %vm598_vm1, %v311_v42  ;;  %6359 = vmatmul.msk.f32.gmra.mxu3 %vm598_vm1, %v455_v43  ;;  %v177_v42 = vld [vmem:[%s12560_s0 + $0x518] sm:$0xff] }
  0x54   :  { %v321_v43 = vld [vmem:[%s12560_s0 + $0x998] sm:$0xff] }
  0x5a   :  { %5928 = vmatmul.msk.f32.gmra.mxu0 %vm598_vm1, %v24_v44  ;;  %6072 = vmatmul.msk.f32.gmra.mxu1 %vm598_vm1, %v168_v45  ;;  %v465_v44 = vld [vmem:[%s12560_s0 + $0xe18] sm:$0xff] }
  0x5b   :  { %6216 = vmatmul.msk.f32.gmra.mxu2 %vm598_vm1, %v312_v46  ;;  %6360 = vmatmul.msk.f32.gmra.mxu3 %vm598_vm1, %v456_v47 }
  0x62   :  { %5929 = vmatmul.msk.f32.gmra.mxu0 %vm598_vm1, %v25_v48  ;;  %6073 = vmatmul.msk.f32.gmra.mxu1 %vm598_vm1, %v169_v49 }
  0x63   :  { %6217 = vmatmul.msk.f32.gmra.mxu2 %vm598_vm1, %v313_v50  ;;  %6361 = vmatmul.msk.f32.gmra.mxu3 %vm598_vm1, %v457_v51 }
  0x6a   :  { %5930 = vmatmul.msk.f32.gmra.mxu0 %vm598_vm1, %v26_v52  ;;  %6074 = vmatmul.msk.f32.gmra.mxu1 %vm598_vm1, %v170_v53  ;;  %v34_v53 = vld [vmem:[%s12560_s0 + $0xa0] sm:$0xff] }
  0x6b   :  { %6218 = vmatmul.msk.f32.gmra.mxu2 %vm598_vm1, %v314_v54  ;;  %6362 = vmatmul.msk.f32.gmra.mxu3 %vm598_vm1, %v458_v55  ;;  %v178_v54 = vld [vmem:[%s12560_s0 + $0x520] sm:$0xff] }
  0x6c   :  { %v322_v55 = vld [vmem:[%s12560_s0 + $0x9a0] sm:$0xff] }
  0x72   :  { %5931 = vmatmul.msk.f32.gmra.mxu0 %vm598_vm1, %v27_v56  ;;  %6075 = vmatmul.msk.f32.gmra.mxu1 %vm598_vm1, %v171_v57  ;;  %v466_v56 = vld [vmem:[%s12560_s0 + $0xe20] sm:$0xff] }
  0x73   :  { %6219 = vmatmul.msk.f32.gmra.mxu2 %vm598_vm1, %v315_v58  ;;  %6363 = vmatmul.msk.f32.gmra.mxu3 %vm598_vm1, %v459_v59 }
  0x7a   :  { %5932 = vmatmul.msk.f32.gmra.mxu0 %vm598_vm1, %v28_v60  ;;  %6076 = vmatmul.msk.f32.gmra.mxu1 %vm598_vm1, %v172_v61 }
  0x7b   :  { %6220 = vmatmul.msk.f32.gmra.mxu2 %vm598_vm1, %v316_v62  ;;  %6364 = vmatmul.msk.f32.gmra.mxu3 %vm598_vm1, %v460_v63 }
  0x82   :  { %5933 = vmatmul.msk.f32.gmra.mxu0 %vm598_vm1, %v29_v0  ;;  %6077 = vmatmul.msk.f32.gmra.mxu1 %vm598_vm1, %v173_v1 }
  0x83   :  { %6221 = vmatmul.msk.f32.gmra.mxu2 %vm598_vm1, %v317_v2  ;;  %6365 = vmatmul.msk.f32.gmra.mxu3 %vm598_vm1, %v461_v3  ;;  %v35_v3 = vld [vmem:[%s12560_s0 + $0xa8] sm:$0xff] }
  0x87   :  { %v6802_v4 = vpop.f32.mrf.mxu0  ;;  %v6804_v5 = vpop.f32.mrf.mxu1 }
  0x88   :  { %12669 = vst [vmem:[#allocation2_spill] sm:$0xff] %v6802_v4 }
  0x89   :  { %12670 = vst [vmem:[#allocation3_spill] sm:$0xff] %v6804_v5 }
  0x8a   :  { %5934 = vmatmul.msk.f32.gmra.mxu0 %vm598_vm1, %v30_v6  ;;  %6078 = vmatmul.msk.f32.gmra.mxu1 %vm598_vm1, %v174_v7  ;;  %v179_v6 = vld [vmem:[%s12560_s0 + $0x528] sm:$0xff] }
  0x8b   :  { %6222 = vmatmul.msk.f32.gmra.mxu2 %vm598_vm1, %v318_v8  ;;  %6366 = vmatmul.msk.f32.gmra.mxu3 %vm598_vm1, %v462_v9  ;;  %v323_v7 = vld [vmem:[%s12560_s0 + $0x9a8] sm:$0xff] }
  0x8c   :  { %v467_v8 = vld [vmem:[%s12560_s0 + $0xe28] sm:$0xff] }
  0x8e   :  { %v3212_v10 = vpop.f32.mrf.mxu2  ;;  %v3644_v11 = vpop.f32.mrf.mxu3 }
  0x8f   :  { %v6822_v12 = vpop.f32.mrf.mxu0  ;;  %v6824_v13 = vpop.f32.mrf.mxu1  ;;  %v3213_v19 = vadd.f32 %v6841_v18, %v3212_v10  ;;  %v3645_v20 = vadd.f32 %v6841_v18, %v3644_v11 }
  0x90   :  { %12671 = vst [vmem:[#allocation4_spill] sm:$0xff] %v6822_v12 }
  0x91   :  { %12672 = vst [vmem:[#allocation5_spill] sm:$0xff] %v6824_v13  ;;  %v6868_v31 = vsel %vm4076_vm2, %v3213_v19, -inf  ;;  %v6871_v32 = vsel %vm4076_vm2, %v3645_v20, -inf  ;;  %v36_v20 = vld [vmem:[%s12560_s0 + $0xb0] sm:$0xff] }
  0x92   :  { %5935 = vmatmul.msk.f32.gmra.mxu0 %vm598_vm1, %v31_v14  ;;  %6079 = vmatmul.msk.f32.gmra.mxu1 %vm598_vm1, %v175_v15 }
  0x93   :  { %6223 = vmatmul.msk.f32.gmra.mxu2 %vm598_vm1, %v319_v16  ;;  %6367 = vmatmul.msk.f32.gmra.mxu3 %vm598_vm1, %v463_v17 }
  0x96   :  { %v3215_v21 = vpop.f32.mrf.mxu2  ;;  %v3647_v22 = vpop.f32.mrf.mxu3 }
  0x97   :  { %v3216_v23 = vadd.f32 %v6841_v18, %v3215_v21  ;;  %v3648_v24 = vadd.f32 %v6841_v18, %v3647_v22  ;;  %v6851_v25 = vpop.f32.mrf.mxu0  ;;  %v6853_v26 = vpop.f32.mrf.mxu1  ;;  %v180_v21 = vld [vmem:[%s12560_s0 + $0x530] sm:$0xff] }
  0x98   :  { %12673 = vst [vmem:[#allocation6_spill] sm:$0xff] %v6851_v25  ;;  %v324_v22 = vld [vmem:[%s12560_s0 + $0x9b0] sm:$0xff] }
  0x99   :  { %12674 = vst [vmem:[#allocation7_spill] sm:$0xff] %v6853_v26  ;;  %v6874_v33 = vsel %vm4076_vm2, %v3216_v23, -inf  ;;  %v6877_v34 = vsel %vm4076_vm2, %v3648_v24, -inf  ;;  %v468_v23 = vld [vmem:[%s12560_s0 + $0xe30] sm:$0xff] }
  0x9a   :  { %5936 = vmatmul.msk.f32.gmra.mxu0 %vm598_vm1, %v32_v27  ;;  %6080 = vmatmul.msk.f32.gmra.mxu1 %vm598_vm1, %v176_v28 }
  0x9b   :  { %6224 = vmatmul.msk.f32.gmra.mxu2 %vm598_vm1, %v320_v29  ;;  %6368 = vmatmul.msk.f32.gmra.mxu3 %vm598_vm1, %v464_v30  ;;  %v43_v30 = vld [vmem:[%s12560_s0 + $0xe8] sm:$0xff] }
  0x9e   :  { %v3218_v37 = vpop.f32.mrf.mxu2  ;;  %v3650_v38 = vpop.f32.mrf.mxu3 }
  0x9f   :  { %v6887_v39 = vpop.f32.mrf.mxu0  ;;  %v6889_v40 = vpop.f32.mrf.mxu1  ;;  %v3219_v45 = vadd.f32 %v6841_v18, %v3218_v37  ;;  %v3651_v46 = vadd.f32 %v6841_v18, %v3650_v38 }
  0xa0   :  { %12675 = vst [vmem:[#allocation8_spill] sm:$0xff] %v6887_v39  ;;  %v12723_v39 = vmax.f32 %v6868_v31, %v6874_v33  ;;  %v57_v31 = vld [vmem:[%s12560_s0 + $0x158] sm:$0xff] }
  0xa1   :  { %12676 = vst [vmem:[#allocation9_spill] sm:$0xff] %v6889_v40  ;;  %v6928_v57 = vsel %vm4076_vm2, %v3219_v45, -inf  ;;  %v6931_v58 = vsel %vm4076_vm2, %v3651_v46, -inf  ;;  %v181_v45 = vld [vmem:[%s12560_s0 + $0x538] sm:$0xff] }
  0xa2   :  { %5937 = vmatmul.msk.f32.gmra.mxu0 %vm598_vm1, %v33_v41  ;;  %6081 = vmatmul.msk.f32.gmra.mxu1 %vm598_vm1, %v177_v42  ;;  %v325_v46 = vld [vmem:[%s12560_s0 + $0x9b8] sm:$0xff] }
  0xa3   :  { %6225 = vmatmul.msk.f32.gmra.mxu2 %vm598_vm1, %v321_v43  ;;  %6369 = vmatmul.msk.f32.gmra.mxu3 %vm598_vm1, %v465_v44  ;;  %v37_v44 = vld [vmem:[%s12560_s0 + $0xb8] sm:$0xff] }
  0xa4   :  { %v489_v33 = vld [vmem:[%s12560_s0 + $0xed8] sm:$0xff] }
  0xa6   :  { %v3221_v47 = vpop.f32.mrf.mxu2  ;;  %v3653_v48 = vpop.f32.mrf.mxu3 }
  0xa7   :  { %v3222_v49 = vadd.f32 %v6841_v18, %v3221_v47  ;;  %v3654_v50 = vadd.f32 %v6841_v18, %v3653_v48  ;;  %v6911_v51 = vpop.f32.mrf.mxu0  ;;  %v6913_v52 = vpop.f32.mrf.mxu1  ;;  %v469_v47 = vld [vmem:[%s12560_s0 + $0xe38] sm:$0xff] }
  0xa8   :  { %12677 = vst [vmem:[#allocation10_spill] sm:$0xff] %v6911_v51 }
  0xa9   :  { %12678 = vst [vmem:[#allocation11_spill] sm:$0xff] %v6913_v52  ;;  %v6934_v59 = vsel %vm4076_vm2, %v3222_v49, -inf  ;;  %v6937_v60 = vsel %vm4076_vm2, %v3654_v50, -inf }
  0xaa   :  { %5938 = vmatmul.msk.f32.gmra.mxu0 %vm598_vm1, %v34_v53  ;;  %6082 = vmatmul.msk.f32.gmra.mxu1 %vm598_vm1, %v178_v54 }
  0xab   :  { %6226 = vmatmul.msk.f32.gmra.mxu2 %vm598_vm1, %v322_v55  ;;  %6370 = vmatmul.msk.f32.gmra.mxu3 %vm598_vm1, %v466_v56 }
  0xae   :  { %v3224_v63 = vpop.f32.mrf.mxu2  ;;  %v3656_v0 = vpop.f32.mrf.mxu3 }
  0xaf   :  { %v6947_v1 = vpop.f32.mrf.mxu0  ;;  %v6949_v2 = vpop.f32.mrf.mxu1  ;;  %v3225_v9 = vadd.f32 %v6841_v18, %v3224_v63  ;;  %v3657_v10 = vadd.f32 %v6841_v18, %v3656_v0  ;;  %v38_v0 = vld [vmem:[%s12560_s0 + $0xc0] sm:$0xff] }
  0xb0   :  { %12679 = vst [vmem:[#allocation12_spill] sm:$0xff] %v6947_v1 }
  0xb1   :  { %12680 = vst [vmem:[#allocation13_spill] sm:$0xff] %v6949_v2  ;;  %v6988_v24 = vsel %vm4076_vm2, %v3225_v9, -inf  ;;  %v6991_v27 = vsel %vm4076_vm2, %v3657_v10, -inf }
  0xb2   :  { %5939 = vmatmul.msk.f32.gmra.mxu0 %vm598_vm1, %v35_v3  ;;  %6083 = vmatmul.msk.f32.gmra.mxu1 %vm598_vm1, %v179_v6  ;;  %v182_v3 = vld [vmem:[%s12560_s0 + $0x540] sm:$0xff] }
  0xb3   :  { %6227 = vmatmul.msk.f32.gmra.mxu2 %vm598_vm1, %v323_v7  ;;  %6371 = vmatmul.msk.f32.gmra.mxu3 %vm598_vm1, %v467_v8  ;;  %v326_v6 = vld [vmem:[%s12560_s0 + $0x9c0] sm:$0xff] }
  0xb4   :  { %v470_v7 = vld [vmem:[%s12560_s0 + $0xe40] sm:$0xff] }
  0xb6   :  { %v3227_v11 = vpop.f32.mrf.mxu2  ;;  %v3659_v14 = vpop.f32.mrf.mxu3 }
  0xb7   :  { %v3228_v15 = vadd.f32 %v6841_v18, %v3227_v11  ;;  %v3660_v16 = vadd.f32 %v6841_v18, %v3659_v14  ;;  %v6971_v17 = vpop.f32.mrf.mxu0  ;;  %v6973_v19 = vpop.f32.mrf.mxu1 }
  0xb8   :  { %12681 = vst [vmem:[#allocation14_spill] sm:$0xff] %v6971_v17 }
  0xb9   :  { %12682 = vst [vmem:[#allocation15_spill] sm:$0xff] %v6973_v19  ;;  %v6994_v28 = vsel %vm4076_vm2, %v3228_v15, -inf  ;;  %v6997_v29 = vsel %vm4076_vm2, %v3660_v16, -inf }
  0xba   :  { %5940 = vmatmul.msk.f32.gmra.mxu0 %vm598_vm1, %v36_v20  ;;  %6084 = vmatmul.msk.f32.gmra.mxu1 %vm598_vm1, %v180_v21 }
  0xbb   :  { %6228 = vmatmul.msk.f32.gmra.mxu2 %vm598_vm1, %v324_v22  ;;  %6372 = vmatmul.msk.f32.gmra.mxu3 %vm598_vm1, %v468_v23  ;;  %v39_v23 = vld [vmem:[%s12560_s0 + $0xc8] sm:$0xff] }
  0xbe   :  { %v3230_v38 = vpop.f32.mrf.mxu2  ;;  %v3662_v41 = vpop.f32.mrf.mxu3 }
  0xbf   :  { %v7007_v42 = vpop.f32.mrf.mxu0  ;;  %v7009_v43 = vpop.f32.mrf.mxu1  ;;  %v3231_v48 = vadd.f32 %v6841_v18, %v3230_v38  ;;  %v3663_v49 = vadd.f32 %v6841_v18, %v3662_v41  ;;  %v183_v38 = vld [vmem:[%s12560_s0 + $0x548] sm:$0xff] }
  0xc0   :  { %12683 = vst [vmem:[#allocation16_spill] sm:$0xff] %v7007_v42  ;;  %v327_v41 = vld [vmem:[%s12560_s0 + $0x9c8] sm:$0xff] }
  0xc1   :  { %12684 = vst [vmem:[#allocation17_spill] sm:$0xff] %v7009_v43  ;;  %v7048_v8 = vsel %vm4076_vm2, %v3231_v48, -inf  ;;  %v7051_v9 = vsel %vm4076_vm2, %v3663_v49, -inf }
  0xc2   :  { %5941 = vmatmul.msk.f32.gmra.mxu0 %vm598_vm1, %v37_v44  ;;  %6085 = vmatmul.msk.f32.gmra.mxu1 %vm598_vm1, %v181_v45  ;;  %v471_v44 = vld [vmem:[%s12560_s0 + $0xe48] sm:$0xff] }
  0xc3   :  { %6229 = vmatmul.msk.f32.gmra.mxu2 %vm598_vm1, %v325_v46  ;;  %6373 = vmatmul.msk.f32.gmra.mxu3 %vm598_vm1, %v469_v47 }
  0xc6   :  { %v3233_v50 = vpop.f32.mrf.mxu2  ;;  %v3665_v53 = vpop.f32.mrf.mxu3 }
  0xc7   :  { %v3234_v54 = vadd.f32 %v6841_v18, %v3233_v50  ;;  %v3666_v55 = vadd.f32 %v6841_v18, %v3665_v53  ;;  %v7031_v56 = vpop.f32.mrf.mxu0  ;;  %v7033_v63 = vpop.f32.mrf.mxu1 }
  0xc8   :  { %12685 = vst [vmem:[#allocation18_spill] sm:$0xff] %v7031_v56 }
  0xc9   :  { %12686 = vst [vmem:[#allocation19_spill] sm:$0xff] %v7033_v63  ;;  %v7054_v10 = vsel %vm4076_vm2, %v3234_v54, -inf  ;;  %v7057_v11 = vsel %vm4076_vm2, %v3666_v55, -inf  ;;  %v40_v55 = vld [vmem:[%s12560_s0 + $0xd0] sm:$0xff] }
  0xca   :  { %5942 = vmatmul.msk.f32.gmra.mxu0 %vm598_vm1, %v38_v0  ;;  %6086 = vmatmul.msk.f32.gmra.mxu1 %vm598_vm1, %v182_v3  ;;  %v184_v0 = vld [vmem:[%s12560_s0 + $0x550] sm:$0xff] }
  0xcb   :  { %6230 = vmatmul.msk.f32.gmra.mxu2 %vm598_vm1, %v326_v6  ;;  %6374 = vmatmul.msk.f32.gmra.mxu3 %vm598_vm1, %v470_v7  ;;  %v328_v3 = vld [vmem:[%s12560_s0 + $0x9d0] sm:$0xff] }
  0xcc   :  { %v472_v6 = vld [vmem:[%s12560_s0 + $0xe50] sm:$0xff] }
  0xce   :  { %v3236_v16 = vpop.f32.mrf.mxu2  ;;  %v3668_v20 = vpop.f32.mrf.mxu3 }
  0xcf   :  { %v7067_v21 = vpop.f32.mrf.mxu0  ;;  %v7069_v22 = vpop.f32.mrf.mxu1  ;;  %v3237_v45 = vadd.f32 %v6841_v18, %v3236_v16  ;;  %v3669_v46 = vadd.f32 %v6841_v18, %v3668_v20 }
  0xd0   :  { %12687 = vst [vmem:[#allocation20_spill] sm:$0xff] %v7067_v21 }
  0xd1   :  { %12688 = vst [vmem:[#allocation21_spill] sm:$0xff] %v7069_v22  ;;  %v7108_v7 = vsel %vm4076_vm2, %v3237_v45, -inf  ;;  %v7111_v16 = vsel %vm4076_vm2, %v3669_v46, -inf }
  0xd2   :  { %5943 = vmatmul.msk.f32.gmra.mxu0 %vm598_vm1, %v39_v23  ;;  %6087 = vmatmul.msk.f32.gmra.mxu1 %vm598_vm1, %v183_v38 }
  0xd3   :  { %6231 = vmatmul.msk.f32.gmra.mxu2 %vm598_vm1, %v327_v41  ;;  %6375 = vmatmul.msk.f32.gmra.mxu3 %vm598_vm1, %v471_v44 }
  0xd6   :  { %v3239_v47 = vpop.f32.mrf.mxu2  ;;  %v3671_v48 = vpop.f32.mrf.mxu3 }
  0xd7   :  { %v3240_v49 = vadd.f32 %v6841_v18, %v3239_v47  ;;  %v3672_v50 = vadd.f32 %v6841_v18, %v3671_v48  ;;  %v7091_v53 = vpop.f32.mrf.mxu0  ;;  %v7093_v54 = vpop.f32.mrf.mxu1  ;;  %v41_v48 = vld [vmem:[%s12560_s0 + $0xd8] sm:$0xff] }
  0xd8   :  { %12689 = vst [vmem:[#allocation22_spill] sm:$0xff] %v7091_v53 }
  0xd9   :  { %12690 = vst [vmem:[#allocation23_spill] sm:$0xff] %v7093_v54  ;;  %v7114_v20 = vsel %vm4076_vm2, %v3240_v49, -inf  ;;  %v7117_v23 = vsel %vm4076_vm2, %v3672_v50, -inf  ;;  %v185_v49 = vld [vmem:[%s12560_s0 + $0x558] sm:$0xff] }
  0xda   :  { %5944 = vmatmul.msk.f32.gmra.mxu0 %vm598_vm1, %v40_v55  ;;  %6088 = vmatmul.msk.f32.gmra.mxu1 %vm598_vm1, %v184_v0  ;;  %v329_v50 = vld [vmem:[%s12560_s0 + $0x9d8] sm:$0xff] }
  0xdb   :  { %6232 = vmatmul.msk.f32.gmra.mxu2 %vm598_vm1, %v328_v3  ;;  %6376 = vmatmul.msk.f32.gmra.mxu3 %vm598_vm1, %v472_v6  ;;  %v473_v55 = vld [vmem:[%s12560_s0 + $0xe58] sm:$0xff] }
  0xde   :  { %v3242_v44 = vpop.f32.mrf.mxu2  ;;  %v3674_v45 = vpop.f32.mrf.mxu3 }
  0xdf   :  { %v7127_v46 = vpop.f32.mrf.mxu0  ;;  %v7129_v47 = vpop.f32.mrf.mxu1  ;;  %v3243_v0 = vadd.f32 %v6841_v18, %v3242_v44  ;;  %v3675_v3 = vadd.f32 %v6841_v18, %v3674_v45  ;;  %v186_v44 = vld [vmem:[%s12560_s0 + $0x560] sm:$0xff] }
  0xe0   :  { %12691 = vst [vmem:[#allocation24_spill] sm:$0xff] %v7127_v46  ;;  %v330_v45 = vld [vmem:[%s12560_s0 + $0x9e0] sm:$0xff] }
  0xe1   :  { %12692 = vst [vmem:[#allocation25_spill] sm:$0xff] %v7129_v47 }
  0xe2   :  { %5945 = vmatmul.msk.f32.gmra.mxu0 %vm598_vm1, %v41_v48  ;;  %6089 = vmatmul.msk.f32.gmra.mxu1 %vm598_vm1, %v185_v49  ;;  %v42_v48 = vld [vmem:[%s12560_s0 + $0xe0] sm:$0xff]  ;;  %v7168_v49 = vsel %vm4076_vm2, %v3243_v0, -inf }
  0xe3   :  { %6233 = vmatmul.msk.f32.gmra.mxu2 %vm598_vm1, %v329_v50  ;;  %6377 = vmatmul.msk.f32.gmra.mxu3 %vm598_vm1, %v473_v55  ;;  %v7171_v50 = vsel %vm4076_vm2, %v3675_v3, -inf }
  0xe6   :  { %v3245_v6 = vpop.f32.mrf.mxu2  ;;  %v3677_v41 = vpop.f32.mrf.mxu3 }
  0xe7   :  { %v3246_v38 = vadd.f32 %v6841_v18, %v3245_v6  ;;  %v3678_v15 = vadd.f32 %v6841_v18, %v3677_v41  ;;  %v7151_v14 = vpop.f32.mrf.mxu0  ;;  %v7153_v37 = vpop.f32.mrf.mxu1  ;;  %v474_v41 = vld [vmem:[%s12560_s0 + $0xe60] sm:$0xff] }
  0xe8   :  { %12693 = vst [vmem:[#allocation26_spill] sm:$0xff] %v7151_v14 }
  0xe9   :  { %12694 = vst [vmem:[#allocation27_spill] sm:$0xff] %v7153_v37  ;;  %v7174_v55 = vsel %vm4076_vm2, %v3246_v38, -inf  ;;  %v7177_v6 = vsel %vm4076_vm2, %v3678_v15, -inf }
  0xea   :  { %5946 = vmatmul.msk.f32.gmra.mxu0 %vm598_vm1, %v42_v48  ;;  %6090 = vmatmul.msk.f32.gmra.mxu1 %vm598_vm1, %v186_v44  ;;  %v187_v48 = vld [vmem:[%s12560_s0 + $0x568] sm:$0xff] }
  0xeb   :  { %6234 = vmatmul.msk.f32.gmra.mxu2 %vm598_vm1, %v330_v45  ;;  %6378 = vmatmul.msk.f32.gmra.mxu3 %vm598_vm1, %v474_v41  ;;  %v331_v44 = vld [vmem:[%s12560_s0 + $0x9e8] sm:$0xff] }
  0xec   :  { %v475_v45 = vld [vmem:[%s12560_s0 + $0xe68] sm:$0xff] }
  0xee   :  { %v3248_v0 = vpop.f32.mrf.mxu2  ;;  %v3680_v38 = vpop.f32.mrf.mxu3 }
  0xef   :  { %v7187_v3 = vpop.f32.mrf.mxu0  ;;  %v7189_v15 = vpop.f32.mrf.mxu1  ;;  %v3249_v41 = vadd.f32 %v6841_v18, %v3248_v0  ;;  %v3681_v62 = vadd.f32 %v6841_v18, %v3680_v38  ;;  %v188_v0 = vld [vmem:[%s12560_s0 + $0x570] sm:$0xff] }
  0xf0   :  { %12695 = vst [vmem:[#allocation28_spill] sm:$0xff] %v7187_v3  ;;  %v332_v38 = vld [vmem:[%s12560_s0 + $0x9f0] sm:$0xff] }
  0xf1   :  { %12696 = vst [vmem:[#allocation29_spill] sm:$0xff] %v7189_v15 }
  0xf2   :  { %5947 = vmatmul.msk.f32.gmra.mxu0 %vm598_vm1, %v43_v30  ;;  %6091 = vmatmul.msk.f32.gmra.mxu1 %vm598_vm1, %v187_v48  ;;  %v44_v30 = vld [vmem:[%s12560_s0 + $0xf0] sm:$0xff]  ;;  %v7231_v48 = vsel %vm4076_vm2, %v3681_v62, -inf }
  0xf3   :  { %6235 = vmatmul.msk.f32.gmra.mxu2 %vm598_vm1, %v331_v44  ;;  %6379 = vmatmul.msk.f32.gmra.mxu3 %vm598_vm1, %v475_v45 }
  0xf6   :  { %v3251_v61 = vpop.f32.mrf.mxu2  ;;  %v3683_v36 = vpop.f32.mrf.mxu3 }
  0xf7   :  { %v3252_v35 = vadd.f32 %v6841_v18, %v3251_v61  ;;  %v3684_v37 = vadd.f32 %v6841_v18, %v3683_v36  ;;  %v7211_v54 = vpop.f32.mrf.mxu0  ;;  %v7213_v15 = vpop.f32.mrf.mxu1  ;;  %v476_v36 = vld [vmem:[%s12560_s0 + $0xe70] sm:$0xff]  ;;  %v7228_v61 = vsel %vm4076_vm2, %v3249_v41, -inf }
  0xf8   :  { %12697 = vst [vmem:[#allocation30_spill] sm:$0xff] %v7211_v54 }
  0xf9   :  { %12698 = vst [vmem:[#allocation31_spill] sm:$0xff] %v7213_v15  ;;  %v7234_v44 = vsel %vm4076_vm2, %v3252_v35, -inf  ;;  %v7237_v45 = vsel %vm4076_vm2, %v3684_v37, -inf  ;;  %v45_v15 = vld [vmem:[%s12560_s0 + $0xf8] sm:$0xff] }
  0xfa   :  { %5948 = vmatmul.msk.f32.gmra.mxu0 %vm598_vm1, %v44_v30  ;;  %6092 = vmatmul.msk.f32.gmra.mxu1 %vm598_vm1, %v188_v0  ;;  %v189_v30 = vld [vmem:[%s12560_s0 + $0x578] sm:$0xff] }
  0xfb   :  { %6236 = vmatmul.msk.f32.gmra.mxu2 %vm598_vm1, %v332_v38  ;;  %6380 = vmatmul.msk.f32.gmra.mxu3 %vm598_vm1, %v476_v36  ;;  %v333_v0 = vld [vmem:[%s12560_s0 + $0x9f8] sm:$0xff] }
  0xfc   :  { %v477_v38 = vld [vmem:[%s12560_s0 + $0xe78] sm:$0xff] }
  0xfe   :  { %v3254_v62 = vpop.f32.mrf.mxu2  ;;  %v3686_v35 = vpop.f32.mrf.mxu3 }
  0xff   :  { %v7247_v41 = vpop.f32.mrf.mxu0  ;;  %v7249_v37 = vpop.f32.mrf.mxu1  ;;  %v3255_v36 = vadd.f32 %v6841_v18, %v3254_v62  ;;  %v3687_v47 = vadd.f32 %v6841_v18, %v3686_v35  ;;  %v190_v62 = vld [vmem:[%s12560_s0 + $0x580] sm:$0xff] }
 0x100   :  { %12699 = vst [vmem:[#allocation32_spill] sm:$0xff] %v7247_v41  ;;  %v334_v35 = vld [vmem:[%s12560_s0 + $0xa00] sm:$0xff] }
 0x101   :  { %12700 = vst [vmem:[#allocation33_spill] sm:$0xff] %v7249_v37 }
 0x102   :  { %5949 = vmatmul.msk.f32.gmra.mxu0 %vm598_vm1, %v45_v15  ;;  %6093 = vmatmul.msk.f32.gmra.mxu1 %vm598_vm1, %v189_v30  ;;  %v46_v15 = vld [vmem:[%s12560_s0 + $0x100] sm:$0xff]  ;;  %v7291_v30 = vsel %vm4076_vm2, %v3687_v47, -inf }
 0x103   :  { %6237 = vmatmul.msk.f32.gmra.mxu2 %vm598_vm1, %v333_v0  ;;  %6381 = vmatmul.msk.f32.gmra.mxu3 %vm598_vm1, %v477_v38 }
 0x106   :  { %v3257_v37 = vpop.f32.mrf.mxu2  ;;  %v3689_v63 = vpop.f32.mrf.mxu3 }
 0x107   :  { %v3258_v19 = vadd.f32 %v6841_v18, %v3257_v37  ;;  %v3690_v22 = vadd.f32 %v6841_v18, %v3689_v63  ;;  %v7271_v43 = vpop.f32.mrf.mxu0  ;;  %v7273_v52 = vpop.f32.mrf.mxu1  ;;  %v478_v63 = vld [vmem:[%s12560_s0 + $0xe80] sm:$0xff]  ;;  %v7288_v37 = vsel %vm4076_vm2, %v3255_v36, -inf }
 0x108   :  { %12701 = vst [vmem:[#allocation34_spill] sm:$0xff] %v7271_v43 }
 0x109   :  { %12702 = vst [vmem:[#allocation35_spill] sm:$0xff] %v7273_v52  ;;  %v7294_v0 = vsel %vm4076_vm2, %v3258_v19, -inf  ;;  %v7297_v38 = vsel %vm4076_vm2, %v3690_v22, -inf  ;;  %v47_v52 = vld [vmem:[%s12560_s0 + $0x108] sm:$0xff] }
 0x10a   :  { %5950 = vmatmul.msk.f32.gmra.mxu0 %vm598_vm1, %v46_v15  ;;  %6094 = vmatmul.msk.f32.gmra.mxu1 %vm598_vm1, %v190_v62  ;;  %v191_v15 = vld [vmem:[%s12560_s0 + $0x588] sm:$0xff] }
 0x10b   :  { %6238 = vmatmul.msk.f32.gmra.mxu2 %vm598_vm1, %v334_v35  ;;  %6382 = vmatmul.msk.f32.gmra.mxu3 %vm598_vm1, %v478_v63  ;;  %v335_v62 = vld [vmem:[%s12560_s0 + $0xa08] sm:$0xff] }
 0x10c   :  { %v479_v35 = vld [vmem:[%s12560_s0 + $0xe88] sm:$0xff] }
 0x10e   :  { %v3260_v47 = vpop.f32.mrf.mxu2  ;;  %v3692_v19 = vpop.f32.mrf.mxu3 }
 0x10f   :  { %v7307_v36 = vpop.f32.mrf.mxu0  ;;  %v7309_v22 = vpop.f32.mrf.mxu1  ;;  %v3261_v63 = vadd.f32 %v6841_v18, %v3260_v47  ;;  %v3693_v26 = vadd.f32 %v6841_v18, %v3692_v19  ;;  %v192_v47 = vld [vmem:[%s12560_s0 + $0x590] sm:$0xff] }
 0x110   :  { %12703 = vst [vmem:[#allocation36_spill] sm:$0xff] %v7307_v36  ;;  %v336_v19 = vld [vmem:[%s12560_s0 + $0xa10] sm:$0xff] }
 0x111   :  { %12704 = vst [vmem:[#allocation37_spill] sm:$0xff] %v7309_v22 }
 0x112   :  { %5951 = vmatmul.msk.f32.gmra.mxu0 %vm598_vm1, %v47_v52  ;;  %6095 = vmatmul.msk.f32.gmra.mxu1 %vm598_vm1, %v191_v15  ;;  %v48_v52 = vld [vmem:[%s12560_s0 + $0x110] sm:$0xff]  ;;  %v7351_v15 = vsel %vm4076_vm2, %v3693_v26, -inf }
 0x113   :  { %6239 = vmatmul.msk.f32.gmra.mxu2 %vm598_vm1, %v335_v62  ;;  %6383 = vmatmul.msk.f32.gmra.mxu3 %vm598_vm1, %v479_v35 }
 0x116   :  { %v3263_v22 = vpop.f32.mrf.mxu2  ;;  %v3695_v5 = vpop.f32.mrf.mxu3 }
 0x117   :  { %v3264_v2 = vadd.f32 %v6841_v18, %v3263_v22  ;;  %v3696_v40 = vadd.f32 %v6841_v18, %v3695_v5  ;;  %v7331_v13 = vpop.f32.mrf.mxu0  ;;  %v7333_v43 = vpop.f32.mrf.mxu1  ;;  %v480_v5 = vld [vmem:[%s12560_s0 + $0xe90] sm:$0xff]  ;;  %v7348_v22 = vsel %vm4076_vm2, %v3261_v63, -inf }
 0x118   :  { %12705 = vst [vmem:[#allocation38_spill] sm:$0xff] %v7331_v13 }
 0x119   :  { %12706 = vst [vmem:[#allocation39_spill] sm:$0xff] %v7333_v43  ;;  %v7354_v62 = vsel %vm4076_vm2, %v3264_v2, -inf  ;;  %v7357_v35 = vsel %vm4076_vm2, %v3696_v40, -inf  ;;  %v49_v43 = vld [vmem:[%s12560_s0 + $0x118] sm:$0xff] }
 0x11a   :  { %5952 = vmatmul.msk.f32.gmra.mxu0 %vm598_vm1, %v48_v52  ;;  %6096 = vmatmul.msk.f32.gmra.mxu1 %vm598_vm1, %v192_v47  ;;  %v193_v52 = vld [vmem:[%s12560_s0 + $0x598] sm:$0xff] }
 0x11b   :  { %6240 = vmatmul.msk.f32.gmra.mxu2 %vm598_vm1, %v336_v19  ;;  %6384 = vmatmul.msk.f32.gmra.mxu3 %vm598_vm1, %v480_v5  ;;  %v337_v47 = vld [vmem:[%s12560_s0 + $0xa18] sm:$0xff] }
 0x11c   :  { %v481_v19 = vld [vmem:[%s12560_s0 + $0xe98] sm:$0xff] }
 0x11e   :  { %v3266_v26 = vpop.f32.mrf.mxu2  ;;  %v3698_v2 = vpop.f32.mrf.mxu3 }
 0x11f   :  { %v7367_v63 = vpop.f32.mrf.mxu0  ;;  %v7369_v40 = vpop.f32.mrf.mxu1  ;;  %v3267_v5 = vadd.f32 %v6841_v18, %v3266_v26  ;;  %v3699_v36 = vadd.f32 %v6841_v18, %v3698_v2  ;;  %v194_v26 = vld [vmem:[%s12560_s0 + $0x5a0] sm:$0xff] }
 0x120   :  { %12707 = vst [vmem:[#allocation40_spill] sm:$0xff] %v7367_v63  ;;  %v338_v2 = vld [vmem:[%s12560_s0 + $0xa20] sm:$0xff] }
 0x121   :  { %12708 = vst [vmem:[#allocation41_spill] sm:$0xff] %v7369_v40 }
 0x122   :  { %5953 = vmatmul.msk.f32.gmra.mxu0 %vm598_vm1, %v49_v43  ;;  %6097 = vmatmul.msk.f32.gmra.mxu1 %vm598_vm1, %v193_v52  ;;  %v50_v43 = vld [vmem:[%s12560_s0 + $0x120] sm:$0xff]  ;;  %v7411_v52 = vsel %vm4076_vm2, %v3699_v36, -inf }
 0x123   :  { %6241 = vmatmul.msk.f32.gmra.mxu2 %vm598_vm1, %v337_v47  ;;  %6385 = vmatmul.msk.f32.gmra.mxu3 %vm598_vm1, %v481_v19 }
 0x126   :  { %v3269_v40 = vpop.f32.mrf.mxu2  ;;  %v3701_v13 = vpop.f32.mrf.mxu3 }
 0x127   :  { %v3270_v63 = vadd.f32 %v6841_v18, %v3269_v40  ;;  %v3702_v14 = vadd.f32 %v6841_v18, %v3701_v13  ;;  %v7391_v3 = vpop.f32.mrf.mxu0  ;;  %v7393_v54 = vpop.f32.mrf.mxu1  ;;  %v482_v13 = vld [vmem:[%s12560_s0 + $0xea0] sm:$0xff]  ;;  %v7408_v40 = vsel %vm4076_vm2, %v3267_v5, -inf }
 0x128   :  { %12709 = vst [vmem:[#allocation42_spill] sm:$0xff] %v7391_v3 }
 0x129   :  { %12710 = vst [vmem:[#allocation43_spill] sm:$0xff] %v7393_v54  ;;  %v7414_v47 = vsel %vm4076_vm2, %v3270_v63, -inf  ;;  %v7417_v19 = vsel %vm4076_vm2, %v3702_v14, -inf  ;;  %v51_v54 = vld [vmem:[%s12560_s0 + $0x128] sm:$0xff] }
 0x12a   :  { %5954 = vmatmul.msk.f32.gmra.mxu0 %vm598_vm1, %v50_v43  ;;  %6098 = vmatmul.msk.f32.gmra.mxu1 %vm598_vm1, %v194_v26  ;;  %v195_v43 = vld [vmem:[%s12560_s0 + $0x5a8] sm:$0xff] }
 0x12b   :  { %6242 = vmatmul.msk.f32.gmra.mxu2 %vm598_vm1, %v338_v2  ;;  %6386 = vmatmul.msk.f32.gmra.mxu3 %vm598_vm1, %v482_v13  ;;  %v339_v26 = vld [vmem:[%s12560_s0 + $0xa28] sm:$0xff] }
 0x12c   :  { %v483_v2 = vld [vmem:[%s12560_s0 + $0xea8] sm:$0xff] }
 0x12e   :  { %v3272_v36 = vpop.f32.mrf.mxu2  ;;  %v3704_v63 = vpop.f32.mrf.mxu3 }
 0x12f   :  { %v7427_v5 = vpop.f32.mrf.mxu0  ;;  %v7429_v14 = vpop.f32.mrf.mxu1  ;;  %v3273_v13 = vadd.f32 %v6841_v18, %v3272_v36  ;;  %v3705_v3 = vadd.f32 %v6841_v18, %v3704_v63  ;;  %v196_v36 = vld [vmem:[%s12560_s0 + $0x5b0] sm:$0xff] }
 0x130   :  { %12711 = vst [vmem:[#allocation44_spill] sm:$0xff] %v7427_v5  ;;  %v340_v63 = vld [vmem:[%s12560_s0 + $0xa30] sm:$0xff] }
 0x131   :  { %12712 = vst [vmem:[#allocation45_spill] sm:$0xff] %v7429_v14 }
 0x132   :  { %5955 = vmatmul.msk.f32.gmra.mxu0 %vm598_vm1, %v51_v54  ;;  %6099 = vmatmul.msk.f32.gmra.mxu1 %vm598_vm1, %v195_v43  ;;  %v52_v54 = vld [vmem:[%s12560_s0 + $0x130] sm:$0xff]  ;;  %v7471_v43 = vsel %vm4076_vm2, %v3705_v3, -inf }
 0x133   :  { %6243 = vmatmul.msk.f32.gmra.mxu2 %vm598_vm1, %v339_v26  ;;  %6387 = vmatmul.msk.f32.gmra.mxu3 %vm598_vm1, %v483_v2 }
 0x136   :  { %v3275_v14 = vpop.f32.mrf.mxu2  ;;  %v3707_v5 = vpop.f32.mrf.mxu3 }
 0x137   :  { %v3276_v41 = vadd.f32 %v6841_v18, %v3275_v14  ;;  %v3708_v56 = vadd.f32 %v6841_v18, %v3707_v5  ;;  %v7451_v21 = vpop.f32.mrf.mxu0  ;;  %v7453_v53 = vpop.f32.mrf.mxu1  ;;  %v484_v5 = vld [vmem:[%s12560_s0 + $0xeb0] sm:$0xff]  ;;  %v7468_v14 = vsel %vm4076_vm2, %v3273_v13, -inf }
 0x138   :  { %12713 = vst [vmem:[#allocation46_spill] sm:$0xff] %v7451_v21 }
 0x139   :  { %12714 = vst [vmem:[#allocation47_spill] sm:$0xff] %v7453_v53  ;;  %v7474_v26 = vsel %vm4076_vm2, %v3276_v41, -inf  ;;  %v7477_v2 = vsel %vm4076_vm2, %v3708_v56, -inf  ;;  %v53_v53 = vld [vmem:[%s12560_s0 + $0x138] sm:$0xff] }
 0x13a   :  { %5956 = vmatmul.msk.f32.gmra.mxu0 %vm598_vm1, %v52_v54  ;;  %6100 = vmatmul.msk.f32.gmra.mxu1 %vm598_vm1, %v196_v36  ;;  %v197_v54 = vld [vmem:[%s12560_s0 + $0x5b8] sm:$0xff] }
 0x13b   :  { %6244 = vmatmul.msk.f32.gmra.mxu2 %vm598_vm1, %v340_v63  ;;  %6388 = vmatmul.msk.f32.gmra.mxu3 %vm598_vm1, %v484_v5  ;;  %v341_v36 = vld [vmem:[%s12560_s0 + $0xa38] sm:$0xff] }
 0x13c   :  { %v485_v63 = vld [vmem:[%s12560_s0 + $0xeb8] sm:$0xff] }
 0x13e   :  { %v3278_v3 = vpop.f32.mrf.mxu2  ;;  %v3710_v41 = vpop.f32.mrf.mxu3 }
 0x13f   :  { %v7487_v13 = vpop.f32.mrf.mxu0  ;;  %v7489_v56 = vpop.f32.mrf.mxu1  ;;  %v3279_v5 = vadd.f32 %v6841_v18, %v3278_v3  ;;  %v3711_v21 = vadd.f32 %v6841_v18, %v3710_v41  ;;  %v198_v3 = vld [vmem:[%s12560_s0 + $0x5c0] sm:$0xff] }
 0x140   :  { %12715 = vst [vmem:[#allocation48_spill] sm:$0xff] %v7487_v13  ;;  %v342_v41 = vld [vmem:[%s12560_s0 + $0xa40] sm:$0xff] }
 0x141   :  { %12716 = vst [vmem:[#allocation49_spill] sm:$0xff] %v7489_v56 }
 0x142   :  { %5957 = vmatmul.msk.f32.gmra.mxu0 %vm598_vm1, %v53_v53  ;;  %6101 = vmatmul.msk.f32.gmra.mxu1 %vm598_vm1, %v197_v54  ;;  %v54_v53 = vld [vmem:[%s12560_s0 + $0x140] sm:$0xff]  ;;  %v7531_v54 = vsel %vm4076_vm2, %v3711_v21, -inf }
 0x143   :  { %6245 = vmatmul.msk.f32.gmra.mxu2 %vm598_vm1, %v341_v36  ;;  %6389 = vmatmul.msk.f32.gmra.mxu3 %vm598_vm1, %v485_v63 }
 0x146   :  { %v3281_v56 = vpop.f32.mrf.mxu2  ;;  %v3713_v13 = vpop.f32.mrf.mxu3 }
 0x147   :  { %v3282_v46 = vadd.f32 %v6841_v18, %v3281_v56  ;;  %v3714_v51 = vadd.f32 %v6841_v18, %v3713_v13  ;;  %v7511_v1 = vpop.f32.mrf.mxu0  ;;  %v7513_v17 = vpop.f32.mrf.mxu1  ;;  %v486_v13 = vld [vmem:[%s12560_s0 + $0xec0] sm:$0xff]  ;;  %v7528_v56 = vsel %vm4076_vm2, %v3279_v5, -inf }
 0x148   :  { %12717 = vst [vmem:[#allocation50_spill] sm:$0xff] %v7511_v1 }
 0x149   :  { %12718 = vst [vmem:[#allocation51_spill] sm:$0xff] %v7513_v17  ;;  %v7534_v36 = vsel %vm4076_vm2, %v3282_v46, -inf  ;;  %v7537_v63 = vsel %vm4076_vm2, %v3714_v51, -inf  ;;  %v55_v17 = vld [vmem:[%s12560_s0 + $0x148] sm:$0xff] }
 0x14a   :  { %5958 = vmatmul.msk.f32.gmra.mxu0 %vm598_vm1, %v54_v53  ;;  %6102 = vmatmul.msk.f32.gmra.mxu1 %vm598_vm1, %v198_v3  ;;  %v199_v53 = vld [vmem:[%s12560_s0 + $0x5c8] sm:$0xff] }
 0x14b   :  { %6246 = vmatmul.msk.f32.gmra.mxu2 %vm598_vm1, %v342_v41  ;;  %6390 = vmatmul.msk.f32.gmra.mxu3 %vm598_vm1, %v486_v13  ;;  %v343_v3 = vld [vmem:[%s12560_s0 + $0xa48] sm:$0xff] }
 0x14c   :  { %v487_v41 = vld [vmem:[%s12560_s0 + $0xec8] sm:$0xff] }
 0x14e   :  { %v3284_v21 = vpop.f32.mrf.mxu2  ;;  %v3716_v46 = vpop.f32.mrf.mxu3 }
 0x14f   :  { %v7547_v5 = vpop.f32.mrf.mxu0  ;;  %v7549_v51 = vpop.f32.mrf.mxu1  ;;  %v3285_v13 = vadd.f32 %v6841_v18, %v3284_v21  ;;  %v3717_v42 = vadd.f32 %v6841_v18, %v3716_v46  ;;  %v200_v21 = vld [vmem:[%s12560_s0 + $0x5d0] sm:$0xff] }
 0x150   :  { %12719 = vst [vmem:[#allocation52_spill] sm:$0xff] %v7547_v5  ;;  %v344_v46 = vld [vmem:[%s12560_s0 + $0xa50] sm:$0xff] }
 0x151   :  { %12720 = vst [vmem:[#allocation53_spill] sm:$0xff] %v7549_v51 }
 0x152   :  { %5959 = vmatmul.msk.f32.gmra.mxu0 %vm598_vm1, %v55_v17  ;;  %6103 = vmatmul.msk.f32.gmra.mxu1 %vm598_vm1, %v199_v53  ;;  %v56_v17 = vld [vmem:[%s12560_s0 + $0x150] sm:$0xff]  ;;  %v4761_v53 = vsel %vm4076_vm2, %v3717_v42, -inf }
 0x153   :  { %6247 = vmatmul.msk.f32.gmra.mxu2 %vm598_vm1, %v343_v3  ;;  %6391 = vmatmul.msk.f32.gmra.mxu3 %vm598_vm1, %v487_v41 }
 0x156   :  { %v3287_v51 = vpop.f32.mrf.mxu2  ;;  %v3719_v4 = vpop.f32.mrf.mxu3 }
 0x157   :  { %v3288_v1 = vadd.f32 %v6841_v18, %v3287_v51  ;;  %v3720_v12 = vadd.f32 %v6841_v18, %v3719_v4  ;;  %v7571_v5 = vpop.f32.mrf.mxu0  ;;  %v7573_v25 = vpop.f32.mrf.mxu1  ;;  %v488_v4 = vld [vmem:[%s12560_s0 + $0xed0] sm:$0xff]  ;;  %v4545_v51 = vsel %vm4076_vm2, %v3285_v13, -inf  ;;  %v5157_v13 = vsel %vm4076_vm2, %v12723_v39, -inf }
 0x158   :  { %12721 = vst [vmem:[#allocation54_spill] sm:$0xff] %v7571_v5 }
 0x159   :  { %12722 = vst [vmem:[#allocation55_spill] sm:$0xff] %v7573_v25  ;;  %v4546_v3 = vsel %vm4076_vm2, %v3288_v1, -inf  ;;  %v4762_v41 = vsel %vm4076_vm2, %v3720_v12, -inf  ;;  %v12724_v1 = vmax.f32 %v6871_v32, %v6877_v34  ;;  %v201_v32 = vld [vmem:[%s12560_s0 + $0x5d8] sm:$0xff] }
 0x15a   :  { %v4547_v25 = vmax.f32 %v4545_v51, %v4546_v3  ;;  %v4763_v5 = vmax.f32 %v4761_v53, %v4762_v41  ;;  %5960 = vmatmul.msk.f32.gmra.mxu0 %vm598_vm1, %v56_v17  ;;  %6104 = vmatmul.msk.f32.gmra.mxu1 %vm598_vm1, %v200_v21 }
 0x15b   :  { %6248 = vmatmul.msk.f32.gmra.mxu2 %vm598_vm1, %v344_v46  ;;  %6392 = vmatmul.msk.f32.gmra.mxu3 %vm598_vm1, %v488_v4  ;;  %v5265_v12 = vsel %vm4076_vm2, %v12724_v1, -inf }
 0x15c   :  { %v5158_v42 = vsel %vm4076_vm2, %v4547_v25, -inf  ;;  %v5266_v17 = vsel %vm4076_vm2, %v4763_v5, -inf  ;;  %v345_v25 = vld [vmem:[%s12560_s0 + $0xa58] sm:$0xff] }
 0x15d   :  { %v5159_v51 = vmax.f32 %v5157_v13, %v5158_v42  ;;  %v5267_v21 = vmax.f32 %v5265_v12, %v5266_v17  ;;  %v58_v17 = vld [vmem:[%s12560_s0 + $0x160] sm:$0xff] }
 0x15e   :  { %v3290_v53 = vpop.f32.mrf.mxu2  ;;  %v3722_v46 = vpop.f32.mrf.mxu3 }
 0x15f   :  { %v7605_v3 = vpop.f32.mrf.mxu0  ;;  %v7607_v4 = vpop.f32.mrf.mxu1  ;;  %v3291_v34 = vadd.f32 %v6841_v18, %v3290_v53  ;;  %v3723_v39 = vadd.f32 %v6841_v18, %v3722_v46  ;;  %v202_v53 = vld [vmem:[%s12560_s0 + $0x5e0] sm:$0xff] }
 0x160   :  { %12725 = vst [vmem:[#allocation56_spill] sm:$0xff] %v7607_v4  ;;  %v346_v46 = vld [vmem:[%s12560_s0 + $0xa60] sm:$0xff]  ;;  %v12728_v4 = vmax.f32 %v6928_v57, %v6934_v59 }
 0x162   :  { %5961 = vmatmul.msk.f32.gmra.mxu0 %vm598_vm1, %v57_v31  ;;  %6105 = vmatmul.msk.f32.gmra.mxu1 %vm598_vm1, %v201_v32  ;;  %v490_v31 = vld [vmem:[%s12560_s0 + $0xee0] sm:$0xff]  ;;  %v4548_v32 = vsel %vm4076_vm2, %v3291_v34, -inf  ;;  %v5160_v34 = vsel %vm4076_vm2, %v12728_v4, -inf }
 0x163   :  { %6249 = vmatmul.msk.f32.gmra.mxu2 %vm598_vm1, %v345_v25  ;;  %6393 = vmatmul.msk.f32.gmra.mxu3 %vm598_vm1, %v489_v33  ;;  %v4764_v25 = vsel %vm4076_vm2, %v3723_v39, -inf  ;;  %v12729_v39 = vmax.f32 %v6931_v58, %v6937_v60  ;;  %v59_v58 = vld [vmem:[%s12560_s0 + $0x168] sm:$0xff] }
 0x164   :  { %v203_v60 = vld [vmem:[%s12560_s0 + $0x5e8] sm:$0xff] }
 0x166   :  { %v3293_v5 = vpop.f32.mrf.mxu2  ;;  %v3725_v41 = vpop.f32.mrf.mxu3 }
 0x167   :  { %v3294_v13 = vadd.f32 %v6841_v18, %v3293_v5  ;;  %v3726_v1 = vadd.f32 %v6841_v18, %v3725_v41  ;;  %v7629_v12 = vpop.f32.mrf.mxu0  ;;  %v7631_v42 = vpop.f32.mrf.mxu1 }
 0x168   :  { %12726 = vst [vmem:[#allocation57_spill] sm:$0xff] %v7629_v12 }
 0x169   :  { %12727 = vst [vmem:[#allocation58_spill] sm:$0xff] %v7631_v42  ;;  %v4549_v33 = vsel %vm4076_vm2, %v3294_v13, -inf  ;;  %v4765_v5 = vsel %vm4076_vm2, %v3726_v1, -inf  ;;  %v5268_v13 = vsel %vm4076_vm2, %v12729_v39, -inf  ;;  %v12734_v39 = vmax.f32 %v6988_v24, %v6994_v28  ;;  %v61_v24 = vld [vmem:[%s12560_s0 + $0x178] sm:$0xff] }
 0x16a   :  { %v4550_v41 = vmax.f32 %v4548_v32, %v4549_v33  ;;  %v4766_v42 = vmax.f32 %v4764_v25, %v4765_v5  ;;  %5962 = vmatmul.msk.f32.gmra.mxu0 %vm598_vm1, %v58_v17  ;;  %6106 = vmatmul.msk.f32.gmra.mxu1 %vm598_vm1, %v202_v53  ;;  %v5445_v32 = vmax.f32 %v5159_v51, 0.0  ;;  %v5481_v53 = vmax.f32 %v5267_v21, 0.0  ;;  %v347_v51 = vld [vmem:[%s12560_s0 + $0xa68] sm:$0xff]  ;;  %v349_v28 = vld [vmem:[%s12560_s0 + $0xa78] sm:$0xff] }
 0x16b   :  { %6250 = vmatmul.msk.f32.gmra.mxu2 %vm598_vm1, %v346_v46  ;;  %6394 = vmatmul.msk.f32.gmra.mxu3 %vm598_vm1, %v490_v31  ;;  %v491_v21 = vld [vmem:[%s12560_s0 + $0xee8] sm:$0xff] }
 0x16c   :  { %v5161_v1 = vsel %vm4076_vm2, %v4550_v41, -inf  ;;  %v5269_v17 = vsel %vm4076_vm2, %v4766_v42, -inf  ;;  %v7680_v4 = vsel %vm4076_vm2, %v5445_v32, -inf  ;;  %v7683_v42 = vsel %vm4076_vm2, %v5481_v53, -inf }
 0x16d   :  { %v5162_v25 = vmax.f32 %v5160_v34, %v5161_v1  ;;  %v5270_v46 = vmax.f32 %v5268_v13, %v5269_v17  ;;  %12731 = vst [vmem:[#allocation60_spill] sm:$0xff] %v7683_v42 }
 0x16e   :  { %v3296_v33 = vpop.f32.mrf.mxu2  ;;  %v3728_v31 = vpop.f32.mrf.mxu3 }
 0x16f   :  { %v5446_v5 = vmax.f32 %v5162_v25, 0.0  ;;  %v5482_v12 = vmax.f32 %v5270_v46, 0.0  ;;  %v7663_v57 = vpop.f32.mrf.mxu0  ;;  %v7665_v59 = vpop.f32.mrf.mxu1  ;;  %v3297_v1 = vadd.f32 %v6841_v18, %v3296_v33  ;;  %v3729_v17 = vadd.f32 %v6841_v18, %v3728_v31  ;;  %v204_v33 = vld [vmem:[%s12560_s0 + $0x5f0] sm:$0xff] }
 0x170   :  { %12730 = vst [vmem:[#allocation59_spill] sm:$0xff] %v7665_v59  ;;  %v348_v31 = vld [vmem:[%s12560_s0 + $0xa70] sm:$0xff] }
 0x171   :  { %v7686_v41 = vsel %vm4076_vm2, %v5446_v5, -inf  ;;  %v7689_v34 = vsel %vm4076_vm2, %v5482_v12, -inf }
 0x172   :  { %12732 = vst [vmem:[#allocation61_spill] sm:$0xff] %v7689_v34  ;;  %5963 = vmatmul.msk.f32.gmra.mxu0 %vm598_vm1, %v59_v58  ;;  %6107 = vmatmul.msk.f32.gmra.mxu1 %vm598_vm1, %v203_v60  ;;  %v60_v58 = vld [vmem:[%s12560_s0 + $0x170] sm:$0xff]  ;;  %v4551_v60 = vsel %vm4076_vm2, %v3297_v1, -inf  ;;  %v5163_v1 = vsel %vm4076_vm2, %v12734_v39, -inf  ;;  %v7760_v39 = vld [vmem:[%s12561_s2] ss:$0 sm:$0xff] }
 0x173   :  { %6251 = vmatmul.msk.f32.gmra.mxu2 %vm598_vm1, %v347_v51  ;;  %6395 = vmatmul.msk.f32.gmra.mxu3 %vm598_vm1, %v491_v21  ;;  %v4767_v51 = vsel %vm4076_vm2, %v3729_v17, -inf  ;;  %v12735_v17 = vmax.f32 %v6991_v27, %v6997_v29  ;;  %v205_v27 = vld [vmem:[%s12560_s0 + $0x5f8] sm:$0xff] }
 0x174   :  { %v493_v29 = vld [vmem:[%s12560_s0 + $0xef8] sm:$0xff] }
 0x176   :  { %v3299_v12 = vpop.f32.mrf.mxu2  ;;  %v3731_v32 = vpop.f32.mrf.mxu3 }
 0x177   :  { %v3300_v53 = vadd.f32 %v6841_v18, %v3299_v12  ;;  %v3732_v25 = vadd.f32 %v6841_v18, %v3731_v32  ;;  %v7703_v46 = vpop.f32.mrf.mxu0  ;;  %v7705_v5 = vpop.f32.mrf.mxu1  ;;  %v492_v18 = vld [vmem:[%s12560_s0 + $0xef0] sm:$0xff] }
 0x178   :  { %12733 = vst [vmem:[#allocation62_spill] sm:$0xff] %v7705_v5 }
 0x179   :  { %v4552_v21 = vsel %vm4076_vm2, %v3300_v53, -inf  ;;  %v4768_v12 = vsel %vm4076_vm2, %v3732_v25, -inf  ;;  %v5271_v53 = vsel %vm4076_vm2, %v12735_v17, -inf }
 0x17a   :  { %v4553_v32 = vmax.f32 %v4551_v60, %v4552_v21  ;;  %v4769_v13 = vmax.f32 %v4767_v51, %v4768_v12  ;;  %5964 = vmatmul.msk.f32.gmra.mxu0 %vm598_vm1, %v60_v58  ;;  %6108 = vmatmul.msk.f32.gmra.mxu1 %vm598_vm1, %v204_v33 }
 0x17b   :  { %6252 = vmatmul.msk.f32.gmra.mxu2 %vm598_vm1, %v348_v31  ;;  %6396 = vmatmul.msk.f32.gmra.mxu3 %vm598_vm1, %v492_v18 }
 0x17c   :  { %v5164_v25 = vsel %vm4076_vm2, %v4553_v32, -inf  ;;  %v5272_v58 = vsel %vm4076_vm2, %v4769_v13, -inf }
 0x17d   :  { %v5165_v60 = vmax.f32 %v5163_v1, %v5164_v25  ;;  %v5273_v33 = vmax.f32 %v5271_v53, %v5272_v58 }
 0x17e   :  { %v3302_v51 = vpop.f32.mrf.mxu2  ;;  %v3734_v31 = vpop.f32.mrf.mxu3 }
 0x17f   :  { %v7737_v21 = vpop.f32.mrf.mxu0  ;;  %v7739_v18 = vpop.f32.mrf.mxu1  ;;  %v3303_v13 = vadd.f32 %v7760_v39, %v3302_v51  ;;  %v3735_v12 = vadd.f32 %v7760_v39, %v3734_v31  ;;  %v206_v51 = vld [vmem:[%s12560_s0 + $0x600] sm:$0xff] }
 0x180   :  { %12736 = vst [vmem:[#allocation63_spill] sm:$0xff] %v7739_v18  ;;  %v350_v31 = vld [vmem:[%s12560_s0 + $0xa80] sm:$0xff] }
 0x182   :  { %5965 = vmatmul.msk.f32.gmra.mxu0 %vm598_vm1, %v61_v24  ;;  %6109 = vmatmul.msk.f32.gmra.mxu1 %vm598_vm1, %v205_v27  ;;  %v62_v24 = vld [vmem:[%s12560_s0 + $0x180] sm:$0xff] }
 0x183   :  { %6253 = vmatmul.msk.f32.gmra.mxu2 %vm598_vm1, %v349_v28  ;;  %6397 = vmatmul.msk.f32.gmra.mxu3 %vm598_vm1, %v493_v29  ;;  %v494_v27 = vld [vmem:[%s12560_s0 + $0xf00] sm:$0xff]  ;;  %v4554_v28 = vsel %vm4076_vm2, %v3303_v13, -inf  ;;  %v4770_v29 = vsel %vm4076_vm2, %v3735_v12, -inf  ;;  %v12739_v12 = vmax.f32 %v7051_v9, %v7057_v11  ;;  %v63_v9 = vld [vmem:[%s12560_s0 + $0x188] sm:$0xff] }
 0x184   :  { %v207_v11 = vld [vmem:[%s12560_s0 + $0x608] sm:$0xff] }
 0x186   :  { %v3305_v32 = vpop.f32.mrf.mxu2  ;;  %v3737_v1 = vpop.f32.mrf.mxu3 }
 0x187   :  { %v3306_v17 = vadd.f32 %v7760_v39, %v3305_v32  ;;  %v3738_v53 = vadd.f32 %v7760_v39, %v3737_v1  ;;  %v7766_v25 = vpop.f32.mrf.mxu0  ;;  %v7768_v58 = vpop.f32.mrf.mxu1 }
 0x188   :  { %12737 = vst [vmem:[#allocation64_spill] sm:$0xff] %v7768_v58  ;;  %v12738_v58 = vmax.f32 %v7048_v8, %v7054_v10 }
 0x189   :  { %v4555_v32 = vsel %vm4076_vm2, %v3306_v17, -inf  ;;  %v4771_v1 = vsel %vm4076_vm2, %v3738_v53, -inf  ;;  %v5274_v17 = vsel %vm4076_vm2, %v12739_v12, -inf }
 0x18a   :  { %v4556_v34 = vmax.f32 %v4554_v28, %v4555_v32  ;;  %v4772_v42 = vmax.f32 %v4770_v29, %v4771_v1  ;;  %5966 = vmatmul.msk.f32.gmra.mxu0 %vm598_vm1, %v62_v24  ;;  %6110 = vmatmul.msk.f32.gmra.mxu1 %vm598_vm1, %v206_v51  ;;  %v5166_v13 = vsel %vm4076_vm2, %v12738_v58, -inf  ;;  %v5447_v28 = vmax.f32 %v5165_v60, 0.0 }
 0x18b   :  { %6254 = vmatmul.msk.f32.gmra.mxu2 %vm598_vm1, %v350_v31  ;;  %6398 = vmatmul.msk.f32.gmra.mxu3 %vm598_vm1, %v494_v27  ;;  %v5483_v51 = vmax.f32 %v5273_v33, 0.0 }
 0x18c   :  { %v5167_v53 = vsel %vm4076_vm2, %v4556_v34, -inf  ;;  %v5275_v24 = vsel %vm4076_vm2, %v4772_v42, -inf  ;;  %v351_v42 = vld [vmem:[%s12560_s0 + $0xa88] sm:$0xff]  ;;  %v7817_v60 = vsel %vm4076_vm2, %v5447_v28, -inf }
 0x18d   :  { %v5168_v29 = vmax.f32 %v5166_v13, %v5167_v53  ;;  %v5276_v31 = vmax.f32 %v5274_v17, %v5275_v24  ;;  %v495_v34 = vld [vmem:[%s12560_s0 + $0xf08] sm:$0xff]  ;;  %v7820_v33 = vsel %vm4076_vm2, %v5483_v51, -inf }
 0x18e   :  { %v3308_v32 = vpop.f32.mrf.mxu2  ;;  %v3740_v27 = vpop.f32.mrf.mxu3  ;;  %12741 = vst [vmem:[#allocation66_spill] sm:$0xff] %v7820_v33 }
 0x18f   :  { %v5448_v1 = vmax.f32 %v5168_v29, 0.0  ;;  %v5484_v5 = vmax.f32 %v5276_v31, 0.0  ;;  %v7800_v8 = vpop.f32.mrf.mxu0  ;;  %v7802_v10 = vpop.f32.mrf.mxu1  ;;  %v3309_v53 = vadd.f32 %v7760_v39, %v3308_v32  ;;  %v3741_v24 = vadd.f32 %v7760_v39, %v3740_v27  ;;  %v208_v32 = vld [vmem:[%s12560_s0 + $0x610] sm:$0xff] }
 0x190   :  { %12740 = vst [vmem:[#allocation65_spill] sm:$0xff] %v7802_v10  ;;  %v352_v27 = vld [vmem:[%s12560_s0 + $0xa90] sm:$0xff] }
 0x191   :  { %v7823_v58 = vsel %vm4076_vm2, %v5448_v1, -inf  ;;  %v7826_v13 = vsel %vm4076_vm2, %v5484_v5, -inf }
 0x192   :  { %12742 = vst [vmem:[#allocation67_spill] sm:$0xff] %v7826_v13  ;;  %5967 = vmatmul.msk.f32.gmra.mxu0 %vm598_vm1, %v63_v9  ;;  %6111 = vmatmul.msk.f32.gmra.mxu1 %vm598_vm1, %v207_v11  ;;  %v64_v9 = vld [vmem:[%s12560_s0 + $0x190] sm:$0xff]  ;;  %v12744_v13 = vmax.f32 %v7108_v7, %v7114_v20  ;;  %v65_v7 = vld [vmem:[%s12560_s0 + $0x198] sm:$0xff] }
 0x193   :  { %6255 = vmatmul.msk.f32.gmra.mxu2 %vm598_vm1, %v351_v42  ;;  %6399 = vmatmul.msk.f32.gmra.mxu3 %vm598_vm1, %v495_v34  ;;  %v496_v11 = vld [vmem:[%s12560_s0 + $0xf10] sm:$0xff]  ;;  %v4557_v42 = vsel %vm4076_vm2, %v3309_v53, -inf  ;;  %v4773_v34 = vsel %vm4076_vm2, %v3741_v24, -inf  ;;  %v12745_v24 = vmax.f32 %v7111_v16, %v7117_v23  ;;  %v209_v16 = vld [vmem:[%s12560_s0 + $0x618] sm:$0xff] }
 0x194   :  { %v5169_v53 = vsel %vm4076_vm2, %v12744_v13, -inf  ;;  %v353_v20 = vld [vmem:[%s12560_s0 + $0xa98] sm:$0xff] }
 0x195   :  { %v497_v23 = vld [vmem:[%s12560_s0 + $0xf18] sm:$0xff] }
 0x196   :  { %v3311_v5 = vpop.f32.mrf.mxu2  ;;  %v3743_v28 = vpop.f32.mrf.mxu3 }
 0x197   :  { %v3312_v51 = vadd.f32 %v7760_v39, %v3311_v5  ;;  %v3744_v29 = vadd.f32 %v7760_v39, %v3743_v28  ;;  %v7840_v31 = vpop.f32.mrf.mxu0  ;;  %v7842_v1 = vpop.f32.mrf.mxu1 }
 0x198   :  { %12743 = vst [vmem:[#allocation68_spill] sm:$0xff] %v7842_v1 }
 0x199   :  { %v4558_v5 = vsel %vm4076_vm2, %v3312_v51, -inf  ;;  %v4774_v28 = vsel %vm4076_vm2, %v3744_v29, -inf  ;;  %v5277_v51 = vsel %vm4076_vm2, %v12745_v24, -inf }
 0x19a   :  { %v4559_v17 = vmax.f32 %v4557_v42, %v4558_v5  ;;  %v4775_v12 = vmax.f32 %v4773_v34, %v4774_v28  ;;  %5968 = vmatmul.msk.f32.gmra.mxu0 %vm598_vm1, %v64_v9  ;;  %6112 = vmatmul.msk.f32.gmra.mxu1 %vm598_vm1, %v208_v32 }
 0x19b   :  { %6256 = vmatmul.msk.f32.gmra.mxu2 %vm598_vm1, %v352_v27  ;;  %6400 = vmatmul.msk.f32.gmra.mxu3 %vm598_vm1, %v496_v11 }
 0x19c   :  { %v5170_v29 = vsel %vm4076_vm2, %v4559_v17, -inf  ;;  %v5278_v9 = vsel %vm4076_vm2, %v4775_v12, -inf }
 0x19d   :  { %v5171_v42 = vmax.f32 %v5169_v53, %v5170_v29  ;;  %v5279_v32 = vmax.f32 %v5277_v51, %v5278_v9  ;;  %v66_v9 = vld [vmem:[%s12560_s0 + $0x1a0] sm:$0xff] }
 0x19e   :  { %v3314_v34 = vpop.f32.mrf.mxu2  ;;  %v3746_v27 = vpop.f32.mrf.mxu3 }
 0x19f   :  { %v7874_v5 = vpop.f32.mrf.mxu0  ;;  %v7876_v11 = vpop.f32.mrf.mxu1  ;;  %v3315_v13 = vadd.f32 %v7760_v39, %v3314_v34  ;;  %v3747_v12 = vadd.f32 %v7760_v39, %v3746_v27  ;;  %v210_v34 = vld [vmem:[%s12560_s0 + $0x620] sm:$0xff] }
 0x1a0   :  { %12746 = vst [vmem:[#allocation69_spill] sm:$0xff] %v7876_v11  ;;  %v354_v27 = vld [vmem:[%s12560_s0 + $0xaa0] sm:$0xff] }
 0x1a2   :  { %5969 = vmatmul.msk.f32.gmra.mxu0 %vm598_vm1, %v65_v7  ;;  %6113 = vmatmul.msk.f32.gmra.mxu1 %vm598_vm1, %v209_v16  ;;  %v498_v7 = vld [vmem:[%s12560_s0 + $0xf20] sm:$0xff]  ;;  %v4560_v16 = vsel %vm4076_vm2, %v3315_v13, -inf }
 0x1a3   :  { %6257 = vmatmul.msk.f32.gmra.mxu2 %vm598_vm1, %v353_v20  ;;  %6401 = vmatmul.msk.f32.gmra.mxu3 %vm598_vm1, %v497_v23  ;;  %v4776_v20 = vsel %vm4076_vm2, %v3747_v12, -inf  ;;  %v12750_v12 = vmax.f32 %v7171_v50, %v7177_v6  ;;  %v67_v50 = vld [vmem:[%s12560_s0 + $0x1a8] sm:$0xff] }
 0x1a4   :  { %v211_v6 = vld [vmem:[%s12560_s0 + $0x628] sm:$0xff] }
 0x1a6   :  { %v3317_v17 = vpop.f32.mrf.mxu2  ;;  %v3749_v28 = vpop.f32.mrf.mxu3 }
 0x1a7   :  { %v3318_v53 = vadd.f32 %v7760_v39, %v3317_v17  ;;  %v3750_v24 = vadd.f32 %v7760_v39, %v3749_v28  ;;  %v7898_v51 = vpop.f32.mrf.mxu0  ;;  %v7900_v29 = vpop.f32.mrf.mxu1 }
 0x1a8   :  { %12747 = vst [vmem:[#allocation70_spill] sm:$0xff] %v7898_v51 }
 0x1a9   :  { %12748 = vst [vmem:[#allocation71_spill] sm:$0xff] %v7900_v29  ;;  %v4561_v23 = vsel %vm4076_vm2, %v3318_v53, -inf  ;;  %v4777_v17 = vsel %vm4076_vm2, %v3750_v24, -inf  ;;  %v12749_v29 = vmax.f32 %v7168_v49, %v7174_v55  ;;  %v5280_v53 = vsel %vm4076_vm2, %v12750_v12, -inf }
 0x1aa   :  { %v4562_v28 = vmax.f32 %v4560_v16, %v4561_v23  ;;  %v4778_v33 = vmax.f32 %v4776_v20, %v4777_v17  ;;  %5970 = vmatmul.msk.f32.gmra.mxu0 %vm598_vm1, %v66_v9  ;;  %6114 = vmatmul.msk.f32.gmra.mxu1 %vm598_vm1, %v210_v34  ;;  %v5449_v16 = vmax.f32 %v5171_v42, 0.0  ;;  %v5485_v34 = vmax.f32 %v5279_v32, 0.0  ;;  %v499_v42 = vld [vmem:[%s12560_s0 + $0xf28] sm:$0xff] }
 0x1ab   :  { %6258 = vmatmul.msk.f32.gmra.mxu2 %vm598_vm1, %v354_v27  ;;  %6402 = vmatmul.msk.f32.gmra.mxu3 %vm598_vm1, %v498_v7  ;;  %v5172_v13 = vsel %vm4076_vm2, %v12749_v29, -inf }
 0x1ac   :  { %v5173_v24 = vsel %vm4076_vm2, %v4562_v28, -inf  ;;  %v5281_v9 = vsel %vm4076_vm2, %v4778_v33, -inf  ;;  %v355_v33 = vld [vmem:[%s12560_s0 + $0xaa8] sm:$0xff]  ;;  %v7949_v32 = vsel %vm4076_vm2, %v5449_v16, -inf  ;;  %v7952_v29 = vsel %vm4076_vm2, %v5485_v34, -inf }
 0x1ad   :  { %v5174_v20 = vmax.f32 %v5172_v13, %v5173_v24  ;;  %v5282_v27 = vmax.f32 %v5280_v53, %v5281_v9  ;;  %12753 = vst [vmem:[#allocation74_spill] sm:$0xff] %v7949_v32 }
 0x1ae   :  { %v3320_v23 = vpop.f32.mrf.mxu2  ;;  %v3752_v7 = vpop.f32.mrf.mxu3  ;;  %12754 = vst [vmem:[#allocation75_spill] sm:$0xff] %v7952_v29 }
 0x1af   :  { %v5450_v17 = vmax.f32 %v5174_v20, 0.0  ;;  %v5486_v1 = vmax.f32 %v5282_v27, 0.0  ;;  %v7932_v49 = vpop.f32.mrf.mxu0  ;;  %v7934_v55 = vpop.f32.mrf.mxu1  ;;  %v3321_v24 = vadd.f32 %v7760_v39, %v3320_v23  ;;  %v3753_v9 = vadd.f32 %v7760_v39, %v3752_v7  ;;  %v212_v23 = vld [vmem:[%s12560_s0 + $0x630] sm:$0xff] }
 0x1b0   :  { %12751 = vst [vmem:[#allocation72_spill] sm:$0xff] %v7932_v49  ;;  %v356_v7 = vld [vmem:[%s12560_s0 + $0xab0] sm:$0xff] }
 0x1b1   :  { %12752 = vst [vmem:[#allocation73_spill] sm:$0xff] %v7934_v55  ;;  %v7955_v28 = vsel %vm4076_vm2, %v5450_v17, -inf  ;;  %v7958_v13 = vsel %vm4076_vm2, %v5486_v1, -inf }
 0x1b2   :  { %12755 = vst [vmem:[#allocation76_spill] sm:$0xff] %v7955_v28  ;;  %5971 = vmatmul.msk.f32.gmra.mxu0 %vm598_vm1, %v67_v50  ;;  %6115 = vmatmul.msk.f32.gmra.mxu1 %vm598_vm1, %v211_v6  ;;  %v68_v50 = vld [vmem:[%s12560_s0 + $0x1b0] sm:$0xff] }
 0x1b3   :  { %12756 = vst [vmem:[#allocation77_spill] sm:$0xff] %v7958_v13  ;;  %6259 = vmatmul.msk.f32.gmra.mxu2 %vm598_vm1, %v355_v33  ;;  %6403 = vmatmul.msk.f32.gmra.mxu3 %vm598_vm1, %v499_v42  ;;  %v500_v6 = vld [vmem:[%s12560_s0 + $0xf30] sm:$0xff]  ;;  %v4563_v33 = vsel %vm4076_vm2, %v3321_v24, -inf  ;;  %v4779_v42 = vsel %vm4076_vm2, %v3753_v9, -inf  ;;  %v12759_v13 = vmax.f32 %v7228_v61, %v7234_v44  ;;  %v12760_v9 = vmax.f32 %v7231_v48, %v7237_v45  ;;  %v69_v61 = vld [vmem:[%s12560_s0 + $0x1b8] sm:$0xff] }
 0x1b4   :  { %v213_v48 = vld [vmem:[%s12560_s0 + $0x638] sm:$0xff] }
 0x1b5   :  { %v5175_v24 = vsel %vm4076_vm2, %v12759_v13, -inf  ;;  %v357_v44 = vld [vmem:[%s12560_s0 + $0xab8] sm:$0xff] }
 0x1b6   :  { %v3323_v1 = vpop.f32.mrf.mxu2  ;;  %v3755_v16 = vpop.f32.mrf.mxu3  ;;  %v501_v45 = vld [vmem:[%s12560_s0 + $0xf38] sm:$0xff] }
 0x1b7   :  { %v3324_v34 = vadd.f32 %v7760_v39, %v3323_v1  ;;  %v3756_v20 = vadd.f32 %v7760_v39, %v3755_v16  ;;  %v7972_v27 = vpop.f32.mrf.mxu0  ;;  %v7974_v17 = vpop.f32.mrf.mxu1 }
 0x1b8   :  { %12757 = vst [vmem:[#allocation78_spill] sm:$0xff] %v7972_v27 }
 0x1b9   :  { %12758 = vst [vmem:[#allocation79_spill] sm:$0xff] %v7974_v17  ;;  %v4564_v1 = vsel %vm4076_vm2, %v3324_v34, -inf  ;;  %v4780_v16 = vsel %vm4076_vm2, %v3756_v20, -inf  ;;  %v5283_v34 = vsel %vm4076_vm2, %v12760_v9, -inf }
 0x1ba   :  { %v4565_v53 = vmax.f32 %v4563_v33, %v4564_v1  ;;  %v4781_v12 = vmax.f32 %v4779_v42, %v4780_v16  ;;  %5972 = vmatmul.msk.f32.gmra.mxu0 %vm598_vm1, %v68_v50  ;;  %6116 = vmatmul.msk.f32.gmra.mxu1 %vm598_vm1, %v212_v23 }
 0x1bb   :  { %6260 = vmatmul.msk.f32.gmra.mxu2 %vm598_vm1, %v356_v7  ;;  %6404 = vmatmul.msk.f32.gmra.mxu3 %vm598_vm1, %v500_v6 }
 0x1bc   :  { %v5176_v20 = vsel %vm4076_vm2, %v4565_v53, -inf  ;;  %v5284_v50 = vsel %vm4076_vm2, %v4781_v12, -inf }
 0x1bd   :  { %v5177_v33 = vmax.f32 %v5175_v24, %v5176_v20  ;;  %v5285_v23 = vmax.f32 %v5283_v34, %v5284_v50  ;;  %v70_v50 = vld [vmem:[%s12560_s0 + $0x1c0] sm:$0xff] }
 0x1be   :  { %v3326_v42 = vpop.f32.mrf.mxu2  ;;  %v3758_v7 = vpop.f32.mrf.mxu3 }
 0x1bf   :  { %v8006_v1 = vpop.f32.mrf.mxu0  ;;  %v8008_v6 = vpop.f32.mrf.mxu1  ;;  %v3327_v13 = vadd.f32 %v7760_v39, %v3326_v42  ;;  %v3759_v12 = vadd.f32 %v7760_v39, %v3758_v7  ;;  %v214_v42 = vld [vmem:[%s12560_s0 + $0x640] sm:$0xff] }
 0x1c0   :  { %12761 = vst [vmem:[#allocation80_spill] sm:$0xff] %v8006_v1  ;;  %v358_v7 = vld [vmem:[%s12560_s0 + $0xac0] sm:$0xff] }
 0x1c1   :  { %12762 = vst [vmem:[#allocation81_spill] sm:$0xff] %v8008_v6  ;;  %v12876_v1 = vld [vmem:[#allocation50_spill] sm:$0xff] }
 0x1c2   :  { %5973 = vmatmul.msk.f32.gmra.mxu0 %vm598_vm1, %v69_v61  ;;  %6117 = vmatmul.msk.f32.gmra.mxu1 %vm598_vm1, %v213_v48  ;;  %v502_v61 = vld [vmem:[%s12560_s0 + $0xf40] sm:$0xff]  ;;  %v4566_v48 = vsel %vm4076_vm2, %v3327_v13, -inf }
 0x1c3   :  { %6261 = vmatmul.msk.f32.gmra.mxu2 %vm598_vm1, %v357_v44  ;;  %6405 = vmatmul.msk.f32.gmra.mxu3 %vm598_vm1, %v501_v45  ;;  %v4782_v44 = vsel %vm4076_vm2, %v3759_v12, -inf  ;;  %v12766_v12 = vmax.f32 %v7291_v30, %v7297_v38  ;;  %v71_v30 = vld [vmem:[%s12560_s0 + $0x1c8] sm:$0xff] }
 0x1c4   :  { %v215_v38 = vld [vmem:[%s12560_s0 + $0x648] sm:$0xff] }
 0x1c6   :  { %v3329_v53 = vpop.f32.mrf.mxu2  ;;  %v3761_v16 = vpop.f32.mrf.mxu3 }
 0x1c7   :  { %v3330_v24 = vadd.f32 %v7760_v39, %v3329_v53  ;;  %v3762_v9 = vadd.f32 %v7760_v39, %v3761_v16  ;;  %v8030_v34 = vpop.f32.mrf.mxu0  ;;  %v8032_v20 = vpop.f32.mrf.mxu1 }
 0x1c8   :  { %12763 = vst [vmem:[#allocation82_spill] sm:$0xff] %v8030_v34 }
 0x1c9   :  { %12764 = vst [vmem:[#allocation83_spill] sm:$0xff] %v8032_v20  ;;  %v4567_v45 = vsel %vm4076_vm2, %v3330_v24, -inf  ;;  %v4783_v53 = vsel %vm4076_vm2, %v3762_v9, -inf  ;;  %v12765_v20 = vmax.f32 %v7288_v37, %v7294_v0  ;;  %v5286_v24 = vsel %vm4076_vm2, %v12766_v12, -inf }
 0x1ca   :  { %v4568_v16 = vmax.f32 %v4566_v48, %v4567_v45  ;;  %v4784_v29 = vmax.f32 %v4782_v44, %v4783_v53  ;;  %5974 = vmatmul.msk.f32.gmra.mxu0 %vm598_vm1, %v70_v50  ;;  %6118 = vmatmul.msk.f32.gmra.mxu1 %vm598_vm1, %v214_v42  ;;  %v5451_v48 = vmax.f32 %v5177_v33, 0.0  ;;  %v5487_v42 = vmax.f32 %v5285_v23, 0.0  ;;  %v503_v33 = vld [vmem:[%s12560_s0 + $0xf48] sm:$0xff] }
 0x1cb   :  { %6262 = vmatmul.msk.f32.gmra.mxu2 %vm598_vm1, %v358_v7  ;;  %6406 = vmatmul.msk.f32.gmra.mxu3 %vm598_vm1, %v502_v61  ;;  %v5178_v13 = vsel %vm4076_vm2, %v12765_v20, -inf }
 0x1cc   :  { %v5179_v9 = vsel %vm4076_vm2, %v4568_v16, -inf  ;;  %v5287_v50 = vsel %vm4076_vm2, %v4784_v29, -inf  ;;  %v359_v29 = vld [vmem:[%s12560_s0 + $0xac8] sm:$0xff]  ;;  %v8081_v23 = vsel %vm4076_vm2, %v5451_v48, -inf  ;;  %v8084_v20 = vsel %vm4076_vm2, %v5487_v42, -inf }
 0x1cd   :  { %v5180_v44 = vmax.f32 %v5178_v13, %v5179_v9  ;;  %v5288_v7 = vmax.f32 %v5286_v24, %v5287_v50  ;;  %12769 = vst [vmem:[#allocation86_spill] sm:$0xff] %v8081_v23 }
 0x1ce   :  { %v3332_v45 = vpop.f32.mrf.mxu2  ;;  %v3764_v61 = vpop.f32.mrf.mxu3  ;;  %12770 = vst [vmem:[#allocation87_spill] sm:$0xff] %v8084_v20 }
 0x1cf   :  { %v5452_v53 = vmax.f32 %v5180_v44, 0.0  ;;  %v5488_v17 = vmax.f32 %v5288_v7, 0.0  ;;  %v8064_v37 = vpop.f32.mrf.mxu0  ;;  %v8066_v0 = vpop.f32.mrf.mxu1  ;;  %v3333_v9 = vadd.f32 %v7760_v39, %v3332_v45  ;;  %v3765_v50 = vadd.f32 %v7760_v39, %v3764_v61  ;;  %v216_v45 = vld [vmem:[%s12560_s0 + $0x650] sm:$0xff] }
 0x1d0   :  { %12767 = vst [vmem:[#allocation84_spill] sm:$0xff] %v8064_v37  ;;  %v360_v61 = vld [vmem:[%s12560_s0 + $0xad0] sm:$0xff] }
 0x1d1   :  { %12768 = vst [vmem:[#allocation85_spill] sm:$0xff] %v8066_v0  ;;  %v8087_v16 = vsel %vm4076_vm2, %v5452_v53, -inf  ;;  %v8090_v13 = vsel %vm4076_vm2, %v5488_v17, -inf }
 0x1d2   :  { %12771 = vst [vmem:[#allocation88_spill] sm:$0xff] %v8087_v16  ;;  %5975 = vmatmul.msk.f32.gmra.mxu0 %vm598_vm1, %v71_v30  ;;  %6119 = vmatmul.msk.f32.gmra.mxu1 %vm598_vm1, %v215_v38  ;;  %v72_v30 = vld [vmem:[%s12560_s0 + $0x1d0] sm:$0xff] }
 0x1d3   :  { %12772 = vst [vmem:[#allocation89_spill] sm:$0xff] %v8090_v13  ;;  %6263 = vmatmul.msk.f32.gmra.mxu2 %vm598_vm1, %v359_v29  ;;  %6407 = vmatmul.msk.f32.gmra.mxu3 %vm598_vm1, %v503_v33  ;;  %v504_v38 = vld [vmem:[%s12560_s0 + $0xf50] sm:$0xff]  ;;  %v4569_v29 = vsel %vm4076_vm2, %v3333_v9, -inf  ;;  %v4785_v33 = vsel %vm4076_vm2, %v3765_v50, -inf  ;;  %v12775_v13 = vmax.f32 %v7348_v22, %v7354_v62  ;;  %v12776_v50 = vmax.f32 %v7351_v15, %v7357_v35  ;;  %v73_v22 = vld [vmem:[%s12560_s0 + $0x1d8] sm:$0xff] }
 0x1d4   :  { %v217_v15 = vld [vmem:[%s12560_s0 + $0x658] sm:$0xff] }
 0x1d5   :  { %v5181_v9 = vsel %vm4076_vm2, %v12775_v13, -inf  ;;  %v361_v62 = vld [vmem:[%s12560_s0 + $0xad8] sm:$0xff] }
 0x1d6   :  { %v3335_v17 = vpop.f32.mrf.mxu2  ;;  %v3767_v48 = vpop.f32.mrf.mxu3  ;;  %v505_v35 = vld [vmem:[%s12560_s0 + $0xf58] sm:$0xff] }
 0x1d7   :  { %v3336_v42 = vadd.f32 %v7760_v39, %v3335_v17  ;;  %v3768_v44 = vadd.f32 %v7760_v39, %v3767_v48  ;;  %v8104_v7 = vpop.f32.mrf.mxu0  ;;  %v8106_v53 = vpop.f32.mrf.mxu1 }
 0x1d8   :  { %12773 = vst [vmem:[#allocation90_spill] sm:$0xff] %v8104_v7 }
 0x1d9   :  { %12774 = vst [vmem:[#allocation91_spill] sm:$0xff] %v8106_v53  ;;  %v4570_v17 = vsel %vm4076_vm2, %v3336_v42, -inf  ;;  %v4786_v48 = vsel %vm4076_vm2, %v3768_v44, -inf  ;;  %v5289_v42 = vsel %vm4076_vm2, %v12776_v50, -inf }
 0x1da   :  { %v4571_v24 = vmax.f32 %v4569_v29, %v4570_v17  ;;  %v4787_v12 = vmax.f32 %v4785_v33, %v4786_v48  ;;  %5976 = vmatmul.msk.f32.gmra.mxu0 %vm598_vm1, %v72_v30  ;;  %6120 = vmatmul.msk.f32.gmra.mxu1 %vm598_vm1, %v216_v45 }
 0x1db   :  { %6264 = vmatmul.msk.f32.gmra.mxu2 %vm598_vm1, %v360_v61  ;;  %6408 = vmatmul.msk.f32.gmra.mxu3 %vm598_vm1, %v504_v38 }
 0x1dc   :  { %v5182_v44 = vsel %vm4076_vm2, %v4571_v24, -inf  ;;  %v5290_v30 = vsel %vm4076_vm2, %v4787_v12, -inf }
 0x1dd   :  { %v5183_v29 = vmax.f32 %v5181_v9, %v5182_v44  ;;  %v5291_v45 = vmax.f32 %v5289_v42, %v5290_v30  ;;  %v74_v30 = vld [vmem:[%s12560_s0 + $0x1e0] sm:$0xff] }
 0x1de   :  { %v3338_v33 = vpop.f32.mrf.mxu2  ;;  %v3770_v61 = vpop.f32.mrf.mxu3 }
 0x1df   :  { %v8138_v17 = vpop.f32.mrf.mxu0  ;;  %v8140_v38 = vpop.f32.mrf.mxu1  ;;  %v3339_v13 = vadd.f32 %v7760_v39, %v3338_v33  ;;  %v3771_v12 = vadd.f32 %v7760_v39, %v3770_v61  ;;  %v218_v33 = vld [vmem:[%s12560_s0 + $0x660] sm:$0xff] }
 0x1e0   :  { %12777 = vst [vmem:[#allocation92_spill] sm:$0xff] %v8138_v17  ;;  %v362_v61 = vld [vmem:[%s12560_s0 + $0xae0] sm:$0xff] }
 0x1e1   :  { %12778 = vst [vmem:[#allocation93_spill] sm:$0xff] %v8140_v38 }
 0x1e2   :  { %5977 = vmatmul.msk.f32.gmra.mxu0 %vm598_vm1, %v73_v22  ;;  %6121 = vmatmul.msk.f32.gmra.mxu1 %vm598_vm1, %v217_v15  ;;  %v506_v22 = vld [vmem:[%s12560_s0 + $0xf60] sm:$0xff]  ;;  %v4572_v15 = vsel %vm4076_vm2, %v3339_v13, -inf }
 0x1e3   :  { %6265 = vmatmul.msk.f32.gmra.mxu2 %vm598_vm1, %v361_v62  ;;  %6409 = vmatmul.msk.f32.gmra.mxu3 %vm598_vm1, %v505_v35  ;;  %v4788_v62 = vsel %vm4076_vm2, %v3771_v12, -inf  ;;  %v12782_v12 = vmax.f32 %v7411_v52, %v7417_v19  ;;  %v75_v52 = vld [vmem:[%s12560_s0 + $0x1e8] sm:$0xff] }
 0x1e4   :  { %v219_v19 = vld [vmem:[%s12560_s0 + $0x668] sm:$0xff] }
 0x1e6   :  { %v3341_v24 = vpop.f32.mrf.mxu2  ;;  %v3773_v48 = vpop.f32.mrf.mxu3 }
 0x1e7   :  { %v3342_v9 = vadd.f32 %v7760_v39, %v3341_v24  ;;  %v3774_v50 = vadd.f32 %v7760_v39, %v3773_v48  ;;  %v8162_v42 = vpop.f32.mrf.mxu0  ;;  %v8164_v44 = vpop.f32.mrf.mxu1 }
 0x1e8   :  { %12779 = vst [vmem:[#allocation94_spill] sm:$0xff] %v8162_v42 }
 0x1e9   :  { %12780 = vst [vmem:[#allocation95_spill] sm:$0xff] %v8164_v44  ;;  %v4573_v35 = vsel %vm4076_vm2, %v3342_v9, -inf  ;;  %v4789_v24 = vsel %vm4076_vm2, %v3774_v50, -inf  ;;  %v12781_v44 = vmax.f32 %v7408_v40, %v7414_v47  ;;  %v5292_v9 = vsel %vm4076_vm2, %v12782_v12, -inf }
 0x1ea   :  { %v4574_v48 = vmax.f32 %v4572_v15, %v4573_v35  ;;  %v4790_v20 = vmax.f32 %v4788_v62, %v4789_v24  ;;  %5978 = vmatmul.msk.f32.gmra.mxu0 %vm598_vm1, %v74_v30  ;;  %6122 = vmatmul.msk.f32.gmra.mxu1 %vm598_vm1, %v218_v33  ;;  %v5453_v15 = vmax.f32 %v5183_v29, 0.0  ;;  %v5489_v33 = vmax.f32 %v5291_v45, 0.0  ;;  %v507_v29 = vld [vmem:[%s12560_s0 + $0xf68] sm:$0xff] }
 0x1eb   :  { %6266 = vmatmul.msk.f32.gmra.mxu2 %vm598_vm1, %v362_v61  ;;  %6410 = vmatmul.msk.f32.gmra.mxu3 %vm598_vm1, %v506_v22  ;;  %v5184_v13 = vsel %vm4076_vm2, %v12781_v44, -inf }
 0x1ec   :  { %v5185_v50 = vsel %vm4076_vm2, %v4574_v48, -inf  ;;  %v5293_v30 = vsel %vm4076_vm2, %v4790_v20, -inf  ;;  %v363_v20 = vld [vmem:[%s12560_s0 + $0xae8] sm:$0xff]  ;;  %v8213_v45 = vsel %vm4076_vm2, %v5453_v15, -inf  ;;  %v8216_v44 = vsel %vm4076_vm2, %v5489_v33, -inf }
 0x1ed   :  { %v5186_v62 = vmax.f32 %v5184_v13, %v5185_v50  ;;  %v5294_v61 = vmax.f32 %v5292_v9, %v5293_v30  ;;  %12785 = vst [vmem:[#allocation98_spill] sm:$0xff] %v8213_v45 }
 0x1ee   :  { %v3344_v35 = vpop.f32.mrf.mxu2  ;;  %v3776_v22 = vpop.f32.mrf.mxu3  ;;  %12786 = vst [vmem:[#allocation99_spill] sm:$0xff] %v8216_v44 }
 0x1ef   :  { %v5454_v24 = vmax.f32 %v5186_v62, 0.0  ;;  %v5490_v53 = vmax.f32 %v5294_v61, 0.0  ;;  %v8196_v40 = vpop.f32.mrf.mxu0  ;;  %v8198_v47 = vpop.f32.mrf.mxu1  ;;  %v3345_v50 = vadd.f32 %v7760_v39, %v3344_v35  ;;  %v3777_v30 = vadd.f32 %v7760_v39, %v3776_v22  ;;  %v220_v35 = vld [vmem:[%s12560_s0 + $0x670] sm:$0xff] }
 0x1f0   :  { %12783 = vst [vmem:[#allocation96_spill] sm:$0xff] %v8196_v40  ;;  %v364_v22 = vld [vmem:[%s12560_s0 + $0xaf0] sm:$0xff] }
 0x1f1   :  { %12784 = vst [vmem:[#allocation97_spill] sm:$0xff] %v8198_v47  ;;  %v8219_v48 = vsel %vm4076_vm2, %v5454_v24, -inf  ;;  %v8222_v13 = vsel %vm4076_vm2, %v5490_v53, -inf }
 0x1f2   :  { %12787 = vst [vmem:[#allocation100_spill] sm:$0xff] %v8219_v48  ;;  %5979 = vmatmul.msk.f32.gmra.mxu0 %vm598_vm1, %v75_v52  ;;  %6123 = vmatmul.msk.f32.gmra.mxu1 %vm598_vm1, %v219_v19  ;;  %v76_v52 = vld [vmem:[%s12560_s0 + $0x1f0] sm:$0xff]  ;;  %v87_v48 = vld [vmem:[%s12560_s0 + $0x248] sm:$0xff] }
 0x1f3   :  { %12788 = vst [vmem:[#allocation101_spill] sm:$0xff] %v8222_v13  ;;  %6267 = vmatmul.msk.f32.gmra.mxu2 %vm598_vm1, %v363_v20  ;;  %6411 = vmatmul.msk.f32.gmra.mxu3 %vm598_vm1, %v507_v29  ;;  %v508_v19 = vld [vmem:[%s12560_s0 + $0xf70] sm:$0xff]  ;;  %v4575_v20 = vsel %vm4076_vm2, %v3345_v50, -inf  ;;  %v4791_v29 = vsel %vm4076_vm2, %v3777_v30, -inf  ;;  %v12791_v13 = vmax.f32 %v7468_v14, %v7474_v26  ;;  %v12792_v30 = vmax.f32 %v7471_v43, %v7477_v2  ;;  %v77_v14 = vld [vmem:[%s12560_s0 + $0x1f8] sm:$0xff] }
 0x1f4   :  { %v221_v43 = vld [vmem:[%s12560_s0 + $0x678] sm:$0xff] }
 0x1f5   :  { %v5187_v50 = vsel %vm4076_vm2, %v12791_v13, -inf  ;;  %v365_v26 = vld [vmem:[%s12560_s0 + $0xaf8] sm:$0xff] }
 0x1f6   :  { %v3347_v53 = vpop.f32.mrf.mxu2  ;;  %v3779_v15 = vpop.f32.mrf.mxu3  ;;  %v509_v2 = vld [vmem:[%s12560_s0 + $0xf78] sm:$0xff] }
 0x1f7   :  { %v3348_v33 = vadd.f32 %v7760_v39, %v3347_v53  ;;  %v3780_v62 = vadd.f32 %v7760_v39, %v3779_v15  ;;  %v8236_v61 = vpop.f32.mrf.mxu0  ;;  %v8238_v24 = vpop.f32.mrf.mxu1 }
 0x1f8   :  { %12789 = vst [vmem:[#allocation102_spill] sm:$0xff] %v8236_v61 }
 0x1f9   :  { %12790 = vst [vmem:[#allocation103_spill] sm:$0xff] %v8238_v24  ;;  %v4576_v53 = vsel %vm4076_vm2, %v3348_v33, -inf  ;;  %v4792_v15 = vsel %vm4076_vm2, %v3780_v62, -inf  ;;  %v5295_v33 = vsel %vm4076_vm2, %v12792_v30, -inf }
 0x1fa   :  { %v4577_v9 = vmax.f32 %v4575_v20, %v4576_v53  ;;  %v4793_v12 = vmax.f32 %v4791_v29, %v4792_v15  ;;  %5980 = vmatmul.msk.f32.gmra.mxu0 %vm598_vm1, %v76_v52  ;;  %6124 = vmatmul.msk.f32.gmra.mxu1 %vm598_vm1, %v220_v35 }
 0x1fb   :  { %6268 = vmatmul.msk.f32.gmra.mxu2 %vm598_vm1, %v364_v22  ;;  %6412 = vmatmul.msk.f32.gmra.mxu3 %vm598_vm1, %v508_v19 }
 0x1fc   :  { %v5188_v62 = vsel %vm4076_vm2, %v4577_v9, -inf  ;;  %v5296_v52 = vsel %vm4076_vm2, %v4793_v12, -inf }
 0x1fd   :  { %v5189_v20 = vmax.f32 %v5187_v50, %v5188_v62  ;;  %v5297_v35 = vmax.f32 %v5295_v33, %v5296_v52  ;;  %v78_v52 = vld [vmem:[%s12560_s0 + $0x200] sm:$0xff] }
 0x1fe   :  { %v3350_v29 = vpop.f32.mrf.mxu2  ;;  %v3782_v22 = vpop.f32.mrf.mxu3 }
 0x1ff   :  { %v8270_v53 = vpop.f32.mrf.mxu0  ;;  %v8272_v19 = vpop.f32.mrf.mxu1  ;;  %v3351_v13 = vadd.f32 %v7760_v39, %v3350_v29  ;;  %v3783_v12 = vadd.f32 %v7760_v39, %v3782_v22  ;;  %v222_v29 = vld [vmem:[%s12560_s0 + $0x680] sm:$0xff] }
 0x200   :  { %12793 = vst [vmem:[#allocation104_spill] sm:$0xff] %v8270_v53  ;;  %v366_v22 = vld [vmem:[%s12560_s0 + $0xb00] sm:$0xff] }
 0x201   :  { %12794 = vst [vmem:[#allocation105_spill] sm:$0xff] %v8272_v19 }
 0x202   :  { %5981 = vmatmul.msk.f32.gmra.mxu0 %vm598_vm1, %v77_v14  ;;  %6125 = vmatmul.msk.f32.gmra.mxu1 %vm598_vm1, %v221_v43  ;;  %v510_v14 = vld [vmem:[%s12560_s0 + $0xf80] sm:$0xff]  ;;  %v4578_v43 = vsel %vm4076_vm2, %v3351_v13, -inf }
 0x203   :  { %6269 = vmatmul.msk.f32.gmra.mxu2 %vm598_vm1, %v365_v26  ;;  %6413 = vmatmul.msk.f32.gmra.mxu3 %vm598_vm1, %v509_v2  ;;  %v4794_v26 = vsel %vm4076_vm2, %v3783_v12, -inf  ;;  %v12797_v12 = vmax.f32 %v7531_v54, %v7537_v63  ;;  %v79_v54 = vld [vmem:[%s12560_s0 + $0x208] sm:$0xff] }
 0x204   :  { %v223_v63 = vld [vmem:[%s12560_s0 + $0x688] sm:$0xff] }
 0x206   :  { %v3353_v9 = vpop.f32.mrf.mxu2  ;;  %v3785_v15 = vpop.f32.mrf.mxu3 }
 0x207   :  { %v3354_v50 = vadd.f32 %v7760_v39, %v3353_v9  ;;  %v3786_v30 = vadd.f32 %v7760_v39, %v3785_v15  ;;  %v8294_v33 = vpop.f32.mrf.mxu0  ;;  %v8296_v62 = vpop.f32.mrf.mxu1 }
 0x208   :  { %12795 = vst [vmem:[#allocation106_spill] sm:$0xff] %v8296_v62  ;;  %v12796_v62 = vmax.f32 %v7528_v56, %v7534_v36 }
 0x209   :  { %v4579_v2 = vsel %vm4076_vm2, %v3354_v50, -inf  ;;  %v4795_v9 = vsel %vm4076_vm2, %v3786_v30, -inf  ;;  %v5298_v50 = vsel %vm4076_vm2, %v12797_v12, -inf }
 0x20a   :  { %v4580_v15 = vmax.f32 %v4578_v43, %v4579_v2  ;;  %v4796_v44 = vmax.f32 %v4794_v26, %v4795_v9  ;;  %5982 = vmatmul.msk.f32.gmra.mxu0 %vm598_vm1, %v78_v52  ;;  %6126 = vmatmul.msk.f32.gmra.mxu1 %vm598_vm1, %v222_v29  ;;  %v5190_v13 = vsel %vm4076_vm2, %v12796_v62, -inf  ;;  %v5455_v43 = vmax.f32 %v5189_v20, 0.0  ;;  %v511_v20 = vld [vmem:[%s12560_s0 + $0xf88] sm:$0xff] }
 0x20b   :  { %6270 = vmatmul.msk.f32.gmra.mxu2 %vm598_vm1, %v366_v22  ;;  %6414 = vmatmul.msk.f32.gmra.mxu3 %vm598_vm1, %v510_v14  ;;  %v5491_v29 = vmax.f32 %v5297_v35, 0.0 }
 0x20c   :  { %v5191_v30 = vsel %vm4076_vm2, %v4580_v15, -inf  ;;  %v5299_v52 = vsel %vm4076_vm2, %v4796_v44, -inf  ;;  %v367_v44 = vld [vmem:[%s12560_s0 + $0xb08] sm:$0xff]  ;;  %v8345_v35 = vsel %vm4076_vm2, %v5455_v43, -inf }
 0x20d   :  { %v5192_v26 = vmax.f32 %v5190_v13, %v5191_v30  ;;  %v5300_v22 = vmax.f32 %v5298_v50, %v5299_v52  ;;  %12799 = vst [vmem:[#allocation108_spill] sm:$0xff] %v8345_v35  ;;  %v8348_v62 = vsel %vm4076_vm2, %v5491_v29, -inf  ;;  %v81_v50 = vld [vmem:[%s12560_s0 + $0x218] sm:$0xff] }
 0x20e   :  { %v3356_v2 = vpop.f32.mrf.mxu2  ;;  %v3788_v14 = vpop.f32.mrf.mxu3  ;;  %12800 = vst [vmem:[#allocation109_spill] sm:$0xff] %v8348_v62 }
 0x20f   :  { %v5456_v9 = vmax.f32 %v5192_v26, 0.0  ;;  %v5492_v24 = vmax.f32 %v5300_v22, 0.0  ;;  %v8328_v56 = vpop.f32.mrf.mxu0  ;;  %v8330_v36 = vpop.f32.mrf.mxu1  ;;  %v3357_v30 = vadd.f32 %v7760_v39, %v3356_v2  ;;  %v3789_v52 = vadd.f32 %v7760_v39, %v3788_v14  ;;  %v224_v2 = vld [vmem:[%s12560_s0 + $0x690] sm:$0xff] }
 0x210   :  { %12798 = vst [vmem:[#allocation107_spill] sm:$0xff] %v8330_v36  ;;  %v368_v14 = vld [vmem:[%s12560_s0 + $0xb10] sm:$0xff] }
 0x211   :  { %v8351_v15 = vsel %vm4076_vm2, %v5456_v9, -inf  ;;  %v8354_v13 = vsel %vm4076_vm2, %v5492_v24, -inf }
 0x212   :  { %12801 = vst [vmem:[#allocation110_spill] sm:$0xff] %v8351_v15  ;;  %5983 = vmatmul.msk.f32.gmra.mxu0 %vm598_vm1, %v79_v54  ;;  %6127 = vmatmul.msk.f32.gmra.mxu1 %vm598_vm1, %v223_v63  ;;  %v80_v54 = vld [vmem:[%s12560_s0 + $0x210] sm:$0xff] }
 0x213   :  { %12802 = vst [vmem:[#allocation111_spill] sm:$0xff] %v8354_v13  ;;  %6271 = vmatmul.msk.f32.gmra.mxu2 %vm598_vm1, %v367_v44  ;;  %6415 = vmatmul.msk.f32.gmra.mxu3 %vm598_vm1, %v511_v20  ;;  %v512_v63 = vld [vmem:[%s12560_s0 + $0xf90] sm:$0xff]  ;;  %v8385_v44 = vsel %vm4076_vm2, %v3357_v30, -inf  ;;  %v8388_v20 = vsel %vm4076_vm2, %v3789_v52, -inf }
 0x216   :  { %v3359_v24 = vpop.f32.mrf.mxu2  ;;  %v3791_v43 = vpop.f32.mrf.mxu3 }
 0x217   :  { %v3360_v29 = vadd.f32 %v7760_v39, %v3359_v24  ;;  %v3792_v26 = vadd.f32 %v7760_v39, %v3791_v43  ;;  %v8368_v22 = vpop.f32.mrf.mxu0  ;;  %v8370_v9 = vpop.f32.mrf.mxu1 }
 0x218   :  { %12803 = vst [vmem:[#allocation112_spill] sm:$0xff] %v8370_v9 }
 0x219   :  { %v8391_v24 = vsel %vm4076_vm2, %v3360_v29, -inf  ;;  %v8394_v43 = vsel %vm4076_vm2, %v3792_v26, -inf }
 0x21a   :  { %5984 = vmatmul.msk.f32.gmra.mxu0 %vm598_vm1, %v80_v54  ;;  %6128 = vmatmul.msk.f32.gmra.mxu1 %vm598_vm1, %v224_v2  ;;  %v225_v54 = vld [vmem:[%s12560_s0 + $0x698] sm:$0xff] }
 0x21b   :  { %6272 = vmatmul.msk.f32.gmra.mxu2 %vm598_vm1, %v368_v14  ;;  %6416 = vmatmul.msk.f32.gmra.mxu3 %vm598_vm1, %v512_v63  ;;  %v369_v2 = vld [vmem:[%s12560_s0 + $0xb18] sm:$0xff] }
 0x21c   :  { %v513_v14 = vld [vmem:[%s12560_s0 + $0xf98] sm:$0xff] }
 0x21e   :  { %v3362_v30 = vpop.f32.mrf.mxu2  ;;  %v3794_v52 = vpop.f32.mrf.mxu3 }
 0x21f   :  { %v8404_v29 = vpop.f32.mrf.mxu0  ;;  %v8406_v26 = vpop.f32.mrf.mxu1  ;;  %v3363_v63 = vadd.f32 %v7760_v39, %v3362_v30  ;;  %v3795_v12 = vadd.f32 %v7760_v39, %v3794_v52  ;;  %v226_v30 = vld [vmem:[%s12560_s0 + $0x6a0] sm:$0xff] }
 0x220   :  { %12804 = vst [vmem:[#allocation113_spill] sm:$0xff] %v8406_v26  ;;  %v370_v52 = vld [vmem:[%s12560_s0 + $0xb20] sm:$0xff] }
 0x222   :  { %5985 = vmatmul.msk.f32.gmra.mxu0 %vm598_vm1, %v81_v50  ;;  %6129 = vmatmul.msk.f32.gmra.mxu1 %vm598_vm1, %v225_v54  ;;  %v82_v50 = vld [vmem:[%s12560_s0 + $0x220] sm:$0xff]  ;;  %v8448_v54 = vsel %vm4076_vm2, %v3795_v12, -inf }
 0x223   :  { %6273 = vmatmul.msk.f32.gmra.mxu2 %vm598_vm1, %v369_v2  ;;  %6417 = vmatmul.msk.f32.gmra.mxu3 %vm598_vm1, %v513_v14 }
 0x226   :  { %v3365_v13 = vpop.f32.mrf.mxu2  ;;  %v3797_v62 = vpop.f32.mrf.mxu3 }
 0x227   :  { %v3366_v26 = vadd.f32 %v7760_v39, %v3365_v13  ;;  %v3798_v9 = vadd.f32 %v7760_v39, %v3797_v62  ;;  %v8428_v36 = vpop.f32.mrf.mxu0  ;;  %v8430_v19 = vpop.f32.mrf.mxu1  ;;  %v514_v62 = vld [vmem:[%s12560_s0 + $0xfa0] sm:$0xff]  ;;  %v8445_v13 = vsel %vm4076_vm2, %v3363_v63, -inf }
 0x228   :  { %12805 = vst [vmem:[#allocation114_spill] sm:$0xff] %v8430_v19  ;;  %v83_v19 = vld [vmem:[%s12560_s0 + $0x228] sm:$0xff] }
 0x229   :  { %v8451_v2 = vsel %vm4076_vm2, %v3366_v26, -inf  ;;  %v8454_v14 = vsel %vm4076_vm2, %v3798_v9, -inf }
 0x22a   :  { %5986 = vmatmul.msk.f32.gmra.mxu0 %vm598_vm1, %v82_v50  ;;  %6130 = vmatmul.msk.f32.gmra.mxu1 %vm598_vm1, %v226_v30  ;;  %v227_v50 = vld [vmem:[%s12560_s0 + $0x6a8] sm:$0xff] }
 0x22b   :  { %6274 = vmatmul.msk.f32.gmra.mxu2 %vm598_vm1, %v370_v52  ;;  %6418 = vmatmul.msk.f32.gmra.mxu3 %vm598_vm1, %v514_v62  ;;  %v371_v30 = vld [vmem:[%s12560_s0 + $0xb28] sm:$0xff] }
 0x22c   :  { %v515_v52 = vld [vmem:[%s12560_s0 + $0xfa8] sm:$0xff] }
 0x22e   :  { %v3368_v12 = vpop.f32.mrf.mxu2  ;;  %v3800_v26 = vpop.f32.mrf.mxu3 }
 0x22f   :  { %v8464_v63 = vpop.f32.mrf.mxu0  ;;  %v8466_v9 = vpop.f32.mrf.mxu1  ;;  %v3369_v62 = vadd.f32 %v7760_v39, %v3368_v12  ;;  %v3801_v47 = vadd.f32 %v7760_v39, %v3800_v26  ;;  %v228_v12 = vld [vmem:[%s12560_s0 + $0x6b0] sm:$0xff] }
 0x230   :  { %12806 = vst [vmem:[#allocation115_spill] sm:$0xff] %v8466_v9  ;;  %v372_v26 = vld [vmem:[%s12560_s0 + $0xb30] sm:$0xff] }
 0x232   :  { %5987 = vmatmul.msk.f32.gmra.mxu0 %vm598_vm1, %v83_v19  ;;  %6131 = vmatmul.msk.f32.gmra.mxu1 %vm598_vm1, %v227_v50  ;;  %v84_v19 = vld [vmem:[%s12560_s0 + $0x230] sm:$0xff] }
 0x233   :  { %6275 = vmatmul.msk.f32.gmra.mxu2 %vm598_vm1, %v371_v30  ;;  %6419 = vmatmul.msk.f32.gmra.mxu3 %vm598_vm1, %v515_v52  ;;  %v85_v52 = vld [vmem:[%s12560_s0 + $0x238] sm:$0xff] }
 0x236   :  { %v3371_v9 = vpop.f32.mrf.mxu2  ;;  %v3803_v38 = vpop.f32.mrf.mxu3 }
 0x237   :  { %v3372_v0 = vadd.f32 %v7760_v39, %v3371_v9  ;;  %v3804_v6 = vadd.f32 %v7760_v39, %v3803_v38  ;;  %v8488_v55 = vpop.f32.mrf.mxu0  ;;  %v8490_v10 = vpop.f32.mrf.mxu1  ;;  %v516_v39 = vld [vmem:[%s12560_s0 + $0xfb0] sm:$0xff]  ;;  %v8505_v38 = vsel %vm4076_vm2, %v3369_v62, -inf  ;;  %v8508_v9 = vsel %vm4076_vm2, %v3801_v47, -inf }
 0x238   :  { %12807 = vst [vmem:[#allocation116_spill] sm:$0xff] %v8490_v10 }
 0x239   :  { %v8511_v50 = vsel %vm4076_vm2, %v3372_v0, -inf  ;;  %v8514_v30 = vsel %vm4076_vm2, %v3804_v6, -inf }
 0x23a   :  { %5988 = vmatmul.msk.f32.gmra.mxu0 %vm598_vm1, %v84_v19  ;;  %6132 = vmatmul.msk.f32.gmra.mxu1 %vm598_vm1, %v228_v12  ;;  %v229_v19 = vld [vmem:[%s12560_s0 + $0x6b8] sm:$0xff] }
 0x23b   :  { %6276 = vmatmul.msk.f32.gmra.mxu2 %vm598_vm1, %v372_v26  ;;  %6420 = vmatmul.msk.f32.gmra.mxu3 %vm598_vm1, %v516_v39  ;;  %v373_v12 = vld [vmem:[%s12560_s0 + $0xb38] sm:$0xff]  ;;  %v8547_v39 = vld [vmem:[%s12561_s2] ss:$0 sm:$0xff] }
 0x23c   :  { %v517_v26 = vld [vmem:[%s12560_s0 + $0xfb8] sm:$0xff] }
 0x23e   :  { %v3374_v47 = vpop.f32.mrf.mxu2  ;;  %v3806_v0 = vpop.f32.mrf.mxu3 }
 0x23f   :  { %v8524_v62 = vpop.f32.mrf.mxu0  ;;  %v8526_v6 = vpop.f32.mrf.mxu1  ;;  %v3375_v10 = vadd.f32 %v8547_v39, %v3374_v47  ;;  %v230_v47 = vld [vmem:[%s12560_s0 + $0x6c0] sm:$0xff] }
 0x240   :  { %12808 = vst [vmem:[#allocation117_spill] sm:$0xff] %v8526_v6  ;;  %v3807_v6 = vadd.f32 %v8547_v39, %v3806_v0  ;;  %v374_v0 = vld [vmem:[%s12560_s0 + $0xb40] sm:$0xff] }
 0x242   :  { %5989 = vmatmul.msk.f32.gmra.mxu0 %vm598_vm1, %v85_v52  ;;  %6133 = vmatmul.msk.f32.gmra.mxu1 %vm598_vm1, %v229_v19 }
 0x243   :  { %6277 = vmatmul.msk.f32.gmra.mxu2 %vm598_vm1, %v373_v12  ;;  %6421 = vmatmul.msk.f32.gmra.mxu3 %vm598_vm1, %v517_v26  ;;  %v86_v26 = vld [vmem:[%s12560_s0 + $0x240] sm:$0xff] }
 0x246   :  { %v3377_v11 = vpop.f32.mrf.mxu2  ;;  %v3809_v18 = vpop.f32.mrf.mxu3 }
 0x247   :  { %v3378_v59 = vadd.f32 %v8547_v39, %v3377_v11  ;;  %v3810_v52 = vadd.f32 %v8547_v39, %v3809_v18  ;;  %v8553_v19 = vpop.f32.mrf.mxu0  ;;  %v8555_v12 = vpop.f32.mrf.mxu1  ;;  %v518_v18 = vld [vmem:[%s12560_s0 + $0xfc0] sm:$0xff]  ;;  %v8570_v11 = vsel %vm4076_vm2, %v3375_v10, -inf }
 0x248   :  { %12809 = vst [vmem:[#allocation118_spill] sm:$0xff] %v8555_v12  ;;  %v8573_v12 = vsel %vm4076_vm2, %v3807_v6, -inf }
 0x249   :  { %v8576_v15 = vsel %vm4076_vm2, %v3378_v59, -inf  ;;  %v8579_v35 = vsel %vm4076_vm2, %v3810_v52, -inf }
 0x24a   :  { %5990 = vmatmul.msk.f32.gmra.mxu0 %vm598_vm1, %v86_v26  ;;  %6134 = vmatmul.msk.f32.gmra.mxu1 %vm598_vm1, %v230_v47  ;;  %v231_v26 = vld [vmem:[%s12560_s0 + $0x6c8] sm:$0xff] }
 0x24b   :  { %6278 = vmatmul.msk.f32.gmra.mxu2 %vm598_vm1, %v374_v0  ;;  %6422 = vmatmul.msk.f32.gmra.mxu3 %vm598_vm1, %v518_v18  ;;  %v375_v47 = vld [vmem:[%s12560_s0 + $0xb48] sm:$0xff] }
 0x24c   :  { %v519_v0 = vld [vmem:[%s12560_s0 + $0xfc8] sm:$0xff] }
 0x24e   :  { %v3380_v10 = vpop.f32.mrf.mxu2  ;;  %v3812_v59 = vpop.f32.mrf.mxu3 }
 0x24f   :  { %v8589_v6 = vpop.f32.mrf.mxu0  ;;  %v8591_v52 = vpop.f32.mrf.mxu1  ;;  %v3381_v18 = vadd.f32 %v8547_v39, %v3380_v10  ;;  %v3813_v45 = vadd.f32 %v8547_v39, %v3812_v59  ;;  %v232_v10 = vld [vmem:[%s12560_s0 + $0x6d0] sm:$0xff] }
 0x250   :  { %12810 = vst [vmem:[#allocation119_spill] sm:$0xff] %v8591_v52  ;;  %v376_v59 = vld [vmem:[%s12560_s0 + $0xb50] sm:$0xff] }
 0x252   :  { %5991 = vmatmul.msk.f32.gmra.mxu0 %vm598_vm1, %v87_v48  ;;  %6135 = vmatmul.msk.f32.gmra.mxu1 %vm598_vm1, %v231_v26  ;;  %v88_v48 = vld [vmem:[%s12560_s0 + $0x250] sm:$0xff]  ;;  %v8633_v26 = vsel %vm4076_vm2, %v3813_v45, -inf }
 0x253   :  { %6279 = vmatmul.msk.f32.gmra.mxu2 %vm598_vm1, %v375_v47  ;;  %6423 = vmatmul.msk.f32.gmra.mxu3 %vm598_vm1, %v519_v0  ;;  %12813 = vst [vmem:[#allocation122_spill] sm:$0xff] %v8633_v26 }
 0x256   :  { %v3383_v52 = vpop.f32.mrf.mxu2  ;;  %v3815_v42 = vpop.f32.mrf.mxu3 }
 0x257   :  { %v3384_v61 = vadd.f32 %v8547_v39, %v3383_v52  ;;  %v3816_v40 = vadd.f32 %v8547_v39, %v3815_v42  ;;  %v8613_v53 = vpop.f32.mrf.mxu0  ;;  %v8615_v16 = vpop.f32.mrf.mxu1  ;;  %v520_v42 = vld [vmem:[%s12560_s0 + $0xfd0] sm:$0xff]  ;;  %v8630_v52 = vsel %vm4076_vm2, %v3381_v18, -inf }
 0x258   :  { %12811 = vst [vmem:[#allocation120_spill] sm:$0xff] %v8615_v16  ;;  %v89_v16 = vld [vmem:[%s12560_s0 + $0x258] sm:$0xff] }
 0x259   :  { %12812 = vst [vmem:[#allocation121_spill] sm:$0xff] %v8630_v52  ;;  %v8636_v47 = vsel %vm4076_vm2, %v3384_v61, -inf  ;;  %v8639_v0 = vsel %vm4076_vm2, %v3816_v40, -inf }
 0x25a   :  { %12814 = vst [vmem:[#allocation123_spill] sm:$0xff] %v8636_v47  ;;  %5992 = vmatmul.msk.f32.gmra.mxu0 %vm598_vm1, %v88_v48  ;;  %6136 = vmatmul.msk.f32.gmra.mxu1 %vm598_vm1, %v232_v10  ;;  %v233_v48 = vld [vmem:[%s12560_s0 + $0x6d8] sm:$0xff] }
 0x25b   :  { %12815 = vst [vmem:[#allocation124_spill] sm:$0xff] %v8639_v0  ;;  %6280 = vmatmul.msk.f32.gmra.mxu2 %vm598_vm1, %v376_v59  ;;  %6424 = vmatmul.msk.f32.gmra.mxu3 %vm598_vm1, %v520_v42  ;;  %v377_v10 = vld [vmem:[%s12560_s0 + $0xb58] sm:$0xff] }
 0x25c   :  { %v521_v59 = vld [vmem:[%s12560_s0 + $0xfd8] sm:$0xff] }
 0x25e   :  { %v3386_v45 = vpop.f32.mrf.mxu2  ;;  %v3818_v61 = vpop.f32.mrf.mxu3 }
 0x25f   :  { %v8649_v18 = vpop.f32.mrf.mxu0  ;;  %v8651_v40 = vpop.f32.mrf.mxu1  ;;  %v3387_v42 = vadd.f32 %v8547_v39, %v3386_v45  ;;  %v3819_v23 = vadd.f32 %v8547_v39, %v3818_v61  ;;  %v234_v45 = vld [vmem:[%s12560_s0 + $0x6e0] sm:$0xff] }
 0x260   :  { %12816 = vst [vmem:[#allocation125_spill] sm:$0xff] %v8651_v40  ;;  %v378_v61 = vld [vmem:[%s12560_s0 + $0xb60] sm:$0xff] }
 0x262   :  { %5993 = vmatmul.msk.f32.gmra.mxu0 %vm598_vm1, %v89_v16  ;;  %6137 = vmatmul.msk.f32.gmra.mxu1 %vm598_vm1, %v233_v48  ;;  %v90_v16 = vld [vmem:[%s12560_s0 + $0x260] sm:$0xff]  ;;  %v8693_v48 = vsel %vm4076_vm2, %v3819_v23, -inf }
 0x263   :  { %6281 = vmatmul.msk.f32.gmra.mxu2 %vm598_vm1, %v377_v10  ;;  %6425 = vmatmul.msk.f32.gmra.mxu3 %vm598_vm1, %v521_v59  ;;  %12820 = vst [vmem:[#allocation129_spill] sm:$0xff] %v8693_v48 }
 0x266   :  { %v3389_v40 = vpop.f32.mrf.mxu2  ;;  %v3821_v34 = vpop.f32.mrf.mxu3 }
 0x267   :  { %v3390_v7 = vadd.f32 %v8547_v39, %v3389_v40  ;;  %v3822_v37 = vadd.f32 %v8547_v39, %v3821_v34  ;;  %v8673_v17 = vpop.f32.mrf.mxu0  ;;  %v8675_v28 = vpop.f32.mrf.mxu1  ;;  %v522_v34 = vld [vmem:[%s12560_s0 + $0xfe0] sm:$0xff]  ;;  %v8690_v40 = vsel %vm4076_vm2, %v3387_v42, -inf }
 0x268   :  { %12817 = vst [vmem:[#allocation126_spill] sm:$0xff] %v8673_v17 }
 0x269   :  { %12818 = vst [vmem:[#allocation127_spill] sm:$0xff] %v8675_v28  ;;  %v8696_v10 = vsel %vm4076_vm2, %v3390_v7, -inf  ;;  %v8699_v59 = vsel %vm4076_vm2, %v3822_v37, -inf  ;;  %v91_v28 = vld [vmem:[%s12560_s0 + $0x268] sm:$0xff] }
 0x26a   :  { %12819 = vst [vmem:[#allocation128_spill] sm:$0xff] %v8690_v40  ;;  %5994 = vmatmul.msk.f32.gmra.mxu0 %vm598_vm1, %v90_v16  ;;  %6138 = vmatmul.msk.f32.gmra.mxu1 %vm598_vm1, %v234_v45  ;;  %v235_v16 = vld [vmem:[%s12560_s0 + $0x6e8] sm:$0xff] }
 0x26b   :  { %12821 = vst [vmem:[#allocation130_spill] sm:$0xff] %v8696_v10  ;;  %6282 = vmatmul.msk.f32.gmra.mxu2 %vm598_vm1, %v378_v61  ;;  %6426 = vmatmul.msk.f32.gmra.mxu3 %vm598_vm1, %v522_v34  ;;  %v379_v45 = vld [vmem:[%s12560_s0 + $0xb68] sm:$0xff] }
 0x26c   :  { %12822 = vst [vmem:[#allocation131_spill] sm:$0xff] %v8699_v59  ;;  %v523_v61 = vld [vmem:[%s12560_s0 + $0xfe8] sm:$0xff] }
 0x26e   :  { %v3392_v23 = vpop.f32.mrf.mxu2  ;;  %v3824_v7 = vpop.f32.mrf.mxu3 }
 0x26f   :  { %v8709_v42 = vpop.f32.mrf.mxu0  ;;  %v8711_v37 = vpop.f32.mrf.mxu1  ;;  %v3393_v34 = vadd.f32 %v8547_v39, %v3392_v23  ;;  %v3825_v17 = vadd.f32 %v8547_v39, %v3824_v7  ;;  %v236_v23 = vld [vmem:[%s12560_s0 + $0x6f0] sm:$0xff] }
 0x270   :  { %12823 = vst [vmem:[#allocation132_spill] sm:$0xff] %v8709_v42  ;;  %v380_v7 = vld [vmem:[%s12560_s0 + $0xb70] sm:$0xff] }
 0x271   :  { %12824 = vst [vmem:[#allocation133_spill] sm:$0xff] %v8711_v37 }
 0x272   :  { %5995 = vmatmul.msk.f32.gmra.mxu0 %vm598_vm1, %v91_v28  ;;  %6139 = vmatmul.msk.f32.gmra.mxu1 %vm598_vm1, %v235_v16  ;;  %v92_v28 = vld [vmem:[%s12560_s0 + $0x270] sm:$0xff]  ;;  %v8753_v16 = vsel %vm4076_vm2, %v3825_v17, -inf }
 0x273   :  { %6283 = vmatmul.msk.f32.gmra.mxu2 %vm598_vm1, %v379_v45  ;;  %6427 = vmatmul.msk.f32.gmra.mxu3 %vm598_vm1, %v523_v61  ;;  %12828 = vst [vmem:[#allocation137_spill] sm:$0xff] %v8753_v16 }
 0x276   :  { %v3395_v37 = vpop.f32.mrf.mxu2  ;;  %v3827_v42 = vpop.f32.mrf.mxu3 }
 0x277   :  { %v3396_v32 = vadd.f32 %v8547_v39, %v3395_v37  ;;  %v3828_v51 = vadd.f32 %v8547_v39, %v3827_v42  ;;  %v8733_v27 = vpop.f32.mrf.mxu0  ;;  %v8735_v49 = vpop.f32.mrf.mxu1  ;;  %v524_v42 = vld [vmem:[%s12560_s0 + $0xff0] sm:$0xff]  ;;  %v8750_v37 = vsel %vm4076_vm2, %v3393_v34, -inf }
 0x278   :  { %12825 = vst [vmem:[#allocation134_spill] sm:$0xff] %v8733_v27 }
 0x279   :  { %12826 = vst [vmem:[#allocation135_spill] sm:$0xff] %v8735_v49  ;;  %v8756_v45 = vsel %vm4076_vm2, %v3396_v32, -inf  ;;  %v8759_v61 = vsel %vm4076_vm2, %v3828_v51, -inf  ;;  %v93_v49 = vld [vmem:[%s12560_s0 + $0x278] sm:$0xff] }
 0x27a   :  { %12827 = vst [vmem:[#allocation136_spill] sm:$0xff] %v8750_v37  ;;  %5996 = vmatmul.msk.f32.gmra.mxu0 %vm598_vm1, %v92_v28  ;;  %6140 = vmatmul.msk.f32.gmra.mxu1 %vm598_vm1, %v236_v23  ;;  %v237_v28 = vld [vmem:[%s12560_s0 + $0x6f8] sm:$0xff] }
 0x27b   :  { %12829 = vst [vmem:[#allocation138_spill] sm:$0xff] %v8756_v45  ;;  %6284 = vmatmul.msk.f32.gmra.mxu2 %vm598_vm1, %v380_v7  ;;  %6428 = vmatmul.msk.f32.gmra.mxu3 %vm598_vm1, %v524_v42  ;;  %v381_v23 = vld [vmem:[%s12560_s0 + $0xb78] sm:$0xff] }
 0x27c   :  { %12830 = vst [vmem:[#allocation139_spill] sm:$0xff] %v8759_v61  ;;  %v525_v7 = vld [vmem:[%s12560_s0 + $0xff8] sm:$0xff] }
 0x27e   :  { %v3398_v17 = vpop.f32.mrf.mxu2  ;;  %v3830_v32 = vpop.f32.mrf.mxu3 }
 0x27f   :  { %v8769_v34 = vpop.f32.mrf.mxu0  ;;  %v8771_v51 = vpop.f32.mrf.mxu1  ;;  %v3399_v42 = vadd.f32 %v8547_v39, %v3398_v17  ;;  %v3831_v27 = vadd.f32 %v8547_v39, %v3830_v32  ;;  %v238_v17 = vld [vmem:[%s12560_s0 + $0x700] sm:$0xff] }
 0x280   :  { %12831 = vst [vmem:[#allocation140_spill] sm:$0xff] %v8769_v34  ;;  %v382_v32 = vld [vmem:[%s12560_s0 + $0xb80] sm:$0xff] }
 0x281   :  { %12832 = vst [vmem:[#allocation141_spill] sm:$0xff] %v8771_v51 }
 0x282   :  { %5997 = vmatmul.msk.f32.gmra.mxu0 %vm598_vm1, %v93_v49  ;;  %6141 = vmatmul.msk.f32.gmra.mxu1 %vm598_vm1, %v237_v28  ;;  %v94_v49 = vld [vmem:[%s12560_s0 + $0x280] sm:$0xff]  ;;  %v8813_v28 = vsel %vm4076_vm2, %v3831_v27, -inf }
 0x283   :  { %6285 = vmatmul.msk.f32.gmra.mxu2 %vm598_vm1, %v381_v23  ;;  %6429 = vmatmul.msk.f32.gmra.mxu3 %vm598_vm1, %v525_v7  ;;  %12836 = vst [vmem:[#allocation145_spill] sm:$0xff] %v8813_v28 }
 0x286   :  { %v3401_v51 = vpop.f32.mrf.mxu2  ;;  %v3833_v45 = vpop.f32.mrf.mxu3 }
 0x287   :  { %v3402_v37 = vadd.f32 %v8547_v39, %v3401_v51  ;;  %v3834_v61 = vadd.f32 %v8547_v39, %v3833_v45  ;;  %v8793_v16 = vpop.f32.mrf.mxu0  ;;  %v8795_v34 = vpop.f32.mrf.mxu1  ;;  %v526_v45 = vld [vmem:[%s12560_s0 + $0x1000] sm:$0xff]  ;;  %v8810_v51 = vsel %vm4076_vm2, %v3399_v42, -inf }
 0x288   :  { %12833 = vst [vmem:[#allocation142_spill] sm:$0xff] %v8793_v16 }
 0x289   :  { %12834 = vst [vmem:[#allocation143_spill] sm:$0xff] %v8795_v34  ;;  %v8816_v23 = vsel %vm4076_vm2, %v3402_v37, -inf  ;;  %v8819_v7 = vsel %vm4076_vm2, %v3834_v61, -inf  ;;  %v95_v34 = vld [vmem:[%s12560_s0 + $0x288] sm:$0xff] }
 0x28a   :  { %12835 = vst [vmem:[#allocation144_spill] sm:$0xff] %v8810_v51  ;;  %5998 = vmatmul.msk.f32.gmra.mxu0 %vm598_vm1, %v94_v49  ;;  %6142 = vmatmul.msk.f32.gmra.mxu1 %vm598_vm1, %v238_v17  ;;  %v239_v49 = vld [vmem:[%s12560_s0 + $0x708] sm:$0xff] }
 0x28b   :  { %12837 = vst [vmem:[#allocation146_spill] sm:$0xff] %v8816_v23  ;;  %6286 = vmatmul.msk.f32.gmra.mxu2 %vm598_vm1, %v382_v32  ;;  %6430 = vmatmul.msk.f32.gmra.mxu3 %vm598_vm1, %v526_v45  ;;  %v383_v17 = vld [vmem:[%s12560_s0 + $0xb88] sm:$0xff] }
 0x28c   :  { %12838 = vst [vmem:[#allocation147_spill] sm:$0xff] %v8819_v7  ;;  %v527_v32 = vld [vmem:[%s12560_s0 + $0x1008] sm:$0xff] }
 0x28e   :  { %v3404_v27 = vpop.f32.mrf.mxu2  ;;  %v3836_v37 = vpop.f32.mrf.mxu3 }
 0x28f   :  { %v8829_v42 = vpop.f32.mrf.mxu0  ;;  %v8831_v61 = vpop.f32.mrf.mxu1  ;;  %v3405_v45 = vadd.f32 %v8547_v39, %v3404_v27  ;;  %v3837_v16 = vadd.f32 %v8547_v39, %v3836_v37  ;;  %v240_v27 = vld [vmem:[%s12560_s0 + $0x710] sm:$0xff] }
 0x290   :  { %12839 = vst [vmem:[#allocation148_spill] sm:$0xff] %v8829_v42  ;;  %v384_v37 = vld [vmem:[%s12560_s0 + $0xb90] sm:$0xff] }
 0x291   :  { %12840 = vst [vmem:[#allocation149_spill] sm:$0xff] %v8831_v61 }
 0x292   :  { %5999 = vmatmul.msk.f32.gmra.mxu0 %vm598_vm1, %v95_v34  ;;  %6143 = vmatmul.msk.f32.gmra.mxu1 %vm598_vm1, %v239_v49  ;;  %v96_v34 = vld [vmem:[%s12560_s0 + $0x290] sm:$0xff]  ;;  %v8873_v49 = vsel %vm4076_vm2, %v3837_v16, -inf }
 0x293   :  { %6287 = vmatmul.msk.f32.gmra.mxu2 %vm598_vm1, %v383_v17  ;;  %6431 = vmatmul.msk.f32.gmra.mxu3 %vm598_vm1, %v527_v32  ;;  %12844 = vst [vmem:[#allocation153_spill] sm:$0xff] %v8873_v49 }
 0x296   :  { %v3407_v61 = vpop.f32.mrf.mxu2  ;;  %v3839_v42 = vpop.f32.mrf.mxu3 }
 0x297   :  { %v3408_v7 = vadd.f32 %v8547_v39, %v3407_v61  ;;  %v3840_v28 = vadd.f32 %v8547_v39, %v3839_v42  ;;  %v8853_v23 = vpop.f32.mrf.mxu0  ;;  %v8855_v51 = vpop.f32.mrf.mxu1  ;;  %v528_v42 = vld [vmem:[%s12560_s0 + $0x1010] sm:$0xff]  ;;  %v8870_v61 = vsel %vm4076_vm2, %v3405_v45, -inf }
 0x298   :  { %12841 = vst [vmem:[#allocation150_spill] sm:$0xff] %v8853_v23 }
 0x299   :  { %12842 = vst [vmem:[#allocation151_spill] sm:$0xff] %v8855_v51  ;;  %v8876_v17 = vsel %vm4076_vm2, %v3408_v7, -inf  ;;  %v8879_v32 = vsel %vm4076_vm2, %v3840_v28, -inf  ;;  %v97_v51 = vld [vmem:[%s12560_s0 + $0x298] sm:$0xff] }
 0x29a   :  { %12843 = vst [vmem:[#allocation152_spill] sm:$0xff] %v8870_v61  ;;  %6000 = vmatmul.msk.f32.gmra.mxu0 %vm598_vm1, %v96_v34  ;;  %6144 = vmatmul.msk.f32.gmra.mxu1 %vm598_vm1, %v240_v27  ;;  %v241_v34 = vld [vmem:[%s12560_s0 + $0x718] sm:$0xff] }
 0x29b   :  { %12845 = vst [vmem:[#allocation154_spill] sm:$0xff] %v8876_v17  ;;  %6288 = vmatmul.msk.f32.gmra.mxu2 %vm598_vm1, %v384_v37  ;;  %6432 = vmatmul.msk.f32.gmra.mxu3 %vm598_vm1, %v528_v42  ;;  %v385_v27 = vld [vmem:[%s12560_s0 + $0xb98] sm:$0xff] }
 0x29c   :  { %12846 = vst [vmem:[#allocation155_spill] sm:$0xff] %v8879_v32  ;;  %v529_v37 = vld [vmem:[%s12560_s0 + $0x1018] sm:$0xff] }
 0x29e   :  { %v3410_v16 = vpop.f32.mrf.mxu2  ;;  %v3842_v7 = vpop.f32.mrf.mxu3 }
 0x29f   :  { %v8889_v45 = vpop.f32.mrf.mxu0  ;;  %v8891_v28 = vpop.f32.mrf.mxu1  ;;  %v3411_v42 = vadd.f32 %v8547_v39, %v3410_v16  ;;  %v3843_v23 = vadd.f32 %v8547_v39, %v3842_v7  ;;  %v242_v16 = vld [vmem:[%s12560_s0 + $0x720] sm:$0xff] }
 0x2a0   :  { %12847 = vst [vmem:[#allocation156_spill] sm:$0xff] %v8889_v45  ;;  %v386_v7 = vld [vmem:[%s12560_s0 + $0xba0] sm:$0xff] }
 0x2a1   :  { %12848 = vst [vmem:[#allocation157_spill] sm:$0xff] %v8891_v28 }
 0x2a2   :  { %6001 = vmatmul.msk.f32.gmra.mxu0 %vm598_vm1, %v97_v51  ;;  %6145 = vmatmul.msk.f32.gmra.mxu1 %vm598_vm1, %v241_v34  ;;  %v98_v51 = vld [vmem:[%s12560_s0 + $0x2a0] sm:$0xff]  ;;  %v8933_v34 = vsel %vm4076_vm2, %v3843_v23, -inf }
 0x2a3   :  { %6289 = vmatmul.msk.f32.gmra.mxu2 %vm598_vm1, %v385_v27  ;;  %6433 = vmatmul.msk.f32.gmra.mxu3 %vm598_vm1, %v529_v37  ;;  %12852 = vst [vmem:[#allocation161_spill] sm:$0xff] %v8933_v34 }
 0x2a6   :  { %v3413_v28 = vpop.f32.mrf.mxu2  ;;  %v3845_v17 = vpop.f32.mrf.mxu3 }
 0x2a7   :  { %v3414_v61 = vadd.f32 %v8547_v39, %v3413_v28  ;;  %v3846_v32 = vadd.f32 %v8547_v39, %v3845_v17  ;;  %v8913_v49 = vpop.f32.mrf.mxu0  ;;  %v8915_v45 = vpop.f32.mrf.mxu1  ;;  %v530_v17 = vld [vmem:[%s12560_s0 + $0x1020] sm:$0xff]  ;;  %v8930_v28 = vsel %vm4076_vm2, %v3411_v42, -inf }
 0x2a8   :  { %12849 = vst [vmem:[#allocation158_spill] sm:$0xff] %v8913_v49 }
 0x2a9   :  { %12850 = vst [vmem:[#allocation159_spill] sm:$0xff] %v8915_v45  ;;  %v8936_v27 = vsel %vm4076_vm2, %v3414_v61, -inf  ;;  %v8939_v37 = vsel %vm4076_vm2, %v3846_v32, -inf  ;;  %v99_v45 = vld [vmem:[%s12560_s0 + $0x2a8] sm:$0xff] }
 0x2aa   :  { %12851 = vst [vmem:[#allocation160_spill] sm:$0xff] %v8930_v28  ;;  %6002 = vmatmul.msk.f32.gmra.mxu0 %vm598_vm1, %v98_v51  ;;  %6146 = vmatmul.msk.f32.gmra.mxu1 %vm598_vm1, %v242_v16  ;;  %v243_v51 = vld [vmem:[%s12560_s0 + $0x728] sm:$0xff] }
 0x2ab   :  { %12853 = vst [vmem:[#allocation162_spill] sm:$0xff] %v8936_v27  ;;  %6290 = vmatmul.msk.f32.gmra.mxu2 %vm598_vm1, %v386_v7  ;;  %6434 = vmatmul.msk.f32.gmra.mxu3 %vm598_vm1, %v530_v17  ;;  %v387_v16 = vld [vmem:[%s12560_s0 + $0xba8] sm:$0xff] }
 0x2ac   :  { %12854 = vst [vmem:[#allocation163_spill] sm:$0xff] %v8939_v37  ;;  %v531_v7 = vld [vmem:[%s12560_s0 + $0x1028] sm:$0xff] }
 0x2ae   :  { %v3416_v23 = vpop.f32.mrf.mxu2  ;;  %v3848_v61 = vpop.f32.mrf.mxu3 }
 0x2af   :  { %v8949_v42 = vpop.f32.mrf.mxu0  ;;  %v8951_v32 = vpop.f32.mrf.mxu1  ;;  %v3417_v17 = vadd.f32 %v8547_v39, %v3416_v23  ;;  %v3849_v49 = vadd.f32 %v8547_v39, %v3848_v61  ;;  %v244_v23 = vld [vmem:[%s12560_s0 + $0x730] sm:$0xff] }
 0x2b0   :  { %12855 = vst [vmem:[#allocation164_spill] sm:$0xff] %v8949_v42  ;;  %v388_v61 = vld [vmem:[%s12560_s0 + $0xbb0] sm:$0xff] }
 0x2b1   :  { %12856 = vst [vmem:[#allocation165_spill] sm:$0xff] %v8951_v32 }
 0x2b2   :  { %6003 = vmatmul.msk.f32.gmra.mxu0 %vm598_vm1, %v99_v45  ;;  %6147 = vmatmul.msk.f32.gmra.mxu1 %vm598_vm1, %v243_v51  ;;  %v100_v45 = vld [vmem:[%s12560_s0 + $0x2b0] sm:$0xff]  ;;  %v8993_v51 = vsel %vm4076_vm2, %v3849_v49, -inf }
 0x2b3   :  { %6291 = vmatmul.msk.f32.gmra.mxu2 %vm598_vm1, %v387_v16  ;;  %6435 = vmatmul.msk.f32.gmra.mxu3 %vm598_vm1, %v531_v7  ;;  %12860 = vst [vmem:[#allocation169_spill] sm:$0xff] %v8993_v51 }
 0x2b6   :  { %v3419_v32 = vpop.f32.mrf.mxu2  ;;  %v3851_v42 = vpop.f32.mrf.mxu3 }
 0x2b7   :  { %v3420_v37 = vadd.f32 %v8547_v39, %v3419_v32  ;;  %v3852_v34 = vadd.f32 %v8547_v39, %v3851_v42  ;;  %v8973_v27 = vpop.f32.mrf.mxu0  ;;  %v8975_v28 = vpop.f32.mrf.mxu1  ;;  %v532_v42 = vld [vmem:[%s12560_s0 + $0x1030] sm:$0xff]  ;;  %v8990_v32 = vsel %vm4076_vm2, %v3417_v17, -inf }
 0x2b8   :  { %12857 = vst [vmem:[#allocation166_spill] sm:$0xff] %v8973_v27 }
 0x2b9   :  { %12858 = vst [vmem:[#allocation167_spill] sm:$0xff] %v8975_v28  ;;  %v8996_v16 = vsel %vm4076_vm2, %v3420_v37, -inf  ;;  %v8999_v7 = vsel %vm4076_vm2, %v3852_v34, -inf  ;;  %v101_v28 = vld [vmem:[%s12560_s0 + $0x2b8] sm:$0xff] }
 0x2ba   :  { %12859 = vst [vmem:[#allocation168_spill] sm:$0xff] %v8990_v32  ;;  %6004 = vmatmul.msk.f32.gmra.mxu0 %vm598_vm1, %v100_v45  ;;  %6148 = vmatmul.msk.f32.gmra.mxu1 %vm598_vm1, %v244_v23  ;;  %v245_v45 = vld [vmem:[%s12560_s0 + $0x738] sm:$0xff] }
 0x2bb   :  { %12861 = vst [vmem:[#allocation170_spill] sm:$0xff] %v8996_v16  ;;  %6292 = vmatmul.msk.f32.gmra.mxu2 %vm598_vm1, %v388_v61  ;;  %6436 = vmatmul.msk.f32.gmra.mxu3 %vm598_vm1, %v532_v42  ;;  %v389_v23 = vld [vmem:[%s12560_s0 + $0xbb8] sm:$0xff] }
 0x2bc   :  { %12862 = vst [vmem:[#allocation171_spill] sm:$0xff] %v8999_v7  ;;  %v533_v61 = vld [vmem:[%s12560_s0 + $0x1038] sm:$0xff] }
 0x2be   :  { %v3422_v49 = vpop.f32.mrf.mxu2  ;;  %v3854_v37 = vpop.f32.mrf.mxu3 }
 0x2bf   :  { %v9009_v17 = vpop.f32.mrf.mxu0  ;;  %v9011_v34 = vpop.f32.mrf.mxu1  ;;  %v3423_v42 = vadd.f32 %v8547_v39, %v3422_v49  ;;  %v3855_v27 = vadd.f32 %v8547_v39, %v3854_v37  ;;  %v390_v49 = vld [vmem:[%s12560_s0 + $0xbc0] sm:$0xff] }
 0x2c0   :  { %12863 = vst [vmem:[#allocation172_spill] sm:$0xff] %v9009_v17  ;;  %v534_v37 = vld [vmem:[%s12560_s0 + $0x1040] sm:$0xff] }
 0x2c1   :  { %12864 = vst [vmem:[#allocation173_spill] sm:$0xff] %v9011_v34 }
 0x2c2   :  { %6005 = vmatmul.msk.f32.gmra.mxu0 %vm598_vm1, %v101_v28  ;;  %6149 = vmatmul.msk.f32.gmra.mxu1 %vm598_vm1, %v245_v45  ;;  %v102_v28 = vld [vmem:[%s12560_s0 + $0x2c0] sm:$0xff] }
 0x2c3   :  { %6293 = vmatmul.msk.f32.gmra.mxu2 %vm598_vm1, %v389_v23  ;;  %6437 = vmatmul.msk.f32.gmra.mxu3 %vm598_vm1, %v533_v61  ;;  %v246_v45 = vld [vmem:[%s12560_s0 + $0x740] sm:$0xff] }
 0x2c6   :  { %v3425_v34 = vpop.f32.mrf.mxu2  ;;  %v3857_v16 = vpop.f32.mrf.mxu3 }
 0x2c7   :  { %v3426_v32 = vadd.f32 %v8547_v39, %v3425_v34  ;;  %v3858_v7 = vadd.f32 %v8547_v39, %v3857_v16  ;;  %v2564_v51 = vpop.f32.mrf.mxu0  ;;  %v9033_v17 = vpop.f32.mrf.mxu1  ;;  %v9048_v16 = vsel %vm4076_vm2, %v3423_v42, -inf  ;;  %v9051_v34 = vsel %vm4076_vm2, %v3855_v27, -inf }
 0x2c8   :  { %12865 = vst [vmem:[#allocation174_spill] sm:$0xff] %v9033_v17  ;;  %v2430_v27 = vadd.f32 %v8547_v39, %v7605_v3  ;;  %v247_v3 = vld [vmem:[%s12560_s0 + $0x748] sm:$0xff] }
 0x2c9   :  { %12866 = vst [vmem:[#allocation175_spill] sm:$0xff] %v9048_v16  ;;  %v9054_v23 = vsel %vm4076_vm2, %v3426_v32, -inf  ;;  %v9057_v61 = vsel %vm4076_vm2, %v3858_v7, -inf  ;;  %v12870_v32 = vld [vmem:[#allocation8_spill] sm:$0xff] }
 0x2ca   :  { %12867 = vst [vmem:[#allocation176_spill] sm:$0xff] %v9051_v34  ;;  %6006 = vmatmul.msk.f32.gmra.mxu0 %vm598_vm1, %v102_v28  ;;  %6150 = vmatmul.msk.f32.gmra.mxu1 %vm598_vm1, %v246_v45  ;;  %v2358_v7 = vadd.f32 %v8547_v39, %v12870_v32  ;;  %v103_v45 = vld [vmem:[%s12560_s0 + $0x2c8] sm:$0xff]  ;;  %v12874_v32 = vld [vmem:[#allocation52_spill] sm:$0xff]  ;;  %v4117_v10 = vsel %vm4076_vm2, %v2430_v27, -inf }
 0x2cb   :  { %12868 = vst [vmem:[#allocation177_spill] sm:$0xff] %v9054_v23  ;;  %6294 = vmatmul.msk.f32.gmra.mxu2 %vm598_vm1, %v390_v49  ;;  %6438 = vmatmul.msk.f32.gmra.mxu3 %vm598_vm1, %v534_v37  ;;  %v12871_v23 = vld [vmem:[#allocation54_spill] sm:$0xff]  ;;  %v2424_v34 = vadd.f32 %v8547_v39, %v12874_v32  ;;  %v12875_v16 = vld [vmem:[#allocation4_spill] sm:$0xff] }
 0x2cc   :  { %12869 = vst [vmem:[#allocation178_spill] sm:$0xff] %v9057_v61  ;;  %v2427_v59 = vadd.f32 %v8547_v39, %v12871_v23  ;;  %v12873_v49 = vld [vmem:[#allocation6_spill] sm:$0xff]  ;;  %v391_v23 = vld [vmem:[%s12560_s0 + $0xbc8] sm:$0xff]  ;;  %v2352_v48 = vadd.f32 %v8547_v39, %v12875_v16  ;;  %v4081_v40 = vsel %vm4076_vm2, %v2358_v7, -inf }
 0x2cd   :  { %v2355_v37 = vadd.f32 %v8547_v39, %v12873_v49  ;;  %v2421_v49 = vadd.f32 %v8547_v39, %v12876_v1  ;;  %v12877_v32 = vld [vmem:[#allocation2_spill] sm:$0xff]  ;;  %v4114_v27 = vsel %vm4076_vm2, %v2424_v34, -inf }
 0x2ce   :  { %v9071_v42 = vpop.f32.mrf.mxu2  ;;  %v3860_v17 = vpop.f32.mrf.mxu3  ;;  %v2349_v47 = vadd.f32 %v8547_v39, %v12877_v32  ;;  %v4116_v52 = vsel %vm4076_vm2, %v2427_v59, -inf  ;;  %v2496_v59 = vadd.f32 %v8547_v39, %v8328_v56  ;;  %v248_v56 = vld [vmem:[%s12560_s0 + $0x750] sm:$0xff] }
 0x2cf   :  { %v2567_v61 = vpop.f32.mrf.mxu0  ;;  %v9075_v28 = vpop.f32.mrf.mxu1  ;;  %v4080_v16 = vsel %vm4076_vm2, %v2355_v37, -inf  ;;  %v4118_v7 = vmax.f32 %v4116_v52, %v4117_v10  ;;  %v4113_v32 = vsel %vm4076_vm2, %v2421_v49, -inf  ;;  %v536_v49 = vld [vmem:[%s12560_s0 + $0x1050] sm:$0xff] }
 0x2d0   :  { %12872 = vst [vmem:[#allocation8_spill] sm:$0xff] %v9075_v28  ;;  %v535_v28 = vld [vmem:[%s12560_s0 + $0x1048] sm:$0xff]  ;;  %v2568_v1 = vadd.f32 %v8547_v39, %v2567_v61  ;;  %v4082_v0 = vmax.f32 %v4080_v16, %v4081_v40  ;;  %v4077_v37 = vsel %vm4076_vm2, %v2349_v47, -inf  ;;  %v4115_v34 = vmax.f32 %v4113_v32, %v4114_v27  ;;  %v104_v40 = vld [vmem:[%s12560_s0 + $0x2d0] sm:$0xff] }
 0x2d1   :  { %v2493_v47 = vadd.f32 %v8547_v39, %v8294_v33  ;;  %v2502_v27 = vadd.f32 %v8547_v39, %v8404_v29  ;;  %v4150_v33 = vsel %vm4076_vm2, %v2496_v59, -inf  ;;  %v2499_v29 = vadd.f32 %v8547_v39, %v8368_v22 }
 0x2d2   :  { %6007 = vmatmul.msk.f32.gmra.mxu0 %vm598_vm1, %v103_v45  ;;  %6151 = vmatmul.msk.f32.gmra.mxu1 %vm598_vm1, %v247_v3  ;;  %v4078_v45 = vsel %vm4076_vm2, %v2352_v48, -inf  ;;  %v3861_v3 = vadd.f32 %v8547_v39, %v3860_v17  ;;  %v4186_v17 = vsel %vm4076_vm2, %v2568_v1, -inf  ;;  %v4944_v16 = vsel %vm4076_vm2, %v4082_v0, -inf }
 0x2d3   :  { %6295 = vmatmul.msk.f32.gmra.mxu2 %vm598_vm1, %v391_v23  ;;  %6439 = vmatmul.msk.f32.gmra.mxu3 %vm598_vm1, %v535_v28  ;;  %v2565_v23 = vadd.f32 %v8547_v39, %v2564_v51  ;;  %v4079_v48 = vmax.f32 %v4077_v37, %v4078_v45  ;;  %v4945_v51 = vsel %vm4076_vm2, %v4118_v7, -inf  ;;  %v4942_v0 = vsel %vm4076_vm2, %v4115_v34, -inf }
 0x2d4   :  { %v4833_v7 = vsel %vm4076_vm2, %v3861_v3, -inf  ;;  %v4149_v59 = vsel %vm4076_vm2, %v2493_v47, -inf  ;;  %v3429_v34 = vadd.f32 %v8547_v39, %v9071_v42  ;;  %v4152_v42 = vsel %vm4076_vm2, %v2499_v29, -inf }
 0x2d5   :  { %v4185_v1 = vsel %vm4076_vm2, %v2565_v23, -inf  ;;  %v12879_v23 = vmax.f32 %v8388_v20, %v8394_v43  ;;  %v4941_v22 = vsel %vm4076_vm2, %v4079_v48, -inf  ;;  %v105_v48 = vld [vmem:[%s12560_s0 + $0x2d8] sm:$0xff] }
 0x2d6   :  { %v3431_v28 = vpop.f32.mrf.mxu2  ;;  %v3863_v26 = vpop.f32.mrf.mxu3  ;;  %v4187_v3 = vmax.f32 %v4185_v1, %v4186_v17  ;;  %v4943_v47 = vmax.f32 %v4941_v22, %v4942_v0 }
 0x2d7   :  { %v3864_v52 = vadd.f32 %v8547_v39, %v3863_v26  ;;  %v2570_v10 = vpop.f32.mrf.mxu0  ;;  %v9117_v61 = vpop.f32.mrf.mxu1  ;;  %v392_v26 = vld [vmem:[%s12560_s0 + $0xbd0] sm:$0xff]  ;;  %v3432_v32 = vadd.f32 %v8547_v39, %v3431_v28  ;;  %v9155_v28 = vsel %vm4076_vm2, %v12879_v23, -inf }
 0x2d8   :  { %12878 = vst [vmem:[#allocation54_spill] sm:$0xff] %v9117_v61  ;;  %v4946_v61 = vmax.f32 %v4944_v16, %v4945_v51  ;;  %v2571_v43 = vadd.f32 %v8547_v39, %v2570_v10  ;;  %v4617_v10 = vsel %vm4076_vm2, %v3429_v34, -inf }
 0x2d9   :  { %v4834_v45 = vsel %vm4076_vm2, %v3864_v52, -inf  ;;  %v4618_v20 = vsel %vm4076_vm2, %v3432_v32, -inf  ;;  %v393_v32 = vld [vmem:[%s12560_s0 + $0xbd8] sm:$0xff] }
 0x2da   :  { %v4835_v37 = vmax.f32 %v4833_v7, %v4834_v45  ;;  %6008 = vmatmul.msk.f32.gmra.mxu0 %vm598_vm1, %v104_v40  ;;  %6152 = vmatmul.msk.f32.gmra.mxu1 %vm598_vm1, %v248_v56  ;;  %v4151_v40 = vmax.f32 %v4149_v59, %v4150_v33  ;;  %v4153_v56 = vsel %vm4076_vm2, %v2502_v27, -inf  ;;  %v249_v27 = vld [vmem:[%s12560_s0 + $0x758] sm:$0xff]  ;;  %v5374_v45 = vmax.f32 %v4946_v61, 0.0 }
 0x2db   :  { %6296 = vmatmul.msk.f32.gmra.mxu2 %vm598_vm1, %v392_v26  ;;  %6440 = vmatmul.msk.f32.gmra.mxu3 %vm598_vm1, %v536_v49  ;;  %v4978_v49 = vsel %vm4076_vm2, %v4187_v3, -inf  ;;  %v4154_v33 = vmax.f32 %v4152_v42, %v4153_v56  ;;  %v4619_v29 = vmax.f32 %v4617_v10, %v4618_v20  ;;  %v5373_v3 = vmax.f32 %v4943_v47, 0.0 }
 0x2dc   :  { %v9160_v52 = vsel %vm4076_vm2, %v4835_v37, -inf  ;;  %v537_v37 = vld [vmem:[%s12560_s0 + $0x1058] sm:$0xff]  ;;  %v4977_v0 = vsel %vm4076_vm2, %v4151_v40, -inf  ;;  %v4188_v61 = vsel %vm4076_vm2, %v2571_v43, -inf  ;;  %v5518_v22 = vsel %vm4076_vm2, %v5374_v45, -inf }
 0x2dd   :  { %v5303_v51 = vmax.f32 %v9155_v28, %v9160_v52  ;;  %v4979_v59 = vmax.f32 %v4977_v0, %v4978_v49  ;;  %v4980_v40 = vsel %vm4076_vm2, %v4154_v33, -inf  ;;  %v5194_v56 = vsel %vm4076_vm2, %v4619_v29, -inf  ;;  %v250_v0 = vld [vmem:[%s12560_s0 + $0x760] sm:$0xff]  ;;  %v12881_v29 = vld [vmem:[#allocation16_spill] sm:$0xff] }
 0x2de   :  { %v3434_v17 = vpop.f32.mrf.mxu2  ;;  %v3866_v26 = vpop.f32.mrf.mxu3  ;;  %v5517_v42 = vsel %vm4076_vm2, %v5373_v3, -inf  ;;  %v12880_v45 = vmax.f32 %v8385_v44, %v8391_v24  ;;  %v2370_v44 = vadd.f32 %v8547_v39, %v12881_v29 }
 0x2df   :  { %v2573_v16 = vpop.f32.mrf.mxu0  ;;  %v9170_v7 = vpop.f32.mrf.mxu1  ;;  %v3435_v47 = vadd.f32 %v8547_v39, %v3434_v17  ;;  %v3867_v20 = vadd.f32 %v8547_v39, %v3866_v26  ;;  %v5385_v49 = vmax.f32 %v4979_v59, 0.0  ;;  %v5519_v10 = vmax.f32 %v5517_v42, %v5518_v22  ;;  %v394_v59 = vld [vmem:[%s12560_s0 + $0xbe0] sm:$0xff] }
 0x2e0   :  { %v2574_v1 = vadd.f32 %v8547_v39, %v2573_v16  ;;  %v5193_v33 = vsel %vm4076_vm2, %v12880_v45, -inf }
 0x2e1   :  { %v5195_v24 = vmax.f32 %v5193_v33, %v5194_v56 }
 0x2e2   :  { %v4189_v23 = vsel %vm4076_vm2, %v2574_v1, -inf  ;;  %6009 = vmatmul.msk.f32.gmra.mxu0 %vm598_vm1, %v105_v48  ;;  %6153 = vmatmul.msk.f32.gmra.mxu1 %vm598_vm1, %v249_v27 }
 0x2e3   :  { %v4190_v34 = vmax.f32 %v4188_v61, %v4189_v23  ;;  %6297 = vmatmul.msk.f32.gmra.mxu2 %vm598_vm1, %v393_v32  ;;  %6441 = vmatmul.msk.f32.gmra.mxu3 %vm598_vm1, %v537_v37  ;;  %v106_v37 = vld [vmem:[%s12560_s0 + $0x2e0] sm:$0xff]  ;;  %v4620_v23 = vsel %vm4076_vm2, %v3435_v47, -inf  ;;  %v2442_v47 = vadd.f32 %v8547_v39, %v7737_v21 }
 0x2e4   :  { %v538_v61 = vld [vmem:[%s12560_s0 + $0x1060] sm:$0xff] }
 0x2e5   :  { %v4981_v43 = vsel %vm4076_vm2, %v4190_v34, -inf  ;;  %v4836_v34 = vsel %vm4076_vm2, %v3867_v20, -inf  ;;  %v12882_v20 = vmax.f32 %v8445_v13, %v8451_v2  ;;  %v5493_v13 = vmax.f32 %v5303_v51, 0.0 }
 0x2e6   :  { %v4982_v16 = vmax.f32 %v4980_v40, %v4981_v43  ;;  %v3437_v48 = vpop.f32.mrf.mxu2  ;;  %v3869_v27 = vpop.f32.mrf.mxu3  ;;  %v5535_v43 = vsel %vm4076_vm2, %v5385_v49, -inf  ;;  %v12883_v49 = vmax.f32 %v8448_v54, %v8454_v14 }
 0x2e7   :  { %v3438_v1 = vadd.f32 %v8547_v39, %v3437_v48  ;;  %v3870_v17 = vadd.f32 %v8547_v39, %v3869_v27  ;;  %v9206_v32 = vpop.f32.mrf.mxu0  ;;  %v9208_v26 = vpop.f32.mrf.mxu1  ;;  %v5733_v48 = vsel %vm4076_vm2, %v5519_v10, -inf  ;;  %v5196_v27 = vsel %vm4076_vm2, %v12882_v20, -inf }
 0x2e8   :  { %v5386_v3 = vmax.f32 %v4982_v16, 0.0  ;;  %v5304_v33 = vsel %vm4076_vm2, %v12883_v49, -inf }
 0x2e9   :  { %v4621_v22 = vsel %vm4076_vm2, %v3438_v1, -inf  ;;  %v4837_v40 = vsel %vm4076_vm2, %v3870_v17, -inf  ;;  %v5457_v1 = vmax.f32 %v5195_v24, 0.0  ;;  %v2436_v24 = vadd.f32 %v8547_v39, %v7663_v57 }
 0x2ea   :  { %v5536_v56 = vsel %vm4076_vm2, %v5386_v3, -inf  ;;  %v4622_v42 = vmax.f32 %v4620_v23, %v4621_v22  ;;  %v4838_v16 = vmax.f32 %v4836_v34, %v4837_v40  ;;  %6010 = vmatmul.msk.f32.gmra.mxu0 %vm598_vm1, %v106_v37  ;;  %6154 = vmatmul.msk.f32.gmra.mxu1 %vm598_vm1, %v250_v0  ;;  %v12884_v0 = vld [vmem:[#allocation14_spill] sm:$0xff]  ;;  %v107_v23 = vld [vmem:[%s12560_s0 + $0x2e8] sm:$0xff]  ;;  %v12885_v22 = vld [vmem:[#allocation12_spill] sm:$0xff]  ;;  %v4087_v57 = vsel %vm4076_vm2, %v2370_v44, -inf }
 0x2eb   :  { %v5537_v45 = vmax.f32 %v5535_v43, %v5536_v56  ;;  %6298 = vmatmul.msk.f32.gmra.mxu2 %vm598_vm1, %v394_v59  ;;  %6442 = vmatmul.msk.f32.gmra.mxu3 %vm598_vm1, %v538_v61  ;;  %v2367_v29 = vadd.f32 %v8547_v39, %v12884_v0  ;;  %v2439_v59 = vadd.f32 %v8547_v39, %v7703_v46  ;;  %v251_v34 = vld [vmem:[%s12560_s0 + $0x768] sm:$0xff]  ;;  %v4123_v46 = vsel %vm4076_vm2, %v2442_v47, -inf  ;;  %v12886_v47 = vld [vmem:[#allocation57_spill] sm:$0xff] }
 0x2ec   :  { %v5197_v10 = vsel %vm4076_vm2, %v4622_v42, -inf  ;;  %v5305_v21 = vsel %vm4076_vm2, %v4838_v16, -inf  ;;  %v2364_v40 = vadd.f32 %v8547_v39, %v12885_v22  ;;  %v395_v56 = vld [vmem:[%s12560_s0 + $0xbe8] sm:$0xff]  ;;  %v5643_v16 = vsel %vm4076_vm2, %v5457_v1, -inf }
 0x2ed   :  { %v5734_v2 = vsel %vm4076_vm2, %v5537_v45, -inf  ;;  %v5198_v17 = vmax.f32 %v5196_v27, %v5197_v10  ;;  %v5306_v37 = vmax.f32 %v5304_v33, %v5305_v21  ;;  %v539_v42 = vld [vmem:[%s12560_s0 + $0x1068] sm:$0xff]  ;;  %v2433_v27 = vadd.f32 %v8547_v39, %v12886_v47  ;;  %v12887_v33 = vld [vmem:[#allocation10_spill] sm:$0xff]  ;;  %v540_v47 = vld [vmem:[%s12560_s0 + $0x1070] sm:$0xff] }
 0x2ee   :  { %v5735_v3 = vmax.f32 %v5733_v48, %v5734_v2  ;;  %v9253_v54 = vpop.f32.mrf.mxu2  ;;  %v3872_v14 = vpop.f32.mrf.mxu3  ;;  %v9279_v48 = vsel %vm4076_vm2, %v5493_v13, -inf  ;;  %v2361_v1 = vadd.f32 %v8547_v39, %v12887_v33  ;;  %v4086_v10 = vsel %vm4076_vm2, %v2367_v29, -inf }
 0x2ef   :  { %v5458_v61 = vmax.f32 %v5198_v17, 0.0  ;;  %v5494_v28 = vmax.f32 %v5306_v37, 0.0  ;;  %v2579_v52 = vpop.f32.mrf.mxu0  ;;  %v9259_v51 = vpop.f32.mrf.mxu1  ;;  %v4120_v21 = vsel %vm4076_vm2, %v2436_v24, -inf  ;;  %v4122_v13 = vsel %vm4076_vm2, %v2439_v59, -inf }
 0x2f0   :  { %v5841_v43 = vmax.f32 %v5735_v3, 0.0  ;;  %v12888_v2 = vmax.f32 %v7680_v4, %v7686_v41  ;;  %v4124_v37 = vmax.f32 %v4122_v13, %v4123_v46  ;;  %v2580_v3 = vadd.f32 %v8547_v39, %v2579_v52 }
 0x2f1   :  { %v5644_v20 = vsel %vm4076_vm2, %v5458_v61, -inf  ;;  %v9283_v44 = vsel %vm4076_vm2, %v5494_v28, -inf  ;;  %v4084_v29 = vsel %vm4076_vm2, %v2364_v40, -inf  ;;  %v4088_v61 = vmax.f32 %v4086_v10, %v4087_v57 }
 0x2f2   :  { %5877 = vst.msk [vmem:[%s12562_s3] sm:$0xff] %vm4076_vm2, %v5841_v43  ;;  %v5645_v45 = vmax.f32 %v5643_v16, %v5644_v20  ;;  %6011 = vmatmul.msk.f32.gmra.mxu0 %vm598_vm1, %v107_v23  ;;  %6155 = vmatmul.msk.f32.gmra.mxu1 %vm598_vm1, %v251_v34  ;;  %v5787_v17 = vsel %vm4076_vm2, %v12888_v2, -inf  ;;  %v3873_v59 = vadd.f32 %v8547_v39, %v3872_v14  ;;  %v4119_v28 = vsel %vm4076_vm2, %v2433_v27, -inf  ;;  %v108_v14 = vld [vmem:[%s12560_s0 + $0x2f0] sm:$0xff] }
 0x2f3   :  { %6299 = vmatmul.msk.f32.gmra.mxu2 %vm598_vm1, %v395_v56  ;;  %6443 = vmatmul.msk.f32.gmra.mxu3 %vm598_vm1, %v539_v42  ;;  %v2508_v23 = vadd.f32 %v8547_v39, %v8464_v63  ;;  %v2577_v4 = vadd.f32 %v8547_v39, %v9206_v32  ;;  %v4083_v22 = vsel %vm4076_vm2, %v2361_v1, -inf  ;;  %v4121_v46 = vmax.f32 %v4119_v28, %v4120_v21  ;;  %v252_v63 = vld [vmem:[%s12560_s0 + $0x770] sm:$0xff] }
 0x2f4   :  { %v5788_v0 = vsel %vm4076_vm2, %v5645_v45, -inf  ;;  %v4085_v32 = vmax.f32 %v4083_v22, %v4084_v29  ;;  %v4951_v56 = vsel %vm4076_vm2, %v4124_v37, -inf  ;;  %v2505_v42 = vadd.f32 %v8547_v39, %v8428_v36  ;;  %v396_v20 = vld [vmem:[%s12560_s0 + $0xbf0] sm:$0xff] }
 0x2f5   :  { %v5789_v24 = vmax.f32 %v5787_v17, %v5788_v0  ;;  %v4192_v16 = vsel %vm4076_vm2, %v2580_v3, -inf  ;;  %v4950_v27 = vsel %vm4076_vm2, %v4088_v61, -inf  ;;  %v2514_v45 = vadd.f32 %v8547_v39, %v8524_v62  ;;  %v9353_v17 = vld [vmem:[%s12561_s2] ss:$0 sm:$0xff] }
 0x2f6   :  { %v3443_v41 = vpop.f32.mrf.mxu2  ;;  %v3875_v34 = vpop.f32.mrf.mxu3  ;;  %v4839_v36 = vsel %vm4076_vm2, %v3873_v59, -inf  ;;  %v4156_v1 = vsel %vm4076_vm2, %v2508_v23, -inf  ;;  %v4191_v10 = vsel %vm4076_vm2, %v2577_v4, -inf  ;;  %v4948_v62 = vsel %vm4076_vm2, %v4121_v46, -inf }
 0x2f7   :  { %v5859_v52 = vmax.f32 %v5789_v24, 0.0  ;;  %v3876_v40 = vadd.f32 %v8547_v39, %v3875_v34  ;;  %v2582_v57 = vpop.f32.mrf.mxu0  ;;  %v9317_v43 = vpop.f32.mrf.mxu1  ;;  %v3444_v21 = vadd.f32 %v8547_v39, %v3443_v41  ;;  %v4952_v2 = vmax.f32 %v4950_v27, %v4951_v56 }
 0x2f8   :  { %v2511_v37 = vadd.f32 %v9353_v17, %v8488_v55  ;;  %v4193_v0 = vmax.f32 %v4191_v10, %v4192_v16  ;;  %v4155_v39 = vsel %vm4076_vm2, %v2505_v42, -inf  ;;  %v12889_v3 = vmax.f32 %v8508_v9, %v8514_v30  ;;  %v397_v42 = vld [vmem:[%s12560_s0 + $0xbf8] sm:$0xff] }
 0x2f9   :  { %5895 = vst.msk [vmem:[%s12562_s3 + $0x90] sm:$0xff] %vm4076_vm2, %v5859_v52  ;;  %v4840_v33 = vsel %vm4076_vm2, %v3876_v40, -inf  ;;  %v3441_v61 = vadd.f32 %v9353_v17, %v9253_v54  ;;  %v4947_v55 = vsel %vm4076_vm2, %v4085_v32, -inf  ;;  %v4157_v59 = vmax.f32 %v4155_v39, %v4156_v1  ;;  %v109_v40 = vld [vmem:[%s12560_s0 + $0x2f8] sm:$0xff] }
 0x2fa   :  { %v4841_v13 = vmax.f32 %v4839_v36, %v4840_v33  ;;  %6012 = vmatmul.msk.f32.gmra.mxu0 %vm598_vm1, %v108_v14  ;;  %6156 = vmatmul.msk.f32.gmra.mxu1 %vm598_vm1, %v252_v63  ;;  %v9364_v29 = vsel %vm4076_vm2, %v12889_v3, -inf  ;;  %v4159_v28 = vsel %vm4076_vm2, %v2514_v45, -inf  ;;  %v4949_v4 = vmax.f32 %v4947_v55, %v4948_v62  ;;  %v253_v14 = vld [vmem:[%s12560_s0 + $0x778] sm:$0xff] }
 0x2fb   :  { %6300 = vmatmul.msk.f32.gmra.mxu2 %vm598_vm1, %v396_v20  ;;  %6444 = vmatmul.msk.f32.gmra.mxu3 %vm598_vm1, %v540_v47  ;;  %v4624_v9 = vsel %vm4076_vm2, %v3444_v21, -inf  ;;  %v2583_v30 = vadd.f32 %v9353_v17, %v2582_v57  ;;  %v4158_v54 = vsel %vm4076_vm2, %v2511_v37, -inf  ;;  %v4984_v22 = vsel %vm4076_vm2, %v4193_v0, -inf  ;;  %v541_v16 = vld [vmem:[%s12560_s0 + $0x1078] sm:$0xff] }
 0x2fc   :  { %v9369_v24 = vsel %vm4076_vm2, %v4841_v13, -inf  ;;  %v5376_v63 = vmax.f32 %v4952_v2, 0.0  ;;  %v4160_v32 = vmax.f32 %v4158_v54, %v4159_v28  ;;  %v4623_v57 = vsel %vm4076_vm2, %v3441_v61, -inf  ;;  %v110_v54 = vld [vmem:[%s12560_s0 + $0x300] sm:$0xff] }
 0x2fd   :  { %v5309_v23 = vmax.f32 %v9364_v29, %v9369_v24  ;;  %v4983_v20 = vsel %vm4076_vm2, %v4157_v59, -inf  ;;  %v4625_v47 = vmax.f32 %v4623_v57, %v4624_v9  ;;  %v5375_v27 = vmax.f32 %v4949_v4, 0.0 }
 0x2fe   :  { %v3446_v41 = vpop.f32.mrf.mxu2  ;;  %v3878_v34 = vpop.f32.mrf.mxu3  ;;  %v4985_v45 = vmax.f32 %v4983_v20, %v4984_v22  ;;  %v4194_v36 = vsel %vm4076_vm2, %v2583_v30, -inf  ;;  %v5521_v10 = vsel %vm4076_vm2, %v5376_v63, -inf  ;;  %v4986_v21 = vsel %vm4076_vm2, %v4160_v32, -inf  ;;  %v254_v22 = vld [vmem:[%s12560_s0 + $0x780] sm:$0xff] }
 0x2ff   :  { %v2585_v46 = vpop.f32.mrf.mxu0  ;;  %v9379_v52 = vpop.f32.mrf.mxu1  ;;  %v5200_v13 = vsel %vm4076_vm2, %v4625_v47, -inf  ;;  %v3447_v62 = vadd.f32 %v9353_v17, %v3446_v41  ;;  %v3879_v2 = vadd.f32 %v9353_v17, %v3878_v34  ;;  %v5520_v0 = vsel %vm4076_vm2, %v5375_v27, -inf  ;;  %v542_v63 = vld [vmem:[%s12560_s0 + $0x1080] sm:$0xff] }
 0x300   :  { %v2586_v56 = vadd.f32 %v9353_v17, %v2585_v46  ;;  %v5387_v39 = vmax.f32 %v4985_v45, 0.0  ;;  %v5522_v59 = vmax.f32 %v5520_v0, %v5521_v10  ;;  %v12890_v28 = vmax.f32 %v8505_v38, %v8511_v50  ;;  %v12891_v46 = vld [vmem:[#allocation24_spill] sm:$0xff] }
 0x301   :  { %v2382_v38 = vadd.f32 %v9353_v17, %v12891_v46  ;;  %v4626_v32 = vsel %vm4076_vm2, %v3447_v62, -inf  ;;  %v4842_v57 = vsel %vm4076_vm2, %v3879_v2, -inf  ;;  %v399_v46 = vld [vmem:[%s12560_s0 + $0xc08] sm:$0xff] }
 0x302   :  { %v4195_v33 = vsel %vm4076_vm2, %v2586_v56, -inf  ;;  %6013 = vmatmul.msk.f32.gmra.mxu0 %vm598_vm1, %v109_v40  ;;  %6157 = vmatmul.msk.f32.gmra.mxu1 %vm598_vm1, %v253_v14  ;;  %v5199_v4 = vsel %vm4076_vm2, %v12890_v28, -inf  ;;  %v398_v14 = vld [vmem:[%s12560_s0 + $0xc00] sm:$0xff]  ;;  %v5736_v45 = vsel %vm4076_vm2, %v5522_v59, -inf  ;;  %v2451_v59 = vadd.f32 %v9353_v17, %v7840_v31 }
 0x303   :  { %v4196_v1 = vmax.f32 %v4194_v36, %v4195_v33  ;;  %6301 = vmatmul.msk.f32.gmra.mxu2 %vm598_vm1, %v397_v42  ;;  %6445 = vmatmul.msk.f32.gmra.mxu3 %vm598_vm1, %v541_v16  ;;  %v5201_v50 = vmax.f32 %v5199_v4, %v5200_v13  ;;  %v5538_v16 = vsel %vm4076_vm2, %v5387_v39, -inf  ;;  %v2454_v36 = vadd.f32 %v9353_v17, %v7874_v5  ;;  %v12894_v39 = vld [vmem:[#allocation22_spill] sm:$0xff]  ;;  %v111_v4 = vld [vmem:[%s12560_s0 + $0x308] sm:$0xff] }
 0x304   :  { %v12892_v33 = vmax.f32 %v8570_v11, %v8576_v15  ;;  %v5495_v15 = vmax.f32 %v5309_v23, 0.0 }
 0x305   :  { %v4987_v37 = vsel %vm4076_vm2, %v4196_v1, -inf  ;;  %v5459_v62 = vmax.f32 %v5201_v50, 0.0  ;;  %v4129_v31 = vsel %vm4076_vm2, %v2454_v36, -inf  ;;  %v543_v50 = vld [vmem:[%s12560_s0 + $0x1088] sm:$0xff] }
 0x306   :  { %v4988_v3 = vmax.f32 %v4986_v21, %v4987_v37  ;;  %v3449_v61 = vpop.f32.mrf.mxu2  ;;  %v3881_v55 = vpop.f32.mrf.mxu3  ;;  %v5202_v1 = vsel %vm4076_vm2, %v12892_v33, -inf  ;;  %v12893_v21 = vmax.f32 %v8573_v12, %v8579_v35 }
 0x307   :  { %v3450_v9 = vadd.f32 %v9353_v17, %v3449_v61  ;;  %v3882_v30 = vadd.f32 %v9353_v17, %v3881_v55  ;;  %v9415_v41 = vpop.f32.mrf.mxu0  ;;  %v9417_v34 = vpop.f32.mrf.mxu1  ;;  %v2448_v55 = vadd.f32 %v9353_v17, %v7800_v8  ;;  %v4093_v8 = vsel %vm4076_vm2, %v2382_v38, -inf }
 0x308   :  { %v5388_v40 = vmax.f32 %v4988_v3, 0.0  ;;  %v5310_v13 = vsel %vm4076_vm2, %v12893_v21, -inf  ;;  %v2379_v3 = vadd.f32 %v9353_v17, %v12894_v39 }
 0x309   :  { %v4627_v56 = vsel %vm4076_vm2, %v3450_v9, -inf  ;;  %v4843_v42 = vsel %vm4076_vm2, %v3882_v30, -inf  ;;  %v255_v9 = vld [vmem:[%s12560_s0 + $0x788] sm:$0xff]  ;;  %v12895_v30 = vld [vmem:[#allocation20_spill] sm:$0xff] }
 0x30a   :  { %v5539_v20 = vsel %vm4076_vm2, %v5388_v40, -inf  ;;  %v4628_v47 = vmax.f32 %v4626_v32, %v4627_v56  ;;  %v4844_v27 = vmax.f32 %v4842_v57, %v4843_v42  ;;  %6014 = vmatmul.msk.f32.gmra.mxu0 %vm598_vm1, %v110_v54  ;;  %6158 = vmatmul.msk.f32.gmra.mxu1 %vm598_vm1, %v254_v22  ;;  %v2376_v54 = vadd.f32 %v9353_v17, %v12895_v30  ;;  %v12898_v42 = vld [vmem:[#allocation18_spill] sm:$0xff] }
 0x30b   :  { %v5540_v10 = vmax.f32 %v5538_v16, %v5539_v20  ;;  %6302 = vmatmul.msk.f32.gmra.mxu2 %vm598_vm1, %v398_v14  ;;  %6446 = vmatmul.msk.f32.gmra.mxu3 %vm598_vm1, %v542_v63  ;;  %v5646_v40 = vsel %vm4076_vm2, %v5459_v62, -inf  ;;  %v9488_v14 = vsel %vm4076_vm2, %v5495_v15, -inf  ;;  %v2445_v32 = vadd.f32 %v9353_v17, %v7766_v25 }
 0x30c   :  { %v5203_v2 = vsel %vm4076_vm2, %v4628_v47, -inf  ;;  %v5311_v5 = vsel %vm4076_vm2, %v4844_v27, -inf  ;;  %12896 = vst [vmem:[#allocation6_spill] sm:$0xff] %v9488_v14  ;;  %v2373_v16 = vadd.f32 %v9353_v17, %v12898_v42  ;;  %v4092_v20 = vsel %vm4076_vm2, %v2379_v3, -inf }
 0x30d   :  { %v5737_v11 = vsel %vm4076_vm2, %v5540_v10, -inf  ;;  %v5204_v37 = vmax.f32 %v5202_v1, %v5203_v2  ;;  %v5312_v0 = vmax.f32 %v5310_v13, %v5311_v5  ;;  %v4126_v25 = vsel %vm4076_vm2, %v2448_v55, -inf }
 0x30e   :  { %v5738_v61 = vmax.f32 %v5736_v45, %v5737_v11  ;;  %v9462_v35 = vpop.f32.mrf.mxu2  ;;  %v3884_v12 = vpop.f32.mrf.mxu3  ;;  %v4128_v47 = vsel %vm4076_vm2, %v2451_v59, -inf  ;;  %v12899_v27 = vmax.f32 %v7817_v60, %v7823_v58  ;;  %v4090_v10 = vsel %vm4076_vm2, %v2376_v54, -inf }
 0x30f   :  { %v5460_v28 = vmax.f32 %v5204_v37, 0.0  ;;  %v5496_v29 = vmax.f32 %v5312_v0, 0.0  ;;  %v2591_v24 = vpop.f32.mrf.mxu0  ;;  %v9468_v23 = vpop.f32.mrf.mxu1  ;;  %v4130_v36 = vmax.f32 %v4128_v47, %v4129_v31  ;;  %v4094_v21 = vmax.f32 %v4092_v20, %v4093_v8 }
 0x310   :  { %v5842_v22 = vmax.f32 %v5738_v61, 0.0  ;;  %v5790_v45 = vsel %vm4076_vm2, %v12899_v27, -inf  ;;  %v2592_v1 = vadd.f32 %v9353_v17, %v2591_v24  ;;  %v3885_v62 = vadd.f32 %v9353_v17, %v3884_v12  ;;  %v112_v12 = vld [vmem:[%s12560_s0 + $0x310] sm:$0xff] }
 0x311   :  { %v5647_v63 = vsel %vm4076_vm2, %v5460_v28, -inf  ;;  %v9492_v38 = vsel %vm4076_vm2, %v5496_v29, -inf  ;;  %v4125_v2 = vsel %vm4076_vm2, %v2445_v32, -inf  ;;  %v2520_v5 = vadd.f32 %v9353_v17, %v8589_v6  ;;  %v256_v6 = vld [vmem:[%s12560_s0 + $0x790] sm:$0xff]  ;;  %v12900_v32 = vld [vmem:[#allocation122_spill] sm:$0xff] }
 0x312   :  { %12897 = vst [vmem:[#allocation52_spill] sm:$0xff] %v9492_v38  ;;  %v5648_v57 = vmax.f32 %v5646_v40, %v5647_v63  ;;  %6015 = vmatmul.msk.f32.gmra.mxu0 %vm598_vm1, %v111_v4  ;;  %6159 = vmatmul.msk.f32.gmra.mxu1 %vm598_vm1, %v255_v9  ;;  %v2589_v60 = vadd.f32 %v9353_v17, %v9415_v41  ;;  %v4089_v11 = vsel %vm4076_vm2, %v2373_v16, -inf  ;;  %v4957_v55 = vsel %vm4076_vm2, %v4130_v36, -inf  ;;  %v400_v29 = vld [vmem:[%s12560_s0 + $0xc10] sm:$0xff] }
 0x313   :  { %5878 = vst.msk [vmem:[%s12562_s3 + $0x8] sm:$0xff] %vm4076_vm2, %v5842_v22  ;;  %6303 = vmatmul.msk.f32.gmra.mxu2 %vm598_vm1, %v399_v46  ;;  %6447 = vmatmul.msk.f32.gmra.mxu3 %vm598_vm1, %v543_v50  ;;  %v4127_v37 = vmax.f32 %v4125_v2, %v4126_v25  ;;  %v4091_v41 = vmax.f32 %v4089_v11, %v4090_v10  ;;  %v4198_v28 = vsel %vm4076_vm2, %v2592_v1, -inf  ;;  %v544_v24 = vld [vmem:[%s12560_s0 + $0x1090] sm:$0xff]  ;;  %v4956_v4 = vsel %vm4076_vm2, %v4094_v21, -inf }
 0x314   :  { %v5791_v33 = vsel %vm4076_vm2, %v5648_v57, -inf  ;;  %v2517_v59 = vadd.f32 %v9353_v17, %v8553_v19  ;;  %v2526_v9 = vadd.f32 %v9353_v17, %v8649_v18  ;;  %v4845_v19 = vsel %vm4076_vm2, %v3885_v62, -inf  ;;  %v12901_v57 = vld [vmem:[#allocation124_spill] sm:$0xff] }
 0x315   :  { %v5792_v13 = vmax.f32 %v5790_v45, %v5791_v33  ;;  %v4162_v54 = vsel %vm4076_vm2, %v2520_v5, -inf  ;;  %v4197_v8 = vsel %vm4076_vm2, %v2589_v60, -inf  ;;  %v4954_v18 = vsel %vm4076_vm2, %v4127_v37, -inf  ;;  %v113_v5 = vld [vmem:[%s12560_s0 + $0x318] sm:$0xff] }
 0x316   :  { %v3455_v58 = vpop.f32.mrf.mxu2  ;;  %v3887_v15 = vpop.f32.mrf.mxu3  ;;  %v4958_v46 = vmax.f32 %v4956_v4, %v4957_v55  ;;  %v2523_v50 = vadd.f32 %v9353_v17, %v8613_v53  ;;  %v4199_v40 = vmax.f32 %v4197_v8, %v4198_v28  ;;  %v4161_v63 = vsel %vm4076_vm2, %v2517_v59, -inf  ;;  %v257_v60 = vld [vmem:[%s12560_s0 + $0x798] sm:$0xff] }
 0x317   :  { %v5860_v0 = vmax.f32 %v5792_v13, 0.0  ;;  %v3888_v39 = vadd.f32 %v9353_v17, %v3887_v15  ;;  %v2594_v3 = vpop.f32.mrf.mxu0  ;;  %v9526_v61 = vpop.f32.mrf.mxu1  ;;  %v3456_v31 = vadd.f32 %v9353_v17, %v3455_v58  ;;  %v12902_v42 = vmax.f32 %v12900_v32, %v12901_v57 }
 0x318   :  { %v3453_v20 = vadd.f32 %v9353_v17, %v9462_v35  ;;  %v4953_v53 = vsel %vm4076_vm2, %v4091_v41, -inf  ;;  %v4163_v47 = vmax.f32 %v4161_v63, %v4162_v54  ;;  %v4165_v27 = vsel %vm4076_vm2, %v2526_v9, -inf }
 0x319   :  { %5896 = vst.msk [vmem:[%s12562_s3 + $0x98] sm:$0xff] %vm4076_vm2, %v5860_v0  ;;  %v4846_v30 = vsel %vm4076_vm2, %v3888_v39, -inf  ;;  %v9568_v16 = vsel %vm4076_vm2, %v12902_v42, -inf  ;;  %v4955_v36 = vmax.f32 %v4953_v53, %v4954_v18  ;;  %v4630_v33 = vsel %vm4076_vm2, %v3456_v31, -inf  ;;  %v401_v0 = vld [vmem:[%s12560_s0 + $0xc18] sm:$0xff] }
 0x31a   :  { %v4847_v22 = vmax.f32 %v4845_v19, %v4846_v30  ;;  %6016 = vmatmul.msk.f32.gmra.mxu0 %vm598_vm1, %v112_v12  ;;  %6160 = vmatmul.msk.f32.gmra.mxu1 %vm598_vm1, %v256_v6  ;;  %v2595_v1 = vadd.f32 %v9353_v17, %v2594_v3  ;;  %v4164_v35 = vsel %vm4076_vm2, %v2523_v50, -inf  ;;  %v4990_v13 = vsel %vm4076_vm2, %v4199_v40, -inf  ;;  %v545_v39 = vld [vmem:[%s12560_s0 + $0x1098] sm:$0xff]  ;;  %v12904_v40 = vld [vmem:[#allocation123_spill] sm:$0xff] }
 0x31b   :  { %6304 = vmatmul.msk.f32.gmra.mxu2 %vm598_vm1, %v400_v29  ;;  %6448 = vmatmul.msk.f32.gmra.mxu3 %vm598_vm1, %v544_v24  ;;  %v5378_v58 = vmax.f32 %v4958_v46, 0.0  ;;  %v4166_v15 = vmax.f32 %v4164_v35, %v4165_v27  ;;  %v4629_v11 = vsel %vm4076_vm2, %v3453_v20, -inf  ;;  %v4989_v3 = vsel %vm4076_vm2, %v4163_v47, -inf  ;;  %v12903_v50 = vld [vmem:[#allocation121_spill] sm:$0xff]  ;;  %v114_v47 = vld [vmem:[%s12560_s0 + $0x320] sm:$0xff] }
 0x31c   :  { %v9573_v25 = vsel %vm4076_vm2, %v4847_v22, -inf  ;;  %v4631_v12 = vmax.f32 %v4629_v11, %v4630_v33  ;;  %v5377_v6 = vmax.f32 %v4955_v36, 0.0  ;;  %v4991_v41 = vmax.f32 %v4989_v3, %v4990_v13  ;;  %v258_v27 = vld [vmem:[%s12560_s0 + $0x7a0] sm:$0xff]  ;;  %v12906_v36 = vld [vmem:[#allocation32_spill] sm:$0xff] }
 0x31d   :  { %v5315_v45 = vmax.f32 %v9568_v16, %v9573_v25  ;;  %v4200_v55 = vsel %vm4076_vm2, %v2595_v1, -inf  ;;  %v5524_v29 = vsel %vm4076_vm2, %v5378_v58, -inf  ;;  %v4992_v24 = vsel %vm4076_vm2, %v4166_v15, -inf  ;;  %v546_v35 = vld [vmem:[%s12560_s0 + $0x10a0] sm:$0xff] }
 0x31e   :  { %v3458_v10 = vpop.f32.mrf.mxu2  ;;  %v3890_v21 = vpop.f32.mrf.mxu3  ;;  %v5206_v4 = vsel %vm4076_vm2, %v4631_v12, -inf  ;;  %v5523_v54 = vsel %vm4076_vm2, %v5377_v6, -inf  ;;  %v5389_v8 = vmax.f32 %v4991_v41, 0.0  ;;  %v12905_v63 = vmax.f32 %v12903_v50, %v12904_v40  ;;  %v12908_v12 = vld [vmem:[#allocation128_spill] sm:$0xff]  ;;  %v12909_v6 = vld [vmem:[#allocation130_spill] sm:$0xff] }
 0x31f   :  { %v2597_v62 = vpop.f32.mrf.mxu0  ;;  %v9583_v2 = vpop.f32.mrf.mxu1  ;;  %v3459_v9 = vadd.f32 %v9353_v17, %v3458_v10  ;;  %v3891_v19 = vadd.f32 %v9353_v17, %v3890_v21  ;;  %v5525_v46 = vmax.f32 %v5523_v54, %v5524_v29  ;;  %v2394_v33 = vadd.f32 %v9353_v17, %v12906_v36  ;;  %v402_v21 = vld [vmem:[%s12560_s0 + $0xc20] sm:$0xff]  ;;  %v12912_v29 = vld [vmem:[#allocation131_spill] sm:$0xff] }
 0x320   :  { %v2598_v37 = vadd.f32 %v9353_v17, %v2597_v62  ;;  %v5205_v32 = vsel %vm4076_vm2, %v12905_v63, -inf  ;;  %v5541_v58 = vsel %vm4076_vm2, %v5389_v8, -inf  ;;  %v12910_v41 = vmax.f32 %v12908_v12, %v12909_v6  ;;  %v115_v36 = vld [vmem:[%s12560_s0 + $0x328] sm:$0xff]  ;;  %v12921_v12 = vld [vmem:[#allocation26_spill] sm:$0xff] }
 0x321   :  { %v5207_v1 = vmax.f32 %v5205_v32, %v5206_v4  ;;  %v4632_v13 = vsel %vm4076_vm2, %v3459_v9, -inf  ;;  %v4848_v62 = vsel %vm4076_vm2, %v3891_v19, -inf  ;;  %v5497_v54 = vmax.f32 %v5315_v45, 0.0  ;;  %v12915_v32 = vld [vmem:[#allocation72_spill] sm:$0xff] }
 0x322   :  { %v4201_v59 = vsel %vm4076_vm2, %v2598_v37, -inf  ;;  %6017 = vmatmul.msk.f32.gmra.mxu0 %vm598_vm1, %v113_v5  ;;  %6161 = vmatmul.msk.f32.gmra.mxu1 %vm598_vm1, %v257_v60  ;;  %v2385_v6 = vadd.f32 %v9353_v17, %v12921_v12 }
 0x323   :  { %v4202_v28 = vmax.f32 %v4200_v55, %v4201_v59  ;;  %6305 = vmatmul.msk.f32.gmra.mxu2 %vm598_vm1, %v401_v0  ;;  %6449 = vmatmul.msk.f32.gmra.mxu3 %vm598_vm1, %v545_v39  ;;  %v5739_v0 = vsel %vm4076_vm2, %v5525_v46, -inf  ;;  %v12907_v39 = vld [vmem:[#allocation80_spill] sm:$0xff]  ;;  %v5208_v55 = vsel %vm4076_vm2, %v12910_v41, -inf  ;;  %v5461_v9 = vmax.f32 %v5207_v1, 0.0  ;;  %v259_v1 = vld [vmem:[%s12560_s0 + $0x7a8] sm:$0xff] }
 0x324   :  { %v2466_v3 = vadd.f32 %v9353_v17, %v12907_v39 }
 0x325   :  { %v4993_v30 = vsel %vm4076_vm2, %v4202_v28, -inf  ;;  %v12911_v28 = vld [vmem:[#allocation129_spill] sm:$0xff] }
 0x326   :  { %v4994_v31 = vmax.f32 %v4992_v24, %v4993_v30  ;;  %v3461_v22 = vpop.f32.mrf.mxu2  ;;  %v3893_v18 = vpop.f32.mrf.mxu3  ;;  %v12913_v24 = vmax.f32 %v12911_v28, %v12912_v29  ;;  %v12922_v28 = vld [vmem:[#allocation74_spill] sm:$0xff]  ;;  %v12923_v29 = vld [vmem:[#allocation76_spill] sm:$0xff] }
 0x327   :  { %v3462_v57 = vadd.f32 %v9353_v17, %v3461_v22  ;;  %v3894_v42 = vadd.f32 %v9353_v17, %v3893_v18  ;;  %v9619_v20 = vpop.f32.mrf.mxu0  ;;  %v9621_v53 = vpop.f32.mrf.mxu1  ;;  %v12914_v18 = vld [vmem:[#allocation30_spill] sm:$0xff] }
 0x328   :  { %v5390_v10 = vmax.f32 %v4994_v31, 0.0  ;;  %v5316_v4 = vsel %vm4076_vm2, %v12913_v24, -inf  ;;  %v2391_v46 = vadd.f32 %v9353_v17, %v12914_v18  ;;  %v12924_v24 = vmax.f32 %v12922_v28, %v12923_v29  ;;  %v12928_v29 = vld [vmem:[#allocation134_spill] sm:$0xff] }
 0x329   :  { %v4633_v5 = vsel %vm4076_vm2, %v3462_v57, -inf  ;;  %v4849_v60 = vsel %vm4076_vm2, %v3894_v42, -inf  ;;  %v2460_v57 = vadd.f32 %v9353_v17, %v12915_v32  ;;  %v12916_v42 = vld [vmem:[#allocation78_spill] sm:$0xff]  ;;  %v2601_v32 = vadd.f32 %v9353_v17, %v9619_v20 }
 0x32a   :  { %v5542_v15 = vsel %vm4076_vm2, %v5390_v10, -inf  ;;  %v4634_v11 = vmax.f32 %v4632_v13, %v4633_v5  ;;  %v4850_v37 = vmax.f32 %v4848_v62, %v4849_v60  ;;  %6018 = vmatmul.msk.f32.gmra.mxu0 %vm598_vm1, %v114_v47  ;;  %6162 = vmatmul.msk.f32.gmra.mxu1 %vm598_vm1, %v258_v27  ;;  %v2463_v47 = vadd.f32 %v9353_v17, %v12916_v42  ;;  %v12917_v10 = vld [vmem:[#allocation28_spill] sm:$0xff]  ;;  %v403_v5 = vld [vmem:[%s12560_s0 + $0xc28] sm:$0xff] }
 0x32b   :  { %v5543_v59 = vmax.f32 %v5541_v58, %v5542_v15  ;;  %6306 = vmatmul.msk.f32.gmra.mxu2 %vm598_vm1, %v402_v21  ;;  %6450 = vmatmul.msk.f32.gmra.mxu3 %vm598_vm1, %v546_v35  ;;  %v2388_v21 = vadd.f32 %v9353_v17, %v12917_v10  ;;  %v4099_v35 = vsel %vm4076_vm2, %v2394_v33, -inf  ;;  %v4135_v13 = vsel %vm4076_vm2, %v2466_v3, -inf  ;;  %v547_v60 = vld [vmem:[%s12560_s0 + $0x10a8] sm:$0xff]  ;;  %v260_v10 = vld [vmem:[%s12560_s0 + $0x7b0] sm:$0xff] }
 0x32c   :  { %v5209_v19 = vsel %vm4076_vm2, %v4634_v11, -inf  ;;  %v5317_v30 = vsel %vm4076_vm2, %v4850_v37, -inf  ;;  %v5649_v58 = vsel %vm4076_vm2, %v5461_v9, -inf  ;;  %v9692_v15 = vsel %vm4076_vm2, %v5497_v54, -inf  ;;  %v12920_v37 = vld [vmem:[#allocation70_spill] sm:$0xff] }
 0x32d   :  { %v5740_v8 = vsel %vm4076_vm2, %v5543_v59, -inf  ;;  %v5210_v31 = vmax.f32 %v5208_v55, %v5209_v19  ;;  %v5318_v22 = vmax.f32 %v5316_v4, %v5317_v30  ;;  %12918 = vst [vmem:[#allocation4_spill] sm:$0xff] %v9692_v15  ;;  %v4098_v41 = vsel %vm4076_vm2, %v2391_v46, -inf  ;;  %v12925_v46 = vld [vmem:[#allocation132_spill] sm:$0xff] }
 0x32e   :  { %v5741_v50 = vmax.f32 %v5739_v0, %v5740_v8  ;;  %v9666_v40 = vpop.f32.mrf.mxu2  ;;  %v3896_v63 = vpop.f32.mrf.mxu3  ;;  %v2457_v0 = vadd.f32 %v9353_v17, %v12920_v37  ;;  %v4132_v55 = vsel %vm4076_vm2, %v2460_v57, -inf  ;;  %v4134_v59 = vsel %vm4076_vm2, %v2463_v47, -inf }
 0x32f   :  { %v5462_v27 = vmax.f32 %v5210_v31, 0.0  ;;  %v5498_v16 = vmax.f32 %v5318_v22, 0.0  ;;  %v2603_v25 = vpop.f32.mrf.mxu0  ;;  %v9672_v45 = vpop.f32.mrf.mxu1  ;;  %v5793_v4 = vsel %vm4076_vm2, %v12924_v24, -inf  ;;  %v4136_v9 = vmax.f32 %v4134_v59, %v4135_v13 }
 0x330   :  { %v5843_v62 = vmax.f32 %v5741_v50, 0.0  ;;  %v2604_v30 = vadd.f32 %v9353_v17, %v2603_v25  ;;  %v4096_v54 = vsel %vm4076_vm2, %v2388_v21, -inf  ;;  %v4100_v8 = vmax.f32 %v4098_v41, %v4099_v35  ;;  %v12926_v35 = vld [vmem:[#allocation126_spill] sm:$0xff] }
 0x331   :  { %v5650_v11 = vsel %vm4076_vm2, %v5462_v27, -inf  ;;  %v9696_v33 = vsel %vm4076_vm2, %v5498_v16, -inf  ;;  %v3897_v22 = vadd.f32 %v9353_v17, %v3896_v63  ;;  %v4131_v18 = vsel %vm4076_vm2, %v2457_v0, -inf  ;;  %v116_v63 = vld [vmem:[%s12560_s0 + $0x330] sm:$0xff] }
 0x332   :  { %12919 = vst [vmem:[#allocation50_spill] sm:$0xff] %v9696_v33  ;;  %v5651_v39 = vmax.f32 %v5649_v58, %v5650_v11  ;;  %6019 = vmatmul.msk.f32.gmra.mxu0 %vm598_vm1, %v115_v36  ;;  %6163 = vmatmul.msk.f32.gmra.mxu1 %vm598_vm1, %v259_v1  ;;  %v2532_v50 = vadd.f32 %v9353_v17, %v12925_v46  ;;  %v4095_v47 = vsel %vm4076_vm2, %v2385_v6, -inf  ;;  %v4963_v21 = vsel %vm4076_vm2, %v4136_v9, -inf  ;;  %v12927_v11 = vld [vmem:[#allocation140_spill] sm:$0xff] }
 0x333   :  { %5879 = vst.msk [vmem:[%s12562_s3 + $0x10] sm:$0xff] %vm4076_vm2, %v5843_v62  ;;  %6307 = vmatmul.msk.f32.gmra.mxu2 %vm598_vm1, %v403_v5  ;;  %6451 = vmatmul.msk.f32.gmra.mxu3 %vm598_vm1, %v547_v60  ;;  %v4133_v27 = vmax.f32 %v4131_v18, %v4132_v55  ;;  %v4097_v20 = vmax.f32 %v4095_v47, %v4096_v54  ;;  %v4204_v62 = vsel %vm4076_vm2, %v2604_v30, -inf  ;;  %v404_v5 = vld [vmem:[%s12560_s0 + $0xc30] sm:$0xff]  ;;  %v4962_v58 = vsel %vm4076_vm2, %v4100_v8, -inf  ;;  %v12930_v30 = vld [vmem:[#allocation139_spill] sm:$0xff] }
 0x334   :  { %v5794_v19 = vsel %vm4076_vm2, %v5651_v39, -inf  ;;  %v2529_v13 = vadd.f32 %v9353_v17, %v12926_v35  ;;  %v548_v60 = vld [vmem:[%s12560_s0 + $0x10b0] sm:$0xff]  ;;  %v2538_v37 = vadd.f32 %v9353_v17, %v12927_v11  ;;  %v4851_v0 = vsel %vm4076_vm2, %v3897_v22, -inf }
 0x335   :  { %v5795_v31 = vmax.f32 %v5793_v4, %v5794_v19  ;;  %v4168_v12 = vsel %vm4076_vm2, %v2532_v50, -inf  ;;  %v4203_v6 = vsel %vm4076_vm2, %v2601_v32, -inf  ;;  %v4960_v59 = vsel %vm4076_vm2, %v4133_v27, -inf  ;;  %v12929_v19 = vld [vmem:[#allocation137_spill] sm:$0xff] }
 0x336   :  { %v3467_v57 = vpop.f32.mrf.mxu2  ;;  %v3899_v42 = vpop.f32.mrf.mxu3  ;;  %v4964_v28 = vmax.f32 %v4962_v58, %v4963_v21  ;;  %v2535_v24 = vadd.f32 %v9353_v17, %v12928_v29  ;;  %v4205_v4 = vmax.f32 %v4203_v6, %v4204_v62  ;;  %v4167_v9 = vsel %vm4076_vm2, %v2529_v13, -inf  ;;  %v261_v21 = vld [vmem:[%s12560_s0 + $0x7b8] sm:$0xff] }
 0x337   :  { %v5861_v16 = vmax.f32 %v5795_v31, 0.0  ;;  %v3900_v25 = vadd.f32 %v9353_v17, %v3899_v42  ;;  %v2606_v36 = vpop.f32.mrf.mxu0  ;;  %v9730_v1 = vpop.f32.mrf.mxu1  ;;  %v3468_v41 = vadd.f32 %v9353_v17, %v3467_v57  ;;  %v12931_v54 = vmax.f32 %v12929_v19, %v12930_v30 }
 0x338   :  { %v3465_v31 = vadd.f32 %v9353_v17, %v9666_v40  ;;  %v4959_v18 = vsel %vm4076_vm2, %v4097_v20, -inf  ;;  %v4169_v46 = vmax.f32 %v4167_v9, %v4168_v12  ;;  %v4171_v50 = vsel %vm4076_vm2, %v2538_v37, -inf  ;;  %v117_v20 = vld [vmem:[%s12560_s0 + $0x338] sm:$0xff] }
 0x339   :  { %5897 = vst.msk [vmem:[%s12562_s3 + $0xa0] sm:$0xff] %vm4076_vm2, %v5861_v16  ;;  %v4852_v39 = vsel %vm4076_vm2, %v3900_v25, -inf  ;;  %v9772_v8 = vsel %vm4076_vm2, %v12931_v54, -inf  ;;  %v4961_v57 = vmax.f32 %v4959_v18, %v4960_v59  ;;  %v4636_v42 = vsel %vm4076_vm2, %v3468_v41, -inf  ;;  %v12932_v18 = vld [vmem:[#allocation136_spill] sm:$0xff] }
 0x33a   :  { %v4853_v55 = vmax.f32 %v4851_v0, %v4852_v39  ;;  %6020 = vmatmul.msk.f32.gmra.mxu0 %vm598_vm1, %v116_v63  ;;  %6164 = vmatmul.msk.f32.gmra.mxu1 %vm598_vm1, %v260_v10  ;;  %v2607_v47 = vadd.f32 %v9353_v17, %v2606_v36  ;;  %v4170_v40 = vsel %vm4076_vm2, %v2535_v24, -inf  ;;  %v4996_v25 = vsel %vm4076_vm2, %v4205_v4, -inf }
 0x33b   :  { %6308 = vmatmul.msk.f32.gmra.mxu2 %vm598_vm1, %v404_v5  ;;  %6452 = vmatmul.msk.f32.gmra.mxu3 %vm598_vm1, %v548_v60  ;;  %v5380_v35 = vmax.f32 %v4964_v28, 0.0  ;;  %v4172_v13 = vmax.f32 %v4170_v40, %v4171_v50  ;;  %v4635_v36 = vsel %vm4076_vm2, %v3465_v31, -inf  ;;  %v405_v5 = vld [vmem:[%s12560_s0 + $0xc38] sm:$0xff]  ;;  %v4995_v58 = vsel %vm4076_vm2, %v4169_v46, -inf  ;;  %v12933_v46 = vld [vmem:[#allocation138_spill] sm:$0xff] }
 0x33c   :  { %v9777_v22 = vsel %vm4076_vm2, %v4853_v55, -inf  ;;  %v549_v60 = vld [vmem:[%s12560_s0 + $0x10b8] sm:$0xff]  ;;  %v4637_v11 = vmax.f32 %v4635_v36, %v4636_v42  ;;  %v5379_v37 = vmax.f32 %v4961_v57, 0.0  ;;  %v4997_v0 = vmax.f32 %v4995_v58, %v4996_v25  ;;  %v118_v40 = vld [vmem:[%s12560_s0 + $0x340] sm:$0xff] }
 0x33d   :  { %v5321_v32 = vmax.f32 %v9772_v8, %v9777_v22  ;;  %v4206_v39 = vsel %vm4076_vm2, %v2607_v47, -inf  ;;  %v5527_v41 = vsel %vm4076_vm2, %v5380_v35, -inf  ;;  %v4998_v55 = vsel %vm4076_vm2, %v4172_v13, -inf  ;;  %v262_v25 = vld [vmem:[%s12560_s0 + $0x7c0] sm:$0xff] }
 0x33e   :  { %v3470_v27 = vpop.f32.mrf.mxu2  ;;  %v3902_v16 = vpop.f32.mrf.mxu3  ;;  %v5212_v59 = vsel %vm4076_vm2, %v4637_v11, -inf  ;;  %v5526_v4 = vsel %vm4076_vm2, %v5379_v37, -inf  ;;  %v5391_v9 = vmax.f32 %v4997_v0, 0.0  ;;  %v12934_v50 = vmax.f32 %v12932_v18, %v12933_v46  ;;  %v406_v13 = vld [vmem:[%s12560_s0 + $0xc40] sm:$0xff] }
 0x33f   :  { %v2609_v63 = vpop.f32.mrf.mxu0  ;;  %v9787_v10 = vpop.f32.mrf.mxu1  ;;  %v3471_v28 = vadd.f32 %v9353_v17, %v3470_v27  ;;  %v3903_v29 = vadd.f32 %v9353_v17, %v3902_v16  ;;  %v5528_v31 = vmax.f32 %v5526_v4, %v5527_v41  ;;  %v550_v36 = vld [vmem:[%s12560_s0 + $0x10c0] sm:$0xff]  ;;  %v12941_v4 = vld [vmem:[#allocation145_spill] sm:$0xff]  ;;  %v5499_v46 = vmax.f32 %v5321_v32, 0.0 }
 0x340   :  { %v2610_v62 = vadd.f32 %v9353_v17, %v2609_v63  ;;  %v5211_v57 = vsel %vm4076_vm2, %v12934_v50, -inf  ;;  %v12936_v63 = vld [vmem:[#allocation40_spill] sm:$0xff]  ;;  %v5544_v11 = vsel %vm4076_vm2, %v5391_v9, -inf  ;;  %v12942_v9 = vld [vmem:[#allocation147_spill] sm:$0xff] }
 0x342   :  { %v4207_v12 = vsel %vm4076_vm2, %v2610_v62, -inf  ;;  %6021 = vmatmul.msk.f32.gmra.mxu0 %vm598_vm1, %v117_v20  ;;  %6165 = vmatmul.msk.f32.gmra.mxu1 %vm598_vm1, %v261_v21  ;;  %v2406_v20 = vadd.f32 %v9353_v17, %v12936_v63  ;;  %v5213_v21 = vmax.f32 %v5211_v57, %v5212_v59  ;;  %v4638_v62 = vsel %vm4076_vm2, %v3471_v28, -inf  ;;  %v12939_v59 = vld [vmem:[#allocation146_spill] sm:$0xff] }
 0x343   :  { %v4208_v6 = vmax.f32 %v4206_v39, %v4207_v12  ;;  %6309 = vmatmul.msk.f32.gmra.mxu2 %vm598_vm1, %v405_v5  ;;  %6453 = vmatmul.msk.f32.gmra.mxu3 %vm598_vm1, %v549_v60  ;;  %v4854_v5 = vsel %vm4076_vm2, %v3903_v29, -inf  ;;  %v5742_v12 = vsel %vm4076_vm2, %v5528_v31, -inf }
 0x345   :  { %v4999_v24 = vsel %vm4076_vm2, %v4208_v6, -inf  ;;  %v12937_v6 = vld [vmem:[#allocation92_spill] sm:$0xff] }
 0x346   :  { %v5000_v19 = vmax.f32 %v4998_v55, %v4999_v24  ;;  %v3473_v30 = vpop.f32.mrf.mxu2  ;;  %v3905_v54 = vpop.f32.mrf.mxu3  ;;  %v2478_v41 = vadd.f32 %v9353_v17, %v12937_v6  ;;  %v12938_v55 = vld [vmem:[#allocation144_spill] sm:$0xff]  ;;  %v407_v6 = vld [vmem:[%s12560_s0 + $0xc48] sm:$0xff] }
 0x347   :  { %v3474_v42 = vadd.f32 %v9353_v17, %v3473_v30  ;;  %v3906_v47 = vadd.f32 %v9353_v17, %v3905_v54  ;;  %v9823_v27 = vpop.f32.mrf.mxu0  ;;  %v9825_v16 = vpop.f32.mrf.mxu1  ;;  %v12940_v28 = vmax.f32 %v12938_v55, %v12939_v59  ;;  %v5463_v54 = vmax.f32 %v5213_v21, 0.0  ;;  %v12945_v21 = vld [vmem:[#allocation84_spill] sm:$0xff]  ;;  %v551_v55 = vld [vmem:[%s12560_s0 + $0x10c8] sm:$0xff] }
 0x348   :  { %12935 = vst [vmem:[#allocation2_spill] sm:$0xff] %v9825_v16  ;;  %v5392_v35 = vmax.f32 %v5000_v19, 0.0  ;;  %v12943_v19 = vmax.f32 %v12941_v4, %v12942_v9 }
 0x349   :  { %v4639_v60 = vsel %vm4076_vm2, %v3474_v42, -inf  ;;  %v4855_v58 = vsel %vm4076_vm2, %v3906_v47, -inf  ;;  %v5214_v29 = vsel %vm4076_vm2, %v12940_v28, -inf  ;;  %v12944_v47 = vld [vmem:[#allocation38_spill] sm:$0xff]  ;;  %v5652_v59 = vsel %vm4076_vm2, %v5463_v54, -inf }
 0x34a   :  { %v5545_v37 = vsel %vm4076_vm2, %v5392_v35, -inf  ;;  %v4640_v0 = vmax.f32 %v4638_v62, %v4639_v60  ;;  %v4856_v39 = vmax.f32 %v4854_v5, %v4855_v58  ;;  %6022 = vmatmul.msk.f32.gmra.mxu0 %vm598_vm1, %v118_v40  ;;  %6166 = vmatmul.msk.f32.gmra.mxu1 %vm598_vm1, %v262_v25  ;;  %v5322_v30 = vsel %vm4076_vm2, %v12943_v19, -inf  ;;  %v119_v60 = vld [vmem:[%s12560_s0 + $0x348] sm:$0xff]  ;;  %v12952_v19 = vld [vmem:[#allocation34_spill] sm:$0xff] }
 0x34b   :  { %v5546_v24 = vmax.f32 %v5544_v11, %v5545_v37  ;;  %6310 = vmatmul.msk.f32.gmra.mxu2 %vm598_vm1, %v406_v13  ;;  %6454 = vmatmul.msk.f32.gmra.mxu3 %vm598_vm1, %v550_v36  ;;  %v2403_v40 = vadd.f32 %v9353_v17, %v12944_v47  ;;  %v2472_v13 = vadd.f32 %v9353_v17, %v12945_v21  ;;  %v12946_v36 = vld [vmem:[#allocation90_spill] sm:$0xff]  ;;  %v263_v58 = vld [vmem:[%s12560_s0 + $0x7c8] sm:$0xff]  ;;  %v12948_v11 = vld [vmem:[#allocation36_spill] sm:$0xff]  ;;  %v9896_v28 = vsel %vm4076_vm2, %v5499_v46, -inf }
 0x34c   :  { %v5215_v31 = vsel %vm4076_vm2, %v4640_v0, -inf  ;;  %v5323_v18 = vsel %vm4076_vm2, %v4856_v39, -inf  ;;  %v2475_v62 = vadd.f32 %v9353_v17, %v12946_v36  ;;  %v2400_v37 = vadd.f32 %v9353_v17, %v12948_v11  ;;  %12949 = vst [vmem:[#allocation14_spill] sm:$0xff] %v9896_v28  ;;  %v12953_v46 = vld [vmem:[#allocation86_spill] sm:$0xff] }
 0x34d   :  { %v5743_v50 = vsel %vm4076_vm2, %v5546_v24, -inf  ;;  %v5216_v57 = vmax.f32 %v5214_v29, %v5215_v31  ;;  %v5324_v42 = vmax.f32 %v5322_v30, %v5323_v18  ;;  %v4105_v0 = vsel %vm4076_vm2, %v2406_v20, -inf }
 0x34e   :  { %v5744_v25 = vmax.f32 %v5742_v12, %v5743_v50  ;;  %v9870_v63 = vpop.f32.mrf.mxu2  ;;  %v3908_v35 = vpop.f32.mrf.mxu3  ;;  %v4141_v39 = vsel %vm4076_vm2, %v2478_v41, -inf  ;;  %v12951_v41 = vld [vmem:[#allocation82_spill] sm:$0xff]  ;;  %v2397_v30 = vadd.f32 %v9353_v17, %v12952_v19  ;;  %v4104_v54 = vsel %vm4076_vm2, %v2403_v40, -inf  ;;  %v12954_v50 = vld [vmem:[#allocation88_spill] sm:$0xff] }
 0x34f   :  { %v5464_v5 = vmax.f32 %v5216_v57, 0.0  ;;  %v5500_v8 = vmax.f32 %v5324_v42, 0.0  ;;  %v2615_v22 = vpop.f32.mrf.mxu0  ;;  %v9876_v32 = vpop.f32.mrf.mxu1  ;;  %v2469_v24 = vadd.f32 %v9353_v17, %v12951_v41  ;;  %v4138_v31 = vsel %vm4076_vm2, %v2472_v13, -inf  ;;  %v12958_v41 = vld [vmem:[#allocation142_spill] sm:$0xff]  ;;  %v408_v19 = vld [vmem:[%s12560_s0 + $0xc50] sm:$0xff] }
 0x350   :  { %12947 = vst [vmem:[#allocation16_spill] sm:$0xff] %v9876_v32  ;;  %v5844_v12 = vmax.f32 %v5744_v25, 0.0  ;;  %v4140_v18 = vsel %vm4076_vm2, %v2475_v62, -inf  ;;  %v12955_v57 = vmax.f32 %v12953_v46, %v12954_v50  ;;  %v2616_v21 = vadd.f32 %v9353_v17, %v2615_v22 }
 0x351   :  { %v5653_v29 = vsel %vm4076_vm2, %v5464_v5, -inf  ;;  %v9900_v20 = vsel %vm4076_vm2, %v5500_v8, -inf  ;;  %v4142_v47 = vmax.f32 %v4140_v18, %v4141_v39  ;;  %v4102_v40 = vsel %vm4076_vm2, %v2400_v37, -inf  ;;  %v12956_v8 = vld [vmem:[#allocation148_spill] sm:$0xff] }
 0x352   :  { %12950 = vst [vmem:[#allocation12_spill] sm:$0xff] %v9900_v20  ;;  %v5654_v4 = vmax.f32 %v5652_v59, %v5653_v29  ;;  %6023 = vmatmul.msk.f32.gmra.mxu0 %vm598_vm1, %v119_v60  ;;  %6167 = vmatmul.msk.f32.gmra.mxu1 %vm598_vm1, %v263_v58  ;;  %v5796_v42 = vsel %vm4076_vm2, %v12955_v57, -inf  ;;  %v4106_v36 = vmax.f32 %v4104_v54, %v4105_v0  ;;  %v4137_v5 = vsel %vm4076_vm2, %v2469_v24, -inf  ;;  %v264_v59 = vld [vmem:[%s12560_s0 + $0x7d0] sm:$0xff] }
 0x353   :  { %5880 = vst.msk [vmem:[%s12562_s3 + $0x18] sm:$0xff] %vm4076_vm2, %v5844_v12  ;;  %6311 = vmatmul.msk.f32.gmra.mxu2 %vm598_vm1, %v407_v6  ;;  %6455 = vmatmul.msk.f32.gmra.mxu3 %vm598_vm1, %v551_v55  ;;  %v3909_v62 = vadd.f32 %v9353_v17, %v3908_v35  ;;  %v2544_v60 = vadd.f32 %v9353_v17, %v12956_v8  ;;  %v4101_v12 = vsel %vm4076_vm2, %v2397_v30, -inf  ;;  %v120_v35 = vld [vmem:[%s12560_s0 + $0x350] sm:$0xff]  ;;  %v4969_v29 = vsel %vm4076_vm2, %v4142_v47, -inf  ;;  %v12961_v8 = vld [vmem:[#allocation153_spill] sm:$0xff] }
 0x354   :  { %v5797_v25 = vsel %vm4076_vm2, %v5654_v4, -inf  ;;  %v2613_v58 = vadd.f32 %v9353_v17, %v9823_v27  ;;  %v4139_v6 = vmax.f32 %v4137_v5, %v4138_v31  ;;  %v4103_v27 = vmax.f32 %v4101_v12, %v4102_v40  ;;  %v552_v30 = vld [vmem:[%s12560_s0 + $0x10d0] sm:$0xff] }
 0x355   :  { %v5798_v13 = vmax.f32 %v5796_v42, %v5797_v25  ;;  %v2541_v24 = vadd.f32 %v9353_v17, %v12958_v41  ;;  %v4210_v4 = vsel %vm4076_vm2, %v2616_v21, -inf  ;;  %v4968_v54 = vsel %vm4076_vm2, %v4106_v36, -inf  ;;  %v12959_v31 = vld [vmem:[#allocation156_spill] sm:$0xff]  ;;  %v12960_v36 = vld [vmem:[#allocation150_spill] sm:$0xff] }
 0x356   :  { %v3479_v11 = vpop.f32.mrf.mxu2  ;;  %v3911_v39 = vpop.f32.mrf.mxu3  ;;  %v2550_v18 = vadd.f32 %v9353_v17, %v12959_v31  ;;  %v4857_v46 = vsel %vm4076_vm2, %v3909_v62, -inf  ;;  %v4174_v57 = vsel %vm4076_vm2, %v2544_v60, -inf  ;;  %v4209_v42 = vsel %vm4076_vm2, %v2613_v58, -inf  ;;  %v12962_v60 = vld [vmem:[#allocation155_spill] sm:$0xff]  ;;  %v265_v31 = vld [vmem:[%s12560_s0 + $0x7d8] sm:$0xff] }
 0x357   :  { %v5862_v22 = vmax.f32 %v5798_v13, 0.0  ;;  %v3912_v37 = vadd.f32 %v9353_v17, %v3911_v39  ;;  %v2618_v0 = vpop.f32.mrf.mxu0  ;;  %v9934_v55 = vpop.f32.mrf.mxu1  ;;  %v3480_v47 = vadd.f32 %v9353_v17, %v3479_v11  ;;  %v4966_v21 = vsel %vm4076_vm2, %v4139_v6, -inf }
 0x358   :  { %12957 = vst [vmem:[#allocation57_spill] sm:$0xff] %v9934_v55  ;;  %v4970_v40 = vmax.f32 %v4968_v54, %v4969_v29  ;;  %v2547_v13 = vadd.f32 %v9353_v17, %v12960_v36  ;;  %v4211_v62 = vmax.f32 %v4209_v42, %v4210_v4  ;;  %v4173_v5 = vsel %vm4076_vm2, %v2541_v24, -inf  ;;  %v553_v42 = vld [vmem:[%s12560_s0 + $0x10d8] sm:$0xff] }
 0x359   :  { %5898 = vst.msk [vmem:[%s12562_s3 + $0xa8] sm:$0xff] %vm4076_vm2, %v5862_v22  ;;  %v4858_v50 = vsel %vm4076_vm2, %v3912_v37, -inf  ;;  %v12963_v58 = vmax.f32 %v12961_v8, %v12962_v60  ;;  %v3477_v39 = vadd.f32 %v9353_v17, %v9870_v63  ;;  %v4965_v6 = vsel %vm4076_vm2, %v4103_v27, -inf  ;;  %v121_v27 = vld [vmem:[%s12560_s0 + $0x358] sm:$0xff] }
 0x35a   :  { %v4859_v25 = vmax.f32 %v4857_v46, %v4858_v50  ;;  %6024 = vmatmul.msk.f32.gmra.mxu0 %vm598_vm1, %v120_v35  ;;  %6168 = vmatmul.msk.f32.gmra.mxu1 %vm598_vm1, %v264_v59  ;;  %v4175_v22 = vmax.f32 %v4173_v5, %v4174_v57  ;;  %v4177_v37 = vsel %vm4076_vm2, %v2550_v18, -inf  ;;  %v4967_v59 = vmax.f32 %v4965_v6, %v4966_v21  ;;  %v409_v57 = vld [vmem:[%s12560_s0 + $0xc58] sm:$0xff] }
 0x35b   :  { %6312 = vmatmul.msk.f32.gmra.mxu2 %vm598_vm1, %v408_v19  ;;  %6456 = vmatmul.msk.f32.gmra.mxu3 %vm598_vm1, %v552_v30  ;;  %v9976_v11 = vsel %vm4076_vm2, %v12963_v58, -inf  ;;  %v4642_v29 = vsel %vm4076_vm2, %v3480_v47, -inf  ;;  %v2619_v41 = vadd.f32 %v9353_v17, %v2618_v0  ;;  %v4176_v63 = vsel %vm4076_vm2, %v2547_v13, -inf  ;;  %v10003_v0 = vld [vmem:[%s12561_s2] ss:$0 sm:$0xff] }
 0x35c   :  { %v9981_v12 = vsel %vm4076_vm2, %v4859_v25, -inf  ;;  %v5002_v19 = vsel %vm4076_vm2, %v4211_v62, -inf  ;;  %v5382_v18 = vmax.f32 %v4970_v40, 0.0  ;;  %v4178_v46 = vmax.f32 %v4176_v63, %v4177_v37 }
 0x35d   :  { %v5327_v35 = vmax.f32 %v9976_v11, %v9981_v12  ;;  %v4641_v17 = vsel %vm4076_vm2, %v3477_v39, -inf  ;;  %v5001_v47 = vsel %vm4076_vm2, %v4175_v22, -inf  ;;  %v5381_v21 = vmax.f32 %v4967_v59, 0.0 }
 0x35e   :  { %v3482_v24 = vpop.f32.mrf.mxu2  ;;  %v3914_v4 = vpop.f32.mrf.mxu3  ;;  %v4643_v25 = vmax.f32 %v4641_v17, %v4642_v29  ;;  %v5003_v40 = vmax.f32 %v5001_v47, %v5002_v19  ;;  %v4212_v36 = vsel %vm4076_vm2, %v2619_v41, -inf  ;;  %v5530_v5 = vsel %vm4076_vm2, %v5382_v18, -inf  ;;  %v12965_v19 = vld [vmem:[#allocation152_spill] sm:$0xff]  ;;  %v122_v17 = vld [vmem:[%s12560_s0 + $0x360] sm:$0xff] }
 0x35f   :  { %v2621_v30 = vpop.f32.mrf.mxu0  ;;  %v9991_v54 = vpop.f32.mrf.mxu1  ;;  %v5004_v8 = vsel %vm4076_vm2, %v4178_v46, -inf  ;;  %v3483_v58 = vadd.f32 %v10003_v0, %v3482_v24  ;;  %v3915_v39 = vadd.f32 %v10003_v0, %v3914_v4  ;;  %v5529_v22 = vsel %vm4076_vm2, %v5381_v21, -inf  ;;  %v410_v21 = vld [vmem:[%s12560_s0 + $0xc60] sm:$0xff] }
 0x360   :  { %12964 = vst [vmem:[#allocation10_spill] sm:$0xff] %v9991_v54  ;;  %v2622_v50 = vadd.f32 %v10003_v0, %v2621_v30  ;;  %v5218_v60 = vsel %vm4076_vm2, %v4643_v25, -inf  ;;  %v5393_v37 = vmax.f32 %v5003_v40, 0.0  ;;  %v5531_v63 = vmax.f32 %v5529_v22, %v5530_v5  ;;  %v12966_v30 = vld [vmem:[#allocation154_spill] sm:$0xff] }
 0x361   :  { %v554_v40 = vld [vmem:[%s12560_s0 + $0x10e0] sm:$0xff] }
 0x362   :  { %v4213_v13 = vsel %vm4076_vm2, %v2622_v50, -inf  ;;  %6025 = vmatmul.msk.f32.gmra.mxu0 %vm598_vm1, %v121_v27  ;;  %6169 = vmatmul.msk.f32.gmra.mxu1 %vm598_vm1, %v265_v31  ;;  %v12967_v27 = vmax.f32 %v12965_v19, %v12966_v30  ;;  %v266_v50 = vld [vmem:[%s12560_s0 + $0x7e0] sm:$0xff] }
 0x363   :  { %v4214_v62 = vmax.f32 %v4212_v36, %v4213_v13  ;;  %6313 = vmatmul.msk.f32.gmra.mxu2 %vm598_vm1, %v409_v57  ;;  %6457 = vmatmul.msk.f32.gmra.mxu3 %vm598_vm1, %v553_v42  ;;  %v12969_v57 = vld [vmem:[#allocation48_spill] sm:$0xff]  ;;  %v4644_v36 = vsel %vm4076_vm2, %v3483_v58, -inf  ;;  %v4860_v13 = vsel %vm4076_vm2, %v3915_v39, -inf }
 0x364   :  { %v5217_v31 = vsel %vm4076_vm2, %v12967_v27, -inf  ;;  %v2418_v42 = vadd.f32 %v10003_v0, %v12969_v57  ;;  %v12971_v39 = vld [vmem:[#allocation160_spill] sm:$0xff]  ;;  %v5501_v57 = vmax.f32 %v5327_v35, 0.0 }
 0x365   :  { %v5005_v6 = vsel %vm4076_vm2, %v4214_v62, -inf  ;;  %v5219_v47 = vmax.f32 %v5217_v31, %v5218_v60  ;;  %v12975_v31 = vld [vmem:[#allocation163_spill] sm:$0xff] }
 0x366   :  { %v5006_v59 = vmax.f32 %v5004_v8, %v5005_v6  ;;  %v3485_v29 = vpop.f32.mrf.mxu2  ;;  %v3917_v41 = vpop.f32.mrf.mxu3  ;;  %v5547_v8 = vsel %vm4076_vm2, %v5393_v37, -inf  ;;  %v12974_v37 = vld [vmem:[#allocation161_spill] sm:$0xff] }
 0x367   :  { %v3486_v18 = vadd.f32 %v10003_v0, %v3485_v29  ;;  %v3918_v24 = vadd.f32 %v10003_v0, %v3917_v41  ;;  %v10032_v46 = vpop.f32.mrf.mxu0  ;;  %v10034_v4 = vpop.f32.mrf.mxu1  ;;  %v12970_v29 = vld [vmem:[#allocation104_spill] sm:$0xff]  ;;  %v12972_v41 = vld [vmem:[#allocation162_spill] sm:$0xff] }
 0x368   :  { %12968 = vst [vmem:[#allocation24_spill] sm:$0xff] %v10034_v4  ;;  %v5394_v25 = vmax.f32 %v5006_v59, 0.0  ;;  %v5745_v59 = vsel %vm4076_vm2, %v5531_v63, -inf  ;;  %v2490_v58 = vadd.f32 %v10003_v0, %v12970_v29  ;;  %v12973_v19 = vmax.f32 %v12971_v39, %v12972_v41  ;;  %v123_v39 = vld [vmem:[%s12560_s0 + $0x368] sm:$0xff]  ;;  %v12981_v41 = vld [vmem:[#allocation44_spill] sm:$0xff] }
 0x369   :  { %v4645_v62 = vsel %vm4076_vm2, %v3486_v18, -inf  ;;  %v4861_v5 = vsel %vm4076_vm2, %v3918_v24, -inf  ;;  %v12976_v18 = vmax.f32 %v12974_v37, %v12975_v31  ;;  %v411_v31 = vld [vmem:[%s12560_s0 + $0xc68] sm:$0xff] }
 0x36a   :  { %v5548_v60 = vsel %vm4076_vm2, %v5394_v25, -inf  ;;  %v4646_v6 = vmax.f32 %v4644_v36, %v4645_v62  ;;  %v4862_v22 = vmax.f32 %v4860_v13, %v4861_v5  ;;  %6026 = vmatmul.msk.f32.gmra.mxu0 %vm598_vm1, %v122_v17  ;;  %6170 = vmatmul.msk.f32.gmra.mxu1 %vm598_vm1, %v266_v50  ;;  %v5220_v30 = vsel %vm4076_vm2, %v12973_v19, -inf  ;;  %v12977_v13 = vld [vmem:[#allocation46_spill] sm:$0xff] }
 0x36b   :  { %v5549_v27 = vmax.f32 %v5547_v8, %v5548_v60  ;;  %6314 = vmatmul.msk.f32.gmra.mxu2 %vm598_vm1, %v410_v21  ;;  %6458 = vmatmul.msk.f32.gmra.mxu3 %vm598_vm1, %v554_v40  ;;  %v5328_v24 = vsel %vm4076_vm2, %v12976_v18, -inf  ;;  %v5465_v17 = vmax.f32 %v5219_v47, 0.0  ;;  %v2415_v40 = vadd.f32 %v10003_v0, %v12977_v13  ;;  %v12978_v47 = vld [vmem:[#allocation96_spill] sm:$0xff]  ;;  %v555_v18 = vld [vmem:[%s12560_s0 + $0x10e8] sm:$0xff] }
 0x36c   :  { %v5221_v63 = vsel %vm4076_vm2, %v4646_v6, -inf  ;;  %v5329_v50 = vsel %vm4076_vm2, %v4862_v22, -inf  ;;  %v2484_v60 = vadd.f32 %v10003_v0, %v12978_v47  ;;  %v12979_v6 = vld [vmem:[#allocation102_spill] sm:$0xff]  ;;  %v2412_v19 = vadd.f32 %v10003_v0, %v12981_v41 }
 0x36d   :  { %v5746_v25 = vsel %vm4076_vm2, %v5549_v27, -inf  ;;  %v5222_v36 = vmax.f32 %v5220_v30, %v5221_v63  ;;  %v5330_v21 = vmax.f32 %v5328_v24, %v5329_v50  ;;  %v2487_v22 = vadd.f32 %v10003_v0, %v12979_v6  ;;  %v12986_v6 = vld [vmem:[#allocation98_spill] sm:$0xff] }
 0x36e   :  { %v5747_v62 = vmax.f32 %v5745_v59, %v5746_v25  ;;  %v10079_v5 = vpop.f32.mrf.mxu2  ;;  %v3920_v8 = vpop.f32.mrf.mxu3  ;;  %v267_v59 = vld [vmem:[%s12560_s0 + $0x7e8] sm:$0xff]  ;;  %v4111_v30 = vsel %vm4076_vm2, %v2418_v42, -inf  ;;  %v4147_v27 = vsel %vm4076_vm2, %v2490_v58, -inf  ;;  %v5655_v24 = vsel %vm4076_vm2, %v5465_v17, -inf  ;;  %v12984_v58 = vld [vmem:[#allocation94_spill] sm:$0xff] }
 0x36f   :  { %v5466_v29 = vmax.f32 %v5222_v36, 0.0  ;;  %v5502_v11 = vmax.f32 %v5330_v21, 0.0  ;;  %v2627_v12 = vpop.f32.mrf.mxu0  ;;  %v10085_v35 = vpop.f32.mrf.mxu1  ;;  %v10105_v63 = vsel %vm4076_vm2, %v5501_v57, -inf  ;;  %v2481_v25 = vadd.f32 %v10003_v0, %v12984_v58  ;;  %v12985_v57 = vld [vmem:[#allocation42_spill] sm:$0xff] }
 0x370   :  { %12980 = vst [vmem:[#allocation22_spill] sm:$0xff] %v10085_v35  ;;  %v5845_v37 = vmax.f32 %v5747_v62, 0.0  ;;  %v2409_v21 = vadd.f32 %v10003_v0, %v12985_v57  ;;  %v4110_v13 = vsel %vm4076_vm2, %v2415_v40, -inf  ;;  %v4144_v62 = vsel %vm4076_vm2, %v2484_v60, -inf }
 0x371   :  { %12982 = vst [vmem:[#allocation20_spill] sm:$0xff] %v10105_v63  ;;  %v5656_v50 = vsel %vm4076_vm2, %v5466_v29, -inf  ;;  %v10109_v42 = vsel %vm4076_vm2, %v5502_v11, -inf  ;;  %v4146_v47 = vsel %vm4076_vm2, %v2487_v22, -inf  ;;  %v12987_v29 = vld [vmem:[#allocation100_spill] sm:$0xff]  ;;  %v4108_v40 = vsel %vm4076_vm2, %v2412_v19, -inf }
 0x372   :  { %12983 = vst [vmem:[#allocation18_spill] sm:$0xff] %v10109_v42  ;;  %v5657_v36 = vmax.f32 %v5655_v24, %v5656_v50  ;;  %6027 = vmatmul.msk.f32.gmra.mxu0 %vm598_vm1, %v123_v39  ;;  %6171 = vmatmul.msk.f32.gmra.mxu1 %vm598_vm1, %v267_v59  ;;  %v12988_v11 = vmax.f32 %v12986_v6, %v12987_v29  ;;  %v12989_v50 = vld [vmem:[#allocation164_spill] sm:$0xff]  ;;  %v12991_v29 = vld [vmem:[#allocation158_spill] sm:$0xff] }
 0x373   :  { %5881 = vst.msk [vmem:[%s12562_s3 + $0x20] sm:$0xff] %vm4076_vm2, %v5845_v37  ;;  %6315 = vmatmul.msk.f32.gmra.mxu2 %vm598_vm1, %v411_v31  ;;  %6459 = vmatmul.msk.f32.gmra.mxu3 %vm598_vm1, %v555_v18  ;;  %v4148_v41 = vmax.f32 %v4146_v47, %v4147_v27  ;;  %v2628_v37 = vadd.f32 %v10003_v0, %v2627_v12  ;;  %v4143_v31 = vsel %vm4076_vm2, %v2481_v25, -inf  ;;  %v268_v25 = vld [vmem:[%s12560_s0 + $0x7f0] sm:$0xff] }
 0x374   :  { %v5799_v39 = vsel %vm4076_vm2, %v12988_v11, -inf  ;;  %v5800_v59 = vsel %vm4076_vm2, %v5657_v36, -inf  ;;  %v4112_v24 = vmax.f32 %v4110_v13, %v4111_v30  ;;  %v3921_v22 = vadd.f32 %v10003_v0, %v3920_v8  ;;  %v124_v8 = vld [vmem:[%s12560_s0 + $0x370] sm:$0xff] }
 0x375   :  { %v5801_v60 = vmax.f32 %v5799_v39, %v5800_v59  ;;  %v2556_v18 = vadd.f32 %v10003_v0, %v12989_v50  ;;  %v2625_v58 = vadd.f32 %v10003_v0, %v10032_v46  ;;  %v4107_v36 = vsel %vm4076_vm2, %v2409_v21, -inf  ;;  %v412_v11 = vld [vmem:[%s12560_s0 + $0xc70] sm:$0xff] }
 0x376   :  { %v3491_v57 = vpop.f32.mrf.mxu2  ;;  %v3923_v27 = vpop.f32.mrf.mxu3  ;;  %v4145_v47 = vmax.f32 %v4143_v31, %v4144_v62  ;;  %v4109_v46 = vmax.f32 %v4107_v36, %v4108_v40  ;;  %v4975_v6 = vsel %vm4076_vm2, %v4148_v41, -inf  ;;  %v2553_v21 = vadd.f32 %v10003_v0, %v12991_v29  ;;  %v556_v39 = vld [vmem:[%s12560_s0 + $0x10f0] sm:$0xff] }
 0x377   :  { %v5863_v12 = vmax.f32 %v5801_v60, 0.0  ;;  %v3924_v19 = vadd.f32 %v10003_v0, %v3923_v27  ;;  %v2630_v30 = vpop.f32.mrf.mxu0  ;;  %v10143_v13 = vpop.f32.mrf.mxu1  ;;  %v4216_v62 = vsel %vm4076_vm2, %v2628_v37, -inf  ;;  %v4974_v59 = vsel %vm4076_vm2, %v4112_v24, -inf  ;;  %v12992_v60 = vld [vmem:[#allocation172_spill] sm:$0xff] }
 0x378   :  { %12990 = vst [vmem:[#allocation122_spill] sm:$0xff] %v10143_v13  ;;  %v2562_v40 = vadd.f32 %v10003_v0, %v12992_v60  ;;  %v4863_v41 = vsel %vm4076_vm2, %v3921_v22, -inf  ;;  %v4180_v31 = vsel %vm4076_vm2, %v2556_v18, -inf  ;;  %v4215_v50 = vsel %vm4076_vm2, %v2625_v58, -inf  ;;  %v12993_v60 = vld [vmem:[#allocation166_spill] sm:$0xff]  ;;  %v12994_v58 = vld [vmem:[#allocation169_spill] sm:$0xff] }
 0x379   :  { %5899 = vst.msk [vmem:[%s12562_s3 + $0xb0] sm:$0xff] %vm4076_vm2, %v5863_v12  ;;  %v4864_v37 = vsel %vm4076_vm2, %v3924_v19, -inf  ;;  %v3492_v27 = vadd.f32 %v10003_v0, %v3491_v57  ;;  %v4972_v24 = vsel %vm4076_vm2, %v4145_v47, -inf  ;;  %v4976_v29 = vmax.f32 %v4974_v59, %v4975_v6  ;;  %v12995_v57 = vld [vmem:[#allocation171_spill] sm:$0xff] }
 0x37a   :  { %v4865_v36 = vmax.f32 %v4863_v41, %v4864_v37  ;;  %6028 = vmatmul.msk.f32.gmra.mxu0 %vm598_vm1, %v124_v8  ;;  %6172 = vmatmul.msk.f32.gmra.mxu1 %vm598_vm1, %v268_v25  ;;  %v2559_v12 = vadd.f32 %v10003_v0, %v12993_v60  ;;  %v4217_v22 = vmax.f32 %v4215_v50, %v4216_v62  ;;  %v4179_v18 = vsel %vm4076_vm2, %v2553_v21, -inf }
 0x37b   :  { %6316 = vmatmul.msk.f32.gmra.mxu2 %vm598_vm1, %v412_v11  ;;  %6460 = vmatmul.msk.f32.gmra.mxu3 %vm598_vm1, %v556_v39  ;;  %v12996_v19 = vmax.f32 %v12994_v58, %v12995_v57  ;;  %v3489_v47 = vadd.f32 %v10003_v0, %v10079_v5  ;;  %v4971_v6 = vsel %vm4076_vm2, %v4109_v46, -inf  ;;  %v4181_v62 = vmax.f32 %v4179_v18, %v4180_v31  ;;  %v125_v46 = vld [vmem:[%s12560_s0 + $0x378] sm:$0xff] }
 0x37c   :  { %v10190_v25 = vsel %vm4076_vm2, %v4865_v36, -inf  ;;  %v4183_v11 = vsel %vm4076_vm2, %v2562_v40, -inf  ;;  %v4973_v39 = vmax.f32 %v4971_v6, %v4972_v24  ;;  %v4648_v59 = vsel %vm4076_vm2, %v3492_v27, -inf  ;;  %v269_v40 = vld [vmem:[%s12560_s0 + $0x7f8] sm:$0xff] }
 0x37d   :  { %v10185_v8 = vsel %vm4076_vm2, %v12996_v19, -inf  ;;  %v2631_v41 = vadd.f32 %v10003_v0, %v2630_v30  ;;  %v4182_v5 = vsel %vm4076_vm2, %v2559_v12, -inf  ;;  %v5008_v36 = vsel %vm4076_vm2, %v4217_v22, -inf  ;;  %v413_v12 = vld [vmem:[%s12560_s0 + $0xc78] sm:$0xff] }
 0x37e   :  { %v5333_v21 = vmax.f32 %v10185_v8, %v10190_v25  ;;  %v3494_v37 = vpop.f32.mrf.mxu2  ;;  %v3926_v50 = vpop.f32.mrf.mxu3  ;;  %v5384_v31 = vmax.f32 %v4976_v29, 0.0  ;;  %v4184_v27 = vmax.f32 %v4182_v5, %v4183_v11  ;;  %v4647_v30 = vsel %vm4076_vm2, %v3489_v47, -inf  ;;  %v557_v22 = vld [vmem:[%s12560_s0 + $0x10f8] sm:$0xff]  ;;  %v271_v8 = vld [vmem:[%s12560_s0 + $0x808] sm:$0xff] }
 0x37f   :  { %v2633_v60 = vpop.f32.mrf.mxu0  ;;  %v10200_v58 = vpop.f32.mrf.mxu1  ;;  %v5007_v18 = vsel %vm4076_vm2, %v4181_v62, -inf  ;;  %v4649_v57 = vmax.f32 %v4647_v30, %v4648_v59  ;;  %v5383_v19 = vmax.f32 %v4973_v39, 0.0  ;;  %v4218_v29 = vsel %vm4076_vm2, %v2631_v41, -inf }
 0x380   :  { %12997 = vst [vmem:[#allocation124_spill] sm:$0xff] %v10200_v58  ;;  %v2634_v24 = vadd.f32 %v10003_v0, %v2633_v60  ;;  %v5009_v6 = vmax.f32 %v5007_v18, %v5008_v36  ;;  %v5533_v5 = vsel %vm4076_vm2, %v5384_v31, -inf  ;;  %v5010_v62 = vsel %vm4076_vm2, %v4184_v27, -inf  ;;  %v12999_v18 = vld [vmem:[#allocation170_spill] sm:$0xff]  ;;  %v133_v58 = vld [vmem:[%s12560_s0 + $0x3b8] sm:$0xff] }
 0x381   :  { %v5224_v39 = vsel %vm4076_vm2, %v4649_v57, -inf  ;;  %v3495_v59 = vadd.f32 %v10003_v0, %v3494_v37  ;;  %v3927_v41 = vadd.f32 %v10003_v0, %v3926_v50  ;;  %v5532_v60 = vsel %vm4076_vm2, %v5383_v19, -inf  ;;  %v126_v19 = vld [vmem:[%s12560_s0 + $0x380] sm:$0xff] }
 0x382   :  { %v4219_v11 = vsel %vm4076_vm2, %v2634_v24, -inf  ;;  %6029 = vmatmul.msk.f32.gmra.mxu0 %vm598_vm1, %v125_v46  ;;  %6173 = vmatmul.msk.f32.gmra.mxu1 %vm598_vm1, %v269_v40  ;;  %v5395_v46 = vmax.f32 %v5009_v6, 0.0  ;;  %v270_v6 = vld [vmem:[%s12560_s0 + $0x800] sm:$0xff] }
 0x383   :  { %v4220_v47 = vmax.f32 %v4218_v29, %v4219_v11  ;;  %6317 = vmatmul.msk.f32.gmra.mxu2 %vm598_vm1, %v413_v12  ;;  %6461 = vmatmul.msk.f32.gmra.mxu3 %vm598_vm1, %v557_v22  ;;  %v5534_v12 = vmax.f32 %v5532_v60, %v5533_v5  ;;  %v12998_v22 = vld [vmem:[#allocation168_spill] sm:$0xff]  ;;  %v414_v5 = vld [vmem:[%s12560_s0 + $0xc80] sm:$0xff]  ;;  %v4866_v60 = vsel %vm4076_vm2, %v3927_v41, -inf }
 0x384   :  { %v13000_v31 = vmax.f32 %v12998_v22, %v12999_v18  ;;  %v5550_v22 = vsel %vm4076_vm2, %v5395_v46, -inf  ;;  %v13004_v46 = vld [vmem:[#allocation176_spill] sm:$0xff] }
 0x385   :  { %v5011_v36 = vsel %vm4076_vm2, %v4220_v47, -inf }
 0x386   :  { %v5012_v40 = vmax.f32 %v5010_v62, %v5011_v36  ;;  %v3497_v30 = vpop.f32.mrf.mxu2  ;;  %v3929_v24 = vpop.f32.mrf.mxu3  ;;  %v5223_v27 = vsel %vm4076_vm2, %v13000_v31, -inf  ;;  %v558_v62 = vld [vmem:[%s12560_s0 + $0x1100] sm:$0xff]  ;;  %v4650_v36 = vsel %vm4076_vm2, %v3495_v59, -inf  ;;  %v5748_v31 = vsel %vm4076_vm2, %v5534_v12, -inf  ;;  %v13002_v59 = vld [vmem:[#allocation177_spill] sm:$0xff] }
 0x387   :  { %v3498_v57 = vadd.f32 %v10003_v0, %v3497_v30  ;;  %v3930_v37 = vadd.f32 %v10003_v0, %v3929_v24  ;;  %v10236_v29 = vpop.f32.mrf.mxu0  ;;  %v10238_v50 = vpop.f32.mrf.mxu1  ;;  %v5225_v11 = vmax.f32 %v5223_v27, %v5224_v39  ;;  %v13001_v27 = vld [vmem:[#allocation175_spill] sm:$0xff] }
 0x388   :  { %v5396_v47 = vmax.f32 %v5012_v40, 0.0  ;;  %v13003_v17 = vmax.f32 %v13001_v27, %v13002_v59 }
 0x389   :  { %v4651_v30 = vsel %vm4076_vm2, %v3498_v57, -inf  ;;  %v4867_v24 = vsel %vm4076_vm2, %v3930_v37, -inf  ;;  %v13005_v37 = vld [vmem:[#allocation178_spill] sm:$0xff] }
 0x38a   :  { %v5551_v39 = vsel %vm4076_vm2, %v5396_v47, -inf  ;;  %v4652_v40 = vmax.f32 %v4650_v36, %v4651_v30  ;;  %v4868_v18 = vmax.f32 %v4866_v60, %v4867_v24  ;;  %6030 = vmatmul.msk.f32.gmra.mxu0 %vm598_vm1, %v126_v19  ;;  %6174 = vmatmul.msk.f32.gmra.mxu1 %vm598_vm1, %v270_v6  ;;  %v5226_v41 = vsel %vm4076_vm2, %v13003_v17, -inf }
 0x38b   :  { %v5552_v57 = vmax.f32 %v5550_v22, %v5551_v39  ;;  %6318 = vmatmul.msk.f32.gmra.mxu2 %vm598_vm1, %v414_v5  ;;  %6462 = vmatmul.msk.f32.gmra.mxu3 %vm598_vm1, %v558_v62  ;;  %v13006_v47 = vmax.f32 %v13004_v46, %v13005_v37  ;;  %v5467_v19 = vmax.f32 %v5225_v11, 0.0  ;;  %v5503_v60 = vmax.f32 %v5333_v21, 0.0  ;;  %v415_v21 = vld [vmem:[%s12560_s0 + $0xc88] sm:$0xff] }
 0x38c   :  { %v5227_v6 = vsel %vm4076_vm2, %v4652_v40, -inf  ;;  %v5335_v12 = vsel %vm4076_vm2, %v4868_v18, -inf  ;;  %v127_v40 = vld [vmem:[%s12560_s0 + $0x388] sm:$0xff] }
 0x38d   :  { %v5334_v36 = vsel %vm4076_vm2, %v13006_v47, -inf  ;;  %v5749_v17 = vsel %vm4076_vm2, %v5552_v57, -inf  ;;  %v5228_v30 = vmax.f32 %v5226_v41, %v5227_v6  ;;  %v559_v18 = vld [vmem:[%s12560_s0 + $0x1108] sm:$0xff]  ;;  %v10295_v41 = vsel %vm4076_vm2, %v5503_v60, -inf }
 0x38e   :  { %v5336_v5 = vmax.f32 %v5334_v36, %v5335_v12  ;;  %v5750_v24 = vmax.f32 %v5748_v31, %v5749_v17  ;;  %v3500_v62 = vpop.f32.mrf.mxu2  ;;  %v3932_v22 = vpop.f32.mrf.mxu3  ;;  %v5658_v31 = vsel %vm4076_vm2, %v5467_v19, -inf  ;;  %13007 = vst [vmem:[#allocation121_spill] sm:$0xff] %v10295_v41  ;;  %v13009_v36 = vld [vmem:[#allocation108_spill] sm:$0xff]  ;;  %v13010_v19 = vld [vmem:[#allocation110_spill] sm:$0xff] }
 0x38f   :  { %v5468_v39 = vmax.f32 %v5228_v30, 0.0  ;;  %v10277_v59 = vpop.f32.mrf.mxu0  ;;  %v10279_v11 = vpop.f32.mrf.mxu1  ;;  %v13011_v6 = vmax.f32 %v13009_v36, %v13010_v19  ;;  %v3501_v30 = vadd.f32 %v10003_v0, %v3500_v62  ;;  %v272_v62 = vld [vmem:[%s12560_s0 + $0x810] sm:$0xff] }
 0x390   :  { %v5504_v27 = vmax.f32 %v5336_v5, 0.0  ;;  %v5846_v25 = vmax.f32 %v5750_v24, 0.0  ;;  %v3933_v5 = vadd.f32 %v10003_v0, %v3932_v22  ;;  %v416_v22 = vld [vmem:[%s12560_s0 + $0xc90] sm:$0xff] }
 0x391   :  { %v5659_v57 = vsel %vm4076_vm2, %v5468_v39, -inf  ;;  %v5802_v12 = vsel %vm4076_vm2, %v13011_v6, -inf }
 0x392   :  { %v10299_v46 = vsel %vm4076_vm2, %v5504_v27, -inf  ;;  %5882 = vst.msk [vmem:[%s12562_s3 + $0x28] sm:$0xff] %vm4076_vm2, %v5846_v25  ;;  %v5660_v37 = vmax.f32 %v5658_v31, %v5659_v57  ;;  %6031 = vmatmul.msk.f32.gmra.mxu0 %vm598_vm1, %v127_v40  ;;  %6175 = vmatmul.msk.f32.gmra.mxu1 %vm598_vm1, %v271_v8  ;;  %v560_v31 = vld [vmem:[%s12560_s0 + $0x1110] sm:$0xff]  ;;  %v10341_v57 = vsel %vm4076_vm2, %v3501_v30, -inf }
 0x393   :  { %13008 = vst [vmem:[#allocation123_spill] sm:$0xff] %v10299_v46  ;;  %6319 = vmatmul.msk.f32.gmra.mxu2 %vm598_vm1, %v415_v21  ;;  %6463 = vmatmul.msk.f32.gmra.mxu3 %vm598_vm1, %v559_v18  ;;  %v128_v18 = vld [vmem:[%s12560_s0 + $0x390] sm:$0xff] }
 0x394   :  { %v5803_v60 = vsel %vm4076_vm2, %v5660_v37, -inf  ;;  %13014 = vst [vmem:[#allocation128_spill] sm:$0xff] %v10341_v57  ;;  %v10344_v37 = vsel %vm4076_vm2, %v3933_v5, -inf }
 0x395   :  { %v5804_v17 = vmax.f32 %v5802_v12, %v5803_v60  ;;  %13015 = vst [vmem:[#allocation130_spill] sm:$0xff] %v10344_v37  ;;  %v131_v12 = vld [vmem:[%s12560_s0 + $0x3a8] sm:$0xff] }
 0x396   :  { %v3503_v24 = vpop.f32.mrf.mxu2  ;;  %v3935_v39 = vpop.f32.mrf.mxu3 }
 0x397   :  { %v5864_v27 = vmax.f32 %v5804_v17, 0.0  ;;  %v3504_v40 = vadd.f32 %v10003_v0, %v3503_v24  ;;  %v3936_v8 = vadd.f32 %v10003_v0, %v3935_v39  ;;  %v10320_v25 = vpop.f32.mrf.mxu0  ;;  %v10322_v21 = vpop.f32.mrf.mxu1  ;;  %v129_v24 = vld [vmem:[%s12560_s0 + $0x398] sm:$0xff] }
 0x398   :  { %13012 = vst [vmem:[#allocation32_spill] sm:$0xff] %v10320_v25  ;;  %v273_v39 = vld [vmem:[%s12560_s0 + $0x818] sm:$0xff] }
 0x399   :  { %13013 = vst [vmem:[#allocation80_spill] sm:$0xff] %v10322_v21  ;;  %v10347_v36 = vsel %vm4076_vm2, %v3504_v40, -inf  ;;  %v10350_v19 = vsel %vm4076_vm2, %v3936_v8, -inf  ;;  %v561_v40 = vld [vmem:[%s12560_s0 + $0x1118] sm:$0xff]  ;;  %v13118_v21 = vld [vmem:[#allocation91_spill] sm:$0xff] }
 0x39a   :  { %5900 = vst.msk [vmem:[%s12562_s3 + $0xb8] sm:$0xff] %vm4076_vm2, %v5864_v27  ;;  %6032 = vmatmul.msk.f32.gmra.mxu0 %vm598_vm1, %v128_v18  ;;  %6176 = vmatmul.msk.f32.gmra.mxu1 %vm598_vm1, %v272_v62  ;;  %v417_v27 = vld [vmem:[%s12560_s0 + $0xc98] sm:$0xff] }
 0x39b   :  { %13016 = vst [vmem:[#allocation129_spill] sm:$0xff] %v10347_v36  ;;  %6320 = vmatmul.msk.f32.gmra.mxu2 %vm598_vm1, %v416_v22  ;;  %6464 = vmatmul.msk.f32.gmra.mxu3 %vm598_vm1, %v560_v31  ;;  %v13116_v36 = vld [vmem:[#allocation93_spill] sm:$0xff] }
 0x39c   :  { %13017 = vst [vmem:[#allocation131_spill] sm:$0xff] %v10350_v19 }
 0x39e   :  { %v3506_v60 = vpop.f32.mrf.mxu2  ;;  %v3938_v17 = vpop.f32.mrf.mxu3 }
 0x39f   :  { %v10360_v30 = vpop.f32.mrf.mxu0  ;;  %v10362_v5 = vpop.f32.mrf.mxu1  ;;  %v3507_v8 = vadd.f32 %v10003_v0, %v3506_v60  ;;  %v3939_v18 = vadd.f32 %v10003_v0, %v3938_v17  ;;  %v274_v60 = vld [vmem:[%s12560_s0 + $0x820] sm:$0xff] }
 0x3a0   :  { %v418_v17 = vld [vmem:[%s12560_s0 + $0xca0] sm:$0xff] }
 0x3a2   :  { %6033 = vmatmul.msk.f32.gmra.mxu0 %vm598_vm1, %v129_v24  ;;  %6177 = vmatmul.msk.f32.gmra.mxu1 %vm598_vm1, %v273_v39  ;;  %v130_v24 = vld [vmem:[%s12560_s0 + $0x3a0] sm:$0xff] }
 0x3a3   :  { %6321 = vmatmul.msk.f32.gmra.mxu2 %vm598_vm1, %v417_v27  ;;  %6465 = vmatmul.msk.f32.gmra.mxu3 %vm598_vm1, %v561_v40  ;;  %v562_v39 = vld [vmem:[%s12560_s0 + $0x1120] sm:$0xff]  ;;  %v10401_v27 = vsel %vm4076_vm2, %v3507_v8, -inf  ;;  %v10404_v40 = vsel %vm4076_vm2, %v3939_v18, -inf }
 0x3a4   :  { %13020 = vst [vmem:[#allocation78_spill] sm:$0xff] %v10401_v27 }
 0x3a5   :  { %13021 = vst [vmem:[#allocation28_spill] sm:$0xff] %v10404_v40 }
 0x3a6   :  { %v3509_v62 = vpop.f32.mrf.mxu2  ;;  %v3941_v22 = vpop.f32.mrf.mxu3 }
 0x3a7   :  { %v3510_v31 = vadd.f32 %v10003_v0, %v3509_v62  ;;  %v3942_v47 = vadd.f32 %v10003_v0, %v3941_v22  ;;  %v10384_v9 = vpop.f32.mrf.mxu0  ;;  %v10386_v3 = vpop.f32.mrf.mxu1 }
 0x3a8   :  { %13018 = vst [vmem:[#allocation30_spill] sm:$0xff] %v10384_v9 }
 0x3a9   :  { %13019 = vst [vmem:[#allocation72_spill] sm:$0xff] %v10386_v3  ;;  %v10407_v62 = vsel %vm4076_vm2, %v3510_v31, -inf  ;;  %v10410_v22 = vsel %vm4076_vm2, %v3942_v47, -inf  ;;  %v572_v3 = vld [vmem:[%s12560_s0 + $0x1170] sm:$0xff] }
 0x3aa   :  { %13022 = vst [vmem:[#allocation70_spill] sm:$0xff] %v10407_v62  ;;  %6034 = vmatmul.msk.f32.gmra.mxu0 %vm598_vm1, %v130_v24  ;;  %6178 = vmatmul.msk.f32.gmra.mxu1 %vm598_vm1, %v274_v60  ;;  %v275_v24 = vld [vmem:[%s12560_s0 + $0x828] sm:$0xff] }
 0x3ab   :  { %13023 = vst [vmem:[#allocation26_spill] sm:$0xff] %v10410_v22  ;;  %6322 = vmatmul.msk.f32.gmra.mxu2 %vm598_vm1, %v418_v17  ;;  %6466 = vmatmul.msk.f32.gmra.mxu3 %vm598_vm1, %v562_v39  ;;  %v419_v60 = vld [vmem:[%s12560_s0 + $0xca8] sm:$0xff] }
 0x3ac   :  { %v563_v17 = vld [vmem:[%s12560_s0 + $0x1128] sm:$0xff] }
 0x3ad   :  { %v13081_v22 = vld [vmem:[#allocation51_spill] sm:$0xff] }
 0x3ae   :  { %v3512_v8 = vpop.f32.mrf.mxu2  ;;  %v3944_v18 = vpop.f32.mrf.mxu3 }
 0x3af   :  { %v10420_v31 = vpop.f32.mrf.mxu0  ;;  %v10422_v47 = vpop.f32.mrf.mxu1  ;;  %v3513_v39 = vadd.f32 %v10003_v0, %v3512_v8  ;;  %v3945_v6 = vadd.f32 %v10003_v0, %v3944_v18  ;;  %v276_v8 = vld [vmem:[%s12560_s0 + $0x830] sm:$0xff] }
 0x3b0   :  { %13024 = vst [vmem:[#allocation74_spill] sm:$0xff] %v10420_v31  ;;  %v420_v18 = vld [vmem:[%s12560_s0 + $0xcb0] sm:$0xff] }
 0x3b1   :  { %13025 = vst [vmem:[#allocation76_spill] sm:$0xff] %v10422_v47 }
 0x3b2   :  { %6035 = vmatmul.msk.f32.gmra.mxu0 %vm598_vm1, %v131_v12  ;;  %6179 = vmatmul.msk.f32.gmra.mxu1 %vm598_vm1, %v275_v24  ;;  %v132_v12 = vld [vmem:[%s12560_s0 + $0x3b0] sm:$0xff]  ;;  %v10464_v24 = vsel %vm4076_vm2, %v3945_v6, -inf }
 0x3b3   :  { %6323 = vmatmul.msk.f32.gmra.mxu2 %vm598_vm1, %v419_v60  ;;  %6467 = vmatmul.msk.f32.gmra.mxu3 %vm598_vm1, %v563_v17  ;;  %13029 = vst [vmem:[#allocation134_spill] sm:$0xff] %v10464_v24  ;;  %v13065_v24 = vld [vmem:[#allocation21_spill] sm:$0xff] }
 0x3b6   :  { %v3515_v56 = vpop.f32.mrf.mxu2  ;;  %v3947_v49 = vpop.f32.mrf.mxu3 }
 0x3b7   :  { %v3516_v46 = vadd.f32 %v10003_v0, %v3515_v56  ;;  %v3948_v41 = vadd.f32 %v10003_v0, %v3947_v49  ;;  %v10444_v42 = vpop.f32.mrf.mxu0  ;;  %v10446_v63 = vpop.f32.mrf.mxu1  ;;  %v564_v49 = vld [vmem:[%s12560_s0 + $0x1130] sm:$0xff]  ;;  %v10461_v56 = vsel %vm4076_vm2, %v3513_v39, -inf }
 0x3b8   :  { %13026 = vst [vmem:[#allocation132_spill] sm:$0xff] %v10444_v42 }
 0x3b9   :  { %13027 = vst [vmem:[#allocation126_spill] sm:$0xff] %v10446_v63  ;;  %v10467_v60 = vsel %vm4076_vm2, %v3516_v46, -inf  ;;  %v10470_v17 = vsel %vm4076_vm2, %v3948_v41, -inf }
 0x3ba   :  { %13028 = vst [vmem:[#allocation140_spill] sm:$0xff] %v10461_v56  ;;  %6036 = vmatmul.msk.f32.gmra.mxu0 %vm598_vm1, %v132_v12  ;;  %6180 = vmatmul.msk.f32.gmra.mxu1 %vm598_vm1, %v276_v8  ;;  %v277_v12 = vld [vmem:[%s12560_s0 + $0x838] sm:$0xff] }
 0x3bb   :  { %13030 = vst [vmem:[#allocation137_spill] sm:$0xff] %v10467_v60  ;;  %6324 = vmatmul.msk.f32.gmra.mxu2 %vm598_vm1, %v420_v18  ;;  %6468 = vmatmul.msk.f32.gmra.mxu3 %vm598_vm1, %v564_v49  ;;  %v421_v8 = vld [vmem:[%s12560_s0 + $0xcb8] sm:$0xff]  ;;  %v2808_v60 = vadd.f32 %v10003_v0, %v13065_v24 }
 0x3bc   :  { %13031 = vst [vmem:[#allocation139_spill] sm:$0xff] %v10470_v17  ;;  %v565_v18 = vld [vmem:[%s12560_s0 + $0x1138] sm:$0xff] }
 0x3bd   :  { %v13064_v17 = vld [vmem:[#allocation17_spill] sm:$0xff] }
 0x3be   :  { %v3518_v6 = vpop.f32.mrf.mxu2  ;;  %v3950_v46 = vpop.f32.mrf.mxu3  ;;  %v13069_v24 = vld [vmem:[#allocation29_spill] sm:$0xff] }
 0x3bf   :  { %v10480_v39 = vpop.f32.mrf.mxu0  ;;  %v10482_v41 = vpop.f32.mrf.mxu1  ;;  %v3519_v49 = vadd.f32 %v10003_v0, %v3518_v6  ;;  %v3951_v13 = vadd.f32 %v10003_v0, %v3950_v46  ;;  %v278_v6 = vld [vmem:[%s12560_s0 + $0x840] sm:$0xff]  ;;  %v2820_v16 = vadd.f32 %v10003_v0, %v13069_v24  ;;  %v13073_v24 = vld [vmem:[#allocation23_spill] sm:$0xff] }
 0x3c0   :  { %13032 = vst [vmem:[#allocation136_spill] sm:$0xff] %v10480_v39  ;;  %v422_v46 = vld [vmem:[%s12560_s0 + $0xcc0] sm:$0xff]  ;;  %v2811_v42 = vadd.f32 %v10003_v0, %v13073_v24  ;;  %v428_v39 = vld [vmem:[%s12560_s0 + $0xcf0] sm:$0xff] }
 0x3c1   :  { %13033 = vst [vmem:[#allocation138_spill] sm:$0xff] %v10482_v41  ;;  %v13075_v41 = vld [vmem:[#allocation31_spill] sm:$0xff] }
 0x3c2   :  { %6037 = vmatmul.msk.f32.gmra.mxu0 %vm598_vm1, %v133_v58  ;;  %6181 = vmatmul.msk.f32.gmra.mxu1 %vm598_vm1, %v277_v12  ;;  %v134_v58 = vld [vmem:[%s12560_s0 + $0x3c0] sm:$0xff]  ;;  %v10524_v12 = vsel %vm4076_vm2, %v3951_v13, -inf }
 0x3c3   :  { %6325 = vmatmul.msk.f32.gmra.mxu2 %vm598_vm1, %v421_v8  ;;  %6469 = vmatmul.msk.f32.gmra.mxu3 %vm598_vm1, %v565_v18  ;;  %13037 = vst [vmem:[#allocation146_spill] sm:$0xff] %v10524_v12 }
 0x3c6   :  { %v3521_v35 = vpop.f32.mrf.mxu2  ;;  %v3953_v4 = vpop.f32.mrf.mxu3 }
 0x3c7   :  { %v3522_v20 = vadd.f32 %v10003_v0, %v3521_v35  ;;  %v3954_v28 = vadd.f32 %v10003_v0, %v3953_v4  ;;  %v10504_v33 = vpop.f32.mrf.mxu0  ;;  %v10506_v15 = vpop.f32.mrf.mxu1  ;;  %v566_v4 = vld [vmem:[%s12560_s0 + $0x1140] sm:$0xff]  ;;  %v10521_v35 = vsel %vm4076_vm2, %v3519_v49, -inf }
 0x3c8   :  { %13034 = vst [vmem:[#allocation40_spill] sm:$0xff] %v10504_v33 }
 0x3c9   :  { %13035 = vst [vmem:[#allocation92_spill] sm:$0xff] %v10506_v15  ;;  %v10527_v8 = vsel %vm4076_vm2, %v3522_v20, -inf  ;;  %v10530_v18 = vsel %vm4076_vm2, %v3954_v28, -inf  ;;  %v135_v15 = vld [vmem:[%s12560_s0 + $0x3c8] sm:$0xff] }
 0x3ca   :  { %13036 = vst [vmem:[#allocation144_spill] sm:$0xff] %v10521_v35  ;;  %6038 = vmatmul.msk.f32.gmra.mxu0 %vm598_vm1, %v134_v58  ;;  %6182 = vmatmul.msk.f32.gmra.mxu1 %vm598_vm1, %v278_v6  ;;  %v279_v58 = vld [vmem:[%s12560_s0 + $0x848] sm:$0xff] }
 0x3cb   :  { %13038 = vst [vmem:[#allocation145_spill] sm:$0xff] %v10527_v8  ;;  %6326 = vmatmul.msk.f32.gmra.mxu2 %vm598_vm1, %v422_v46  ;;  %6470 = vmatmul.msk.f32.gmra.mxu3 %vm598_vm1, %v566_v4  ;;  %v423_v6 = vld [vmem:[%s12560_s0 + $0xcc8] sm:$0xff]  ;;  %v13058_v8 = vld [vmem:[#allocation13_spill] sm:$0xff] }
 0x3cc   :  { %13039 = vst [vmem:[#allocation147_spill] sm:$0xff] %v10530_v18  ;;  %v567_v46 = vld [vmem:[%s12560_s0 + $0x1148] sm:$0xff] }
 0x3ce   :  { %v3524_v13 = vpop.f32.mrf.mxu2  ;;  %v3956_v20 = vpop.f32.mrf.mxu3 }
 0x3cf   :  { %v10540_v49 = vpop.f32.mrf.mxu0  ;;  %v10542_v28 = vpop.f32.mrf.mxu1  ;;  %v3525_v4 = vadd.f32 %v10003_v0, %v3524_v13  ;;  %v3957_v33 = vadd.f32 %v10003_v0, %v3956_v20  ;;  %v280_v13 = vld [vmem:[%s12560_s0 + $0x850] sm:$0xff] }
 0x3d0   :  { %13040 = vst [vmem:[#allocation38_spill] sm:$0xff] %v10540_v49  ;;  %v424_v20 = vld [vmem:[%s12560_s0 + $0xcd0] sm:$0xff] }
 0x3d1   :  { %13041 = vst [vmem:[#allocation84_spill] sm:$0xff] %v10542_v28 }
 0x3d2   :  { %6039 = vmatmul.msk.f32.gmra.mxu0 %vm598_vm1, %v135_v15  ;;  %6183 = vmatmul.msk.f32.gmra.mxu1 %vm598_vm1, %v279_v58  ;;  %v136_v15 = vld [vmem:[%s12560_s0 + $0x3d0] sm:$0xff]  ;;  %v10584_v58 = vsel %vm4076_vm2, %v3957_v33, -inf }
 0x3d3   :  { %6327 = vmatmul.msk.f32.gmra.mxu2 %vm598_vm1, %v423_v6  ;;  %6471 = vmatmul.msk.f32.gmra.mxu3 %vm598_vm1, %v567_v46  ;;  %13045 = vst [vmem:[#allocation34_spill] sm:$0xff] %v10584_v58 }
 0x3d6   :  { %v3527_v28 = vpop.f32.mrf.mxu2  ;;  %v3959_v49 = vpop.f32.mrf.mxu3 }
 0x3d7   :  { %v3528_v54 = vadd.f32 %v10003_v0, %v3527_v28  ;;  %v3960_v55 = vadd.f32 %v10003_v0, %v3959_v49  ;;  %v10564_v18 = vpop.f32.mrf.mxu0  ;;  %v10566_v12 = vpop.f32.mrf.mxu1  ;;  %v568_v49 = vld [vmem:[%s12560_s0 + $0x1150] sm:$0xff]  ;;  %v10581_v28 = vsel %vm4076_vm2, %v3525_v4, -inf }
 0x3d8   :  { %13042 = vst [vmem:[#allocation90_spill] sm:$0xff] %v10564_v18 }
 0x3d9   :  { %13043 = vst [vmem:[#allocation36_spill] sm:$0xff] %v10566_v12  ;;  %v10587_v6 = vsel %vm4076_vm2, %v3528_v54, -inf  ;;  %v10590_v46 = vsel %vm4076_vm2, %v3960_v55, -inf  ;;  %v137_v12 = vld [vmem:[%s12560_s0 + $0x3d8] sm:$0xff] }
 0x3da   :  { %13044 = vst [vmem:[#allocation82_spill] sm:$0xff] %v10581_v28  ;;  %6040 = vmatmul.msk.f32.gmra.mxu0 %vm598_vm1, %v136_v15  ;;  %6184 = vmatmul.msk.f32.gmra.mxu1 %vm598_vm1, %v280_v13  ;;  %v281_v15 = vld [vmem:[%s12560_s0 + $0x858] sm:$0xff] }
 0x3db   :  { %13046 = vst [vmem:[#allocation86_spill] sm:$0xff] %v10587_v6  ;;  %6328 = vmatmul.msk.f32.gmra.mxu2 %vm598_vm1, %v424_v20  ;;  %6472 = vmatmul.msk.f32.gmra.mxu3 %vm598_vm1, %v568_v49  ;;  %v425_v13 = vld [vmem:[%s12560_s0 + $0xcd8] sm:$0xff] }
 0x3dc   :  { %13047 = vst [vmem:[#allocation88_spill] sm:$0xff] %v10590_v46  ;;  %v569_v20 = vld [vmem:[%s12560_s0 + $0x1158] sm:$0xff] }
 0x3de   :  { %v3530_v33 = vpop.f32.mrf.mxu2  ;;  %v3962_v54 = vpop.f32.mrf.mxu3 }
 0x3df   :  { %v10600_v4 = vpop.f32.mrf.mxu0  ;;  %v10602_v55 = vpop.f32.mrf.mxu1  ;;  %v3531_v49 = vadd.f32 %v10003_v0, %v3530_v33  ;;  %v3963_v18 = vadd.f32 %v10003_v0, %v3962_v54  ;;  %v282_v33 = vld [vmem:[%s12560_s0 + $0x860] sm:$0xff] }
 0x3e0   :  { %13048 = vst [vmem:[#allocation148_spill] sm:$0xff] %v10600_v4  ;;  %v426_v54 = vld [vmem:[%s12560_s0 + $0xce0] sm:$0xff] }
 0x3e1   :  { %13049 = vst [vmem:[#allocation142_spill] sm:$0xff] %v10602_v55 }
 0x3e2   :  { %6041 = vmatmul.msk.f32.gmra.mxu0 %vm598_vm1, %v137_v12  ;;  %6185 = vmatmul.msk.f32.gmra.mxu1 %vm598_vm1, %v281_v15  ;;  %v138_v12 = vld [vmem:[%s12560_s0 + $0x3e0] sm:$0xff]  ;;  %v10644_v15 = vsel %vm4076_vm2, %v3963_v18, -inf  ;;  %v13056_v18 = vld [vmem:[#allocation5_spill] sm:$0xff] }
 0x3e3   :  { %6329 = vmatmul.msk.f32.gmra.mxu2 %vm598_vm1, %v425_v13  ;;  %6473 = vmatmul.msk.f32.gmra.mxu3 %vm598_vm1, %v569_v20  ;;  %13053 = vst [vmem:[#allocation155_spill] sm:$0xff] %v10644_v15 }
 0x3e6   :  { %v3533_v46 = vpop.f32.mrf.mxu2  ;;  %v3965_v58 = vpop.f32.mrf.mxu3 }
 0x3e7   :  { %v3534_v6 = vadd.f32 %v10003_v0, %v3533_v46  ;;  %v3966_v28 = vadd.f32 %v10003_v0, %v3965_v58  ;;  %v10624_v55 = vpop.f32.mrf.mxu0  ;;  %v10626_v4 = vpop.f32.mrf.mxu1  ;;  %v570_v58 = vld [vmem:[%s12560_s0 + $0x1160] sm:$0xff]  ;;  %v10641_v46 = vsel %vm4076_vm2, %v3531_v49, -inf  ;;  %v13057_v49 = vld [vmem:[#allocation9_spill] sm:$0xff] }
 0x3e8   :  { %13050 = vst [vmem:[#allocation156_spill] sm:$0xff] %v10624_v55  ;;  %v13059_v55 = vld [vmem:[#allocation3_spill] sm:$0xff] }
 0x3e9   :  { %13051 = vst [vmem:[#allocation150_spill] sm:$0xff] %v10626_v4  ;;  %v10647_v13 = vsel %vm4076_vm2, %v3534_v6, -inf  ;;  %v10650_v20 = vsel %vm4076_vm2, %v3966_v28, -inf  ;;  %v2784_v6 = vadd.f32 %v10003_v0, %v13056_v18  ;;  %v2790_v28 = vadd.f32 %v10003_v0, %v13057_v49  ;;  %v139_v18 = vld [vmem:[%s12560_s0 + $0x3e8] sm:$0xff] }
 0x3ea   :  { %13052 = vst [vmem:[#allocation153_spill] sm:$0xff] %v10641_v46  ;;  %6042 = vmatmul.msk.f32.gmra.mxu0 %vm598_vm1, %v138_v12  ;;  %6186 = vmatmul.msk.f32.gmra.mxu1 %vm598_vm1, %v282_v33  ;;  %v2796_v4 = vadd.f32 %v10003_v0, %v13058_v8  ;;  %v2781_v12 = vadd.f32 %v10003_v0, %v13059_v55  ;;  %v283_v8 = vld [vmem:[%s12560_s0 + $0x868] sm:$0xff] }
 0x3eb   :  { %13054 = vst [vmem:[#allocation152_spill] sm:$0xff] %v10647_v13  ;;  %6330 = vmatmul.msk.f32.gmra.mxu2 %vm598_vm1, %v426_v54  ;;  %6474 = vmatmul.msk.f32.gmra.mxu3 %vm598_vm1, %v570_v58  ;;  %v13063_v49 = vld [vmem:[#allocation11_spill] sm:$0xff] }
 0x3ec   :  { %13055 = vst [vmem:[#allocation154_spill] sm:$0xff] %v10650_v20  ;;  %v13060_v20 = vld [vmem:[#allocation7_spill] sm:$0xff]  ;;  %v2793_v15 = vadd.f32 %v10003_v0, %v13063_v49  ;;  %v10695_v35 = vsel %vm4076_vm2, %v2796_v4, -inf  ;;  %v2802_v49 = vadd.f32 %v10003_v0, %v13064_v17  ;;  %v4293_v56 = vsel %vm4076_vm2, %v2781_v12, -inf }
 0x3ed   :  { %v2787_v33 = vadd.f32 %v10003_v0, %v13060_v20  ;;  %v427_v55 = vld [vmem:[%s12560_s0 + $0xce8] sm:$0xff] }
 0x3ee   :  { %v3536_v13 = vpop.f32.mrf.mxu2  ;;  %v3968_v46 = vpop.f32.mrf.mxu3  ;;  %v571_v20 = vld [vmem:[%s12560_s0 + $0x1168] sm:$0xff]  ;;  %v10710_v17 = vsel %vm4076_vm2, %v2793_v15, -inf }
 0x3ef   :  { %v10670_v54 = vpop.f32.mrf.mxu0  ;;  %v10672_v58 = vpop.f32.mrf.mxu1  ;;  %v3537_v12 = vadd.f32 %v10003_v0, %v3536_v13 }
 0x3f0   :  { %13061 = vst [vmem:[#allocation48_spill] sm:$0xff] %v10670_v54  ;;  %v10692_v54 = vsel %vm4076_vm2, %v2790_v28, -inf }
 0x3f1   :  { %13062 = vst [vmem:[#allocation104_spill] sm:$0xff] %v10672_v58  ;;  %v10689_v58 = vsel %vm4076_vm2, %v2784_v6, -inf  ;;  %v4296_v6 = vsel %vm4076_vm2, %v2787_v33, -inf  ;;  %v3969_v33 = vadd.f32 %v10003_v0, %v3968_v46  ;;  %v10755_v47 = vsel %vm4076_vm2, %v3537_v12, -inf }
 0x3f2   :  { %6043 = vmatmul.msk.f32.gmra.mxu0 %vm598_vm1, %v139_v18  ;;  %6187 = vmatmul.msk.f32.gmra.mxu1 %vm598_vm1, %v283_v8  ;;  %v4295_v4 = vmax.f32 %v4293_v56, %v10689_v58  ;;  %v4298_v28 = vmax.f32 %v4296_v6, %v10692_v54  ;;  %v13066_v18 = vld [vmem:[#allocation15_spill] sm:$0xff]  ;;  %v4306_v54 = vsel %vm4076_vm2, %v2808_v60, -inf  ;;  %v13068_v58 = vld [vmem:[#allocation25_spill] sm:$0xff]  ;;  %v140_v60 = vld [vmem:[%s12560_s0 + $0x3f0] sm:$0xff]  ;;  %13077 = vst [vmem:[#allocation161_spill] sm:$0xff] %v10755_v47  ;;  %v4308_v12 = vsel %vm4076_vm2, %v2811_v42, -inf }
 0x3f3   :  { %6331 = vmatmul.msk.f32.gmra.mxu2 %vm598_vm1, %v427_v55  ;;  %6475 = vmatmul.msk.f32.gmra.mxu3 %vm598_vm1, %v571_v20  ;;  %v2799_v8 = vadd.f32 %v10003_v0, %v13066_v18  ;;  %v4303_v55 = vsel %vm4076_vm2, %v2802_v49, -inf  ;;  %v13067_v20 = vld [vmem:[#allocation19_spill] sm:$0xff]  ;;  %v2814_v15 = vadd.f32 %v10003_v0, %v13068_v58  ;;  %v13070_v18 = vld [vmem:[#allocation33_spill] sm:$0xff]  ;;  %v284_v58 = vld [vmem:[%s12560_s0 + $0x870] sm:$0xff]  ;;  %v10758_v24 = vsel %vm4076_vm2, %v3969_v33, -inf }
 0x3f4   :  { %v2805_v56 = vadd.f32 %v10003_v0, %v13067_v20  ;;  %v2826_v13 = vadd.f32 %v10003_v0, %v13070_v18  ;;  %v13074_v18 = vld [vmem:[#allocation27_spill] sm:$0xff]  ;;  %13078 = vst [vmem:[#allocation163_spill] sm:$0xff] %v10758_v24  ;;  %v13091_v47 = vld [vmem:[#allocation45_spill] sm:$0xff] }
 0x3f5   :  { %v4309_v33 = vsel %vm4076_vm2, %v2814_v15, -inf  ;;  %v13082_v15 = vld [vmem:[#allocation37_spill] sm:$0xff] }
 0x3f6   :  { %v3539_v6 = vpop.f32.mrf.mxu2  ;;  %v3971_v32 = vpop.f32.mrf.mxu3  ;;  %v4305_v31 = vsel %vm4076_vm2, %v2805_v56, -inf  ;;  %v4310_v42 = vmax.f32 %v4308_v12, %v4309_v33  ;;  %v141_v12 = vld [vmem:[%s12560_s0 + $0x3f8] sm:$0xff]  ;;  %v13088_v33 = vmax.f32 %v10710_v17, %v10695_v35 }
 0x3f7   :  { %v3540_v46 = vadd.f32 %v10003_v0, %v3539_v6  ;;  %v3972_v49 = vadd.f32 %v10003_v0, %v3971_v32  ;;  %v10730_v63 = vpop.f32.mrf.mxu0  ;;  %v10732_v20 = vpop.f32.mrf.mxu1  ;;  %v2817_v6 = vadd.f32 %v10003_v0, %v13074_v18  ;;  %v2823_v32 = vadd.f32 %v10003_v0, %v13075_v41 }
 0x3f8   :  { %13071 = vst [vmem:[#allocation160_spill] sm:$0xff] %v10730_v63  ;;  %v13076_v63 = vld [vmem:[#allocation53_spill] sm:$0xff]  ;;  %v4307_v9 = vmax.f32 %v4305_v31, %v4306_v54  ;;  %v10795_v31 = vsel %vm4076_vm2, %v4295_v4, -inf }
 0x3f9   :  { %13072 = vst [vmem:[#allocation162_spill] sm:$0xff] %v10732_v20  ;;  %v2856_v20 = vadd.f32 %v10003_v0, %v13076_v63  ;;  %v10761_v18 = vsel %vm4076_vm2, %v3540_v46, -inf  ;;  %v10764_v41 = vsel %vm4076_vm2, %v3972_v49, -inf  ;;  %v4302_v63 = vsel %vm4076_vm2, %v2799_v8, -inf }
 0x3fa   :  { %13079 = vst [vmem:[#allocation46_spill] sm:$0xff] %v10761_v18  ;;  %6044 = vmatmul.msk.f32.gmra.mxu0 %vm598_vm1, %v140_v60  ;;  %6188 = vmatmul.msk.f32.gmra.mxu1 %vm598_vm1, %v284_v58  ;;  %v4312_v46 = vsel %vm4076_vm2, %v2820_v16, -inf  ;;  %v4315_v49 = vsel %vm4076_vm2, %v2826_v13, -inf  ;;  %v2853_v8 = vadd.f32 %v10003_v0, %v13081_v22  ;;  %v4304_v56 = vmax.f32 %v4302_v63, %v4303_v55  ;;  %v10787_v16 = vld [vmem:[%s12561_s2] ss:$0 sm:$0xff]  ;;  %v13083_v22 = vld [vmem:[#allocation41_spill] sm:$0xff] }
 0x3fb   :  { %13080 = vst [vmem:[#allocation96_spill] sm:$0xff] %v10764_v41  ;;  %6332 = vmatmul.msk.f32.gmra.mxu2 %vm598_vm1, %v428_v39  ;;  %6476 = vmatmul.msk.f32.gmra.mxu3 %vm598_vm1, %v572_v3  ;;  %v4311_v60 = vsel %vm4076_vm2, %v2817_v6, -inf  ;;  %v4314_v58 = vsel %vm4076_vm2, %v2823_v32, -inf  ;;  %v2832_v0 = vadd.f32 %v10787_v16, %v13082_v15  ;;  %v2838_v39 = vadd.f32 %v10787_v16, %v13083_v22  ;;  %v13084_v63 = vld [vmem:[#allocation35_spill] sm:$0xff] }
 0x3fc   :  { %v4330_v3 = vsel %vm4076_vm2, %v2856_v20, -inf  ;;  %v4313_v55 = vmax.f32 %v4311_v60, %v4312_v46  ;;  %v4316_v54 = vmax.f32 %v4314_v58, %v4315_v49  ;;  %v10798_v32 = vsel %vm4076_vm2, %v4298_v28, -inf  ;;  %v13085_v15 = vld [vmem:[#allocation39_spill] sm:$0xff]  ;;  %v285_v28 = vld [vmem:[%s12560_s0 + $0x878] sm:$0xff] }
 0x3fd   :  { %v2829_v41 = vadd.f32 %v10787_v16, %v13084_v63  ;;  %v2835_v24 = vadd.f32 %v10787_v16, %v13085_v15  ;;  %v4329_v22 = vsel %vm4076_vm2, %v2853_v8, -inf  ;;  %v10819_v46 = vsel %vm4076_vm2, %v13088_v33, -inf  ;;  %v429_v58 = vld [vmem:[%s12560_s0 + $0xcf8] sm:$0xff]  ;;  %v13089_v15 = vld [vmem:[#allocation56_spill] sm:$0xff]  ;;  %v13090_v33 = vld [vmem:[#allocation59_spill] sm:$0xff] }
 0x3fe   :  { %v3542_v13 = vpop.f32.mrf.mxu2  ;;  %v3974_v6 = vpop.f32.mrf.mxu3  ;;  %v10822_v49 = vsel %vm4076_vm2, %v4304_v56, -inf  ;;  %v10825_v8 = vsel %vm4076_vm2, %v4307_v9, -inf  ;;  %v4331_v60 = vmax.f32 %v4329_v22, %v4330_v3  ;;  %v573_v63 = vld [vmem:[%s12560_s0 + $0x1178] sm:$0xff]  ;;  %v4318_v35 = vsel %vm4076_vm2, %v2832_v0, -inf }
 0x3ff   :  { %v10805_v20 = vpop.f32.mrf.mxu0  ;;  %v10807_v4 = vpop.f32.mrf.mxu1  ;;  %v4321_v17 = vsel %vm4076_vm2, %v2838_v39, -inf  ;;  %v2862_v56 = vadd.f32 %v10787_v16, %v13089_v15  ;;  %v2868_v9 = vadd.f32 %v10787_v16, %v13090_v33  ;;  %v10840_v3 = vsel %vm4076_vm2, %v4310_v42, -inf  ;;  %v13092_v33 = vld [vmem:[#allocation55_spill] sm:$0xff] }
 0x400   :  { %13086 = vst [vmem:[#allocation102_spill] sm:$0xff] %v10805_v20  ;;  %v10843_v22 = vsel %vm4076_vm2, %v4313_v55, -inf  ;;  %v10846_v18 = vsel %vm4076_vm2, %v4316_v54, -inf  ;;  %v2844_v0 = vadd.f32 %v10787_v16, %v13091_v47  ;;  %v4317_v39 = vsel %vm4076_vm2, %v2829_v41, -inf  ;;  %v13094_v20 = vld [vmem:[#allocation63_spill] sm:$0xff] }
 0x401   :  { %13087 = vst [vmem:[#allocation44_spill] sm:$0xff] %v10807_v4  ;;  %v4320_v15 = vsel %vm4076_vm2, %v2835_v24, -inf  ;;  %v2859_v42 = vadd.f32 %v10787_v16, %v13092_v33  ;;  %v13093_v4 = vld [vmem:[#allocation58_spill] sm:$0xff]  ;;  %v4319_v54 = vmax.f32 %v4317_v39, %v4318_v35  ;;  %v4333_v41 = vsel %vm4076_vm2, %v2862_v56, -inf  ;;  %v13096_v35 = vld [vmem:[#allocation49_spill] sm:$0xff] }
 0x402   :  { %6045 = vmatmul.msk.f32.gmra.mxu0 %vm598_vm1, %v141_v12  ;;  %6189 = vmatmul.msk.f32.gmra.mxu1 %vm598_vm1, %v285_v28  ;;  %v2865_v55 = vadd.f32 %v10787_v16, %v13093_v4  ;;  %v4322_v47 = vmax.f32 %v4320_v15, %v4321_v17  ;;  %v5050_v12 = vsel %vm4076_vm2, %v4331_v60, -inf  ;;  %v2874_v28 = vadd.f32 %v10787_v16, %v13094_v20  ;;  %v13095_v4 = vld [vmem:[#allocation43_spill] sm:$0xff]  ;;  %v13097_v17 = vld [vmem:[#allocation62_spill] sm:$0xff] }
 0x403   :  { %6333 = vmatmul.msk.f32.gmra.mxu2 %vm598_vm1, %v429_v58  ;;  %6477 = vmatmul.msk.f32.gmra.mxu3 %vm598_vm1, %v573_v63  ;;  %v4336_v24 = vsel %vm4076_vm2, %v2868_v9, -inf  ;;  %v3543_v33 = vadd.f32 %v10787_v16, %v3542_v13  ;;  %v3975_v40 = vadd.f32 %v10787_v16, %v3974_v6  ;;  %v2841_v58 = vadd.f32 %v10787_v16, %v13095_v4 }
 0x404   :  { %v10870_v63 = vsel %vm4076_vm2, %v2844_v0, -inf  ;;  %v2850_v60 = vadd.f32 %v10787_v16, %v13096_v35  ;;  %v2871_v20 = vadd.f32 %v10787_v16, %v13097_v17  ;;  %v4332_v9 = vsel %vm4076_vm2, %v2859_v42, -inf  ;;  %v142_v35 = vld [vmem:[%s12560_s0 + $0x400] sm:$0xff] }
 0x405   :  { %v4335_v13 = vsel %vm4076_vm2, %v2865_v55, -inf  ;;  %v286_v17 = vld [vmem:[%s12560_s0 + $0x880] sm:$0xff]  ;;  %v5051_v42 = vmax.f32 %v10795_v31, %v5050_v12  ;;  %v4334_v62 = vmax.f32 %v4332_v9, %v4333_v41  ;;  %v10902_v27 = vsel %vm4076_vm2, %v3975_v40, -inf  ;;  %v13104_v41 = vld [vmem:[#allocation69_spill] sm:$0xff] }
 0x406   :  { %v3545_v39 = vpop.f32.mrf.mxu2  ;;  %v3977_v56 = vpop.f32.mrf.mxu3  ;;  %v4337_v55 = vmax.f32 %v4335_v13, %v4336_v24  ;;  %13101 = vst [vmem:[#allocation100_spill] sm:$0xff] %v10902_v27  ;;  %v2886_v24 = vadd.f32 %v10787_v16, %v13104_v41  ;;  %v10920_v40 = vsel %vm4076_vm2, %v4319_v54, -inf  ;;  %v10923_v13 = vsel %vm4076_vm2, %v4322_v47, -inf  ;;  %v13106_v54 = vld [vmem:[#allocation65_spill] sm:$0xff]  ;;  %v13107_v47 = vld [vmem:[#allocation68_spill] sm:$0xff] }
 0x407   :  { %v3546_v6 = vadd.f32 %v10787_v16, %v3545_v39  ;;  %v3978_v15 = vadd.f32 %v10787_v16, %v3977_v56  ;;  %v10880_v4 = vpop.f32.mrf.mxu0  ;;  %v10882_v0 = vpop.f32.mrf.mxu1  ;;  %v4339_v39 = vsel %vm4076_vm2, %v2874_v28, -inf  ;;  %v430_v56 = vld [vmem:[%s12560_s0 + $0xd00] sm:$0xff]  ;;  %v4338_v28 = vsel %vm4076_vm2, %v2871_v20, -inf }
 0x408   :  { %13098 = vst [vmem:[#allocation94_spill] sm:$0xff] %v10880_v4  ;;  %v10899_v4 = vsel %vm4076_vm2, %v3543_v33, -inf  ;;  %v10926_v20 = vsel %vm4076_vm2, %v2841_v58, -inf  ;;  %v2880_v41 = vadd.f32 %v10787_v16, %v13106_v54  ;;  %v2883_v33 = vadd.f32 %v10787_v16, %v13107_v47 }
 0x409   :  { %13099 = vst [vmem:[#allocation42_spill] sm:$0xff] %v10882_v0  ;;  %v574_v0 = vld [vmem:[%s12560_s0 + $0x1180] sm:$0xff]  ;;  %v10905_v31 = vsel %vm4076_vm2, %v3546_v6, -inf  ;;  %v10908_v12 = vsel %vm4076_vm2, %v3978_v15, -inf  ;;  %v4340_v6 = vmax.f32 %v4338_v28, %v4339_v39  ;;  %v10941_v58 = vsel %vm4076_vm2, %v2850_v60, -inf  ;;  %v13109_v28 = vld [vmem:[#allocation81_spill] sm:$0xff] }
 0x40a   :  { %13100 = vst [vmem:[#allocation98_spill] sm:$0xff] %v10899_v4  ;;  %6046 = vmatmul.msk.f32.gmra.mxu0 %vm598_vm1, %v142_v35  ;;  %6190 = vmatmul.msk.f32.gmra.mxu1 %vm598_vm1, %v286_v17  ;;  %v13105_v35 = vld [vmem:[#allocation47_spill] sm:$0xff]  ;;  %v5053_v39 = vsel %vm4076_vm2, %v4334_v62, -inf  ;;  %v2898_v9 = vadd.f32 %v10787_v16, %v13109_v28  ;;  %v10948_v15 = vmax.f32 %v5051_v42, 0.0  ;;  %v4345_v47 = vsel %vm4076_vm2, %v2886_v24, -inf  ;;  %v13113_v28 = vld [vmem:[#allocation85_spill] sm:$0xff] }
 0x40b   :  { %13102 = vst [vmem:[#allocation164_spill] sm:$0xff] %v10905_v31  ;;  %6334 = vmatmul.msk.f32.gmra.mxu2 %vm598_vm1, %v430_v56  ;;  %6478 = vmatmul.msk.f32.gmra.mxu3 %vm598_vm1, %v574_v0  ;;  %v10934_v17 = vadd.f32 %v10787_v16, %v13105_v35  ;;  %v13108_v56 = vld [vmem:[#allocation73_spill] sm:$0xff]  ;;  %v5056_v35 = vsel %vm4076_vm2, %v4337_v55, -inf  ;;  %v5059_v31 = vsel %vm4076_vm2, %v4340_v6, -inf  ;;  %v13111_v62 = vld [vmem:[#allocation71_spill] sm:$0xff]  ;;  %v2904_v42 = vadd.f32 %v10787_v16, %v13113_v28 }
 0x40c   :  { %13103 = vst [vmem:[#allocation158_spill] sm:$0xff] %v10908_v12  ;;  %v2892_v0 = vadd.f32 %v10787_v16, %v13108_v56  ;;  %v13110_v12 = vld [vmem:[#allocation64_spill] sm:$0xff]  ;;  %v2889_v4 = vadd.f32 %v10787_v16, %v13111_v62  ;;  %v13112_v56 = vld [vmem:[#allocation79_spill] sm:$0xff]  ;;  %v5054_v6 = vmax.f32 %v10798_v32, %v5053_v39  ;;  %v4342_v62 = vsel %vm4076_vm2, %v2880_v41, -inf }
 0x40d   :  { %v2877_v54 = vadd.f32 %v10787_v16, %v13110_v12  ;;  %v2895_v19 = vadd.f32 %v10787_v16, %v13112_v56  ;;  %v143_v12 = vld [vmem:[%s12560_s0 + $0x408] sm:$0xff]  ;;  %v4344_v56 = vsel %vm4076_vm2, %v2883_v33, -inf  ;;  %v2910_v28 = vadd.f32 %v10787_v16, %v13116_v36 }
 0x40e   :  { %v3548_v27 = vpop.f32.mrf.mxu2  ;;  %v3980_v60 = vpop.f32.mrf.mxu3  ;;  %v287_v24 = vld [vmem:[%s12560_s0 + $0x888] sm:$0xff]  ;;  %v4346_v57 = vmax.f32 %v4344_v56, %v4345_v47  ;;  %v4348_v38 = vsel %vm4076_vm2, %v2892_v0, -inf  ;;  %v4351_v32 = vsel %vm4076_vm2, %v2898_v9, -inf  ;;  %v5057_v33 = vmax.f32 %v10819_v46, %v5056_v35 }
 0x40f   :  { %v10961_v37 = vpop.f32.mrf.mxu0  ;;  %v10963_v55 = vpop.f32.mrf.mxu1  ;;  %v13117_v39 = vld [vmem:[#allocation83_spill] sm:$0xff]  ;;  %v5060_v36 = vmax.f32 %v10822_v49, %v5059_v31  ;;  %v4341_v14 = vsel %vm4076_vm2, %v2877_v54, -inf  ;;  %v2907_v25 = vadd.f32 %v10787_v16, %v13118_v21  ;;  %v4347_v0 = vsel %vm4076_vm2, %v2889_v4, -inf }
 0x410   :  { %13114 = vst [vmem:[#allocation172_spill] sm:$0xff] %v10961_v37  ;;  %v575_v37 = vld [vmem:[%s12560_s0 + $0x1188] sm:$0xff]  ;;  %v2901_v41 = vadd.f32 %v10787_v16, %v13117_v39  ;;  %v4343_v47 = vmax.f32 %v4341_v14, %v4342_v62  ;;  %v4350_v9 = vsel %vm4076_vm2, %v2895_v19, -inf  ;;  %v4354_v56 = vsel %vm4076_vm2, %v2904_v42, -inf }
 0x411   :  { %13115 = vst [vmem:[#allocation166_spill] sm:$0xff] %v10963_v55  ;;  %v431_v55 = vld [vmem:[%s12560_s0 + $0xd08] sm:$0xff]  ;;  %v5410_v46 = vmax.f32 %v5054_v6, 0.0  ;;  %v4349_v49 = vmax.f32 %v4347_v0, %v4348_v38  ;;  %v4352_v31 = vmax.f32 %v4350_v9, %v4351_v32  ;;  %v4357_v21 = vsel %vm4076_vm2, %v2910_v28, -inf  ;;  %v576_v0 = vld [vmem:[%s12560_s0 + $0x1190] sm:$0xff] }
 0x412   :  { %6047 = vmatmul.msk.f32.gmra.mxu0 %vm598_vm1, %v143_v12  ;;  %6191 = vmatmul.msk.f32.gmra.mxu1 %vm598_vm1, %v287_v24  ;;  %v5065_v35 = vsel %vm4076_vm2, %v4346_v57, -inf  ;;  %v4353_v54 = vsel %vm4076_vm2, %v2901_v41, -inf  ;;  %v3549_v14 = vadd.f32 %v10787_v16, %v3548_v27  ;;  %v3981_v4 = vadd.f32 %v10787_v16, %v3980_v60  ;;  %v144_v27 = vld [vmem:[%s12560_s0 + $0x410] sm:$0xff] }
 0x413   :  { %6335 = vmatmul.msk.f32.gmra.mxu2 %vm598_vm1, %v431_v55  ;;  %6479 = vmatmul.msk.f32.gmra.mxu3 %vm598_vm1, %v575_v37  ;;  %v5411_v19 = vmax.f32 %v5057_v33, 0.0  ;;  %v5412_v12 = vmax.f32 %v5060_v36, 0.0  ;;  %v4355_v42 = vmax.f32 %v4353_v54, %v4354_v56  ;;  %v4356_v55 = vsel %vm4076_vm2, %v2907_v25, -inf  ;;  %v288_v25 = vld [vmem:[%s12560_s0 + $0x890] sm:$0xff]  ;;  %v13120_v33 = vld [vmem:[#allocation97_spill] sm:$0xff] }
 0x414   :  { %v5062_v38 = vsel %vm4076_vm2, %v4343_v47, -inf  ;;  %v4358_v6 = vmax.f32 %v4356_v55, %v4357_v21  ;;  %v5066_v60 = vmax.f32 %v10840_v3, %v5065_v35  ;;  %v5068_v39 = vsel %vm4076_vm2, %v4349_v49, -inf  ;;  %v432_v47 = vld [vmem:[%s12560_s0 + $0xd10] sm:$0xff]  ;;  %v13125_v21 = vld [vmem:[#allocation95_spill] sm:$0xff] }
 0x415   :  { %v5071_v41 = vsel %vm4076_vm2, %v4352_v31, -inf  ;;  %v2916_v36 = vadd.f32 %v10787_v16, %v13120_v33  ;;  %v11029_v9 = vsel %vm4076_vm2, %v3549_v14, -inf  ;;  %v11032_v3 = vsel %vm4076_vm2, %v3981_v4, -inf  ;;  %v578_v14 = vld [vmem:[%s12560_s0 + $0x11a0] sm:$0xff] }
 0x416   :  { %v3551_v24 = vpop.f32.mrf.mxu2  ;;  %v3983_v37 = vpop.f32.mrf.mxu3  ;;  %13121 = vst [vmem:[#allocation171_spill] sm:$0xff] %v11029_v9  ;;  %v5074_v31 = vsel %vm4076_vm2, %v4355_v42, -inf  ;;  %v2913_v35 = vadd.f32 %v10787_v16, %v13125_v21  ;;  %v4326_v4 = vsel %vm4076_vm2, %v10934_v17, -inf  ;;  %v5572_v55 = vsel %vm4076_vm2, %v5410_v46, -inf  ;;  %v577_v21 = vld [vmem:[%s12560_s0 + $0x1198] sm:$0xff] }
 0x417   :  { %v3552_v62 = vadd.f32 %v10787_v16, %v3551_v24  ;;  %v3984_v57 = vadd.f32 %v10787_v16, %v3983_v37  ;;  %v11007_v28 = vpop.f32.mrf.mxu0  ;;  %v11009_v32 = vpop.f32.mrf.mxu1  ;;  %13122 = vst [vmem:[#allocation168_spill] sm:$0xff] %v11032_v3  ;;  %v5063_v42 = vmax.f32 %v10825_v8, %v5062_v38  ;;  %v5077_v24 = vsel %vm4076_vm2, %v4358_v6, -inf }
 0x418   :  { %13119 = vst [vmem:[#allocation169_spill] sm:$0xff] %v11009_v32  ;;  %v5575_v37 = vsel %vm4076_vm2, %v5412_v12, -inf  ;;  %v4328_v17 = vmax.f32 %v4326_v4, %v10941_v58  ;;  %v5571_v46 = vsel %vm4076_vm2, %v10948_v15, -inf  ;;  %v5414_v8 = vmax.f32 %v5066_v60, 0.0 }
 0x419   :  { %v11035_v56 = vsel %vm4076_vm2, %v3552_v62, -inf  ;;  %v11038_v49 = vsel %vm4076_vm2, %v3984_v57, -inf  ;;  %v5069_v62 = vmax.f32 %v10843_v22, %v5068_v39  ;;  %v5072_v57 = vmax.f32 %v10846_v18, %v5071_v41 }
 0x41a   :  { %13123 = vst [vmem:[#allocation170_spill] sm:$0xff] %v11035_v56  ;;  %6048 = vmatmul.msk.f32.gmra.mxu0 %vm598_vm1, %v144_v27  ;;  %6192 = vmatmul.msk.f32.gmra.mxu1 %vm598_vm1, %v288_v25  ;;  %v4360_v27 = vsel %vm4076_vm2, %v2916_v36, -inf  ;;  %v5075_v38 = vmax.f32 %v10920_v40, %v5074_v31  ;;  %v5573_v6 = vmax.f32 %v5571_v46, %v5572_v55  ;;  %v5574_v25 = vsel %vm4076_vm2, %v5411_v19, -inf  ;;  %v145_v40 = vld [vmem:[%s12560_s0 + $0x418] sm:$0xff] }
 0x41b   :  { %13124 = vst [vmem:[#allocation175_spill] sm:$0xff] %v11038_v49  ;;  %6336 = vmatmul.msk.f32.gmra.mxu2 %vm598_vm1, %v432_v47  ;;  %6480 = vmatmul.msk.f32.gmra.mxu3 %vm598_vm1, %v576_v0  ;;  %v5078_v33 = vmax.f32 %v10923_v13, %v5077_v24  ;;  %v4359_v12 = vsel %vm4076_vm2, %v2913_v35, -inf  ;;  %v5576_v18 = vmax.f32 %v5574_v25, %v5575_v37  ;;  %v5413_v41 = vmax.f32 %v5063_v42, 0.0  ;;  %v13126_v47 = vld [vmem:[#allocation105_spill] sm:$0xff]  ;;  %v13128_v24 = vld [vmem:[#allocation103_spill] sm:$0xff] }
 0x41c   :  { %v4361_v36 = vmax.f32 %v4359_v12, %v4360_v27  ;;  %v2922_v58 = vadd.f32 %v10787_v16, %v13126_v47  ;;  %v289_v13 = vld [vmem:[%s12560_s0 + $0x898] sm:$0xff]  ;;  %v5415_v19 = vmax.f32 %v5069_v62, 0.0  ;;  %v5416_v60 = vmax.f32 %v5072_v57, 0.0  ;;  %v13129_v27 = vld [vmem:[#allocation60_spill] sm:$0xff]  ;;  %v13132_v12 = vld [vmem:[#allocation66_spill] sm:$0xff] }
 0x41d   :  { %v433_v31 = vld [vmem:[%s12560_s0 + $0xd18] sm:$0xff]  ;;  %v13127_v35 = vmax.f32 %v10926_v20, %v10870_v63  ;;  %v5578_v55 = vsel %vm4076_vm2, %v5414_v8, -inf  ;;  %v5417_v42 = vmax.f32 %v5075_v38, 0.0  ;;  %v2919_v37 = vadd.f32 %v10787_v16, %v13128_v24  ;;  %v13133_v47 = vld [vmem:[#allocation67_spill] sm:$0xff] }
 0x41e   :  { %v3554_v22 = vpop.f32.mrf.mxu2  ;;  %v3986_v39 = vpop.f32.mrf.mxu3  ;;  %v11095_v62 = vsel %vm4076_vm2, %v4328_v17, -inf  ;;  %v11098_v57 = vsel %vm4076_vm2, %v5573_v6, -inf  ;;  %v13130_v46 = vld [vmem:[#allocation61_spill] sm:$0xff]  ;;  %v5418_v20 = vmax.f32 %v5078_v33, 0.0  ;;  %v11109_v8 = vsel %vm4076_vm2, %v5576_v18, -inf }
 0x41f   :  { %v11069_v0 = vpop.f32.mrf.mxu0  ;;  %v11071_v15 = vpop.f32.mrf.mxu1  ;;  %v11089_v4 = vsel %vm4076_vm2, %v13127_v35, -inf  ;;  %v13131_v25 = vmax.f32 %v13129_v27, %v13130_v46  ;;  %v5577_v17 = vsel %vm4076_vm2, %v5413_v41, -inf  ;;  %v5080_v38 = vsel %vm4076_vm2, %v4361_v36, -inf }
 0x420   :  { %v4363_v6 = vsel %vm4076_vm2, %v2922_v58, -inf  ;;  %v13134_v33 = vmax.f32 %v13132_v12, %v13133_v47  ;;  %v11123_v18 = vsel %vm4076_vm2, %v5415_v19, -inf  ;;  %v11126_v41 = vsel %vm4076_vm2, %v5416_v60, -inf  ;;  %v13135_v19 = vld [vmem:[#allocation106_spill] sm:$0xff] }
 0x421   :  { %v11104_v63 = vsel %vm4076_vm2, %v13131_v25, -inf  ;;  %v11129_v36 = vsel %vm4076_vm2, %v5417_v42, -inf  ;;  %v4362_v58 = vsel %vm4076_vm2, %v2919_v37, -inf  ;;  %v11135_v35 = vsel %vm4076_vm2, %v5418_v20, -inf  ;;  %v13136_v25 = vld [vmem:[#allocation107_spill] sm:$0xff] }
 0x422   :  { %6049 = vmatmul.msk.f32.gmra.mxu0 %vm598_vm1, %v145_v40  ;;  %6193 = vmatmul.msk.f32.gmra.mxu1 %vm598_vm1, %v289_v13  ;;  %v11120_v40 = vsel %vm4076_vm2, %v13134_v33, -inf  ;;  %v5579_v13 = vmax.f32 %v5577_v17, %v5578_v55  ;;  %v5081_v55 = vmax.f32 %v11089_v4, %v5080_v38  ;;  %v4364_v24 = vmax.f32 %v4362_v58, %v4363_v6  ;;  %v13137_v17 = vld [vmem:[#allocation112_spill] sm:$0xff]  ;;  %v146_v4 = vld [vmem:[%s12560_s0 + $0x420] sm:$0xff]  ;;  %v13140_v6 = vld [vmem:[#allocation113_spill] sm:$0xff] }
 0x423   :  { %6337 = vmatmul.msk.f32.gmra.mxu2 %vm598_vm1, %v433_v31  ;;  %6481 = vmatmul.msk.f32.gmra.mxu3 %vm598_vm1, %v577_v21  ;;  %v3555_v31 = vadd.f32 %v10787_v16, %v3554_v22  ;;  %v3987_v21 = vadd.f32 %v10787_v16, %v3986_v39  ;;  %v2925_v27 = vadd.f32 %v10787_v16, %v13135_v19  ;;  %v290_v38 = vld [vmem:[%s12560_s0 + $0x8a0] sm:$0xff]  ;;  %v13142_v19 = vld [vmem:[#allocation115_spill] sm:$0xff] }
 0x424   :  { %v2928_v42 = vadd.f32 %v10787_v16, %v13136_v25  ;;  %v2931_v37 = vadd.f32 %v10787_v16, %v13137_v17  ;;  %v2934_v47 = vadd.f32 %v10787_v16, %v13140_v6  ;;  %v13141_v33 = vld [vmem:[#allocation114_spill] sm:$0xff] }
 0x425   :  { %v2937_v58 = vadd.f32 %v10787_v16, %v13141_v33  ;;  %v434_v17 = vld [vmem:[%s12560_s0 + $0xd20] sm:$0xff]  ;;  %v11171_v54 = vsel %vm4076_vm2, %v3555_v31, -inf  ;;  %v11174_v6 = vsel %vm4076_vm2, %v3987_v21, -inf  ;;  %v11192_v21 = vsel %vm4076_vm2, %v5579_v13, -inf }
 0x426   :  { %v3557_v60 = vpop.f32.mrf.mxu2  ;;  %v3989_v46 = vpop.f32.mrf.mxu3  ;;  %13144 = vst [vmem:[#allocation178_spill] sm:$0xff] %v11171_v54  ;;  %v13150_v31 = vld [vmem:[#allocation118_spill] sm:$0xff] }
 0x427   :  { %v3558_v22 = vadd.f32 %v10787_v16, %v3557_v60  ;;  %v3990_v39 = vadd.f32 %v10787_v16, %v3989_v46  ;;  %v11146_v20 = vpop.f32.mrf.mxu0  ;;  %v11148_v12 = vpop.f32.mrf.mxu1  ;;  %v2940_v60 = vadd.f32 %v10787_v16, %v13142_v19  ;;  %v13143_v46 = vld [vmem:[#allocation117_spill] sm:$0xff]  ;;  %13145 = vst [vmem:[#allocation108_spill] sm:$0xff] %v11174_v6  ;;  %v2949_v49 = vadd.f32 %v10787_v16, %v13150_v31 }
 0x428   :  { %13138 = vst [vmem:[#allocation177_spill] sm:$0xff] %v11146_v20  ;;  %v2946_v25 = vadd.f32 %v10787_v16, %v13143_v46  ;;  %v5083_v46 = vsel %vm4076_vm2, %v4364_v24, -inf  ;;  %v5585_v24 = vmax.f32 %v11129_v36, %v11135_v35  ;;  %v4365_v36 = vsel %vm4076_vm2, %v2925_v27, -inf }
 0x429   :  { %13139 = vst [vmem:[#allocation176_spill] sm:$0xff] %v11148_v12  ;;  %v11177_v33 = vsel %vm4076_vm2, %v3558_v22, -inf  ;;  %v11180_v19 = vsel %vm4076_vm2, %v3990_v39, -inf  ;;  %v13148_v12 = vld [vmem:[#allocation119_spill] sm:$0xff]  ;;  %v5582_v22 = vmax.f32 %v11123_v18, %v11126_v41  ;;  %v13149_v39 = vld [vmem:[#allocation116_spill] sm:$0xff]  ;;  %v4372_v13 = vsel %vm4076_vm2, %v2940_v60, -inf }
 0x42a   :  { %13146 = vst [vmem:[#allocation110_spill] sm:$0xff] %v11177_v33  ;;  %v2952_v20 = vadd.f32 %v10787_v16, %v13148_v12  ;;  %6050 = vmatmul.msk.f32.gmra.mxu0 %vm598_vm1, %v146_v4  ;;  %6194 = vmatmul.msk.f32.gmra.mxu1 %vm598_vm1, %v290_v38  ;;  %v2943_v12 = vadd.f32 %v10787_v16, %v13149_v39  ;;  %v4366_v4 = vsel %vm4076_vm2, %v2928_v42, -inf  ;;  %v4369_v38 = vsel %vm4076_vm2, %v2934_v47, -inf  ;;  %v13151_v39 = vld [vmem:[#allocation125_spill] sm:$0xff] }
 0x42b   :  { %13147 = vst [vmem:[#allocation5_spill] sm:$0xff] %v11180_v19  ;;  %6338 = vmatmul.msk.f32.gmra.mxu2 %vm598_vm1, %v434_v17  ;;  %6482 = vmatmul.msk.f32.gmra.mxu3 %vm598_vm1, %v578_v14  ;;  %v5419_v18 = vmax.f32 %v5081_v55, 0.0  ;;  %v5084_v41 = vmax.f32 %v11095_v62, %v5083_v46  ;;  %v4375_v35 = vsel %vm4076_vm2, %v2946_v25, -inf  ;;  %v4368_v17 = vsel %vm4076_vm2, %v2931_v37, -inf  ;;  %v147_v37 = vld [vmem:[%s12560_s0 + $0x428] sm:$0xff]  ;;  %v13155_v25 = vld [vmem:[#allocation77_spill] sm:$0xff] }
 0x42c   :  { %v4371_v14 = vsel %vm4076_vm2, %v2937_v58, -inf  ;;  %v4378_v42 = vsel %vm4076_vm2, %v2952_v20, -inf  ;;  %v2958_v47 = vadd.f32 %v10787_v16, %v13151_v39  ;;  %v4367_v6 = vmax.f32 %v4365_v36, %v4366_v4  ;;  %v291_v20 = vld [vmem:[%s12560_s0 + $0x8a8] sm:$0xff] }
 0x42d   :  { %v4370_v31 = vmax.f32 %v4368_v17, %v4369_v38  ;;  %v4373_v55 = vmax.f32 %v4371_v14, %v4372_v13  ;;  %v4374_v62 = vsel %vm4076_vm2, %v2943_v12, -inf  ;;  %v13154_v58 = vld [vmem:[#allocation75_spill] sm:$0xff]  ;;  %v4377_v12 = vsel %vm4076_vm2, %v2949_v49, -inf  ;;  %v13157_v13 = vld [vmem:[#allocation120_spill] sm:$0xff] }
 0x42e   :  { %v3560_v60 = vpop.f32.mrf.mxu2  ;;  %v3992_v19 = vpop.f32.mrf.mxu3  ;;  %v13156_v39 = vmax.f32 %v13154_v58, %v13155_v25  ;;  %v4376_v38 = vmax.f32 %v4374_v62, %v4375_v35  ;;  %v2955_v36 = vadd.f32 %v10787_v16, %v13157_v13  ;;  %v435_v17 = vld [vmem:[%s12560_s0 + $0xd28] sm:$0xff]  ;;  %v13159_v25 = vld [vmem:[#allocation89_spill] sm:$0xff]  ;;  %v11251_v49 = vsel %vm4076_vm2, %v5585_v24, -inf }
 0x42f   :  { %v11216_v46 = vpop.f32.mrf.mxu0  ;;  %v11218_v27 = vpop.f32.mrf.mxu1  ;;  %v579_v14 = vld [vmem:[%s12560_s0 + $0x11a8] sm:$0xff]  ;;  %13161 = vst [vmem:[#allocation3_spill] sm:$0xff] %v11251_v49  ;;  %v4379_v62 = vmax.f32 %v4377_v12, %v4378_v42  ;;  %v11260_v3 = vsel %vm4076_vm2, %v5419_v18, -inf  ;;  %v11269_v24 = vmax.f32 %v5084_v41, 0.0  ;;  %v11272_v42 = vsel %vm4076_vm2, %v4367_v6, -inf  ;;  %v13168_v41 = vld [vmem:[#allocation8_spill] sm:$0xff] }
 0x430   :  { %13152 = vst [vmem:[#allocation9_spill] sm:$0xff] %v11216_v46  ;;  %v11230_v4 = vsel %vm4076_vm2, %v13156_v39, -inf  ;;  %v13158_v58 = vld [vmem:[#allocation87_spill] sm:$0xff]  ;;  %v13163_v46 = vld [vmem:[#allocation101_spill] sm:$0xff]  ;;  %v11278_v18 = vsel %vm4076_vm2, %v4373_v55, -inf  ;;  %v3000_v6 = vadd.f32 %v10787_v16, %v13168_v41 }
 0x431   :  { %13153 = vst [vmem:[#allocation13_spill] sm:$0xff] %v11218_v27  ;;  %v11242_v27 = vsel %vm4076_vm2, %v5582_v22, -inf  ;;  %v13160_v39 = vmax.f32 %v13158_v58, %v13159_v25  ;;  %v13162_v13 = vld [vmem:[#allocation99_spill] sm:$0xff]  ;;  %v11263_v22 = vsel %vm4076_vm2, %v2958_v47, -inf  ;;  %v11283_v47 = vsel %vm4076_vm2, %v4376_v38, -inf }
 0x432   :  { %v13164_v33 = vmax.f32 %v13162_v13, %v13163_v46  ;;  %13166 = vst [vmem:[#allocation11_spill] sm:$0xff] %v11260_v3  ;;  %v13167_v58 = vld [vmem:[#allocation127_spill] sm:$0xff]  ;;  %6051 = vmatmul.msk.f32.gmra.mxu0 %vm598_vm1, %v147_v37  ;;  %6195 = vmatmul.msk.f32.gmra.mxu1 %vm598_vm1, %v291_v20  ;;  %v11286_v46 = vsel %vm4076_vm2, %v2955_v36, -inf  ;;  %v11293_v37 = vsel %vm4076_vm2, %v4379_v62, -inf  ;;  %v3561_v20 = vadd.f32 %v10787_v16, %v3560_v60  ;;  %v13169_v36 = vld [vmem:[#allocation133_spill] sm:$0xff]  ;;  %v13172_v60 = vld [vmem:[#allocation54_spill] sm:$0xff] }
 0x433   :  { %v11248_v35 = vsel %vm4076_vm2, %v13160_v39, -inf  ;;  %v2961_v25 = vadd.f32 %v10787_v16, %v13167_v58  ;;  %6339 = vmatmul.msk.f32.gmra.mxu2 %vm598_vm1, %v435_v17  ;;  %6483 = vmatmul.msk.f32.gmra.mxu3 %vm598_vm1, %v579_v14  ;;  %v3993_v38 = vadd.f32 %v10787_v16, %v3992_v19  ;;  %v2964_v17 = vadd.f32 %v10787_v16, %v13169_v36  ;;  %v13170_v14 = vld [vmem:[#allocation141_spill] sm:$0xff]  ;;  %v13171_v58 = vld [vmem:[#allocation174_spill] sm:$0xff] }
 0x434   :  { %v11257_v54 = vsel %vm4076_vm2, %v13164_v33, -inf  ;;  %v11275_v33 = vsel %vm4076_vm2, %v4370_v31, -inf  ;;  %v3006_v31 = vadd.f32 %v10787_v16, %v9170_v7  ;;  %v2970_v39 = vadd.f32 %v10787_v16, %v13170_v14  ;;  %v292_v14 = vld [vmem:[%s12560_s0 + $0x8b0] sm:$0xff] }
 0x435   :  { %13165 = vst [vmem:[#allocation7_spill] sm:$0xff] %v11257_v54  ;;  %v11300_v12 = vsel %vm4076_vm2, %v2961_v25, -inf  ;;  %v3018_v7 = vadd.f32 %v10787_v16, %v9379_v52  ;;  %v2997_v41 = vadd.f32 %v10787_v16, %v13171_v58  ;;  %v3003_v19 = vadd.f32 %v10787_v16, %v13172_v60  ;;  %v148_v52 = vld [vmem:[%s12560_s0 + $0x430] sm:$0xff] }
 0x436   :  { %v3563_v62 = vpop.f32.mrf.mxu2  ;;  %v3995_v13 = vpop.f32.mrf.mxu3  ;;  %v4402_v58 = vsel %vm4076_vm2, %v3000_v6, -inf  ;;  %v4405_v60 = vsel %vm4076_vm2, %v3006_v31, -inf  ;;  %v11337_v54 = vsel %vm4076_vm2, %v3561_v20, -inf  ;;  %v11340_v6 = vsel %vm4076_vm2, %v3993_v38, -inf }
 0x437   :  { %v3564_v25 = vadd.f32 %v10787_v16, %v3563_v62  ;;  %v3996_v55 = vadd.f32 %v10787_v16, %v3995_v13  ;;  %v11314_v3 = vpop.f32.mrf.mxu0  ;;  %v11316_v36 = vpop.f32.mrf.mxu1  ;;  %v3012_v62 = vadd.f32 %v10787_v16, %v9259_v51  ;;  %v3015_v13 = vadd.f32 %v10787_v16, %v9317_v43  ;;  %13175 = vst [vmem:[#allocation15_spill] sm:$0xff] %v11337_v54  ;;  %v13179_v43 = vld [vmem:[#allocation135_spill] sm:$0xff] }
 0x438   :  { %13173 = vst [vmem:[#allocation17_spill] sm:$0xff] %v11314_v3  ;;  %v580_v3 = vld [vmem:[%s12560_s0 + $0x11b0] sm:$0xff]  ;;  %v2967_v49 = vadd.f32 %v10787_v16, %v13179_v43  ;;  %v4411_v56 = vsel %vm4076_vm2, %v3018_v7, -inf  ;;  %v11358_v38 = vsel %vm4076_vm2, %v2964_v17, -inf  ;;  %v3009_v7 = vadd.f32 %v10787_v16, %v9208_v26 }
 0x439   :  { %13174 = vst [vmem:[#allocation21_spill] sm:$0xff] %v11316_v36  ;;  %v436_v36 = vld [vmem:[%s12560_s0 + $0xd30] sm:$0xff]  ;;  %v11343_v31 = vsel %vm4076_vm2, %v3564_v25, -inf  ;;  %v11346_v51 = vsel %vm4076_vm2, %v3996_v55, -inf  ;;  %v4401_v55 = vsel %vm4076_vm2, %v2997_v41, -inf  ;;  %v4404_v25 = vsel %vm4076_vm2, %v3003_v19, -inf }
 0x43a   :  { %13176 = vst [vmem:[#allocation19_spill] sm:$0xff] %v11340_v6  ;;  %6052 = vmatmul.msk.f32.gmra.mxu0 %vm598_vm1, %v148_v52  ;;  %6196 = vmatmul.msk.f32.gmra.mxu1 %vm598_vm1, %v292_v14  ;;  %v11367_v43 = vsel %vm4076_vm2, %v2970_v39, -inf  ;;  %v4403_v52 = vmax.f32 %v4401_v55, %v4402_v58  ;;  %v4406_v20 = vmax.f32 %v4404_v25, %v4405_v60  ;;  %v4410_v14 = vsel %vm4076_vm2, %v3015_v13, -inf  ;;  %v13180_v39 = vld [vmem:[#allocation149_spill] sm:$0xff]  ;;  %v13185_v6 = vld [vmem:[#allocation151_spill] sm:$0xff] }
 0x43b   :  { %13177 = vst [vmem:[#allocation25_spill] sm:$0xff] %v11343_v31  ;;  %6340 = vmatmul.msk.f32.gmra.mxu2 %vm598_vm1, %v436_v36  ;;  %6484 = vmatmul.msk.f32.gmra.mxu3 %vm598_vm1, %v580_v3  ;;  %v4408_v17 = vsel %vm4076_vm2, %v3012_v62, -inf  ;;  %v4412_v9 = vmax.f32 %v4410_v14, %v4411_v56  ;;  %v3024_v41 = vadd.f32 %v10787_v16, %v9468_v23  ;;  %v11378_v3 = vsel %vm4076_vm2, %v2967_v49, -inf  ;;  %v13181_v58 = vld [vmem:[#allocation157_spill] sm:$0xff] }
 0x43c   :  { %13178 = vst [vmem:[#allocation29_spill] sm:$0xff] %v11346_v51  ;;  %v3030_v26 = vadd.f32 %v10787_v16, %v9583_v2  ;;  %v2976_v36 = vadd.f32 %v10787_v16, %v13180_v39  ;;  %v2982_v60 = vadd.f32 %v10787_v16, %v13181_v58  ;;  %v4407_v13 = vsel %vm4076_vm2, %v3009_v7, -inf  ;;  %v149_v14 = vld [vmem:[%s12560_s0 + $0x438] sm:$0xff]  ;;  %v13184_v58 = vld [vmem:[#allocation143_spill] sm:$0xff] }
 0x43d   :  { %v3021_v2 = vadd.f32 %v10787_v16, %v9417_v34  ;;  %v3027_v49 = vadd.f32 %v10787_v16, %v9526_v61  ;;  %v293_v39 = vld [vmem:[%s12560_s0 + $0x8b8] sm:$0xff]  ;;  %v2973_v7 = vadd.f32 %v10787_v16, %v13184_v58  ;;  %v5086_v34 = vsel %vm4076_vm2, %v4403_v52, -inf }
 0x43e   :  { %v3566_v62 = vpop.f32.mrf.mxu2  ;;  %v3998_v56 = vpop.f32.mrf.mxu3  ;;  %v5089_v23 = vsel %vm4076_vm2, %v4406_v20, -inf  ;;  %v4409_v61 = vmax.f32 %v4407_v13, %v4408_v17  ;;  %v437_v19 = vld [vmem:[%s12560_s0 + $0xd38] sm:$0xff]  ;;  %v2979_v31 = vadd.f32 %v10787_v16, %v13185_v6  ;;  %v5095_v54 = vsel %vm4076_vm2, %v4412_v9, -inf  ;;  %v13186_v13 = vld [vmem:[#allocation159_spill] sm:$0xff] }
 0x43f   :  { %v11391_v55 = vpop.f32.mrf.mxu0  ;;  %v11393_v25 = vpop.f32.mrf.mxu1  ;;  %v581_v51 = vld [vmem:[%s12560_s0 + $0x11b8] sm:$0xff]  ;;  %v4414_v58 = vsel %vm4076_vm2, %v3024_v41, -inf  ;;  %v4417_v52 = vsel %vm4076_vm2, %v3030_v26, -inf  ;;  %v11417_v20 = vsel %vm4076_vm2, %v2976_v36, -inf  ;;  %v11420_v17 = vsel %vm4076_vm2, %v2982_v60, -inf }
 0x440   :  { %13182 = vst [vmem:[#allocation33_spill] sm:$0xff] %v11391_v55  ;;  %v13187_v55 = vld [vmem:[#allocation165_spill] sm:$0xff]  ;;  %v5087_v9 = vmax.f32 %v11272_v42, %v5086_v34  ;;  %v5090_v6 = vmax.f32 %v11275_v33, %v5089_v23  ;;  %v4413_v41 = vsel %vm4076_vm2, %v3021_v2, -inf  ;;  %v4416_v26 = vsel %vm4076_vm2, %v3027_v49, -inf }
 0x441   :  { %13183 = vst [vmem:[#allocation23_spill] sm:$0xff] %v11393_v25  ;;  %v2985_v25 = vadd.f32 %v10787_v16, %v13186_v13  ;;  %v2988_v32 = vadd.f32 %v10787_v16, %v13187_v55  ;;  %v5092_v36 = vsel %vm4076_vm2, %v4409_v61, -inf  ;;  %v5096_v60 = vmax.f32 %v11283_v47, %v5095_v54  ;;  %v582_v13 = vld [vmem:[%s12560_s0 + $0x11c0] sm:$0xff] }
 0x442   :  { %6053 = vmatmul.msk.f32.gmra.mxu0 %vm598_vm1, %v149_v14  ;;  %6197 = vmatmul.msk.f32.gmra.mxu1 %vm598_vm1, %v293_v39  ;;  %v4415_v55 = vmax.f32 %v4413_v41, %v4414_v58  ;;  %v4418_v14 = vmax.f32 %v4416_v26, %v4417_v52  ;;  %v4389_v39 = vsel %vm4076_vm2, %v2973_v7, -inf  ;;  %v4392_v42 = vsel %vm4076_vm2, %v2979_v31, -inf  ;;  %v150_v58 = vld [vmem:[%s12560_s0 + $0x440] sm:$0xff] }
 0x443   :  { %6341 = vmatmul.msk.f32.gmra.mxu2 %vm598_vm1, %v437_v19  ;;  %6485 = vmatmul.msk.f32.gmra.mxu3 %vm598_vm1, %v581_v51  ;;  %v3567_v33 = vadd.f32 %v10787_v16, %v3566_v62  ;;  %v3999_v23 = vadd.f32 %v10787_v16, %v3998_v56  ;;  %v4391_v2 = vmax.f32 %v4389_v39, %v11417_v20  ;;  %v4395_v51 = vsel %vm4076_vm2, %v2985_v25, -inf  ;;  %v13209_v39 = vld [vmem:[#allocation26_spill] sm:$0xff] }
 0x444   :  { %v4394_v19 = vmax.f32 %v4392_v42, %v11420_v17  ;;  %v4396_v49 = vsel %vm4076_vm2, %v2988_v32, -inf  ;;  %v5422_v47 = vmax.f32 %v5090_v6, 0.0  ;;  %v5093_v61 = vmax.f32 %v11278_v18, %v5092_v36  ;;  %v294_v32 = vld [vmem:[%s12560_s0 + $0x8c0] sm:$0xff]  ;;  %v13189_v42 = vld [vmem:[#allocation167_spill] sm:$0xff] }
 0x445   :  { %v5421_v25 = vmax.f32 %v5087_v9, 0.0  ;;  %v5424_v52 = vmax.f32 %v5096_v60, 0.0  ;;  %v5098_v18 = vsel %vm4076_vm2, %v4415_v55, -inf  ;;  %v5101_v20 = vsel %vm4076_vm2, %v4418_v14, -inf  ;;  %v438_v17 = vld [vmem:[%s12560_s0 + $0xd40] sm:$0xff] }
 0x446   :  { %v3569_v34 = vpop.f32.mrf.mxu2  ;;  %v4001_v54 = vpop.f32.mrf.mxu3  ;;  %v11466_v6 = vsel %vm4076_vm2, %v3567_v33, -inf  ;;  %v11469_v41 = vsel %vm4076_vm2, %v3999_v23, -inf  ;;  %v13188_v36 = vmax.f32 %v11286_v46, %v11263_v22  ;;  %v4397_v55 = vmax.f32 %v4395_v51, %v4396_v49  ;;  %v13190_v23 = vld [vmem:[#allocation173_spill] sm:$0xff] }
 0x447   :  { %v3570_v7 = vadd.f32 %v10787_v16, %v3569_v34  ;;  %v4002_v31 = vadd.f32 %v10787_v16, %v4001_v54  ;;  %v11447_v62 = vpop.f32.mrf.mxu0  ;;  %v11449_v56 = vpop.f32.mrf.mxu1  ;;  %v2991_v33 = vadd.f32 %v10787_v16, %v13189_v42  ;;  %v2994_v34 = vadd.f32 %v10787_v16, %v13190_v23 }
 0x448   :  { %v5100_v60 = vsel %vm4076_vm2, %v13188_v36, -inf  ;;  %v5590_v22 = vsel %vm4076_vm2, %v5422_v47, -inf  ;;  %v5423_v46 = vmax.f32 %v5093_v61, 0.0  ;;  %v11496_v51 = vsel %vm4076_vm2, %v11269_v24, -inf }
 0x449   :  { %v11472_v9 = vsel %vm4076_vm2, %v3570_v7, -inf  ;;  %v11475_v26 = vsel %vm4076_vm2, %v4002_v31, -inf  ;;  %v5099_v49 = vmax.f32 %v11293_v37, %v5098_v18  ;;  %v5102_v54 = vmax.f32 %v5100_v60, %v5101_v20 }
 0x44a   :  { %6054 = vmatmul.msk.f32.gmra.mxu0 %vm598_vm1, %v150_v58  ;;  %6198 = vmatmul.msk.f32.gmra.mxu1 %vm598_vm1, %v294_v32  ;;  %v3036_v7 = vadd.f32 %v10787_v16, %v9672_v45  ;;  %v13191_v31 = vmax.f32 %v11300_v12, %v11358_v38  ;;  %v13192_v61 = vmax.f32 %v11378_v3, %v11367_v43  ;;  %v5589_v24 = vsel %vm4076_vm2, %v5421_v25, -inf }
 0x44b   :  { %6342 = vmatmul.msk.f32.gmra.mxu2 %vm598_vm1, %v438_v17  ;;  %6486 = vmatmul.msk.f32.gmra.mxu3 %vm598_vm1, %v582_v13  ;;  %v5593_v37 = vsel %vm4076_vm2, %v5424_v52, -inf  ;;  %v11516_v32 = vsel %vm4076_vm2, %v4391_v2, -inf  ;;  %v11519_v45 = vsel %vm4076_vm2, %v4394_v19, -inf  ;;  %v11522_v12 = vsel %vm4076_vm2, %v4397_v55, -inf  ;;  %v151_v17 = vld [vmem:[%s12560_s0 + $0x448] sm:$0xff] }
 0x44c   :  { %v11505_v47 = vsel %vm4076_vm2, %v13191_v31, -inf  ;;  %v11511_v58 = vsel %vm4076_vm2, %v13192_v61, -inf  ;;  %v5591_v38 = vmax.f32 %v5589_v24, %v5590_v22  ;;  %v11529_v3 = vsel %vm4076_vm2, %v2991_v33, -inf  ;;  %v295_v13 = vld [vmem:[%s12560_s0 + $0x8c8] sm:$0xff] }
 0x44d   :  { %v11532_v25 = vsel %vm4076_vm2, %v2994_v34, -inf  ;;  %v5592_v2 = vsel %vm4076_vm2, %v5423_v46, -inf  ;;  %v3033_v19 = vadd.f32 %v10787_v16, %v9621_v53  ;;  %v5425_v60 = vmax.f32 %v5099_v49, 0.0  ;;  %v439_v33 = vld [vmem:[%s12560_s0 + $0xd48] sm:$0xff] }
 0x44e   :  { %v11524_v18 = vpop.f32.mrf.mxu2  ;;  %v11526_v43 = vpop.f32.mrf.mxu3  ;;  %v5594_v36 = vmax.f32 %v5592_v2, %v5593_v37  ;;  %v5426_v55 = vmax.f32 %v5102_v54, 0.0  ;;  %v4420_v42 = vsel %vm4076_vm2, %v3036_v7, -inf  ;;  %v583_v53 = vld [vmem:[%s12560_s0 + $0x11c8] sm:$0xff]  ;;  %v2640_v23 = vadd.f32 %v10787_v16, %v10277_v59 }
 0x44f   :  { %v2711_v52 = vpop.f32.mrf.mxu0  ;;  %v3143_v20 = vpop.f32.mrf.mxu1  ;;  %v3072_v34 = vadd.f32 %v10787_v16, %v10279_v11  ;;  %v4400_v49 = vmax.f32 %v11529_v3, %v11532_v25  ;;  %v11559_v54 = vsel %vm4076_vm2, %v5591_v38, -inf  ;;  %v2637_v7 = vadd.f32 %v10787_v16, %v10236_v29 }
 0x450   :  { %v2712_v22 = vadd.f32 %v10787_v16, %v2711_v52  ;;  %v3144_v46 = vadd.f32 %v10787_v16, %v3143_v20  ;;  %v3069_v31 = vadd.f32 %v10787_v16, %v10238_v50  ;;  %v13193_v59 = vmax.f32 %v9279_v48, %v9283_v44 }
 0x451   :  { %v4419_v61 = vsel %vm4076_vm2, %v3033_v19, -inf  ;;  %v2709_v24 = vadd.f32 %v10787_v16, %v11447_v62  ;;  %v3141_v29 = vadd.f32 %v10787_v16, %v11449_v56  ;;  %v11581_v50 = vsel %vm4076_vm2, %v5594_v36, -inf }
 0x452   :  { %6055 = vmatmul.msk.f32.gmra.mxu0 %vm598_vm1, %v151_v17  ;;  %6199 = vmatmul.msk.f32.gmra.mxu1 %vm598_vm1, %v295_v13  ;;  %v11571_v11 = vsel %vm4076_vm2, %v13193_v59, -inf  ;;  %v11584_v48 = vsel %vm4076_vm2, %v5425_v60, -inf  ;;  %v11587_v44 = vsel %vm4076_vm2, %v5426_v55, -inf  ;;  %v4421_v37 = vmax.f32 %v4419_v61, %v4420_v42  ;;  %v13195_v61 = vld [vmem:[#allocation80_spill] sm:$0xff] }
 0x453   :  { %6343 = vmatmul.msk.f32.gmra.mxu2 %vm598_vm1, %v439_v33  ;;  %6487 = vmatmul.msk.f32.gmra.mxu3 %vm598_vm1, %v583_v53  ;;  %v4222_v38 = vsel %vm4076_vm2, %v2640_v23, -inf  ;;  %v4438_v62 = vsel %vm4076_vm2, %v3072_v34, -inf  ;;  %v4258_v56 = vsel %vm4076_vm2, %v2712_v22, -inf  ;;  %v4474_v2 = vsel %vm4076_vm2, %v3144_v46, -inf  ;;  %v296_v23 = vld [vmem:[%s12560_s0 + $0x8d0] sm:$0xff] }
 0x454   :  { %v3039_v19 = vadd.f32 %v10787_v16, %v9730_v1  ;;  %v3042_v52 = vadd.f32 %v10787_v16, %v9787_v10  ;;  %v4221_v20 = vsel %vm4076_vm2, %v2637_v7, -inf  ;;  %v4437_v17 = vsel %vm4076_vm2, %v3069_v31, -inf  ;;  %v152_v10 = vld [vmem:[%s12560_s0 + $0x450] sm:$0xff] }
 0x455   :  { %v2646_v60 = vadd.f32 %v10787_v16, %v10360_v30  ;;  %v3078_v55 = vadd.f32 %v10787_v16, %v10362_v5  ;;  %v4257_v42 = vsel %vm4076_vm2, %v2709_v24, -inf  ;;  %v4473_v33 = vsel %vm4076_vm2, %v3141_v29, -inf  ;;  %v440_v5 = vld [vmem:[%s12560_s0 + $0xd50] sm:$0xff] }
 0x456   :  { %v3575_v13 = vpop.f32.mrf.mxu2  ;;  %v4007_v36 = vpop.f32.mrf.mxu3  ;;  %v4223_v34 = vmax.f32 %v4221_v20, %v4222_v38  ;;  %v4439_v22 = vmax.f32 %v4437_v17, %v4438_v62  ;;  %v4259_v30 = vmax.f32 %v4257_v42, %v4258_v56  ;;  %v4475_v46 = vmax.f32 %v4473_v33, %v4474_v2  ;;  %v584_v7 = vld [vmem:[%s12560_s0 + $0x11d0] sm:$0xff] }
 0x457   :  { %v2714_v1 = vpop.f32.mrf.mxu0  ;;  %v3146_v53 = vpop.f32.mrf.mxu1  ;;  %v13194_v31 = vld [vmem:[#allocation32_spill] sm:$0xff]  ;;  %v3075_v24 = vadd.f32 %v10787_v16, %v13195_v61  ;;  %v3576_v29 = vadd.f32 %v10787_v16, %v3575_v13  ;;  %v4008_v38 = vadd.f32 %v10787_v16, %v4007_v36  ;;  %v5597_v62 = vmax.f32 %v11584_v48, %v11587_v44  ;;  %v11641_v48 = vld [vmem:[%s12561_s2] ss:$0 sm:$0xff]  ;;  %v153_v61 = vld [vmem:[%s12560_s0 + $0x458] sm:$0xff] }
 0x458   :  { %v2643_v59 = vadd.f32 %v10787_v16, %v13194_v31  ;;  %v11626_v56 = vsel %vm4076_vm2, %v4421_v37, -inf  ;;  %v11629_v2 = vsel %vm4076_vm2, %v3039_v19, -inf  ;;  %v11632_v20 = vsel %vm4076_vm2, %v3042_v52, -inf }
 0x459   :  { %v4225_v17 = vsel %vm4076_vm2, %v2646_v60, -inf  ;;  %v4441_v16 = vsel %vm4076_vm2, %v3078_v55, -inf  ;;  %v3573_v44 = vadd.f32 %v11641_v48, %v11524_v18  ;;  %v4005_v37 = vadd.f32 %v11641_v48, %v11526_v43 }
 0x45a   :  { %6056 = vmatmul.msk.f32.gmra.mxu0 %vm598_vm1, %v152_v10  ;;  %6200 = vmatmul.msk.f32.gmra.mxu1 %vm598_vm1, %v296_v23  ;;  %v5013_v19 = vsel %vm4076_vm2, %v4223_v34, -inf  ;;  %v5121_v52 = vsel %vm4076_vm2, %v4439_v22, -inf  ;;  %v5014_v13 = vsel %vm4076_vm2, %v4259_v30, -inf  ;;  %v5122_v36 = vsel %vm4076_vm2, %v4475_v46, -inf }
 0x45b   :  { %6344 = vmatmul.msk.f32.gmra.mxu2 %vm598_vm1, %v440_v5  ;;  %6488 = vmatmul.msk.f32.gmra.mxu3 %vm598_vm1, %v584_v7  ;;  %v4224_v60 = vsel %vm4076_vm2, %v2643_v59, -inf  ;;  %v4440_v55 = vsel %vm4076_vm2, %v3075_v24, -inf  ;;  %v4690_v18 = vsel %vm4076_vm2, %v3576_v29, -inf  ;;  %v4906_v43 = vsel %vm4076_vm2, %v4008_v38, -inf }
 0x45c   :  { %v4226_v42 = vmax.f32 %v4224_v60, %v4225_v17  ;;  %v4442_v33 = vmax.f32 %v4440_v55, %v4441_v16  ;;  %v2715_v10 = vadd.f32 %v11641_v48, %v2714_v1  ;;  %v3147_v23 = vadd.f32 %v11641_v48, %v3146_v53  ;;  %v297_v1 = vld [vmem:[%s12560_s0 + $0x8d8] sm:$0xff] }
 0x45d   :  { %v4689_v30 = vsel %vm4076_vm2, %v3573_v44, -inf  ;;  %v4905_v46 = vsel %vm4076_vm2, %v4005_v37, -inf  ;;  %v5015_v5 = vmax.f32 %v5013_v19, %v5014_v13  ;;  %v5123_v7 = vmax.f32 %v5121_v52, %v5122_v36  ;;  %v441_v17 = vld [vmem:[%s12560_s0 + $0xd58] sm:$0xff]  ;;  %v13196_v44 = vld [vmem:[#allocation6_spill] sm:$0xff]  ;;  %v13197_v37 = vld [vmem:[#allocation52_spill] sm:$0xff] }
 0x45e   :  { %v3578_v34 = vpop.f32.mrf.mxu2  ;;  %v4010_v22 = vpop.f32.mrf.mxu3  ;;  %v4691_v24 = vmax.f32 %v4689_v30, %v4690_v18  ;;  %v4907_v53 = vmax.f32 %v4905_v46, %v4906_v43  ;;  %v585_v16 = vld [vmem:[%s12560_s0 + $0x11d8] sm:$0xff]  ;;  %v13198_v19 = vmax.f32 %v13196_v44, %v13197_v37  ;;  %v11682_v13 = vsel %vm4076_vm2, %v5597_v62, -inf  ;;  %v13199_v44 = vld [vmem:[#allocation128_spill] sm:$0xff] }
 0x45f   :  { %v2717_v31 = vpop.f32.mrf.mxu0  ;;  %v3149_v59 = vpop.f32.mrf.mxu1  ;;  %v5105_v36 = vmax.f32 %v11505_v47, %v11626_v56  ;;  %v4424_v60 = vmax.f32 %v11629_v2, %v11632_v20  ;;  %v4260_v55 = vsel %vm4076_vm2, %v2715_v10, -inf  ;;  %v4476_v18 = vsel %vm4076_vm2, %v3147_v23, -inf }
 0x460   :  { %v2718_v29 = vadd.f32 %v11641_v48, %v2717_v31  ;;  %v3150_v38 = vadd.f32 %v11641_v48, %v3149_v59  ;;  %v11679_v52 = vsel %vm4076_vm2, %v13198_v19, -inf  ;;  %v5397_v62 = vmax.f32 %v5015_v5, 0.0  ;;  %v13203_v19 = vld [vmem:[#allocation131_spill] sm:$0xff] }
 0x461   :  { %v5433_v46 = vmax.f32 %v5123_v7, 0.0  ;;  %v5016_v10 = vsel %vm4076_vm2, %v4226_v42, -inf  ;;  %v5124_v23 = vsel %vm4076_vm2, %v4442_v33, -inf  ;;  %v13202_v42 = vld [vmem:[#allocation130_spill] sm:$0xff] }
 0x462   :  { %v4261_v43 = vsel %vm4076_vm2, %v2718_v29, -inf  ;;  %v4477_v30 = vsel %vm4076_vm2, %v3150_v38, -inf  ;;  %6057 = vmatmul.msk.f32.gmra.mxu0 %vm598_vm1, %v153_v61  ;;  %6201 = vmatmul.msk.f32.gmra.mxu1 %vm598_vm1, %v297_v1  ;;  %v5230_v29 = vsel %vm4076_vm2, %v4691_v24, -inf  ;;  %v5338_v38 = vsel %vm4076_vm2, %v4907_v53, -inf }
 0x463   :  { %v4262_v31 = vmax.f32 %v4260_v55, %v4261_v43  ;;  %v4478_v59 = vmax.f32 %v4476_v18, %v4477_v30  ;;  %6345 = vmatmul.msk.f32.gmra.mxu2 %vm598_vm1, %v441_v17  ;;  %6489 = vmatmul.msk.f32.gmra.mxu3 %vm598_vm1, %v585_v16  ;;  %v3579_v61 = vadd.f32 %v11641_v48, %v3578_v34  ;;  %v13200_v17 = vld [vmem:[#allocation129_spill] sm:$0xff]  ;;  %v5607_v43 = vsel %vm4076_vm2, %v5433_v46, -inf }
 0x464   :  { %v4011_v1 = vadd.f32 %v11641_v48, %v4010_v22  ;;  %v13201_v37 = vmax.f32 %v13199_v44, %v13200_v17  ;;  %v13204_v33 = vmax.f32 %v13202_v42, %v13203_v19  ;;  %v5553_v22 = vsel %vm4076_vm2, %v5397_v62, -inf  ;;  %v154_v17 = vld [vmem:[%s12560_s0 + $0x460] sm:$0xff] }
 0x465   :  { %v5017_v5 = vsel %vm4076_vm2, %v4262_v31, -inf  ;;  %v5125_v7 = vsel %vm4076_vm2, %v4478_v59, -inf  ;;  %v4692_v42 = vsel %vm4076_vm2, %v3579_v61, -inf }
 0x466   :  { %v5229_v16 = vsel %vm4076_vm2, %v13201_v37, -inf  ;;  %v5337_v24 = vsel %vm4076_vm2, %v13204_v33, -inf  ;;  %v5018_v55 = vmax.f32 %v5016_v10, %v5017_v5  ;;  %v5126_v53 = vmax.f32 %v5124_v23, %v5125_v7  ;;  %v3581_v18 = vpop.f32.mrf.mxu2  ;;  %v4013_v34 = vpop.f32.mrf.mxu3  ;;  %v298_v10 = vld [vmem:[%s12560_s0 + $0x8e0] sm:$0xff] }
 0x467   :  { %v3582_v30 = vadd.f32 %v11641_v48, %v3581_v18  ;;  %v4014_v31 = vadd.f32 %v11641_v48, %v4013_v34  ;;  %v11716_v59 = vpop.f32.mrf.mxu0  ;;  %v11718_v44 = vpop.f32.mrf.mxu1  ;;  %v5231_v23 = vmax.f32 %v5229_v16, %v5230_v29  ;;  %v5339_v62 = vmax.f32 %v5337_v24, %v5338_v38  ;;  %v442_v7 = vld [vmem:[%s12560_s0 + $0xd60] sm:$0xff] }
 0x468   :  { %v5398_v5 = vmax.f32 %v5018_v55, 0.0  ;;  %v5434_v46 = vmax.f32 %v5126_v53, 0.0  ;;  %v586_v37 = vld [vmem:[%s12560_s0 + $0x11e0] sm:$0xff]  ;;  %v4908_v19 = vsel %vm4076_vm2, %v4011_v1, -inf  ;;  %v13208_v1 = vld [vmem:[#allocation28_spill] sm:$0xff] }
 0x469   :  { %v4693_v33 = vsel %vm4076_vm2, %v3582_v30, -inf  ;;  %v4909_v18 = vsel %vm4076_vm2, %v4014_v31, -inf  ;;  %v13205_v55 = vld [vmem:[#allocation78_spill] sm:$0xff]  ;;  %v13210_v30 = vmax.f32 %v13208_v1, %v13209_v39 }
 0x46a   :  { %v5554_v29 = vsel %vm4076_vm2, %v5398_v5, -inf  ;;  %v5608_v38 = vsel %vm4076_vm2, %v5434_v46, -inf  ;;  %v4694_v16 = vmax.f32 %v4692_v42, %v4693_v33  ;;  %v4910_v24 = vmax.f32 %v4908_v19, %v4909_v18  ;;  %6058 = vmatmul.msk.f32.gmra.mxu0 %vm598_vm1, %v154_v17  ;;  %6202 = vmatmul.msk.f32.gmra.mxu1 %vm598_vm1, %v298_v10  ;;  %v13206_v53 = vld [vmem:[#allocation70_spill] sm:$0xff] }
 0x46b   :  { %v13207_v34 = vmax.f32 %v13205_v55, %v13206_v53  ;;  %v5340_v31 = vsel %vm4076_vm2, %v13210_v30, -inf  ;;  %v5555_v14 = vmax.f32 %v5553_v22, %v5554_v29  ;;  %v5609_v5 = vmax.f32 %v5607_v43, %v5608_v38  ;;  %6346 = vmatmul.msk.f32.gmra.mxu2 %vm598_vm1, %v442_v7  ;;  %6490 = vmatmul.msk.f32.gmra.mxu3 %vm598_vm1, %v586_v37  ;;  %v13211_v43 = vld [vmem:[#allocation30_spill] sm:$0xff]  ;;  %v443_v30 = vld [vmem:[%s12560_s0 + $0xd68] sm:$0xff] }
 0x46c   :  { %v5469_v46 = vmax.f32 %v5231_v23, 0.0  ;;  %v5505_v17 = vmax.f32 %v5339_v62, 0.0  ;;  %v5233_v10 = vsel %vm4076_vm2, %v4694_v16, -inf  ;;  %v5341_v42 = vsel %vm4076_vm2, %v4910_v24, -inf  ;;  %v13212_v29 = vld [vmem:[#allocation74_spill] sm:$0xff]  ;;  %v13213_v16 = vld [vmem:[#allocation76_spill] sm:$0xff] }
 0x46d   :  { %v5232_v61 = vsel %vm4076_vm2, %v13207_v34, -inf  ;;  %v5751_v19 = vsel %vm4076_vm2, %v5555_v14, -inf  ;;  %v5770_v33 = vsel %vm4076_vm2, %v5609_v5, -inf  ;;  %v5342_v39 = vmax.f32 %v5340_v31, %v5341_v42  ;;  %v587_v31 = vld [vmem:[%s12560_s0 + $0x11e8] sm:$0xff] }
 0x46e   :  { %v5234_v18 = vmax.f32 %v5232_v61, %v5233_v10  ;;  %v11758_v22 = vsel %vm4076_vm2, %v4424_v60, -inf  ;;  %v2649_v23 = vadd.f32 %v11641_v48, %v13211_v43  ;;  %v5753_v62 = vmax.f32 %v5751_v19, %v11098_v57  ;;  %v11764_v37 = vpop.f32.mrf.mxu2  ;;  %v11766_v14 = vpop.f32.mrf.mxu3  ;;  %v155_v57 = vld [vmem:[%s12560_s0 + $0x468] sm:$0xff]  ;;  %v13214_v19 = vld [vmem:[#allocation72_spill] sm:$0xff] }
 0x46f   :  { %v5771_v7 = vmax.f32 %v11559_v54, %v5770_v33  ;;  %v2652_v38 = vadd.f32 %v11641_v48, %v13212_v29  ;;  %v3084_v2 = vadd.f32 %v11641_v48, %v13213_v16  ;;  %v5506_v60 = vmax.f32 %v5342_v39, 0.0  ;;  %v2723_v24 = vpop.f32.mrf.mxu0  ;;  %v3155_v55 = vpop.f32.mrf.mxu1  ;;  %v299_v54 = vld [vmem:[%s12560_s0 + $0x8e8] sm:$0xff] }
 0x470   :  { %v5470_v20 = vmax.f32 %v5234_v18, 0.0  ;;  %v5661_v53 = vsel %vm4076_vm2, %v5469_v46, -inf  ;;  %v5715_v34 = vsel %vm4076_vm2, %v5505_v17, -inf  ;;  %v5847_v61 = vmax.f32 %v5753_v62, 0.0 }
 0x471   :  { %v5853_v1 = vmax.f32 %v5771_v7, 0.0  ;;  %v5716_v10 = vsel %vm4076_vm2, %v5506_v60, -inf  ;;  %v2724_v42 = vadd.f32 %v11641_v48, %v2723_v24  ;;  %v3156_v46 = vadd.f32 %v11641_v48, %v3155_v55  ;;  %v13215_v55 = vld [vmem:[#allocation136_spill] sm:$0xff] }
 0x472   :  { %v5662_v5 = vsel %vm4076_vm2, %v5470_v20, -inf  ;;  %v3081_v17 = vadd.f32 %v11641_v48, %v13214_v19  ;;  %5883 = vst.msk [vmem:[%s12562_s3 + $0x30] sm:$0xff] %vm4076_vm2, %v5847_v61  ;;  %v5717_v18 = vmax.f32 %v5715_v34, %v5716_v10  ;;  %6059 = vmatmul.msk.f32.gmra.mxu0 %vm598_vm1, %v155_v57  ;;  %6203 = vmatmul.msk.f32.gmra.mxu1 %vm598_vm1, %v299_v54  ;;  %v4228_v7 = vsel %vm4076_vm2, %v2652_v38, -inf  ;;  %v444_v19 = vld [vmem:[%s12560_s0 + $0xd70] sm:$0xff] }
 0x473   :  { %v5663_v33 = vmax.f32 %v5661_v53, %v5662_v5  ;;  %v5108_v39 = vmax.f32 %v11511_v58, %v11758_v22  ;;  %5889 = vst.msk [vmem:[%s12562_s3 + $0x60] sm:$0xff] %vm4076_vm2, %v5853_v1  ;;  %v2721_v43 = vadd.f32 %v11641_v48, %v11716_v59  ;;  %v3153_v62 = vadd.f32 %v11641_v48, %v11718_v44 }
 0x474   :  { %6347 = vmatmul.msk.f32.gmra.mxu2 %vm598_vm1, %v443_v30  ;;  %6491 = vmatmul.msk.f32.gmra.mxu3 %vm598_vm1, %v587_v31  ;;  %v4444_v29 = vsel %vm4076_vm2, %v3084_v2, -inf  ;;  %v5824_v22 = vsel %vm4076_vm2, %v5717_v18, -inf  ;;  %v4264_v59 = vsel %vm4076_vm2, %v2724_v42, -inf  ;;  %v4480_v44 = vsel %vm4076_vm2, %v3156_v46, -inf  ;;  %v13216_v2 = vld [vmem:[#allocation138_spill] sm:$0xff]  ;;  %v300_v31 = vld [vmem:[%s12560_s0 + $0x8f0] sm:$0xff] }
 0x475   :  { %v5805_v58 = vsel %vm4076_vm2, %v5663_v33, -inf  ;;  %v5825_v20 = vmax.f32 %v11571_v11, %v5824_v22  ;;  %v4227_v60 = vsel %vm4076_vm2, %v2649_v23, -inf  ;;  %v4443_v24 = vsel %vm4076_vm2, %v3081_v17, -inf  ;;  %v156_v23 = vld [vmem:[%s12560_s0 + $0x470] sm:$0xff] }
 0x476   :  { %v5807_v16 = vmax.f32 %v5805_v58, %v11104_v63  ;;  %v2658_v38 = vadd.f32 %v11641_v48, %v13215_v55  ;;  %v3090_v57 = vadd.f32 %v11641_v48, %v13216_v2  ;;  %v3587_v54 = vpop.f32.mrf.mxu2  ;;  %v4019_v53 = vpop.f32.mrf.mxu3  ;;  %v4263_v11 = vsel %vm4076_vm2, %v2721_v43, -inf  ;;  %v588_v17 = vld [vmem:[%s12560_s0 + $0x11f0] sm:$0xff]  ;;  %v13218_v43 = vld [vmem:[#allocation126_spill] sm:$0xff] }
 0x477   :  { %v5871_v63 = vmax.f32 %v5825_v20, 0.0  ;;  %v4479_v61 = vsel %vm4076_vm2, %v3153_v62, -inf  ;;  %v2726_v1 = vpop.f32.mrf.mxu0  ;;  %v3158_v30 = vpop.f32.mrf.mxu1  ;;  %v4229_v5 = vmax.f32 %v4227_v60, %v4228_v7  ;;  %v4445_v10 = vmax.f32 %v4443_v24, %v4444_v29  ;;  %v13217_v33 = vld [vmem:[#allocation132_spill] sm:$0xff] }
 0x478   :  { %v5865_v34 = vmax.f32 %v5807_v16, 0.0  ;;  %v4265_v42 = vmax.f32 %v4263_v11, %v4264_v59  ;;  %v4481_v46 = vmax.f32 %v4479_v61, %v4480_v44  ;;  %v2655_v18 = vadd.f32 %v11641_v48, %v13217_v33  ;;  %v13219_v16 = vld [vmem:[#allocation2_spill] sm:$0xff]  ;;  %v13220_v59 = vld [vmem:[#allocation16_spill] sm:$0xff] }
 0x479   :  { %v3087_v62 = vadd.f32 %v11641_v48, %v13218_v43  ;;  %v3588_v7 = vadd.f32 %v11641_v48, %v3587_v54  ;;  %v4020_v29 = vadd.f32 %v11641_v48, %v4019_v53  ;;  %v5427_v58 = vmax.f32 %v5105_v36, 0.0  ;;  %5907 = vst.msk [vmem:[%s12562_s3 + $0xf0] sm:$0xff] %vm4076_vm2, %v5871_v63  ;;  %v445_v43 = vld [vmem:[%s12560_s0 + $0xd78] sm:$0xff] }
 0x47a   :  { %5901 = vst.msk [vmem:[%s12562_s3 + $0xc0] sm:$0xff] %vm4076_vm2, %v5865_v34  ;;  %v5428_v22 = vmax.f32 %v5108_v39, 0.0  ;;  %v3045_v20 = vadd.f32 %v11641_v48, %v13219_v16  ;;  %v3048_v44 = vadd.f32 %v11641_v48, %v13220_v59  ;;  %6060 = vmatmul.msk.f32.gmra.mxu0 %vm598_vm1, %v156_v23  ;;  %6204 = vmatmul.msk.f32.gmra.mxu1 %vm598_vm1, %v300_v31  ;;  %v4231_v60 = vsel %vm4076_vm2, %v2658_v38, -inf }
 0x47b   :  { %v4447_v47 = vsel %vm4076_vm2, %v3090_v57, -inf  ;;  %v3585_v56 = vadd.f32 %v11641_v48, %v11764_v37  ;;  %v4017_v36 = vadd.f32 %v11641_v48, %v11766_v14  ;;  %v5019_v39 = vsel %vm4076_vm2, %v4229_v5, -inf }
 0x47c   :  { %6348 = vmatmul.msk.f32.gmra.mxu2 %vm598_vm1, %v444_v19  ;;  %6492 = vmatmul.msk.f32.gmra.mxu3 %vm598_vm1, %v588_v17  ;;  %v5127_v24 = vsel %vm4076_vm2, %v4445_v10, -inf  ;;  %v5020_v55 = vsel %vm4076_vm2, %v4265_v42, -inf  ;;  %v5128_v38 = vsel %vm4076_vm2, %v4481_v46, -inf  ;;  %v4230_v2 = vsel %vm4076_vm2, %v2655_v18, -inf  ;;  %v157_v19 = vld [vmem:[%s12560_s0 + $0x478] sm:$0xff] }
 0x47d   :  { %v4446_v57 = vsel %vm4076_vm2, %v3087_v62, -inf  ;;  %v4696_v37 = vsel %vm4076_vm2, %v3588_v7, -inf  ;;  %v4912_v14 = vsel %vm4076_vm2, %v4020_v29, -inf  ;;  %v4232_v54 = vmax.f32 %v4230_v2, %v4231_v60  ;;  %v589_v62 = vld [vmem:[%s12560_s0 + $0x11f8] sm:$0xff] }
 0x47e   :  { %v4448_v53 = vmax.f32 %v4446_v57, %v4447_v47  ;;  %v2727_v34 = vadd.f32 %v11641_v48, %v2726_v1  ;;  %v3159_v63 = vadd.f32 %v11641_v48, %v3158_v30  ;;  %v3590_v11 = vpop.f32.mrf.mxu2  ;;  %v4022_v61 = vpop.f32.mrf.mxu3  ;;  %v4695_v23 = vsel %vm4076_vm2, %v3585_v56, -inf  ;;  %v301_v1 = vld [vmem:[%s12560_s0 + $0x8f8] sm:$0xff] }
 0x47f   :  { %v4911_v31 = vsel %vm4076_vm2, %v4017_v36, -inf  ;;  %v5021_v5 = vmax.f32 %v5019_v39, %v5020_v55  ;;  %v5129_v10 = vmax.f32 %v5127_v24, %v5128_v38  ;;  %v2729_v42 = vpop.f32.mrf.mxu0  ;;  %v3161_v46 = vpop.f32.mrf.mxu1  ;;  %v4697_v17 = vmax.f32 %v4695_v23, %v4696_v37 }
 0x480   :  { %v4913_v30 = vmax.f32 %v4911_v31, %v4912_v14  ;;  %v2730_v33 = vadd.f32 %v11641_v48, %v2729_v42  ;;  %v3162_v18 = vadd.f32 %v11641_v48, %v3161_v46  ;;  %v11896_v7 = vsel %vm4076_vm2, %v5427_v58, -inf }
 0x481   :  { %v11899_v29 = vsel %vm4076_vm2, %v5428_v22, -inf  ;;  %v11902_v16 = vsel %vm4076_vm2, %v3045_v20, -inf  ;;  %v11905_v59 = vsel %vm4076_vm2, %v3048_v44, -inf  ;;  %v4266_v60 = vsel %vm4076_vm2, %v2727_v34, -inf  ;;  %v13221_v34 = vld [vmem:[#allocation140_spill] sm:$0xff] }
 0x482   :  { %v4482_v47 = vsel %vm4076_vm2, %v3159_v63, -inf  ;;  %v4267_v56 = vsel %vm4076_vm2, %v2730_v33, -inf  ;;  %v4483_v36 = vsel %vm4076_vm2, %v3162_v18, -inf  ;;  %6061 = vmatmul.msk.f32.gmra.mxu0 %vm598_vm1, %v157_v19  ;;  %6205 = vmatmul.msk.f32.gmra.mxu1 %vm598_vm1, %v301_v1  ;;  %v5399_v58 = vmax.f32 %v5021_v5, 0.0  ;;  %v13222_v63 = vld [vmem:[#allocation137_spill] sm:$0xff]  ;;  %v13225_v5 = vld [vmem:[#allocation139_spill] sm:$0xff] }
 0x483   :  { %v5435_v22 = vmax.f32 %v5129_v10, 0.0  ;;  %v4268_v39 = vmax.f32 %v4266_v60, %v4267_v56  ;;  %v4484_v20 = vmax.f32 %v4482_v47, %v4483_v36  ;;  %v5022_v44 = vsel %vm4076_vm2, %v4232_v54, -inf  ;;  %v13224_v54 = vld [vmem:[#allocation134_spill] sm:$0xff] }
 0x484   :  { %6349 = vmatmul.msk.f32.gmra.mxu2 %vm598_vm1, %v445_v43  ;;  %6493 = vmatmul.msk.f32.gmra.mxu3 %vm598_vm1, %v589_v62  ;;  %v5130_v24 = vsel %vm4076_vm2, %v4448_v53, -inf  ;;  %v5236_v55 = vsel %vm4076_vm2, %v4697_v17, -inf  ;;  %v5344_v38 = vsel %vm4076_vm2, %v4913_v30, -inf  ;;  %v3591_v2 = vadd.f32 %v11641_v48, %v3590_v11 }
 0x485   :  { %v4023_v57 = vadd.f32 %v11641_v48, %v4022_v61  ;;  %v5023_v37 = vsel %vm4076_vm2, %v4268_v39, -inf  ;;  %v5131_v14 = vsel %vm4076_vm2, %v4484_v20, -inf  ;;  %v13223_v23 = vmax.f32 %v13221_v34, %v13222_v63  ;;  %v13230_v34 = vld [vmem:[#allocation146_spill] sm:$0xff]  ;;  %v13231_v63 = vld [vmem:[#allocation147_spill] sm:$0xff] }
 0x486   :  { %v13226_v53 = vmax.f32 %v13224_v54, %v13225_v5  ;;  %v5024_v42 = vmax.f32 %v5022_v44, %v5023_v37  ;;  %v5132_v46 = vmax.f32 %v5130_v24, %v5131_v14  ;;  %v3593_v19 = vpop.f32.mrf.mxu2  ;;  %v4025_v11 = vpop.f32.mrf.mxu3  ;;  %v5556_v61 = vsel %vm4076_vm2, %v5399_v58, -inf  ;;  %v13227_v37 = vld [vmem:[#allocation144_spill] sm:$0xff]  ;;  %v13228_v14 = vld [vmem:[#allocation145_spill] sm:$0xff] }
 0x487   :  { %v5235_v31 = vsel %vm4076_vm2, %v13223_v23, -inf  ;;  %v5610_v1 = vsel %vm4076_vm2, %v5435_v22, -inf  ;;  %v3594_v17 = vadd.f32 %v11641_v48, %v3593_v19  ;;  %v4026_v30 = vadd.f32 %v11641_v48, %v4025_v11  ;;  %v2732_v33 = vpop.f32.mrf.mxu0  ;;  %v3164_v18 = vpop.f32.mrf.mxu1 }
 0x488   :  { %v5343_v10 = vsel %vm4076_vm2, %v13226_v53, -inf  ;;  %v5237_v43 = vmax.f32 %v5235_v31, %v5236_v55  ;;  %v5400_v60 = vmax.f32 %v5024_v42, 0.0  ;;  %v5436_v47 = vmax.f32 %v5132_v46, 0.0 }
 0x489   :  { %v5345_v62 = vmax.f32 %v5343_v10, %v5344_v38  ;;  %v4698_v56 = vsel %vm4076_vm2, %v3591_v2, -inf  ;;  %v4914_v36 = vsel %vm4076_vm2, %v4023_v57, -inf  ;;  %v4699_v39 = vsel %vm4076_vm2, %v3594_v17, -inf  ;;  %v13233_v17 = vld [vmem:[#allocation57_spill] sm:$0xff] }
 0x48a   :  { %v4915_v58 = vsel %vm4076_vm2, %v4026_v30, -inf  ;;  %v5557_v22 = vsel %vm4076_vm2, %v5400_v60, -inf  ;;  %v5611_v20 = vsel %vm4076_vm2, %v5436_v47, -inf  ;;  %v4700_v44 = vmax.f32 %v4698_v56, %v4699_v39  ;;  %v13234_v60 = vld [vmem:[#allocation10_spill] sm:$0xff]  ;;  %v13236_v39 = vld [vmem:[#allocation84_spill] sm:$0xff] }
 0x48b   :  { %v4916_v24 = vmax.f32 %v4914_v36, %v4915_v58  ;;  %v13229_v55 = vmax.f32 %v13227_v37, %v13228_v14  ;;  %v13232_v2 = vmax.f32 %v13230_v34, %v13231_v63  ;;  %v5558_v23 = vmax.f32 %v5556_v61, %v5557_v22  ;;  %v13235_v56 = vld [vmem:[#allocation38_spill] sm:$0xff] }
 0x48c   :  { %v5612_v31 = vmax.f32 %v5610_v1, %v5611_v20  ;;  %v5471_v54 = vmax.f32 %v5237_v43, 0.0  ;;  %v5507_v5 = vmax.f32 %v5345_v62, 0.0  ;;  %v5239_v53 = vsel %vm4076_vm2, %v4700_v44, -inf }
 0x48d   :  { %v5238_v38 = vsel %vm4076_vm2, %v13229_v55, -inf  ;;  %v5346_v57 = vsel %vm4076_vm2, %v13232_v2, -inf  ;;  %v5347_v10 = vsel %vm4076_vm2, %v4916_v24, -inf  ;;  %v5754_v42 = vsel %vm4076_vm2, %v5558_v23, -inf  ;;  %v13237_v2 = vld [vmem:[#allocation40_spill] sm:$0xff] }
 0x48e   :  { %v5773_v46 = vsel %vm4076_vm2, %v5612_v31, -inf  ;;  %v5240_v19 = vmax.f32 %v5238_v38, %v5239_v53  ;;  %v5348_v11 = vmax.f32 %v5346_v57, %v5347_v10  ;;  %v3051_v30 = vadd.f32 %v11641_v48, %v13233_v17  ;;  %v3596_v43 = vpop.f32.mrf.mxu2  ;;  %v4028_v62 = vpop.f32.mrf.mxu3  ;;  %v13238_v23 = vld [vmem:[#allocation92_spill] sm:$0xff] }
 0x48f   :  { %v3054_v47 = vadd.f32 %v11641_v48, %v13234_v60  ;;  %v5756_v61 = vmax.f32 %v5754_v42, %v11109_v8  ;;  %v5774_v1 = vmax.f32 %v11581_v50, %v5773_v46  ;;  %v2664_v36 = vadd.f32 %v11641_v48, %v13235_v56  ;;  %v2735_v44 = vpop.f32.mrf.mxu0  ;;  %v3167_v24 = vpop.f32.mrf.mxu1  ;;  %v13239_v56 = vld [vmem:[#allocation148_spill] sm:$0xff] }
 0x490   :  { %v3096_v58 = vadd.f32 %v11641_v48, %v13236_v39  ;;  %v5472_v22 = vmax.f32 %v5240_v19, 0.0  ;;  %v5508_v20 = vmax.f32 %v5348_v11, 0.0  ;;  %v5664_v37 = vsel %vm4076_vm2, %v5471_v54, -inf  ;;  %v13240_v39 = vld [vmem:[#allocation142_spill] sm:$0xff] }
 0x491   :  { %v5718_v14 = vsel %vm4076_vm2, %v5507_v5, -inf  ;;  %v5848_v55 = vmax.f32 %v5756_v61, 0.0  ;;  %v5854_v8 = vmax.f32 %v5774_v1, 0.0  ;;  %v2736_v34 = vadd.f32 %v11641_v48, %v2735_v44 }
 0x492   :  { %v5665_v50 = vsel %vm4076_vm2, %v5472_v22, -inf  ;;  %v5719_v38 = vsel %vm4076_vm2, %v5508_v20, -inf  ;;  %v3168_v63 = vadd.f32 %v11641_v48, %v3167_v24  ;;  %v2661_v57 = vadd.f32 %v11641_v48, %v13237_v2  ;;  %v13242_v2 = vld [vmem:[#allocation36_spill] sm:$0xff] }
 0x493   :  { %v3093_v31 = vadd.f32 %v11641_v48, %v13238_v23  ;;  %5884 = vst.msk [vmem:[%s12562_s3 + $0x38] sm:$0xff] %vm4076_vm2, %v5848_v55  ;;  %v5666_v54 = vmax.f32 %v5664_v37, %v5665_v50  ;;  %v5720_v5 = vmax.f32 %v5718_v14, %v5719_v38  ;;  %v11978_v53 = vsel %vm4076_vm2, %v3051_v30, -inf }
 0x494   :  { %v11981_v10 = vsel %vm4076_vm2, %v3054_v47, -inf  ;;  %5890 = vst.msk [vmem:[%s12562_s3 + $0x68] sm:$0xff] %vm4076_vm2, %v5854_v8  ;;  %v2733_v42 = vadd.f32 %v11641_v48, %v2732_v33  ;;  %v3165_v46 = vadd.f32 %v11641_v48, %v3164_v18  ;;  %v4234_v19 = vsel %vm4076_vm2, %v2664_v36, -inf }
 0x495   :  { %v4450_v11 = vsel %vm4076_vm2, %v3096_v58, -inf  ;;  %v5808_v17 = vsel %vm4076_vm2, %v5666_v54, -inf  ;;  %v5827_v30 = vsel %vm4076_vm2, %v5720_v5, -inf  ;;  %v4270_v61 = vsel %vm4076_vm2, %v2736_v34, -inf  ;;  %v13241_v34 = vld [vmem:[#allocation90_spill] sm:$0xff]  ;;  %v13243_v54 = vld [vmem:[#allocation4_spill] sm:$0xff] }
 0x496   :  { %v5810_v60 = vmax.f32 %v5808_v17, %v11120_v40  ;;  %v5828_v47 = vmax.f32 %v11679_v52, %v5827_v30  ;;  %v4486_v1 = vsel %vm4076_vm2, %v3168_v63, -inf  ;;  %v4233_v33 = vsel %vm4076_vm2, %v2661_v57, -inf  ;;  %v3599_v22 = vpop.f32.mrf.mxu2  ;;  %v4031_v20 = vpop.f32.mrf.mxu3  ;;  %v13244_v5 = vld [vmem:[#allocation50_spill] sm:$0xff] }
 0x497   :  { %v4449_v18 = vsel %vm4076_vm2, %v3093_v31, -inf  ;;  %v2670_v36 = vadd.f32 %v11641_v48, %v13239_v56  ;;  %v3102_v58 = vadd.f32 %v11641_v48, %v13240_v39  ;;  %v4269_v52 = vsel %vm4076_vm2, %v2733_v42, -inf  ;;  %v2738_v37 = vpop.f32.mrf.mxu0  ;;  %v3170_v14 = vpop.f32.mrf.mxu1 }
 0x498   :  { %v5866_v44 = vmax.f32 %v5810_v60, 0.0  ;;  %v5872_v40 = vmax.f32 %v5828_v47, 0.0  ;;  %v4485_v24 = vsel %vm4076_vm2, %v3165_v46, -inf  ;;  %v4235_v55 = vmax.f32 %v4233_v33, %v4234_v19 }
 0x499   :  { %v4451_v8 = vmax.f32 %v4449_v18, %v4450_v11  ;;  %v4271_v50 = vmax.f32 %v4269_v52, %v4270_v61  ;;  %v4487_v38 = vmax.f32 %v4485_v24, %v4486_v1  ;;  %v2667_v63 = vadd.f32 %v11641_v48, %v13241_v34 }
 0x49a   :  { %v3099_v57 = vadd.f32 %v11641_v48, %v13242_v2  ;;  %5902 = vst.msk [vmem:[%s12562_s3 + $0xc8] sm:$0xff] %vm4076_vm2, %v5866_v44  ;;  %v3600_v23 = vadd.f32 %v11641_v48, %v3599_v22  ;;  %v4032_v31 = vadd.f32 %v11641_v48, %v4031_v20  ;;  %v13245_v42 = vmax.f32 %v13243_v54, %v13244_v5 }
 0x49b   :  { %v5600_v19 = vmax.f32 %v11896_v7, %v11899_v29  ;;  %v4427_v11 = vmax.f32 %v11902_v16, %v11905_v59  ;;  %v4430_v17 = vmax.f32 %v11978_v53, %v11981_v10  ;;  %5908 = vst.msk [vmem:[%s12562_s3 + $0xf8] sm:$0xff] %vm4076_vm2, %v5872_v40  ;;  %v4237_v30 = vsel %vm4076_vm2, %v2670_v36, -inf }
 0x49c   :  { %v12019_v46 = vsel %vm4076_vm2, %v13245_v42, -inf  ;;  %v4453_v60 = vsel %vm4076_vm2, %v3102_v58, -inf  ;;  %v3597_v47 = vadd.f32 %v11641_v48, %v3596_v43  ;;  %v4029_v61 = vadd.f32 %v11641_v48, %v4028_v62 }
 0x49d   :  { %v5025_v7 = vsel %vm4076_vm2, %v4235_v55, -inf  ;;  %v5133_v29 = vsel %vm4076_vm2, %v4451_v8, -inf  ;;  %v5026_v16 = vsel %vm4076_vm2, %v4271_v50, -inf  ;;  %v5134_v59 = vsel %vm4076_vm2, %v4487_v38, -inf  ;;  %v13247_v38 = vld [vmem:[#allocation12_spill] sm:$0xff] }
 0x49e   :  { %v4236_v53 = vsel %vm4076_vm2, %v2667_v63, -inf  ;;  %v4452_v10 = vsel %vm4076_vm2, %v3099_v57, -inf  ;;  %v4702_v1 = vsel %vm4076_vm2, %v3600_v23, -inf  ;;  %v4918_v33 = vsel %vm4076_vm2, %v4032_v31, -inf  ;;  %v3602_v36 = vpop.f32.mrf.mxu2  ;;  %v4034_v39 = vpop.f32.mrf.mxu3 }
 0x49f   :  { %v4238_v18 = vmax.f32 %v4236_v53, %v4237_v30  ;;  %v4454_v43 = vmax.f32 %v4452_v10, %v4453_v60  ;;  %v2739_v62 = vadd.f32 %v11641_v48, %v2738_v37  ;;  %v3171_v56 = vadd.f32 %v11641_v48, %v3170_v14  ;;  %v2741_v40 = vpop.f32.mrf.mxu0  ;;  %v3173_v52 = vpop.f32.mrf.mxu1  ;;  %v13246_v14 = vld [vmem:[#allocation14_spill] sm:$0xff] }
 0x4a0   :  { %v4701_v58 = vsel %vm4076_vm2, %v3597_v47, -inf  ;;  %v4917_v22 = vsel %vm4076_vm2, %v4029_v61, -inf  ;;  %v5027_v20 = vmax.f32 %v5025_v7, %v5026_v16  ;;  %v5135_v44 = vmax.f32 %v5133_v29, %v5134_v59  ;;  %v13249_v53 = vld [vmem:[#allocation82_spill] sm:$0xff] }
 0x4a1   :  { %v4703_v24 = vmax.f32 %v4701_v58, %v4702_v1  ;;  %v4919_v55 = vmax.f32 %v4917_v22, %v4918_v33  ;;  %v2742_v8 = vadd.f32 %v11641_v48, %v2741_v40  ;;  %v3174_v50 = vadd.f32 %v11641_v48, %v3173_v52  ;;  %v13250_v10 = vld [vmem:[#allocation86_spill] sm:$0xff] }
 0x4a2   :  { %v12050_v37 = vsel %vm4076_vm2, %v5600_v19, -inf  ;;  %v13248_v34 = vmax.f32 %v13246_v14, %v13247_v38  ;;  %v12059_v2 = vsel %vm4076_vm2, %v4427_v11, -inf  ;;  %v12062_v57 = vsel %vm4076_vm2, %v4430_v17, -inf }
 0x4a3   :  { %v4272_v23 = vsel %vm4076_vm2, %v2739_v62, -inf  ;;  %v4488_v31 = vsel %vm4076_vm2, %v3171_v56, -inf  ;;  %v4273_v54 = vsel %vm4076_vm2, %v2742_v8, -inf  ;;  %v4489_v5 = vsel %vm4076_vm2, %v3174_v50, -inf  ;;  %v13253_v62 = vld [vmem:[#allocation88_spill] sm:$0xff] }
 0x4a4   :  { %v12056_v63 = vsel %vm4076_vm2, %v13248_v34, -inf  ;;  %v5401_v42 = vmax.f32 %v5027_v20, 0.0  ;;  %v5437_v19 = vmax.f32 %v5135_v44, 0.0  ;;  %v4274_v30 = vmax.f32 %v4272_v23, %v4273_v54 }
 0x4a5   :  { %v4490_v60 = vmax.f32 %v4488_v31, %v4489_v5  ;;  %v5028_v47 = vsel %vm4076_vm2, %v4238_v18, -inf  ;;  %v5136_v11 = vsel %vm4076_vm2, %v4454_v43, -inf  ;;  %v5242_v61 = vsel %vm4076_vm2, %v4703_v24, -inf  ;;  %v13252_v18 = vld [vmem:[#allocation34_spill] sm:$0xff] }
 0x4a6   :  { %v5350_v17 = vsel %vm4076_vm2, %v4919_v55, -inf  ;;  %v3603_v7 = vadd.f32 %v11641_v48, %v3602_v36  ;;  %v4035_v29 = vadd.f32 %v11641_v48, %v4034_v39  ;;  %v5029_v16 = vsel %vm4076_vm2, %v4274_v30, -inf  ;;  %v3605_v20 = vpop.f32.mrf.mxu2  ;;  %v4037_v36 = vpop.f32.mrf.mxu3 }
 0x4a7   :  { %v5137_v59 = vsel %vm4076_vm2, %v4490_v60, -inf  ;;  %v13251_v1 = vmax.f32 %v13249_v53, %v13250_v10  ;;  %v13254_v43 = vmax.f32 %v13252_v18, %v13253_v62  ;;  %v5030_v58 = vmax.f32 %v5028_v47, %v5029_v16  ;;  %v2744_v24 = vpop.f32.mrf.mxu0  ;;  %v3176_v55 = vpop.f32.mrf.mxu1  ;;  %v13255_v60 = vld [vmem:[#allocation153_spill] sm:$0xff]  ;;  %v13256_v47 = vld [vmem:[#allocation152_spill] sm:$0xff]  ;;  %v13259_v16 = vld [vmem:[#allocation154_spill] sm:$0xff] }
 0x4a8   :  { %v5138_v22 = vmax.f32 %v5136_v11, %v5137_v59  ;;  %v5559_v39 = vsel %vm4076_vm2, %v5401_v42, -inf  ;;  %v5613_v44 = vsel %vm4076_vm2, %v5437_v19, -inf  ;;  %v3606_v40 = vadd.f32 %v11641_v48, %v3605_v20 }
 0x4a9   :  { %v5241_v33 = vsel %vm4076_vm2, %v13251_v1, -inf  ;;  %v5349_v56 = vsel %vm4076_vm2, %v13254_v43, -inf  ;;  %v4038_v52 = vadd.f32 %v11641_v48, %v4037_v36  ;;  %v5402_v14 = vmax.f32 %v5030_v58, 0.0 }
 0x4aa   :  { %v5243_v8 = vmax.f32 %v5241_v33, %v5242_v61  ;;  %v5351_v50 = vmax.f32 %v5349_v56, %v5350_v17  ;;  %v5438_v38 = vmax.f32 %v5138_v22, 0.0  ;;  %v4704_v34 = vsel %vm4076_vm2, %v3603_v7, -inf  ;;  %v13258_v17 = vld [vmem:[#allocation155_spill] sm:$0xff] }
 0x4ab   :  { %v4920_v23 = vsel %vm4076_vm2, %v4035_v29, -inf  ;;  %v4705_v31 = vsel %vm4076_vm2, %v3606_v40, -inf  ;;  %v4921_v54 = vsel %vm4076_vm2, %v4038_v52, -inf  ;;  %v5560_v5 = vsel %vm4076_vm2, %v5402_v14, -inf  ;;  %v13261_v52 = vld [vmem:[#allocation48_spill] sm:$0xff] }
 0x4ac   :  { %v5614_v42 = vsel %vm4076_vm2, %v5438_v38, -inf  ;;  %v4706_v19 = vmax.f32 %v4704_v34, %v4705_v31  ;;  %v4922_v30 = vmax.f32 %v4920_v23, %v4921_v54  ;;  %v13257_v11 = vmax.f32 %v13255_v60, %v13256_v47 }
 0x4ad   :  { %v13260_v7 = vmax.f32 %v13258_v17, %v13259_v16  ;;  %v5561_v59 = vmax.f32 %v5559_v39, %v5560_v5  ;;  %v5615_v53 = vmax.f32 %v5613_v44, %v5614_v42  ;;  %v5473_v10 = vmax.f32 %v5243_v8, 0.0  ;;  %v13263_v42 = vld [vmem:[#allocation156_spill] sm:$0xff] }
 0x4ae   :  { %v5244_v61 = vsel %vm4076_vm2, %v13257_v11, -inf  ;;  %v5509_v1 = vmax.f32 %v5351_v50, 0.0  ;;  %v5245_v33 = vsel %vm4076_vm2, %v4706_v19, -inf  ;;  %v5353_v18 = vsel %vm4076_vm2, %v4922_v30, -inf  ;;  %v3608_v44 = vpop.f32.mrf.mxu2  ;;  %v4040_v40 = vpop.f32.mrf.mxu3  ;;  %v13262_v50 = vld [vmem:[#allocation104_spill] sm:$0xff]  ;;  %v13264_v30 = vld [vmem:[#allocation150_spill] sm:$0xff] }
 0x4af   :  { %v5352_v29 = vsel %vm4076_vm2, %v13260_v7, -inf  ;;  %v5757_v62 = vsel %vm4076_vm2, %v5561_v59, -inf  ;;  %v5776_v43 = vsel %vm4076_vm2, %v5615_v53, -inf  ;;  %v5246_v56 = vmax.f32 %v5244_v61, %v5245_v33  ;;  %v2747_v23 = vpop.f32.mrf.mxu0  ;;  %v3179_v31 = vpop.f32.mrf.mxu1 }
 0x4b0   :  { %v5354_v58 = vmax.f32 %v5352_v29, %v5353_v18  ;;  %v5111_v22 = vmax.f32 %v11516_v32, %v12059_v2  ;;  %v5114_v20 = vmax.f32 %v11519_v45, %v12062_v57  ;;  %v5759_v36 = vmax.f32 %v5757_v62, %v11192_v21 }
 0x4b1   :  { %v5777_v39 = vmax.f32 %v11682_v13, %v5776_v43  ;;  %v2676_v8 = vadd.f32 %v11641_v48, %v13261_v52  ;;  %v3108_v14 = vadd.f32 %v11641_v48, %v13262_v50  ;;  %v5474_v38 = vmax.f32 %v5246_v56, 0.0  ;;  %v13265_v43 = vld [vmem:[#allocation102_spill] sm:$0xff] }
 0x4b2   :  { %v5510_v34 = vmax.f32 %v5354_v58, 0.0  ;;  %v5667_v32 = vsel %vm4076_vm2, %v5473_v10, -inf  ;;  %v5721_v45 = vsel %vm4076_vm2, %v5509_v1, -inf  ;;  %v5849_v2 = vmax.f32 %v5759_v36, 0.0  ;;  %v13266_v58 = vld [vmem:[#allocation44_spill] sm:$0xff] }
 0x4b3   :  { %v5855_v21 = vmax.f32 %v5777_v39, 0.0  ;;  %v5668_v13 = vsel %vm4076_vm2, %v5474_v38, -inf  ;;  %v2748_v54 = vadd.f32 %v11641_v48, %v2747_v23  ;;  %v3180_v5 = vadd.f32 %v11641_v48, %v3179_v31  ;;  %v13267_v31 = vld [vmem:[#allocation160_spill] sm:$0xff] }
 0x4b4   :  { %v5722_v57 = vsel %vm4076_vm2, %v5510_v34, -inf  ;;  %v2673_v19 = vadd.f32 %v11641_v48, %v13263_v42  ;;  %v3105_v60 = vadd.f32 %v11641_v48, %v13264_v30  ;;  %5885 = vst.msk [vmem:[%s12562_s3 + $0x40] sm:$0xff] %vm4076_vm2, %v5849_v2  ;;  %v5669_v47 = vmax.f32 %v5667_v32, %v5668_v13 }
 0x4b5   :  { %v5723_v11 = vmax.f32 %v5721_v45, %v5722_v57  ;;  %v5429_v61 = vmax.f32 %v5111_v22, 0.0  ;;  %v5430_v17 = vmax.f32 %v5114_v20, 0.0  ;;  %5891 = vst.msk [vmem:[%s12562_s3 + $0x70] sm:$0xff] %vm4076_vm2, %v5855_v21  ;;  %v2745_v16 = vadd.f32 %v11641_v48, %v2744_v24  ;;  %v13268_v45 = vld [vmem:[#allocation162_spill] sm:$0xff] }
 0x4b6   :  { %v3177_v7 = vadd.f32 %v11641_v48, %v3176_v55  ;;  %v4240_v29 = vsel %vm4076_vm2, %v2676_v8, -inf  ;;  %v4456_v59 = vsel %vm4076_vm2, %v3108_v14, -inf  ;;  %v5811_v53 = vsel %vm4076_vm2, %v5669_v47, -inf  ;;  %v3611_v20 = vpop.f32.mrf.mxu2  ;;  %v4043_v36 = vpop.f32.mrf.mxu3 }
 0x4b7   :  { %v5830_v10 = vsel %vm4076_vm2, %v5723_v11, -inf  ;;  %v5813_v1 = vmax.f32 %v5811_v53, %v11230_v4  ;;  %v4276_v18 = vsel %vm4076_vm2, %v2748_v54, -inf  ;;  %v4492_v62 = vsel %vm4076_vm2, %v3180_v5, -inf  ;;  %v2750_v8 = vpop.f32.mrf.mxu0  ;;  %v3182_v50 = vpop.f32.mrf.mxu1  ;;  %v13269_v5 = vld [vmem:[#allocation24_spill] sm:$0xff] }
 0x4b8   :  { %v5831_v33 = vmax.f32 %v12019_v46, %v5830_v10  ;;  %v4239_v24 = vsel %vm4076_vm2, %v2673_v19, -inf  ;;  %v4455_v55 = vsel %vm4076_vm2, %v3105_v60, -inf  ;;  %v2682_v56 = vadd.f32 %v11641_v48, %v13265_v43  ;;  %v13270_v19 = vld [vmem:[#allocation22_spill] sm:$0xff] }
 0x4b9   :  { %v3114_v22 = vadd.f32 %v11641_v48, %v13266_v58  ;;  %v5867_v39 = vmax.f32 %v5813_v1, 0.0  ;;  %v4275_v46 = vsel %vm4076_vm2, %v2745_v16, -inf  ;;  %v4491_v52 = vsel %vm4076_vm2, %v3177_v7, -inf }
 0x4ba   :  { %v5873_v4 = vmax.f32 %v5831_v33, 0.0  ;;  %v4241_v14 = vmax.f32 %v4239_v24, %v4240_v29  ;;  %v4457_v38 = vmax.f32 %v4455_v55, %v4456_v59  ;;  %v4277_v34 = vmax.f32 %v4275_v46, %v4276_v18 }
 0x4bb   :  { %v4493_v23 = vmax.f32 %v4491_v52, %v4492_v62  ;;  %v2679_v32 = vadd.f32 %v11641_v48, %v13267_v31  ;;  %v3111_v2 = vadd.f32 %v11641_v48, %v13268_v45  ;;  %5903 = vst.msk [vmem:[%s12562_s3 + $0xd0] sm:$0xff] %vm4076_vm2, %v5867_v39  ;;  %v3612_v21 = vadd.f32 %v11641_v48, %v3611_v20 }
 0x4bc   :  { %v4044_v13 = vadd.f32 %v11641_v48, %v4043_v36  ;;  %v12163_v57 = vsel %vm4076_vm2, %v5429_v61, -inf  ;;  %v12166_v54 = vsel %vm4076_vm2, %v5430_v17, -inf  ;;  %v3057_v42 = vadd.f32 %v11641_v48, %v13269_v5  ;;  %5909 = vst.msk [vmem:[%s12562_s3 + $0x100] sm:$0xff] %vm4076_vm2, %v5873_v4 }
 0x4bd   :  { %v3060_v30 = vadd.f32 %v11641_v48, %v13270_v19  ;;  %v4243_v60 = vsel %vm4076_vm2, %v2682_v56, -inf  ;;  %v4459_v47 = vsel %vm4076_vm2, %v3114_v22, -inf  ;;  %v3609_v11 = vadd.f32 %v11641_v48, %v3608_v44 }
 0x4be   :  { %v4041_v61 = vadd.f32 %v11641_v48, %v4040_v40  ;;  %v5031_v17 = vsel %vm4076_vm2, %v4241_v14, -inf  ;;  %v5139_v16 = vsel %vm4076_vm2, %v4457_v38, -inf  ;;  %v5032_v7 = vsel %vm4076_vm2, %v4277_v34, -inf  ;;  %v3614_v62 = vpop.f32.mrf.mxu2  ;;  %v4046_v24 = vpop.f32.mrf.mxu3  ;;  %v13271_v14 = vld [vmem:[#allocation122_spill] sm:$0xff]  ;;  %v13272_v34 = vld [vmem:[#allocation124_spill] sm:$0xff] }
 0x4bf   :  { %v5140_v29 = vsel %vm4076_vm2, %v4493_v23, -inf  ;;  %v4242_v59 = vsel %vm4076_vm2, %v2679_v32, -inf  ;;  %v4458_v53 = vsel %vm4076_vm2, %v3111_v2, -inf  ;;  %v4708_v10 = vsel %vm4076_vm2, %v3612_v21, -inf  ;;  %v2753_v22 = vpop.f32.mrf.mxu0  ;;  %v3185_v20 = vpop.f32.mrf.mxu1 }
 0x4c0   :  { %v4924_v1 = vsel %vm4076_vm2, %v4044_v13, -inf  ;;  %v4244_v33 = vmax.f32 %v4242_v59, %v4243_v60  ;;  %v4460_v44 = vmax.f32 %v4458_v53, %v4459_v47  ;;  %v2751_v40 = vadd.f32 %v11641_v48, %v2750_v8  ;;  %v13276_v53 = vld [vmem:[#allocation163_spill] sm:$0xff] }
 0x4c1   :  { %v3183_v18 = vadd.f32 %v11641_v48, %v3182_v50  ;;  %v4707_v55 = vsel %vm4076_vm2, %v3609_v11, -inf  ;;  %v4923_v43 = vsel %vm4076_vm2, %v4041_v61, -inf  ;;  %v5033_v56 = vmax.f32 %v5031_v17, %v5032_v7  ;;  %v12203_v50 = vld [vmem:[%s12561_s2] ss:$0 sm:$0xff] }
 0x4c2   :  { %v5141_v58 = vmax.f32 %v5139_v16, %v5140_v29  ;;  %v4709_v36 = vmax.f32 %v4707_v55, %v4708_v10  ;;  %v4925_v39 = vmax.f32 %v4923_v43, %v4924_v1  ;;  %v2754_v4 = vadd.f32 %v11641_v48, %v2753_v22  ;;  %v13273_v16 = vld [vmem:[#allocation161_spill] sm:$0xff]  ;;  %v13274_v7 = vld [vmem:[#allocation46_spill] sm:$0xff]  ;;  %v13277_v10 = vld [vmem:[#allocation96_spill] sm:$0xff] }
 0x4c3   :  { %v3186_v46 = vadd.f32 %v11641_v48, %v3185_v20  ;;  %v12195_v52 = vsel %vm4076_vm2, %v3057_v42, -inf  ;;  %v12198_v8 = vsel %vm4076_vm2, %v3060_v30, -inf  ;;  %v3063_v38 = vadd.f32 %v12203_v50, %v13271_v14 }
 0x4c4   :  { %v3066_v23 = vadd.f32 %v12203_v50, %v13272_v34  ;;  %v4278_v31 = vsel %vm4076_vm2, %v2751_v40, -inf  ;;  %v4494_v48 = vsel %vm4076_vm2, %v3183_v18, -inf  ;;  %v4279_v32 = vsel %vm4076_vm2, %v2754_v4, -inf }
 0x4c5   :  { %v4495_v45 = vsel %vm4076_vm2, %v3186_v46, -inf  ;;  %v5403_v2 = vmax.f32 %v5033_v56, 0.0  ;;  %v5439_v21 = vmax.f32 %v5141_v58, 0.0  ;;  %v4280_v13 = vmax.f32 %v4278_v31, %v4279_v32 }
 0x4c6   :  { %v4496_v5 = vmax.f32 %v4494_v48, %v4495_v45  ;;  %v5034_v42 = vsel %vm4076_vm2, %v4244_v33, -inf  ;;  %v5142_v19 = vsel %vm4076_vm2, %v4460_v44, -inf  ;;  %v5248_v30 = vsel %vm4076_vm2, %v4709_v36, -inf  ;;  %v3617_v18 = vpop.f32.mrf.mxu2 }
 0x4c7   :  { %v5356_v60 = vsel %vm4076_vm2, %v4925_v39, -inf  ;;  %v3615_v47 = vadd.f32 %v12203_v50, %v3614_v62  ;;  %v4047_v11 = vadd.f32 %v12203_v50, %v4046_v24  ;;  %v5035_v61 = vsel %vm4076_vm2, %v4280_v13, -inf  ;;  %v4049_v62 = vpop.f32.mrf.mxu3  ;;  %v2756_v58 = vpop.f32.mrf.mxu0  ;;  %v13280_v13 = vld [vmem:[#allocation164_spill] sm:$0xff] }
 0x4c8   :  { %v5143_v17 = vsel %vm4076_vm2, %v4496_v5, -inf  ;;  %v13275_v29 = vmax.f32 %v13273_v16, %v13274_v7  ;;  %v13278_v1 = vmax.f32 %v13276_v53, %v13277_v10  ;;  %v5036_v44 = vmax.f32 %v5034_v42, %v5035_v61  ;;  %v3188_v22 = vpop.f32.mrf.mxu1 }
 0x4c9   :  { %v5144_v40 = vmax.f32 %v5142_v19, %v5143_v17  ;;  %v5562_v24 = vsel %vm4076_vm2, %v5403_v2, -inf  ;;  %v5616_v55 = vsel %vm4076_vm2, %v5439_v21, -inf  ;;  %v3618_v43 = vadd.f32 %v12203_v50, %v3617_v18  ;;  %v13279_v21 = vld [vmem:[#allocation98_spill] sm:$0xff]  ;;  %v13282_v19 = vld [vmem:[#allocation100_spill] sm:$0xff] }
 0x4ca   :  { %v5247_v59 = vsel %vm4076_vm2, %v13275_v29, -inf  ;;  %v5355_v33 = vsel %vm4076_vm2, %v13278_v1, -inf  ;;  %v4050_v56 = vadd.f32 %v12203_v50, %v4049_v62  ;;  %v5404_v39 = vmax.f32 %v5036_v44, 0.0 }
 0x4cb   :  { %v5249_v20 = vmax.f32 %v5247_v59, %v5248_v30  ;;  %v5357_v36 = vmax.f32 %v5355_v33, %v5356_v60  ;;  %v5440_v4 = vmax.f32 %v5144_v40, 0.0  ;;  %v4710_v46 = vsel %vm4076_vm2, %v3615_v47, -inf  ;;  %v13283_v30 = vld [vmem:[#allocation158_spill] sm:$0xff] }
 0x4cc   :  { %v4926_v14 = vsel %vm4076_vm2, %v4047_v11, -inf  ;;  %v4711_v34 = vsel %vm4076_vm2, %v3618_v43, -inf  ;;  %v4927_v31 = vsel %vm4076_vm2, %v4050_v56, -inf  ;;  %v5563_v48 = vsel %vm4076_vm2, %v5404_v39, -inf  ;;  %v13286_v56 = vld [vmem:[#allocation166_spill] sm:$0xff] }
 0x4cd   :  { %v5617_v32 = vsel %vm4076_vm2, %v5440_v4, -inf  ;;  %v4712_v45 = vmax.f32 %v4710_v46, %v4711_v34  ;;  %v4928_v2 = vmax.f32 %v4926_v14, %v4927_v31  ;;  %v13281_v5 = vmax.f32 %v13279_v21, %v13280_v13 }
 0x4ce   :  { %v13284_v60 = vmax.f32 %v13282_v19, %v13283_v30  ;;  %v5564_v11 = vmax.f32 %v5562_v24, %v5563_v48  ;;  %v5618_v61 = vmax.f32 %v5616_v55, %v5617_v32  ;;  %v5475_v17 = vmax.f32 %v5249_v20, 0.0  ;;  %v3620_v62 = vpop.f32.mrf.mxu2  ;;  %v13285_v55 = vld [vmem:[#allocation172_spill] sm:$0xff]  ;;  %v13287_v32 = vld [vmem:[#allocation94_spill] sm:$0xff] }
 0x4cf   :  { %v5250_v42 = vsel %vm4076_vm2, %v13281_v5, -inf  ;;  %v5511_v16 = vmax.f32 %v5357_v36, 0.0  ;;  %v5251_v7 = vsel %vm4076_vm2, %v4712_v45, -inf  ;;  %v5359_v29 = vsel %vm4076_vm2, %v4928_v2, -inf  ;;  %v4052_v24 = vpop.f32.mrf.mxu3  ;;  %v2759_v4 = vpop.f32.mrf.mxu0  ;;  %v13288_v2 = vld [vmem:[#allocation42_spill] sm:$0xff] }
 0x4d0   :  { %v5358_v47 = vsel %vm4076_vm2, %v13284_v60, -inf  ;;  %v5760_v59 = vsel %vm4076_vm2, %v5564_v11, -inf  ;;  %v5779_v53 = vsel %vm4076_vm2, %v5618_v61, -inf  ;;  %v5252_v10 = vmax.f32 %v5250_v42, %v5251_v7  ;;  %v3191_v46 = vpop.f32.mrf.mxu1 }
 0x4d1   :  { %v5360_v1 = vmax.f32 %v5358_v47, %v5359_v29  ;;  %v12252_v33 = vsel %vm4076_vm2, %v3063_v38, -inf  ;;  %v4435_v44 = vsel %vm4076_vm2, %v3066_v23, -inf  ;;  %v5762_v40 = vmax.f32 %v5760_v59, %v11242_v27 }
 0x4d2   :  { %v5780_v18 = vmax.f32 %v12050_v37, %v5779_v53  ;;  %v2688_v43 = vadd.f32 %v12203_v50, %v13285_v55  ;;  %v3120_v20 = vadd.f32 %v12203_v50, %v13286_v56  ;;  %v5476_v36 = vmax.f32 %v5252_v10, 0.0 }
 0x4d3   :  { %v5512_v39 = vmax.f32 %v5360_v1, 0.0  ;;  %v5670_v38 = vsel %vm4076_vm2, %v5475_v17, -inf  ;;  %v5724_v23 = vsel %vm4076_vm2, %v5511_v16, -inf  ;;  %v5850_v14 = vmax.f32 %v5762_v40, 0.0 }
 0x4d4   :  { %v5856_v27 = vmax.f32 %v5780_v18, 0.0  ;;  %v5671_v37 = vsel %vm4076_vm2, %v5476_v36, -inf  ;;  %v2760_v31 = vadd.f32 %v12203_v50, %v2759_v4  ;;  %v3192_v48 = vadd.f32 %v12203_v50, %v3191_v46 }
 0x4d5   :  { %v5725_v34 = vsel %vm4076_vm2, %v5512_v39, -inf  ;;  %v2685_v45 = vadd.f32 %v12203_v50, %v13287_v32  ;;  %v3117_v21 = vadd.f32 %v12203_v50, %v13288_v2  ;;  %5886 = vst.msk [vmem:[%s12562_s3 + $0x48] sm:$0xff] %vm4076_vm2, %v5850_v14  ;;  %v5672_v13 = vmax.f32 %v5670_v38, %v5671_v37 }
 0x4d6   :  { %v5726_v5 = vmax.f32 %v5724_v23, %v5725_v34  ;;  %v4433_v42 = vmax.f32 %v12195_v52, %v12198_v8  ;;  %v4436_v19 = vmax.f32 %v12252_v33, %v4435_v44  ;;  %5892 = vst.msk [vmem:[%s12562_s3 + $0x78] sm:$0xff] %vm4076_vm2, %v5856_v27  ;;  %v2757_v30 = vadd.f32 %v12203_v50, %v2756_v58  ;;  %v3623_v53 = vpop.f32.mrf.mxu2 }
 0x4d7   :  { %v3189_v60 = vadd.f32 %v12203_v50, %v3188_v22  ;;  %v4246_v47 = vsel %vm4076_vm2, %v2688_v43, -inf  ;;  %v4462_v11 = vsel %vm4076_vm2, %v3120_v20, -inf  ;;  %v5814_v61 = vsel %vm4076_vm2, %v5672_v13, -inf  ;;  %v4055_v10 = vpop.f32.mrf.mxu3  ;;  %v2762_v44 = vpop.f32.mrf.mxu0  ;;  %v13289_v20 = vld [vmem:[#allocation169_spill] sm:$0xff] }
 0x4d8   :  { %v5833_v17 = vsel %vm4076_vm2, %v5726_v5, -inf  ;;  %v5816_v52 = vmax.f32 %v5814_v61, %v11248_v35  ;;  %v4282_v16 = vsel %vm4076_vm2, %v2760_v31, -inf  ;;  %v4498_v7 = vsel %vm4076_vm2, %v3192_v48, -inf  ;;  %v3194_v40 = vpop.f32.mrf.mxu1 }
 0x4d9   :  { %v5834_v8 = vmax.f32 %v12056_v63, %v5833_v17  ;;  %v4245_v58 = vsel %vm4076_vm2, %v2685_v45, -inf  ;;  %v4461_v22 = vsel %vm4076_vm2, %v3117_v21, -inf  ;;  %v2694_v29 = vadd.f32 %v12203_v50, %v11069_v0 }
 0x4da   :  { %v3126_v59 = vadd.f32 %v12203_v50, %v11071_v15  ;;  %v5868_v1 = vmax.f32 %v5816_v52, 0.0  ;;  %v4281_v63 = vsel %vm4076_vm2, %v2757_v30, -inf  ;;  %v4497_v33 = vsel %vm4076_vm2, %v3189_v60, -inf }
 0x4db   :  { %v5874_v35 = vmax.f32 %v5834_v8, 0.0  ;;  %v4247_v18 = vmax.f32 %v4245_v58, %v4246_v47  ;;  %v4463_v55 = vmax.f32 %v4461_v22, %v4462_v11  ;;  %v4283_v43 = vmax.f32 %v4281_v63, %v4282_v16  ;;  %v13290_v8 = vld [vmem:[#allocation20_spill] sm:$0xff]  ;;  %v13291_v16 = vld [vmem:[#allocation18_spill] sm:$0xff] }
 0x4dc   :  { %v4499_v56 = vmax.f32 %v4497_v33, %v4498_v7  ;;  %v2691_v0 = vadd.f32 %v12203_v50, %v11007_v28  ;;  %v3123_v15 = vadd.f32 %v12203_v50, %v13289_v20  ;;  %5904 = vst.msk [vmem:[%s12562_s3 + $0xd8] sm:$0xff] %vm4076_vm2, %v5868_v1  ;;  %v3624_v36 = vadd.f32 %v12203_v50, %v3623_v53 }
 0x4dd   :  { %v4056_v39 = vadd.f32 %v12203_v50, %v4055_v10  ;;  %v12314_v4 = vsel %vm4076_vm2, %v4400_v49, -inf  ;;  %v5603_v28 = vmax.f32 %v12163_v57, %v12166_v54  ;;  %v12319_v46 = vsel %vm4076_vm2, %v4433_v42, -inf  ;;  %5910 = vst.msk [vmem:[%s12562_s3 + $0x108] sm:$0xff] %vm4076_vm2, %v5874_v35 }
 0x4de   :  { %v12322_v38 = vsel %vm4076_vm2, %v4436_v19, -inf  ;;  %v4249_v23 = vsel %vm4076_vm2, %v2694_v29, -inf  ;;  %v4465_v3 = vsel %vm4076_vm2, %v3126_v59, -inf  ;;  %v3621_v25 = vadd.f32 %v12203_v50, %v3620_v62  ;;  %v3626_v2 = vpop.f32.mrf.mxu2 }
 0x4df   :  { %v4053_v49 = vadd.f32 %v12203_v50, %v4052_v24  ;;  %v5037_v57 = vsel %vm4076_vm2, %v4247_v18, -inf  ;;  %v5145_v54 = vsel %vm4076_vm2, %v4463_v55, -inf  ;;  %v5038_v14 = vsel %vm4076_vm2, %v4283_v43, -inf  ;;  %v4058_v21 = vpop.f32.mrf.mxu3  ;;  %v2765_v30 = vpop.f32.mrf.mxu0 }
 0x4e0   :  { %v5146_v27 = vsel %vm4076_vm2, %v4499_v56, -inf  ;;  %v4248_v37 = vsel %vm4076_vm2, %v2691_v0, -inf  ;;  %v4464_v34 = vsel %vm4076_vm2, %v3123_v15, -inf  ;;  %v4714_v31 = vsel %vm4076_vm2, %v3624_v36, -inf  ;;  %v3197_v60 = vpop.f32.mrf.mxu1  ;;  %v13293_v15 = vld [vmem:[#allocation171_spill] sm:$0xff]  ;;  %v13294_v36 = vld [vmem:[#allocation170_spill] sm:$0xff] }
 0x4e1   :  { %v4930_v48 = vsel %vm4076_vm2, %v4056_v39, -inf  ;;  %v4250_v32 = vmax.f32 %v4248_v37, %v4249_v23  ;;  %v4466_v62 = vmax.f32 %v4464_v34, %v4465_v3  ;;  %v2763_v24 = vadd.f32 %v12203_v50, %v2762_v44 }
 0x4e2   :  { %v3195_v45 = vadd.f32 %v12203_v50, %v3194_v40  ;;  %v4713_v13 = vsel %vm4076_vm2, %v3621_v25, -inf  ;;  %v4929_v5 = vsel %vm4076_vm2, %v4053_v49, -inf  ;;  %v5039_v42 = vmax.f32 %v5037_v57, %v5038_v14 }
 0x4e3   :  { %v5147_v19 = vmax.f32 %v5145_v54, %v5146_v27  ;;  %v4715_v47 = vmax.f32 %v4713_v13, %v4714_v31  ;;  %v4931_v11 = vmax.f32 %v4929_v5, %v4930_v48  ;;  %v2766_v61 = vadd.f32 %v12203_v50, %v2765_v30 }
 0x4e4   :  { %v3198_v17 = vadd.f32 %v12203_v50, %v3197_v60  ;;  %v12347_v52 = vsel %vm4076_vm2, %v5603_v28, -inf  ;;  %v13292_v7 = vmax.f32 %v13290_v8, %v13291_v16  ;;  %v5117_v22 = vmax.f32 %v11522_v12, %v12319_v46  ;;  %v13296_v28 = vld [vmem:[#allocation168_spill] sm:$0xff]  ;;  %v13297_v46 = vld [vmem:[#allocation175_spill] sm:$0xff]  ;;  %v13299_v60 = vld [vmem:[#allocation178_spill] sm:$0xff] }
 0x4e5   :  { %v5120_v29 = vmax.f32 %v12314_v4, %v12322_v38  ;;  %v4284_v59 = vsel %vm4076_vm2, %v2763_v24, -inf  ;;  %v4500_v53 = vsel %vm4076_vm2, %v3195_v45, -inf  ;;  %v4285_v10 = vsel %vm4076_vm2, %v2766_v61, -inf  ;;  %v13303_v8 = vld [vmem:[#allocation5_spill] sm:$0xff] }
 0x4e6   :  { %v12353_v58 = vsel %vm4076_vm2, %v13292_v7, -inf  ;;  %v4501_v1 = vsel %vm4076_vm2, %v3198_v17, -inf  ;;  %v5405_v35 = vmax.f32 %v5039_v42, 0.0  ;;  %v5441_v63 = vmax.f32 %v5147_v19, 0.0  ;;  %v3629_v49 = vpop.f32.mrf.mxu2  ;;  %v13302_v17 = vld [vmem:[#allocation108_spill] sm:$0xff] }
 0x4e7   :  { %v4286_v33 = vmax.f32 %v4284_v59, %v4285_v10  ;;  %v4502_v44 = vmax.f32 %v4500_v53, %v4501_v1  ;;  %v5040_v40 = vsel %vm4076_vm2, %v4250_v32, -inf  ;;  %v5148_v18 = vsel %vm4076_vm2, %v4466_v62, -inf  ;;  %v4061_v57 = vpop.f32.mrf.mxu3  ;;  %v2768_v34 = vpop.f32.mrf.mxu0 }
 0x4e8   :  { %v5254_v12 = vsel %vm4076_vm2, %v4715_v47, -inf  ;;  %v5362_v55 = vsel %vm4076_vm2, %v4931_v11, -inf  ;;  %v3627_v43 = vadd.f32 %v12203_v50, %v3626_v2  ;;  %v4059_v56 = vadd.f32 %v12203_v50, %v4058_v21  ;;  %v3200_v31 = vpop.f32.mrf.mxu1  ;;  %v13300_v47 = vld [vmem:[#allocation110_spill] sm:$0xff] }
 0x4e9   :  { %v5041_v0 = vsel %vm4076_vm2, %v4286_v33, -inf  ;;  %v5149_v20 = vsel %vm4076_vm2, %v4502_v44, -inf  ;;  %v13295_v39 = vmax.f32 %v13293_v15, %v13294_v36  ;;  %v13298_v38 = vmax.f32 %v13296_v28, %v13297_v46  ;;  %v13306_v36 = vld [vmem:[#allocation9_spill] sm:$0xff] }
 0x4ea   :  { %v5042_v3 = vmax.f32 %v5040_v40, %v5041_v0  ;;  %v5150_v25 = vmax.f32 %v5148_v18, %v5149_v20  ;;  %v5565_v54 = vsel %vm4076_vm2, %v5405_v35, -inf  ;;  %v5619_v14 = vsel %vm4076_vm2, %v5441_v63, -inf }
 0x4eb   :  { %v5253_v4 = vsel %vm4076_vm2, %v13295_v39, -inf  ;;  %v5361_v23 = vsel %vm4076_vm2, %v13298_v38, -inf  ;;  %v3630_v27 = vadd.f32 %v12203_v50, %v3629_v49  ;;  %v4062_v37 = vadd.f32 %v12203_v50, %v4061_v57 }
 0x4ec   :  { %v5255_v48 = vmax.f32 %v5253_v4, %v5254_v12  ;;  %v5363_v32 = vmax.f32 %v5361_v23, %v5362_v55  ;;  %v5406_v62 = vmax.f32 %v5042_v3, 0.0  ;;  %v5442_v24 = vmax.f32 %v5150_v25, 0.0  ;;  %v13307_v4 = vld [vmem:[#allocation13_spill] sm:$0xff] }
 0x4ed   :  { %v4716_v45 = vsel %vm4076_vm2, %v3627_v43, -inf  ;;  %v4932_v2 = vsel %vm4076_vm2, %v4059_v56, -inf  ;;  %v4717_v21 = vsel %vm4076_vm2, %v3630_v27, -inf  ;;  %v4933_v13 = vsel %vm4076_vm2, %v4062_v37, -inf  ;;  %v13305_v43 = vld [vmem:[#allocation3_spill] sm:$0xff]  ;;  %v13308_v27 = vld [vmem:[#allocation177_spill] sm:$0xff] }
 0x4ee   :  { %v5566_v5 = vsel %vm4076_vm2, %v5406_v62, -inf  ;;  %v5620_v42 = vsel %vm4076_vm2, %v5442_v24, -inf  ;;  %v4718_v19 = vmax.f32 %v4716_v45, %v4717_v21  ;;  %v4934_v30 = vmax.f32 %v4932_v2, %v4933_v13  ;;  %v3632_v20 = vpop.f32.mrf.mxu2 }
 0x4ef   :  { %v13301_v11 = vmax.f32 %v13299_v60, %v13300_v47  ;;  %v13304_v16 = vmax.f32 %v13302_v17, %v13303_v8  ;;  %v5567_v59 = vmax.f32 %v5565_v54, %v5566_v5  ;;  %v5621_v53 = vmax.f32 %v5619_v14, %v5620_v42  ;;  %v4064_v15 = vpop.f32.mrf.mxu3  ;;  %v2771_v23 = vpop.f32.mrf.mxu0  ;;  %v13310_v60 = vld [vmem:[#allocation7_spill] sm:$0xff]  ;;  %v13311_v8 = vld [vmem:[#allocation33_spill] sm:$0xff] }
 0x4f0   :  { %v5477_v10 = vmax.f32 %v5255_v48, 0.0  ;;  %v5513_v1 = vmax.f32 %v5363_v32, 0.0  ;;  %v5257_v35 = vsel %vm4076_vm2, %v4718_v19, -inf  ;;  %v5365_v63 = vsel %vm4076_vm2, %v4934_v30, -inf  ;;  %v3203_v3 = vpop.f32.mrf.mxu1  ;;  %v13309_v48 = vld [vmem:[#allocation176_spill] sm:$0xff] }
 0x4f1   :  { %v5256_v61 = vsel %vm4076_vm2, %v13301_v11, -inf  ;;  %v5364_v7 = vsel %vm4076_vm2, %v13304_v16, -inf  ;;  %v5763_v33 = vsel %vm4076_vm2, %v5567_v59, -inf  ;;  %v5782_v44 = vsel %vm4076_vm2, %v5621_v53, -inf }
 0x4f2   :  { %v5258_v40 = vmax.f32 %v5256_v61, %v5257_v35  ;;  %v5366_v18 = vmax.f32 %v5364_v7, %v5365_v63  ;;  %v5431_v12 = vmax.f32 %v5117_v22, 0.0  ;;  %v5432_v55 = vmax.f32 %v5120_v29, 0.0  ;;  %v13312_v7 = vld [vmem:[#allocation23_spill] sm:$0xff] }
 0x4f3   :  { %v5765_v56 = vmax.f32 %v5763_v33, %v13305_v43  ;;  %v5783_v0 = vmax.f32 %v12347_v52, %v5782_v44  ;;  %v2700_v39 = vadd.f32 %v12203_v50, %v13306_v36  ;;  %v3132_v28 = vadd.f32 %v12203_v50, %v13307_v4  ;;  %v13313_v43 = vld [vmem:[#allocation17_spill] sm:$0xff] }
 0x4f4   :  { %v5478_v46 = vmax.f32 %v5258_v40, 0.0  ;;  %v5514_v38 = vmax.f32 %v5366_v18, 0.0  ;;  %v5673_v25 = vsel %vm4076_vm2, %v5477_v10, -inf  ;;  %v5727_v22 = vsel %vm4076_vm2, %v5513_v1, -inf }
 0x4f5   :  { %v5851_v29 = vmax.f32 %v5765_v56, 0.0  ;;  %v5857_v49 = vmax.f32 %v5783_v0, 0.0  ;;  %v2772_v54 = vadd.f32 %v12203_v50, %v2771_v23  ;;  %v3204_v14 = vadd.f32 %v12203_v50, %v3203_v3  ;;  %v13314_v0 = vld [vmem:[#allocation21_spill] sm:$0xff] }
 0x4f6   :  { %v5674_v52 = vsel %vm4076_vm2, %v5478_v46, -inf  ;;  %v5728_v57 = vsel %vm4076_vm2, %v5514_v38, -inf  ;;  %v2697_v37 = vadd.f32 %v12203_v50, %v13308_v27  ;;  %v3129_v32 = vadd.f32 %v12203_v50, %v13309_v48 }
 0x4f7   :  { %5887 = vst.msk [vmem:[%s12562_s3 + $0x50] sm:$0xff] %vm4076_vm2, %v5851_v29  ;;  %v5675_v62 = vmax.f32 %v5673_v25, %v5674_v52  ;;  %v5729_v24 = vmax.f32 %v5727_v22, %v5728_v57  ;;  %v12422_v45 = vsel %vm4076_vm2, %v5431_v12, -inf  ;;  %v12425_v2 = vsel %vm4076_vm2, %v5432_v55, -inf  ;;  %v3635_v53 = vpop.f32.mrf.mxu2  ;;  %v4067_v10 = vpop.f32.mrf.mxu3 }
 0x4f8   :  { %5893 = vst.msk [vmem:[%s12562_s3 + $0x80] sm:$0xff] %vm4076_vm2, %v5857_v49  ;;  %v2769_v21 = vadd.f32 %v12203_v50, %v2768_v34  ;;  %v3201_v13 = vadd.f32 %v12203_v50, %v3200_v31  ;;  %v4252_v5 = vsel %vm4076_vm2, %v2700_v39, -inf  ;;  %v4468_v42 = vsel %vm4076_vm2, %v3132_v28, -inf  ;;  %v2774_v33 = vpop.f32.mrf.mxu0  ;;  %v3206_v44 = vpop.f32.mrf.mxu1  ;;  %v13315_v28 = vld [vmem:[#allocation11_spill] sm:$0xff] }
 0x4f9   :  { %v5817_v19 = vsel %vm4076_vm2, %v5675_v62, -inf  ;;  %v5836_v30 = vsel %vm4076_vm2, %v5729_v24, -inf  ;;  %v4288_v61 = vsel %vm4076_vm2, %v2772_v54, -inf  ;;  %v4504_v17 = vsel %vm4076_vm2, %v3204_v14, -inf }
 0x4fa   :  { %v5819_v47 = vmax.f32 %v5817_v19, %v13310_v60  ;;  %v5837_v11 = vmax.f32 %v12353_v58, %v5836_v30  ;;  %v4251_v34 = vsel %vm4076_vm2, %v2697_v37, -inf  ;;  %v4467_v31 = vsel %vm4076_vm2, %v3129_v32, -inf }
 0x4fb   :  { %v2706_v16 = vadd.f32 %v12203_v50, %v13311_v8  ;;  %v3138_v59 = vadd.f32 %v12203_v50, %v13312_v7  ;;  %v4287_v58 = vsel %vm4076_vm2, %v2769_v21, -inf  ;;  %v4503_v63 = vsel %vm4076_vm2, %v3201_v13, -inf }
 0x4fc   :  { %v5869_v1 = vmax.f32 %v5819_v47, 0.0  ;;  %v5875_v35 = vmax.f32 %v5837_v11, 0.0  ;;  %v4253_v40 = vmax.f32 %v4251_v34, %v4252_v5  ;;  %v4469_v18 = vmax.f32 %v4467_v31, %v4468_v42 }
 0x4fd   :  { %v4289_v12 = vmax.f32 %v4287_v58, %v4288_v61  ;;  %v4505_v55 = vmax.f32 %v4503_v63, %v4504_v17  ;;  %v2703_v56 = vadd.f32 %v12203_v50, %v13313_v43  ;;  %v3135_v36 = vadd.f32 %v12203_v50, %v13314_v0  ;;  %v13319_v43 = vld [vmem:[#allocation19_spill] sm:$0xff] }
 0x4fe   :  { %5905 = vst.msk [vmem:[%s12562_s3 + $0xe0] sm:$0xff] %vm4076_vm2, %v5869_v1  ;;  %v3636_v39 = vadd.f32 %v12203_v50, %v3635_v53  ;;  %v4068_v4 = vadd.f32 %v12203_v50, %v4067_v10  ;;  %v5588_v46 = vmax.f32 %v13315_v28, %v11496_v51  ;;  %v5606_v38 = vmax.f32 %v12422_v45, %v12425_v2 }
 0x4ff   :  { %5911 = vst.msk [vmem:[%s12562_s3 + $0x110] sm:$0xff] %vm4076_vm2, %v5875_v35  ;;  %v4255_v23 = vsel %vm4076_vm2, %v2706_v16, -inf  ;;  %v4471_v3 = vsel %vm4076_vm2, %v3138_v59, -inf  ;;  %v3633_v25 = vadd.f32 %v12203_v50, %v3632_v20  ;;  %v4065_v22 = vadd.f32 %v12203_v50, %v4064_v15  ;;  %v3638_v32 = vpop.f32.mrf.mxu2  ;;  %v4070_v62 = vpop.f32.mrf.mxu3 }
 0x500   :  { %v5043_v29 = vsel %vm4076_vm2, %v4253_v40, -inf  ;;  %v5151_v51 = vsel %vm4076_vm2, %v4469_v18, -inf  ;;  %v5044_v49 = vsel %vm4076_vm2, %v4289_v12, -inf  ;;  %v5152_v52 = vsel %vm4076_vm2, %v4505_v55, -inf  ;;  %v2777_v13 = vpop.f32.mrf.mxu0  ;;  %v3209_v5 = vpop.f32.mrf.mxu1  ;;  %v13316_v40 = vld [vmem:[#allocation15_spill] sm:$0xff]  ;;  %v13317_v18 = vld [vmem:[#allocation25_spill] sm:$0xff] }
 0x501   :  { %v4254_v57 = vsel %vm4076_vm2, %v2703_v56, -inf  ;;  %v4470_v54 = vsel %vm4076_vm2, %v3135_v36, -inf  ;;  %v4720_v14 = vsel %vm4076_vm2, %v3636_v39, -inf  ;;  %v4936_v27 = vsel %vm4076_vm2, %v4068_v4, -inf  ;;  %v13320_v56 = vld [vmem:[#allocation29_spill] sm:$0xff] }
 0x502   :  { %v4256_v37 = vmax.f32 %v4254_v57, %v4255_v23  ;;  %v4472_v20 = vmax.f32 %v4470_v54, %v4471_v3  ;;  %v2775_v15 = vadd.f32 %v12203_v50, %v2774_v33  ;;  %v3207_v48 = vadd.f32 %v12203_v50, %v3206_v44 }
 0x503   :  { %v4719_v24 = vsel %vm4076_vm2, %v3633_v25, -inf  ;;  %v4935_v45 = vsel %vm4076_vm2, %v4065_v22, -inf  ;;  %v5045_v2 = vmax.f32 %v5043_v29, %v5044_v49  ;;  %v5153_v21 = vmax.f32 %v5151_v51, %v5152_v52 }
 0x504   :  { %v4721_v42 = vmax.f32 %v4719_v24, %v4720_v14  ;;  %v4937_v19 = vmax.f32 %v4935_v45, %v4936_v27  ;;  %v2778_v30 = vadd.f32 %v12203_v50, %v2777_v13  ;;  %v3210_v60 = vadd.f32 %v12203_v50, %v3209_v5 }
 0x505   :  { %v5767_v47 = vsel %vm4076_vm2, %v5588_v46, -inf  ;;  %v5784_v11 = vsel %vm4076_vm2, %v5606_v38, -inf  ;;  %v4290_v61 = vsel %vm4076_vm2, %v2775_v15, -inf  ;;  %v4506_v17 = vsel %vm4076_vm2, %v3207_v48, -inf }
 0x506   :  { %v4291_v34 = vsel %vm4076_vm2, %v2778_v30, -inf  ;;  %v4507_v31 = vsel %vm4076_vm2, %v3210_v60, -inf  ;;  %v5407_v8 = vmax.f32 %v5045_v2, 0.0  ;;  %v5443_v16 = vmax.f32 %v5153_v21, 0.0 }
 0x507   :  { %v4292_v7 = vmax.f32 %v4290_v61, %v4291_v34  ;;  %v4508_v59 = vmax.f32 %v4506_v17, %v4507_v31  ;;  %v5046_v53 = vsel %vm4076_vm2, %v4256_v37, -inf  ;;  %v5154_v10 = vsel %vm4076_vm2, %v4472_v20, -inf  ;;  %v3641_v28 = vpop.f32.mrf.mxu2  ;;  %v4073_v46 = vpop.f32.mrf.mxu3 }
 0x508   :  { %v5260_v1 = vsel %vm4076_vm2, %v4721_v42, -inf  ;;  %v5368_v35 = vsel %vm4076_vm2, %v4937_v19, -inf  ;;  %v3639_v58 = vadd.f32 %v12203_v50, %v3638_v32  ;;  %v4071_v63 = vadd.f32 %v12203_v50, %v4070_v62 }
 0x509   :  { %v5047_v33 = vsel %vm4076_vm2, %v4292_v7, -inf  ;;  %v5155_v44 = vsel %vm4076_vm2, %v4508_v59, -inf  ;;  %v13318_v12 = vmax.f32 %v13316_v40, %v13317_v18  ;;  %v13321_v0 = vmax.f32 %v13319_v43, %v13320_v56  ;;  %v13325_v59 = vld [vmem:[#allocation111_spill] sm:$0xff] }
 0x50a   :  { %v5048_v39 = vmax.f32 %v5046_v53, %v5047_v33  ;;  %v5156_v4 = vmax.f32 %v5154_v10, %v5155_v44  ;;  %v5568_v38 = vsel %vm4076_vm2, %v5407_v8, -inf  ;;  %v5622_v23 = vsel %vm4076_vm2, %v5443_v16, -inf }
 0x50b   :  { %v5259_v55 = vsel %vm4076_vm2, %v13318_v12, -inf  ;;  %v5367_v36 = vsel %vm4076_vm2, %v13321_v0, -inf  ;;  %v3642_v3 = vadd.f32 %v12203_v50, %v3641_v28  ;;  %v4074_v25 = vadd.f32 %v12203_v50, %v4073_v46 }
 0x50c   :  { %v5261_v22 = vmax.f32 %v5259_v55, %v5260_v1  ;;  %v5369_v29 = vmax.f32 %v5367_v36, %v5368_v35  ;;  %v5408_v51 = vmax.f32 %v5048_v39, 0.0  ;;  %v5444_v49 = vmax.f32 %v5156_v4, 0.0  ;;  %v13327_v1 = vld [vmem:[#allocation121_spill] sm:$0xff]  ;;  %v13328_v35 = vld [vmem:[#allocation123_spill] sm:$0xff] }
 0x50d   :  { %v4722_v52 = vsel %vm4076_vm2, %v3639_v58, -inf  ;;  %v4938_v57 = vsel %vm4076_vm2, %v4071_v63, -inf  ;;  %v4723_v54 = vsel %vm4076_vm2, %v3642_v3, -inf  ;;  %v4939_v14 = vsel %vm4076_vm2, %v4074_v25, -inf }
 0x50e   :  { %v5569_v27 = vsel %vm4076_vm2, %v5408_v51, -inf  ;;  %v5623_v37 = vsel %vm4076_vm2, %v5444_v49, -inf  ;;  %v4724_v20 = vmax.f32 %v4722_v52, %v4723_v54  ;;  %v4940_v15 = vmax.f32 %v4938_v57, %v4939_v14 }
 0x50f   :  { %v13322_v50 = vmax.f32 %v11466_v6, %v11472_v9  ;;  %v13323_v32 = vmax.f32 %v11469_v41, %v11475_v26  ;;  %v5570_v24 = vmax.f32 %v5568_v38, %v5569_v27  ;;  %v5624_v45 = vmax.f32 %v5622_v23, %v5623_v37 }
 0x510   :  { %v5479_v2 = vmax.f32 %v5261_v22, 0.0  ;;  %v5515_v21 = vmax.f32 %v5369_v29, 0.0  ;;  %v5263_v13 = vsel %vm4076_vm2, %v4724_v20, -inf  ;;  %v5371_v5 = vsel %vm4076_vm2, %v4940_v15, -inf }
 0x511   :  { %v5262_v48 = vsel %vm4076_vm2, %v13322_v50, -inf  ;;  %v5370_v62 = vsel %vm4076_vm2, %v13323_v32, -inf  ;;  %v5766_v42 = vsel %vm4076_vm2, %v5570_v24, -inf  ;;  %v5785_v19 = vsel %vm4076_vm2, %v5624_v45, -inf }
 0x512   :  { %v5264_v6 = vmax.f32 %v5262_v48, %v5263_v13  ;;  %v5372_v9 = vmax.f32 %v5370_v62, %v5371_v5  ;;  %v5768_v30 = vmax.f32 %v5766_v42, %v5767_v47  ;;  %v5786_v60 = vmax.f32 %v5784_v11, %v5785_v19  ;;  %v13324_v11 = vld [vmem:[#allocation109_spill] sm:$0xff] }
 0x513   :  { %v5676_v34 = vsel %vm4076_vm2, %v5479_v2, -inf  ;;  %v5730_v31 = vsel %vm4076_vm2, %v5515_v21, -inf  ;;  %v13326_v53 = vmax.f32 %v13324_v11, %v13325_v59  ;;  %v13329_v58 = vmax.f32 %v13327_v1, %v13328_v35 }
 0x514   :  { %v5480_v61 = vmax.f32 %v5264_v6, 0.0  ;;  %v5516_v41 = vmax.f32 %v5372_v9, 0.0  ;;  %v5852_v26 = vmax.f32 %v5768_v30, 0.0  ;;  %v5858_v17 = vmax.f32 %v5786_v60, 0.0 }
 0x515   :  { %v5821_v10 = vsel %vm4076_vm2, %v13326_v53, -inf  ;;  %v5838_v63 = vsel %vm4076_vm2, %v13329_v58, -inf }
 0x516   :  { %v5677_v8 = vsel %vm4076_vm2, %v5480_v61, -inf  ;;  %v5731_v16 = vsel %vm4076_vm2, %v5516_v41, -inf  ;;  %5888 = vst.msk [vmem:[%s12562_s3 + $0x58] sm:$0xff] %vm4076_vm2, %v5852_v26 }
 0x517   :  { %v5678_v7 = vmax.f32 %v5676_v34, %v5677_v8  ;;  %v5732_v47 = vmax.f32 %v5730_v31, %v5731_v16  ;;  %5894 = vst.msk [vmem:[%s12562_s3 + $0x88] sm:$0xff] %vm4076_vm2, %v5858_v17 }
 0x519   :  { %v5820_v33 = vsel %vm4076_vm2, %v5678_v7, -inf  ;;  %v5839_v44 = vsel %vm4076_vm2, %v5732_v47, -inf }
 0x51a   :  { %v5822_v40 = vmax.f32 %v5820_v33, %v5821_v10  ;;  %v5840_v18 = vmax.f32 %v5838_v63, %v5839_v44 }
 0x51c   :  { %v5870_v12 = vmax.f32 %v5822_v40, 0.0  ;;  %v5876_v55 = vmax.f32 %v5840_v18, 0.0 }
 0x51e   :  { %5906 = vst.msk [vmem:[%s12562_s3 + $0xe8] sm:$0xff] %vm4076_vm2, %v5870_v12 }
 0x51f   :  { %5912 = vst.msk [vmem:[%s12562_s3 + $0x118] sm:$0xff] %vm4076_vm2, %v5876_v55 }

</bundles_post_ra>
